<compile_context>
chip_gen: v7x
topology: tpu7x:2x2x1
jax: 0.10.0
libtpu: 0.0.40
codegen_flags: <defaults>
</compile_context>

<pallas_src>
import numpy as np
import jax
import jax.numpy as jnp
from jax.experimental import pallas as pl
from jax.experimental.pallas import tpu as pltpu


# ----------------------------------------------------------------------------
# Gaussian 1-D window (deterministic, matches _fspecial_gauss_1d)
# ----------------------------------------------------------------------------
def _fspecial_gauss_1d(size: int, sigma: float):
    coords = np.arange(size, dtype=np.float32) - (size // 2)
    g = np.exp(-(coords ** 2) / (2.0 * sigma ** 2)).astype(np.float32)
    g = g / g.sum()
    return tuple(float(v) for v in g)


# ----------------------------------------------------------------------------
# Probe: can BlockSpec constants be single-buffered on this JAX build?
# ----------------------------------------------------------------------------
_BUFFERED1_MODE = "unprobed"


def _const_pipeline_mode():
    """pl.Buffered(1) if supported (constants never change block index, so a
    single VMEM buffer suffices), else None (default double buffering)."""
    global _BUFFERED1_MODE
    if isinstance(_BUFFERED1_MODE, str) and _BUFFERED1_MODE == "unprobed":
        mode = None
        try:
            cand = pl.Buffered(1)

            def _probe(x_ref, o_ref):
                o_ref[...] = x_ref[...] + 1.0

            res = pl.pallas_call(
                _probe,
                out_shape=jax.ShapeDtypeStruct((8, 128), jnp.float32),
                grid=(2,),
                in_specs=[pl.BlockSpec((8, 128), lambda i: (0, 0),
                                       pipeline_mode=cand)],
                out_specs=pl.BlockSpec((8, 128), lambda i: (0, 0)),
            )(jnp.zeros((8, 128), jnp.float32))
            jax.block_until_ready(res)
            mode = cand
        except Exception:
            mode = None
        _BUFFERED1_MODE = mode
    return _BUFFERED1_MODE


# ----------------------------------------------------------------------------
# Per-level constant matrices (banded blur / pool / reduce selectors)
# ----------------------------------------------------------------------------
def _build_constants(C, H, W, win, levels):
    ws = len(win)
    win_np = np.asarray(win, dtype=np.float32)
    metas, consts = [], []
    h, w = H, W
    for lvl in range(levels):
        last = (lvl == levels - 1)
        blur_h, blur_w = h >= ws, w >= ws
        ho = h - ws + 1 if blur_h else h
        wo = w - ws + 1 if blur_w else w
        wop = ((wo + 127) // 128) * 128          # lane-pad the blurred width

        # W-direction "valid" blur, zero-padded columns beyond wo.
        gw = np.zeros((w, wop), np.float32)
        if blur_w:
            for j in range(wo):
                gw[j:j + ws, j] = win_np
        else:                                     # blur skipped (dim < win)
            gw[:w, :w] = np.eye(w, dtype=np.float32)

        # H-direction blur, block-diagonal over channels: (C*ho, C*h).
        if blur_h:
            gh = np.zeros((ho, h), np.float32)
            for i in range(ho):
                gh[i, i:i + ws] = win_np
        else:
            gh = np.eye(h, dtype=np.float32)
        ghc = np.kron(np.eye(C, dtype=np.float32), gh)

        # Lane mask (padded lanes must not enter the mean: they evaluate to 1).
        wmask = np.zeros((wop, 1), np.float32)
        wmask[:wo, 0] = 1.0
        # Per-channel sublane reduce (segment selector) with the mean scale.
        seg = np.zeros((C, C * ho), np.float32)
        inv_cnt = 1.0 / float(ho * wo)
        for c in range(C):
            seg[c, c * ho:(c + 1) * ho] = inv_cnt

        meta = dict(h=h, w=w, ho=ho, wo=wo, wop=wop, last=last)
        level_consts = [gw, ghc, wmask, seg]

        if not last:
            # 2x2 avg-pool, stride 2, pad = dim % 2 both sides,
            # count_include_pad=True, expressed as Ph @ [x;y] @ Pw.
            ph_pad, pw_pad = h % 2, w % 2
            hp = (h + 2 * ph_pad - 2) // 2 + 1
            wp = (w + 2 * pw_pad - 2) // 2 + 1
            ph = np.zeros((hp, h), np.float32)
            for i in range(hp):
                for d in range(2):
                    r = 2 * i + d - ph_pad
                    if 0 <= r < h:
                        ph[i, r] = 0.5
            ph2c = np.kron(np.eye(2 * C, dtype=np.float32), ph)   # x & y fused
            pwm = np.zeros((w, wp), np.float32)
            for j in range(wp):
                for d in range(2):
                    cc = 2 * j + d - pw_pad
                    if 0 <= cc < w:
                        pwm[cc, j] = 0.5
            level_consts += [ph2c, pwm]
            meta.update(hp=hp, wp=wp)
            h, w = hp, wp

        metas.append(meta)
        consts.extend(level_consts)
    return metas, consts


# ----------------------------------------------------------------------------
# Single fused pallas_call: all MS-SSIM levels, channels batched per grid step
# ----------------------------------------------------------------------------
def _ms_ssim_fused_pallas(X, Y, win, C1, C2, levels):
    N, C, H, W = X.shape
    metas, const_np = _build_constants(C, H, W, win, levels)
    n_consts = len(const_np)

    def kernel(*refs):
        x_ref, y_ref = refs[0], refs[1]
        cref = refs[2:2 + n_consts]
        out_ref = refs[2 + n_consts]

        x = x_ref[...]                       # (C*H, W) f32
        y = y_ref[...]
        cols = []
        ci = 0
        for m in metas:
            wop = m['wop']
            gw = cref[ci][...]               # (w, wop)
            ghc = cref[ci + 1][...]          # (C*ho, C*h)
            wmask = cref[ci + 2][...]        # (wop, 1)
            seg = cref[ci + 3][...]          # (C, C*ho)
            ci += 4

            # W-direction blur: five dots streaming against the same weight.
            sw = [jnp.dot(q, gw, preferred_element_type=jnp.float32)
                  for q in (x, y, x * x, y * y, x * y)]           # (C*h, wop)
            # H-direction blur of all 5 quantities & all channels in ONE dot
            # (lane-concat is 128-aligned thanks to the wop padding).
            slab = jnp.concatenate(sw, axis=1)                    # (C*h, 5*wop)
            b = jnp.dot(ghc, slab,
                        preferred_element_type=jnp.float32)       # (C*ho, 5*wop)

            mu1 = b[:, 0 * wop:1 * wop]
            mu2 = b[:, 1 * wop:2 * wop]
            m11 = b[:, 2 * wop:3 * wop]
            m22 = b[:, 3 * wop:4 * wop]
            m12 = b[:, 4 * wop:5 * wop]
            mu1_sq = mu1 * mu1
            mu2_sq = mu2 * mu2
            mu1_mu2 = mu1 * mu2
            cs_map = (2.0 * (m12 - mu1_mu2) + C2) / \
                     ((m11 - mu1_sq) + (m22 - mu2_sq) + C2)
            if m['last']:
                # Only the last level's ssim is consumed downstream.
                red_map = (2.0 * mu1_mu2 + C1) / (mu1_sq + mu2_sq + C1) * cs_map
            else:
                # Lower levels only contribute cs.
                red_map = cs_map

            # Lane (W) reduce on the MXU with padded lanes masked out,
            # then a tiny per-channel sublane reduce (also a matmul).
            col = jnp.dot(red_map, wmask,
                          preferred_element_type=jnp.float32)     # (C*ho, 1)
            col = jnp.dot(seg, col,
                          preferred_element_type=jnp.float32)     # (C, 1)
            cols.append(col)

            if not m['last']:
                ph2c = cref[ci][...]          # (2*C*hp, 2*C*h)
                pwm = cref[ci + 1][...]       # (w, wp)
                ci += 2
                # Fused 2x2 avg-pool of X and Y (sublane-stacked): 2 matmuls.
                xy = jnp.concatenate([x, y], axis=0)               # (2*C*h, w)
                t = jnp.dot(ph2c, xy,
                            preferred_element_type=jnp.float32)    # (2*C*hp, w)
                pooled = jnp.dot(t, pwm,
                                 preferred_element_type=jnp.float32)  # (2*C*hp, wp)
                chp = C * m['hp']
                x = pooled[:chp, :]
                y = pooled[chp:, :]

        # Single merged writeback: cs for levels 0..L-2, ssim for level L-1.
        out_ref[...] = jnp.concatenate(cols, axis=1)               # (C, levels)

    mode = _const_pipeline_mode()

    def const_spec(shape):
        if mode is not None:
            return pl.BlockSpec(shape, lambda n: (0, 0), pipeline_mode=mode)
        return pl.BlockSpec(shape, lambda n: (0, 0))

    img_spec = pl.BlockSpec((pl.Squeezed(), C * H, W), lambda n: (n, 0, 0))
    out_spec = pl.BlockSpec((pl.Squeezed(), C, levels), lambda n: (n, 0, 0))
    in_specs = [img_spec, img_spec] + [const_spec(a.shape) for a in const_np]

    # Advisory cost estimate.
    flops = 0
    for m in metas:
        CH, CHo = C * m['h'], C * m['ho']
        flops += 2 * 5 * CH * m['w'] * m['wop']          # W-direction blurs
        flops += 2 * CHo * CH * 5 * m['wop']             # fused H-direction blur
        flops += 12 * CHo * m['wop']                     # elementwise maps
        flops += 2 * CHo * m['wop'] + 2 * C * CHo        # reduces
        if not m['last']:
            flops += 2 * (2 * C * m['hp']) * (2 * CH) * m['w']
            flops += 2 * (2 * C * m['hp']) * m['w'] * m['wp']
    flops = int(N * flops)
    const_bytes = int(sum(int(a.size) for a in const_np) * 4)
    bytes_accessed = int(N * (2 * C * H * W + C * levels) * 4 + const_bytes)
    ce = pl.CostEstimate(flops=flops, transcendentals=0,
                         bytes_accessed=bytes_accessed)

    # Explicit VMEM budget from the real footprint (never below the default).
    img_block = C * H * W * 4
    out_block = C * levels * 4
    cb_mult = 1 if mode is not None else 2
    wop0 = metas[0]['wop']
    transient = 6 * (C * H) * (5 * wop0) * 4              # slab/b/maps headroom
    footprint = 2 * 2 * img_block + 2 * out_block + cb_mult * const_bytes + transient
    vmem_limit = int(min(max(2 * footprint, 32 << 20), 96 << 20))

    out = pl.pallas_call(
        kernel,
        out_shape=jax.ShapeDtypeStruct((N, C, levels), jnp.float32),
        grid=(N,),
        in_specs=in_specs,
        out_specs=out_spec,
        compiler_params=pltpu.CompilerParams(
            dimension_semantics=("parallel",),
            vmem_limit_bytes=vmem_limit),
        cost_estimate=ce,
    )(X.reshape(N, C * H, W), Y.reshape(N, C * H, W),
      *[jnp.asarray(a) for a in const_np])
    return out                                            # (N, C, levels)


# ----------------------------------------------------------------------------
# MS_SSIM module (forward semantics of the PyTorch class)
# ----------------------------------------------------------------------------
class MSSSIMPallas:
    def __init__(self, data_range=255, size_average=True, win_size=11,
                 win_sigma=1.5, channel=3, spatial_dims=2, weights=None,
                 K=(0.01, 0.03)):
        if spatial_dims != 2:
            # TODO(synk): 3-D (conv3d / avg_pool3d) path not implemented
            raise NotImplementedError("only spatial_dims=2 supported")
        self.win_size = win_size
        self.win = _fspecial_gauss_1d(win_size, win_sigma)  # same per channel
        self.size_average = size_average
        self.data_range = data_range
        self.weights = weights
        self.K = K
        self.channel = channel

    def __call__(self, X, Y):
        if X.shape != Y.shape:
            raise ValueError("Input images should have the same dimensions")
        # parity with ms_ssim: squeeze size-1 dims beyond the channel dim
        keep = [d for d in range(X.ndim) if d < 2 or X.shape[d] != 1]
        if len(keep) != X.ndim:
            X = X.reshape([X.shape[d] for d in keep])
            Y = Y.reshape([Y.shape[d] for d in keep])
        if X.ndim != 4:
            raise ValueError("only 4-D (N,C,H,W) inputs supported")
        if self.win_size % 2 != 1:
            raise ValueError("Window size should be odd.")
        smaller_side = min(X.shape[-2:])
        assert smaller_side > (self.win_size - 1) * 2 ** 4, \
            "Image size should be larger than %d" % ((self.win_size - 1) * 2 ** 4)

        X = X.astype(jnp.float32)
        Y = Y.astype(jnp.float32)

        weights = self.weights
        if weights is None:
            weights = [0.0448, 0.2856, 0.3001, 0.2363, 0.1333]
        weights_t = jnp.asarray(weights, dtype=jnp.float32)
        levels = len(weights)

        K1, K2 = self.K
        C1 = float((K1 * self.data_range) ** 2)
        C2 = float((K2 * self.data_range) ** 2)

        # (N, C, levels): cs for levels 0..L-2, ssim for level L-1.
        per_level = _ms_ssim_fused_pallas(X, Y, self.win, C1, C2, levels)
        stack = jnp.maximum(per_level, 0.0)                # relu(cs), relu(ssim)
        val = jnp.prod(stack ** weights_t[None, None, :], axis=-1)  # (N, C)
        if self.size_average:
            return val.mean()
        return val.mean(axis=1)


# ----------------------------------------------------------------------------
# Pure-JAX reference (same math, no Pallas) for a correctness check
# ----------------------------------------------------------------------------
def _avg_pool2d_ref(x):
    N, C, H, W = x.shape
    ph, pw = H % 2, W % 2
    if ph or pw:
        x = jnp.pad(x, ((0, 0), (0, 0), (ph, ph), (pw, pw)))
    Hp, Wp = H + 2 * ph, W + 2 * pw
    oh = (Hp - 2) // 2 + 1
    ow = (Wp - 2) // 2 + 1
    x = x[:, :, :2 * oh, :2 * ow]
    x = x.reshape(N, C, oh, 2, ow, 2)
    return x.mean(axis=(3, 5))


def _ms_ssim_ref(X, Y, win, data_range, K, weights, size_average=True):
    ws = len(win)
    K1, K2 = K
    C1 = (K1 * data_range) ** 2
    C2 = (K2 * data_range) ** 2

    def gfilter(x):
        H, W = x.shape[-2], x.shape[-1]
        out = x
        if H >= ws:
            Ho = H - ws + 1
            out = sum(win[k] * out[:, :, k:k + Ho, :] for k in range(ws))
        if W >= ws:
            Wo = W - ws + 1
            out = sum(win[k] * out[:, :, :, k:k + Wo] for k in range(ws))
        return out

    def ssim_level(x, y):
        mu1, mu2 = gfilter(x), gfilter(y)
        mu1_sq, mu2_sq, mu1_mu2 = mu1 * mu1, mu2 * mu2, mu1 * mu2
        s1 = gfilter(x * x) - mu1_sq
        s2 = gfilter(y * y) - mu2_sq
        s12 = gfilter(x * y) - mu1_mu2
        cs_map = (2 * s12 + C2) / (s1 + s2 + C2)
        ssim_map = (2 * mu1_mu2 + C1) / (mu1_sq + mu2_sq + C1) * cs_map
        return ssim_map.mean(axis=(2, 3)), cs_map.mean(axis=(2, 3))

    weights_t = jnp.asarray(weights, dtype=X.dtype)
    levels = len(weights)
    mcs = []
    ssim_pc = None
    for i in range(levels):
        ssim_pc, cs = ssim_level(X, Y)
        if i < levels - 1:
            mcs.append(jnp.maximum(cs, 0.0))
            X, Y = _avg_pool2d_ref(X), _avg_pool2d_ref(Y)
    ssim_pc = jnp.maximum(ssim_pc, 0.0)
    stack = jnp.stack(mcs + [ssim_pc], axis=0)
    val = jnp.prod(stack ** weights_t[:, None, None], axis=0)
    return val.mean() if size_average else val.mean(axis=1)


# ----------------------------------------------------------------------------
if __name__ == "__main__":
    key = jax.random.PRNGKey(0)
    k1, k2 = jax.random.split(key)
    # Small shapes: win_size=3 requires min spatial > (3-1)*2**4 = 32.
    N, C, H, W = 2, 4, 48, 48
    X = jax.random.uniform(k1, (N, C, H, W), dtype=jnp.float32)
    Y = jax.random.uniform(k2, (N, C, H, W), dtype=jnp.float32)

    mod = MSSSIMPallas(data_range=1.0, size_average=True, win_size=3,
                       win_sigma=1.5, channel=C, spatial_dims=2)
    out = jax.block_until_ready(mod(X, Y))

    ref = jax.block_until_ready(
        _ms_ssim_ref(X, Y, mod.win, 1.0, (0.01, 0.03),
                     [0.0448, 0.2856, 0.3001, 0.2363, 0.1333]))

    assert np.isfinite(float(out)), "non-finite ms-ssim"
    assert abs(float(out) - float(ref)) < 5e-4, (float(out), float(ref))

    print("KERNEL_OK")
</pallas_src>

<mosaic_0001>
module attributes {stable_mosaic.version = 11 : i64} {
  func.func @_probe(%arg0: i32, %arg1: memref<8x128xf32, #tpu.memory_space<vmem>>, %arg2: memref<8x128xf32, #tpu.memory_space<vmem>>) attributes {dimension_semantics = [#tpu.dimension_semantics<arbitrary>], iteration_bounds = array<i64: 2>, scalar_prefetch = 0 : i64, scratch_operands = 0 : i64, tpu.core_type = #tpu.core_type<tc>, window_params = [{pipeline_mode = #tpu.pipeline_mode<synchronous>, transform_indices = @transform_0, window_bounds = array<i64: 8, 128>}, {pipeline_mode = #tpu.pipeline_mode<synchronous>, transform_indices = @transform_1, window_bounds = array<i64: 8, 128>}]} {
    %c0 = arith.constant 0 : index
    %c0_0 = arith.constant 0 : index
    %0 = vector.load %arg1[%c0, %c0_0] : memref<8x128xf32, #tpu.memory_space<vmem>>, vector<8x128xf32>
    %cst = arith.constant 1.000000e+00 : f32
    %1 = vector.broadcast %cst : f32 to vector<8x128xf32>
    %2 = arith.addf %0, %1 : vector<8x128xf32>
    %c0_1 = arith.constant 0 : index
    %c0_2 = arith.constant 0 : index
    %3 = vector.load %arg2[%c0_1, %c0_2] : memref<8x128xf32, #tpu.memory_space<vmem>>, vector<8x128xf32>
    tpu.vector_store %arg2[%c0_1, %c0_2], %2 {strides = array<i32>} : memref<8x128xf32, #tpu.memory_space<vmem>>, vector<8x128xf32>,
    return
  }
  func.func @transform_0(%arg0: i32) -> (i32, i32) {
    %c0_i32 = arith.constant 0 : i32
    %c0_i32_0 = arith.constant 0 : i32
    %c0_i32_1 = arith.constant 0 : i32
    return %c0_i32, %c0_i32_0 : i32, i32
  }
  func.func @transform_1(%arg0: i32) -> (i32, i32) {
    %c0_i32 = arith.constant 0 : i32
    %c0_i32_0 = arith.constant 0 : i32
    %c0_i32_1 = arith.constant 0 : i32
    return %c0_i32, %c0_i32_0 : i32, i32
  }
}

module attributes {stable_mosaic.version = 11 : i64} {
  func.func @kernel(%arg0: i32, %arg1: memref<1x192x48xf32, #tpu.memory_space<vmem>>, %arg2: memref<1x192x48xf32, #tpu.memory_space<vmem>>, %arg3: memref<48x128xf32, #tpu.memory_space<vmem>>, %arg4: memref<184x192xf32, #tpu.memory_space<vmem>>, %arg5: memref<128x1xf32, #tpu.memory_space<vmem>>, %arg6: memref<4x184xf32, #tpu.memory_space<vmem>>, %arg7: memref<192x384xf32, #tpu.memory_space<vmem>>, %arg8: memref<48x24xf32, #tpu.memory_space<vmem>>, %arg9: memref<24x128xf32, #tpu.memory_space<vmem>>, %arg10: memref<88x96xf32, #tpu.memory_space<vmem>>, %arg11: memref<128x1xf32, #tpu.memory_space<vmem>>, %arg12: memref<4x88xf32, #tpu.memory_space<vmem>>, %arg13: memref<96x192xf32, #tpu.memory_space<vmem>>, %arg14: memref<24x12xf32, #tpu.memory_space<vmem>>, %arg15: memref<12x128xf32, #tpu.memory_space<vmem>>, %arg16: memref<40x48xf32, #tpu.memory_space<vmem>>, %arg17: memref<128x1xf32, #tpu.memory_space<vmem>>, %arg18: memref<4x40xf32, #tpu.memory_space<vmem>>, %arg19: memref<48x96xf32, #tpu.memory_space<vmem>>, %arg20: memref<12x6xf32, #tpu.memory_space<vmem>>, %arg21: memref<6x128xf32, #tpu.memory_space<vmem>>, %arg22: memref<16x24xf32, #tpu.memory_space<vmem>>, %arg23: memref<128x1xf32, #tpu.memory_space<vmem>>, %arg24: memref<4x16xf32, #tpu.memory_space<vmem>>, %arg25: memref<24x48xf32, #tpu.memory_space<vmem>>, %arg26: memref<6x3xf32, #tpu.memory_space<vmem>>, %arg27: memref<3x128xf32, #tpu.memory_space<vmem>>, %arg28: memref<4x12xf32, #tpu.memory_space<vmem>>, %arg29: memref<128x1xf32, #tpu.memory_space<vmem>>, %arg30: memref<4x4xf32, #tpu.memory_space<vmem>>, %arg31: memref<1x4x5xf32, #tpu.memory_space<vmem>>) attributes {dimension_semantics = [#tpu.dimension_semantics<parallel>], iteration_bounds = array<i64: 2>, scalar_prefetch = 0 : i64, scratch_operands = 0 : i64, tpu.core_type = #tpu.core_type<tc>, window_params = [{transform_indices = @transform_0, window_bounds = array<i64: 1, 192, 48>}, {transform_indices = @transform_1, window_bounds = array<i64: 1, 192, 48>}, {pipeline_mode = #tpu.pipeline_mode<synchronous>, transform_indices = @transform_2, window_bounds = array<i64: 48, 128>}, {pipeline_mode = #tpu.pipeline_mode<synchronous>, transform_indices = @transform_3, window_bounds = array<i64: 184, 192>}, {pipeline_mode = #tpu.pipeline_mode<synchronous>, transform_indices = @transform_4, window_bounds = array<i64: 128, 1>}, {pipeline_mode = #tpu.pipeline_mode<synchronous>, transform_indices = @transform_5, window_bounds = array<i64: 4, 184>}, {pipeline_mode = #tpu.pipeline_mode<synchronous>, transform_indices = @transform_6, window_bounds = array<i64: 192, 384>}, {pipeline_mode = #tpu.pipeline_mode<synchronous>, transform_indices = @transform_7, window_bounds = array<i64: 48, 24>}, {pipeline_mode = #tpu.pipeline_mode<synchronous>, transform_indices = @transform_8, window_bounds = array<i64: 24, 128>}, {pipeline_mode = #tpu.pipeline_mode<synchronous>, transform_indices = @transform_9, window_bounds = array<i64: 88, 96>}, {pipeline_mode = #tpu.pipeline_mode<synchronous>, transform_indices = @transform_10, window_bounds = array<i64: 128, 1>}, {pipeline_mode = #tpu.pipeline_mode<synchronous>, transform_indices = @transform_11, window_bounds = array<i64: 4, 88>}, {pipeline_mode = #tpu.pipeline_mode<synchronous>, transform_indices = @transform_12, window_bounds = array<i64: 96, 192>}, {pipeline_mode = #tpu.pipeline_mode<synchronous>, transform_indices = @transform_13, window_bounds = array<i64: 24, 12>}, {pipeline_mode = #tpu.pipeline_mode<synchronous>, transform_indices = @transform_14, window_bounds = array<i64: 12, 128>}, {pipeline_mode = #tpu.pipeline_mode<synchronous>, transform_indices = @transform_15, window_bounds = array<i64: 40, 48>}, {pipeline_mode = #tpu.pipeline_mode<synchronous>, transform_indices = @transform_16, window_bounds = array<i64: 128, 1>}, {pipeline_mode = #tpu.pipeline_mode<synchronous>, transform_indices = @transform_17, window_bounds = array<i64: 4, 40>}, {pipeline_mode = #tpu.pipeline_mode<synchronous>, transform_indices = @transform_18, window_bounds = array<i64: 48, 96>}, {pipeline_mode = #tpu.pipeline_mode<synchronous>, transform_indices = @transform_19, window_bounds = array<i64: 12, 6>}, {pipeline_mode = #tpu.pipeline_mode<synchronous>, transform_indices = @transform_20, window_bounds = array<i64: 6, 128>}, {pipeline_mode = #tpu.pipeline_mode<synchronous>, transform_indices = @transform_21, window_bounds = array<i64: 16, 24>}, {pipeline_mode = #tpu.pipeline_mode<synchronous>, transform_indices = @transform_22, window_bounds = array<i64: 128, 1>}, {pipeline_mode = #tpu.pipeline_mode<synchronous>, transform_indices = @transform_23, window_bounds = array<i64: 4, 16>}, {pipeline_mode = #tpu.pipeline_mode<synchronous>, transform_indices = @transform_24, window_bounds = array<i64: 24, 48>}, {pipeline_mode = #tpu.pipeline_mode<synchronous>, transform_indices = @transform_25, window_bounds = array<i64: 6, 3>}, {pipeline_mode = #tpu.pipeline_mode<synchronous>, transform_indices = @transform_26, window_bounds = array<i64: 3, 128>}, {pipeline_mode = #tpu.pipeline_mode<synchronous>, transform_indices = @transform_27, window_bounds = array<i64: 4, 12>}, {pipeline_mode = #tpu.pipeline_mode<synchronous>, transform_indices = @transform_28, window_bounds = array<i64: 128, 1>}, {pipeline_mode = #tpu.pipeline_mode<synchronous>, transform_indices = @transform_29, window_bounds = array<i64: 4, 4>}, {transform_indices = @transform_30, window_bounds = array<i64: 1, 4, 5>}]} {
    %c0 = arith.constant 0 : index
    %c0_0 = arith.constant 0 : index
    %c0_1 = arith.constant 0 : index
    %0 = vector.load %arg1[%c0, %c0_0, %c0_1] : memref<1x192x48xf32, #tpu.memory_space<vmem>>, vector<1x192x48xf32>
    %1 = vector.shape_cast %0 : vector<1x192x48xf32> to vector<192x48xf32>
    %c0_2 = arith.constant 0 : index
    %c0_3 = arith.constant 0 : index
    %c0_4 = arith.constant 0 : index
    %2 = vector.load %arg2[%c0_2, %c0_3, %c0_4] : memref<1x192x48xf32, #tpu.memory_space<vmem>>, vector<1x192x48xf32>
    %3 = vector.shape_cast %2 : vector<1x192x48xf32> to vector<192x48xf32>
    %c0_5 = arith.constant 0 : index
    %c0_6 = arith.constant 0 : index
    %4 = vector.load %arg3[%c0_5, %c0_6] : memref<48x128xf32, #tpu.memory_space<vmem>>, vector<48x128xf32>
    %c0_7 = arith.constant 0 : index
    %c0_8 = arith.constant 0 : index
    %5 = vector.load %arg4[%c0_7, %c0_8] : memref<184x192xf32, #tpu.memory_space<vmem>>, vector<184x192xf32>
    %c0_9 = arith.constant 0 : index
    %c0_10 = arith.constant 0 : index
    %6 = vector.load %arg5[%c0_9, %c0_10] : memref<128x1xf32, #tpu.memory_space<vmem>>, vector<128x1xf32>
    %c0_11 = arith.constant 0 : index
    %c0_12 = arith.constant 0 : index
    %7 = vector.load %arg6[%c0_11, %c0_12] : memref<4x184xf32, #tpu.memory_space<vmem>>, vector<4x184xf32>
    %8 = arith.mulf %1, %1 : vector<192x48xf32>
    %9 = arith.mulf %3, %3 : vector<192x48xf32>
    %10 = arith.mulf %1, %3 : vector<192x48xf32>
    %cst = arith.constant dense<0.000000e+00> : vector<192x128xf32>
    %11 = tpu.matmul %1, %4, %cst {dimension_numbers = #tpu.dot_dimension_numbers<[1], [0], [0], [1], [0, 0, 1, 1], [], []>} : vector<192x48xf32>, vector<48x128xf32>, vector<192x128xf32> -> vector<192x128xf32>
    %cst_13 = arith.constant dense<0.000000e+00> : vector<192x128xf32>
    %12 = tpu.matmul %3, %4, %cst_13 {dimension_numbers = #tpu.dot_dimension_numbers<[1], [0], [0], [1], [0, 0, 1, 1], [], []>} : vector<192x48xf32>, vector<48x128xf32>, vector<192x128xf32> -> vector<192x128xf32>
    %cst_14 = arith.constant dense<0.000000e+00> : vector<192x128xf32>
    %13 = tpu.matmul %8, %4, %cst_14 {dimension_numbers = #tpu.dot_dimension_numbers<[1], [0], [0], [1], [0, 0, 1, 1], [], []>} : vector<192x48xf32>, vector<48x128xf32>, vector<192x128xf32> -> vector<192x128xf32>
    %cst_15 = arith.constant dense<0.000000e+00> : vector<192x128xf32>
    %14 = tpu.matmul %9, %4, %cst_15 {dimension_numbers = #tpu.dot_dimension_numbers<[1], [0], [0], [1], [0, 0, 1, 1], [], []>} : vector<192x48xf32>, vector<48x128xf32>, vector<192x128xf32> -> vector<192x128xf32>
    %cst_16 = arith.constant dense<0.000000e+00> : vector<192x128xf32>
    %15 = tpu.matmul %10, %4, %cst_16 {dimension_numbers = #tpu.dot_dimension_numbers<[1], [0], [0], [1], [0, 0, 1, 1], [], []>} : vector<192x48xf32>, vector<48x128xf32>, vector<192x128xf32> -> vector<192x128xf32>
    %16 = tpu.concatenate %11, %12, %13, %14, %15 in 1 : vector<192x128xf32>, vector<192x128xf32>, vector<192x128xf32>, vector<192x128xf32>, vector<192x128xf32> -> vector<192x640xf32>
    %cst_17 = arith.constant dense<0.000000e+00> : vector<184x640xf32>
    %17 = tpu.matmul %5, %16, %cst_17 {dimension_numbers = #tpu.dot_dimension_numbers<[1], [0], [0], [1], [0, 0, 1, 1], [], []>} : vector<184x192xf32>, vector<192x640xf32>, vector<184x640xf32> -> vector<184x640xf32>
    %18 = vector.extract_strided_slice %17 {offsets = [0, 0], sizes = [184, 128], strides = [1, 1]} : vector<184x640xf32> to vector<184x128xf32>
    %19 = vector.extract_strided_slice %17 {offsets = [0, 128], sizes = [184, 128], strides = [1, 1]} : vector<184x640xf32> to vector<184x128xf32>
    %20 = vector.extract_strided_slice %17 {offsets = [0, 256], sizes = [184, 128], strides = [1, 1]} : vector<184x640xf32> to vector<184x128xf32>
    %21 = vector.extract_strided_slice %17 {offsets = [0, 384], sizes = [184, 128], strides = [1, 1]} : vector<184x640xf32> to vector<184x128xf32>
    %22 = vector.extract_strided_slice %17 {offsets = [0, 512], sizes = [184, 128], strides = [1, 1]} : vector<184x640xf32> to vector<184x128xf32>
    %23 = arith.mulf %18, %18 : vector<184x128xf32>
    %24 = arith.mulf %19, %19 : vector<184x128xf32>
    %25 = arith.mulf %18, %19 : vector<184x128xf32>
    %26 = arith.subf %22, %25 : vector<184x128xf32>
    %cst_18 = arith.constant 2.000000e+00 : f32
    %27 = vector.broadcast %cst_18 : f32 to vector<184x128xf32>
    %28 = arith.mulf %27, %26 : vector<184x128xf32>
    %cst_19 = arith.constant 8.99999984E-4 : f32
    %29 = vector.broadcast %cst_19 : f32 to vector<184x128xf32>
    %30 = arith.addf %28, %29 : vector<184x128xf32>
    %31 = arith.subf %20, %23 : vector<184x128xf32>
    %32 = arith.subf %21, %24 : vector<184x128xf32>
    %33 = arith.addf %31, %32 : vector<184x128xf32>
    %cst_20 = arith.constant 8.99999984E-4 : f32
    %34 = vector.broadcast %cst_20 : f32 to vector<184x128xf32>
    %35 = arith.addf %33, %34 : vector<184x128xf32>
    %36 = arith.divf %30, %35 : vector<184x128xf32>
    %cst_21 = arith.constant dense<0.000000e+00> : vector<184x1xf32>
    %37 = tpu.matmul %36, %6, %cst_21 {dimension_numbers = #tpu.dot_dimension_numbers<[1], [0], [0], [1], [0, 0, 1, 1], [], []>} : vector<184x128xf32>, vector<128x1xf32>, vector<184x1xf32> -> vector<184x1xf32>
    %cst_22 = arith.constant dense<0.000000e+00> : vector<4x1xf32>
    %38 = tpu.matmul %7, %37, %cst_22 {dimension_numbers = #tpu.dot_dimension_numbers<[1], [0], [0], [1], [0, 0, 1, 1], [], []>} : vector<4x184xf32>, vector<184x1xf32>, vector<4x1xf32> -> vector<4x1xf32>
    %c0_23 = arith.constant 0 : index
    %c0_24 = arith.constant 0 : index
    %39 = vector.load %arg7[%c0_23, %c0_24] : memref<192x384xf32, #tpu.memory_space<vmem>>, vector<192x384xf32>
    %c0_25 = arith.constant 0 : index
    %c0_26 = arith.constant 0 : index
    %40 = vector.load %arg8[%c0_25, %c0_26] : memref<48x24xf32, #tpu.memory_space<vmem>>, vector<48x24xf32>
    %41 = tpu.concatenate %1, %3 in 0 : vector<192x48xf32>, vector<192x48xf32> -> vector<384x48xf32>
    %cst_27 = arith.constant dense<0.000000e+00> : vector<192x48xf32>
    %42 = tpu.matmul %39, %41, %cst_27 {dimension_numbers = #tpu.dot_dimension_numbers<[1], [0], [0], [1], [0, 0, 1, 1], [], []>} : vector<192x384xf32>, vector<384x48xf32>, vector<192x48xf32> -> vector<192x48xf32>
    %cst_28 = arith.constant dense<0.000000e+00> : vector<192x24xf32>
    %43 = tpu.matmul %42, %40, %cst_28 {dimension_numbers = #tpu.dot_dimension_numbers<[1], [0], [0], [1], [0, 0, 1, 1], [], []>} : vector<192x48xf32>, vector<48x24xf32>, vector<192x24xf32> -> vector<192x24xf32>
    %44 = vector.extract_strided_slice %43 {offsets = [0, 0], sizes = [96, 24], strides = [1, 1]} : vector<192x24xf32> to vector<96x24xf32>
    %45 = vector.extract_strided_slice %43 {offsets = [96, 0], sizes = [96, 24], strides = [1, 1]} : vector<192x24xf32> to vector<96x24xf32>
    %c0_29 = arith.constant 0 : index
    %c0_30 = arith.constant 0 : index
    %46 = vector.load %arg9[%c0_29, %c0_30] : memref<24x128xf32, #tpu.memory_space<vmem>>, vector<24x128xf32>
    %c0_31 = arith.constant 0 : index
    %c0_32 = arith.constant 0 : index
    %47 = vector.load %arg10[%c0_31, %c0_32] : memref<88x96xf32, #tpu.memory_space<vmem>>, vector<88x96xf32>
    %c0_33 = arith.constant 0 : index
    %c0_34 = arith.constant 0 : index
    %48 = vector.load %arg11[%c0_33, %c0_34] : memref<128x1xf32, #tpu.memory_space<vmem>>, vector<128x1xf32>
    %c0_35 = arith.constant 0 : index
    %c0_36 = arith.constant 0 : index
    %49 = vector.load %arg12[%c0_35, %c0_36] : memref<4x88xf32, #tpu.memory_space<vmem>>, vector<4x88xf32>
    %50 = arith.mulf %44, %44 : vector<96x24xf32>
    %51 = arith.mulf %45, %45 : vector<96x24xf32>
    %52 = arith.mulf %44, %45 : vector<96x24xf32>
    %cst_37 = arith.constant dense<0.000000e+00> : vector<96x128xf32>
    %53 = tpu.matmul %44, %46, %cst_37 {dimension_numbers = #tpu.dot_dimension_numbers<[1], [0], [0], [1], [0, 0, 1, 1], [], []>} : vector<96x24xf32>, vector<24x128xf32>, vector<96x128xf32> -> vector<96x128xf32>
    %cst_38 = arith.constant dense<0.000000e+00> : vector<96x128xf32>
    %54 = tpu.matmul %45, %46, %cst_38 {dimension_numbers = #tpu.dot_dimension_numbers<[1], [0], [0], [1], [0, 0, 1, 1], [], []>} : vector<96x24xf32>, vector<24x128xf32>, vector<96x128xf32> -> vector<96x128xf32>
    %cst_39 = arith.constant dense<0.000000e+00> : vector<96x128xf32>
    %55 = tpu.matmul %50, %46, %cst_39 {dimension_numbers = #tpu.dot_dimension_numbers<[1], [0], [0], [1], [0, 0, 1, 1], [], []>} : vector<96x24xf32>, vector<24x128xf32>, vector<96x128xf32> -> vector<96x128xf32>
    %cst_40 = arith.constant dense<0.000000e+00> : vector<96x128xf32>
    %56 = tpu.matmul %51, %46, %cst_40 {dimension_numbers = #tpu.dot_dimension_numbers<[1], [0], [0], [1], [0, 0, 1, 1], [], []>} : vector<96x24xf32>, vector<24x128xf32>, vector<96x128xf32> -> vector<96x128xf32>
    %cst_41 = arith.constant dense<0.000000e+00> : vector<96x128xf32>
    %57 = tpu.matmul %52, %46, %cst_41 {dimension_numbers = #tpu.dot_dimension_numbers<[1], [0], [0], [1], [0, 0, 1, 1], [], []>} : vector<96x24xf32>, vector<24x128xf32>, vector<96x128xf32> -> vector<96x128xf32>
    %58 = tpu.concatenate %53, %54, %55, %56, %57 in 1 : vector<96x128xf32>, vector<96x128xf32>, vector<96x128xf32>, vector<96x128xf32>, vector<96x128xf32> -> vector<96x640xf32>
    %cst_42 = arith.constant dense<0.000000e+00> : vector<88x640xf32>
    %59 = tpu.matmul %47, %58, %cst_42 {dimension_numbers = #tpu.dot_dimension_numbers<[1], [0], [0], [1], [0, 0, 1, 1], [], []>} : vector<88x96xf32>, vector<96x640xf32>, vector<88x640xf32> -> vector<88x640xf32>
    %60 = vector.extract_strided_slice %59 {offsets = [0, 0], sizes = [88, 128], strides = [1, 1]} : vector<88x640xf32> to vector<88x128xf32>
    %61 = vector.extract_strided_slice %59 {offsets = [0, 128], sizes = [88, 128], strides = [1, 1]} : vector<88x640xf32> to vector<88x128xf32>
    %62 = vector.extract_strided_slice %59 {offsets = [0, 256], sizes = [88, 128], strides = [1, 1]} : vector<88x640xf32> to vector<88x128xf32>
    %63 = vector.extract_strided_slice %59 {offsets = [0, 384], sizes = [88, 128], strides = [1, 1]} : vector<88x640xf32> to vector<88x128xf32>
    %64 = vector.extract_strided_slice %59 {offsets = [0, 512], sizes = [88, 128], strides = [1, 1]} : vector<88x640xf32> to vector<88x128xf32>
    %65 = arith.mulf %60, %60 : vector<88x128xf32>
    %66 = arith.mulf %61, %61 : vector<88x128xf32>
    %67 = arith.mulf %60, %61 : vector<88x128xf32>
    %68 = arith.subf %64, %67 : vector<88x128xf32>
    %cst_43 = arith.constant 2.000000e+00 : f32
    %69 = vector.broadcast %cst_43 : f32 to vector<88x128xf32>
    %70 = arith.mulf %69, %68 : vector<88x128xf32>
    %cst_44 = arith.constant 8.99999984E-4 : f32
    %71 = vector.broadcast %cst_44 : f32 to vector<88x128xf32>
    %72 = arith.addf %70, %71 : vector<88x128xf32>
    %73 = arith.subf %62, %65 : vector<88x128xf32>
    %74 = arith.subf %63, %66 : vector<88x128xf32>
    %75 = arith.addf %73, %74 : vector<88x128xf32>
    %cst_45 = arith.constant 8.99999984E-4 : f32
    %76 = vector.broadcast %cst_45 : f32 to vector<88x128xf32>
    %77 = arith.addf %75, %76 : vector<88x128xf32>
    %78 = arith.divf %72, %77 : vector<88x128xf32>
    %cst_46 = arith.constant dense<0.000000e+00> : vector<88x1xf32>
    %79 = tpu.matmul %78, %48, %cst_46 {dimension_numbers = #tpu.dot_dimension_numbers<[1], [0], [0], [1], [0, 0, 1, 1], [], []>} : vector<88x128xf32>, vector<128x1xf32>, vector<88x1xf32> -> vector<88x1xf32>
    %cst_47 = arith.constant dense<0.000000e+00> : vector<4x1xf32>
    %80 = tpu.matmul %49, %79, %cst_47 {dimension_numbers = #tpu.dot_dimension_numbers<[1], [0], [0], [1], [0, 0, 1, 1], [], []>} : vector<4x88xf32>, vector<88x1xf32>, vector<4x1xf32> -> vector<4x1xf32>
    %c0_48 = arith.constant 0 : index
    %c0_49 = arith.constant 0 : index
    %81 = vector.load %arg13[%c0_48, %c0_49] : memref<96x192xf32, #tpu.memory_space<vmem>>, vector<96x192xf32>
    %c0_50 = arith.constant 0 : index
    %c0_51 = arith.constant 0 : index
    %82 = vector.load %arg14[%c0_50, %c0_51] : memref<24x12xf32, #tpu.memory_space<vmem>>, vector<24x12xf32>
    %83 = tpu.concatenate %44, %45 in 0 : vector<96x24xf32>, vector<96x24xf32> -> vector<192x24xf32>
    %cst_52 = arith.constant dense<0.000000e+00> : vector<96x24xf32>
    %84 = tpu.matmul %81, %83, %cst_52 {dimension_numbers = #tpu.dot_dimension_numbers<[1], [0], [0], [1], [0, 0, 1, 1], [], []>} : vector<96x192xf32>, vector<192x24xf32>, vector<96x24xf32> -> vector<96x24xf32>
    %cst_53 = arith.constant dense<0.000000e+00> : vector<96x12xf32>
    %85 = tpu.matmul %84, %82, %cst_53 {dimension_numbers = #tpu.dot_dimension_numbers<[1], [0], [0], [1], [0, 0, 1, 1], [], []>} : vector<96x24xf32>, vector<24x12xf32>, vector<96x12xf32> -> vector<96x12xf32>
    %86 = vector.extract_strided_slice %85 {offsets = [0, 0], sizes = [48, 12], strides = [1, 1]} : vector<96x12xf32> to vector<48x12xf32>
    %87 = vector.extract_strided_slice %85 {offsets = [48, 0], sizes = [48, 12], strides = [1, 1]} : vector<96x12xf32> to vector<48x12xf32>
    %c0_54 = arith.constant 0 : index
    %c0_55 = arith.constant 0 : index
    %88 = vector.load %arg15[%c0_54, %c0_55] : memref<12x128xf32, #tpu.memory_space<vmem>>, vector<12x128xf32>
    %c0_56 = arith.constant 0 : index
    %c0_57 = arith.constant 0 : index
    %89 = vector.load %arg16[%c0_56, %c0_57] : memref<40x48xf32, #tpu.memory_space<vmem>>, vector<40x48xf32>
    %c0_58 = arith.constant 0 : index
    %c0_59 = arith.constant 0 : index
    %90 = vector.load %arg17[%c0_58, %c0_59] : memref<128x1xf32, #tpu.memory_space<vmem>>, vector<128x1xf32>
    %c0_60 = arith.constant 0 : index
    %c0_61 = arith.constant 0 : index
    %91 = vector.load %arg18[%c0_60, %c0_61] : memref<4x40xf32, #tpu.memory_space<vmem>>, vector<4x40xf32>
    %92 = arith.mulf %86, %86 : vector<48x12xf32>
    %93 = arith.mulf %87, %87 : vector<48x12xf32>
    %94 = arith.mulf %86, %87 : vector<48x12xf32>
    %cst_62 = arith.constant dense<0.000000e+00> : vector<48x128xf32>
    %95 = tpu.matmul %86, %88, %cst_62 {dimension_numbers = #tpu.dot_dimension_numbers<[1], [0], [0], [1], [0, 0, 1, 1], [], []>} : vector<48x12xf32>, vector<12x128xf32>, vector<48x128xf32> -> vector<48x128xf32>
    %cst_63 = arith.constant dense<0.000000e+00> : vector<48x128xf32>
    %96 = tpu.matmul %87, %88, %cst_63 {dimension_numbers = #tpu.dot_dimension_numbers<[1], [0], [0], [1], [0, 0, 1, 1], [], []>} : vector<48x12xf32>, vector<12x128xf32>, vector<48x128xf32> -> vector<48x128xf32>
    %cst_64 = arith.constant dense<0.000000e+00> : vector<48x128xf32>
    %97 = tpu.matmul %92, %88, %cst_64 {dimension_numbers = #tpu.dot_dimension_numbers<[1], [0], [0], [1], [0, 0, 1, 1], [], []>} : vector<48x12xf32>, vector<12x128xf32>, vector<48x128xf32> -> vector<48x128xf32>
    %cst_65 = arith.constant dense<0.000000e+00> : vector<48x128xf32>
    %98 = tpu.matmul %93, %88, %cst_65 {dimension_numbers = #tpu.dot_dimension_numbers<[1], [0], [0], [1], [0, 0, 1, 1], [], []>} : vector<48x12xf32>, vector<12x128xf32>, vector<48x128xf32> -> vector<48x128xf32>
    %cst_66 = arith.constant dense<0.000000e+00> : vector<48x128xf32>
    %99 = tpu.matmul %94, %88, %cst_66 {dimension_numbers = #tpu.dot_dimension_numbers<[1], [0], [0], [1], [0, 0, 1, 1], [], []>} : vector<48x12xf32>, vector<12x128xf32>, vector<48x128xf32> -> vector<48x128xf32>
    %100 = tpu.concatenate %95, %96, %97, %98, %99 in 1 : vector<48x128xf32>, vector<48x128xf32>, vector<48x128xf32>, vector<48x128xf32>, vector<48x128xf32> -> vector<48x640xf32>
    %cst_67 = arith.constant dense<0.000000e+00> : vector<40x640xf32>
    %101 = tpu.matmul %89, %100, %cst_67 {dimension_numbers = #tpu.dot_dimension_numbers<[1], [0], [0], [1], [0, 0, 1, 1], [], []>} : vector<40x48xf32>, vector<48x640xf32>, vector<40x640xf32> -> vector<40x640xf32>
    %102 = vector.extract_strided_slice %101 {offsets = [0, 0], sizes = [40, 128], strides = [1, 1]} : vector<40x640xf32> to vector<40x128xf32>
    %103 = vector.extract_strided_slice %101 {offsets = [0, 128], sizes = [40, 128], strides = [1, 1]} : vector<40x640xf32> to vector<40x128xf32>
    %104 = vector.extract_strided_slice %101 {offsets = [0, 256], sizes = [40, 128], strides = [1, 1]} : vector<40x640xf32> to vector<40x128xf32>
    %105 = vector.extract_strided_slice %101 {offsets = [0, 384], sizes = [40, 128], strides = [1, 1]} : vector<40x640xf32> to vector<40x128xf32>
    %106 = vector.extract_strided_slice %101 {offsets = [0, 512], sizes = [40, 128], strides = [1, 1]} : vector<40x640xf32> to vector<40x128xf32>
    %107 = arith.mulf %102, %102 : vector<40x128xf32>
    %108 = arith.mulf %103, %103 : vector<40x128xf32>
    %109 = arith.mulf %102, %103 : vector<40x128xf32>
    %110 = arith.subf %106, %109 : vector<40x128xf32>
    %cst_68 = arith.constant 2.000000e+00 : f32
    %111 = vector.broadcast %cst_68 : f32 to vector<40x128xf32>
    %112 = arith.mulf %111, %110 : vector<40x128xf32>
    %cst_69 = arith.constant 8.99999984E-4 : f32
    %113 = vector.broadcast %cst_69 : f32 to vector<40x128xf32>
    %114 = arith.addf %112, %113 : vector<40x128xf32>
    %115 = arith.subf %104, %107 : vector<40x128xf32>
    %116 = arith.subf %105, %108 : vector<40x128xf32>
    %117 = arith.addf %115, %116 : vector<40x128xf32>
    %cst_70 = arith.constant 8.99999984E-4 : f32
    %118 = vector.broadcast %cst_70 : f32 to vector<40x128xf32>
    %119 = arith.addf %117, %118 : vector<40x128xf32>
    %120 = arith.divf %114, %119 : vector<40x128xf32>
    %cst_71 = arith.constant dense<0.000000e+00> : vector<40x1xf32>
    %121 = tpu.matmul %120, %90, %cst_71 {dimension_numbers = #tpu.dot_dimension_numbers<[1], [0], [0], [1], [0, 0, 1, 1], [], []>} : vector<40x128xf32>, vector<128x1xf32>, vector<40x1xf32> -> vector<40x1xf32>
    %cst_72 = arith.constant dense<0.000000e+00> : vector<4x1xf32>
    %122 = tpu.matmul %91, %121, %cst_72 {dimension_numbers = #tpu.dot_dimension_numbers<[1], [0], [0], [1], [0, 0, 1, 1], [], []>} : vector<4x40xf32>, vector<40x1xf32>, vector<4x1xf32> -> vector<4x1xf32>
    %c0_73 = arith.constant 0 : index
    %c0_74 = arith.constant 0 : index
    %123 = vector.load %arg19[%c0_73, %c0_74] : memref<48x96xf32, #tpu.memory_space<vmem>>, vector<48x96xf32>
    %c0_75 = arith.constant 0 : index
    %c0_76 = arith.constant 0 : index
    %124 = vector.load %arg20[%c0_75, %c0_76] : memref<12x6xf32, #tpu.memory_space<vmem>>, vector<12x6xf32>
    %125 = tpu.concatenate %86, %87 in 0 : vector<48x12xf32>, vector<48x12xf32> -> vector<96x12xf32>
    %cst_77 = arith.constant dense<0.000000e+00> : vector<48x12xf32>
    %126 = tpu.matmul %123, %125, %cst_77 {dimension_numbers = #tpu.dot_dimension_numbers<[1], [0], [0], [1], [0, 0, 1, 1], [], []>} : vector<48x96xf32>, vector<96x12xf32>, vector<48x12xf32> -> vector<48x12xf32>
    %cst_78 = arith.constant dense<0.000000e+00> : vector<48x6xf32>
    %127 = tpu.matmul %126, %124, %cst_78 {dimension_numbers = #tpu.dot_dimension_numbers<[1], [0], [0], [1], [0, 0, 1, 1], [], []>} : vector<48x12xf32>, vector<12x6xf32>, vector<48x6xf32> -> vector<48x6xf32>
    %128 = vector.extract_strided_slice %127 {offsets = [0, 0], sizes = [24, 6], strides = [1, 1]} : vector<48x6xf32> to vector<24x6xf32>
    %129 = vector.extract_strided_slice %127 {offsets = [24, 0], sizes = [24, 6], strides = [1, 1]} : vector<48x6xf32> to vector<24x6xf32>
    %c0_79 = arith.constant 0 : index
    %c0_80 = arith.constant 0 : index
    %130 = vector.load %arg21[%c0_79, %c0_80] : memref<6x128xf32, #tpu.memory_space<vmem>>, vector<6x128xf32>
    %c0_81 = arith.constant 0 : index
    %c0_82 = arith.constant 0 : index
    %131 = vector.load %arg22[%c0_81, %c0_82] : memref<16x24xf32, #tpu.memory_space<vmem>>, vector<16x24xf32>
    %c0_83 = arith.constant 0 : index
    %c0_84 = arith.constant 0 : index
    %132 = vector.load %arg23[%c0_83, %c0_84] : memref<128x1xf32, #tpu.memory_space<vmem>>, vector<128x1xf32>
    %c0_85 = arith.constant 0 : index
    %c0_86 = arith.constant 0 : index
    %133 = vector.load %arg24[%c0_85, %c0_86] : memref<4x16xf32, #tpu.memory_space<vmem>>, vector<4x16xf32>
    %134 = arith.mulf %128, %128 : vector<24x6xf32>
    %135 = arith.mulf %129, %129 : vector<24x6xf32>
    %136 = arith.mulf %128, %129 : vector<24x6xf32>
    %cst_87 = arith.constant dense<0.000000e+00> : vector<24x128xf32>
    %137 = tpu.matmul %128, %130, %cst_87 {dimension_numbers = #tpu.dot_dimension_numbers<[1], [0], [0], [1], [0, 0, 1, 1], [], []>} : vector<24x6xf32>, vector<6x128xf32>, vector<24x128xf32> -> vector<24x128xf32>
    %cst_88 = arith.constant dense<0.000000e+00> : vector<24x128xf32>
    %138 = tpu.matmul %129, %130, %cst_88 {dimension_numbers = #tpu.dot_dimension_numbers<[1], [0], [0], [1], [0, 0, 1, 1], [], []>} : vector<24x6xf32>, vector<6x128xf32>, vector<24x128xf32> -> vector<24x128xf32>
    %cst_89 = arith.constant dense<0.000000e+00> : vector<24x128xf32>
    %139 = tpu.matmul %134, %130, %cst_89 {dimension_numbers = #tpu.dot_dimension_numbers<[1], [0], [0], [1], [0, 0, 1, 1], [], []>} : vector<24x6xf32>, vector<6x128xf32>, vector<24x128xf32> -> vector<24x128xf32>
    %cst_90 = arith.constant dense<0.000000e+00> : vector<24x128xf32>
    %140 = tpu.matmul %135, %130, %cst_90 {dimension_numbers = #tpu.dot_dimension_numbers<[1], [0], [0], [1], [0, 0, 1, 1], [], []>} : vector<24x6xf32>, vector<6x128xf32>, vector<24x128xf32> -> vector<24x128xf32>
    %cst_91 = arith.constant dense<0.000000e+00> : vector<24x128xf32>
    %141 = tpu.matmul %136, %130, %cst_91 {dimension_numbers = #tpu.dot_dimension_numbers<[1], [0], [0], [1], [0, 0, 1, 1], [], []>} : vector<24x6xf32>, vector<6x128xf32>, vector<24x128xf32> -> vector<24x128xf32>
    %142 = tpu.concatenate %137, %138, %139, %140, %141 in 1 : vector<24x128xf32>, vector<24x128xf32>, vector<24x128xf32>, vector<24x128xf32>, vector<24x128xf32> -> vector<24x640xf32>
    %cst_92 = arith.constant dense<0.000000e+00> : vector<16x640xf32>
    %143 = tpu.matmul %131, %142, %cst_92 {dimension_numbers = #tpu.dot_dimension_numbers<[1], [0], [0], [1], [0, 0, 1, 1], [], []>} : vector<16x24xf32>, vector<24x640xf32>, vector<16x640xf32> -> vector<16x640xf32>
    %144 = vector.extract_strided_slice %143 {offsets = [0, 0], sizes = [16, 128], strides = [1, 1]} : vector<16x640xf32> to vector<16x128xf32>
    %145 = vector.extract_strided_slice %143 {offsets = [0, 128], sizes = [16, 128], strides = [1, 1]} : vector<16x640xf32> to vector<16x128xf32>
    %146 = vector.extract_strided_slice %143 {offsets = [0, 256], sizes = [16, 128], strides = [1, 1]} : vector<16x640xf32> to vector<16x128xf32>
    %147 = vector.extract_strided_slice %143 {offsets = [0, 384], sizes = [16, 128], strides = [1, 1]} : vector<16x640xf32> to vector<16x128xf32>
    %148 = vector.extract_strided_slice %143 {offsets = [0, 512], sizes = [16, 128], strides = [1, 1]} : vector<16x640xf32> to vector<16x128xf32>
    %149 = arith.mulf %144, %144 : vector<16x128xf32>
    %150 = arith.mulf %145, %145 : vector<16x128xf32>
    %151 = arith.mulf %144, %145 : vector<16x128xf32>
    %152 = arith.subf %148, %151 : vector<16x128xf32>
    %cst_93 = arith.constant 2.000000e+00 : f32
    %153 = vector.broadcast %cst_93 : f32 to vector<16x128xf32>
    %154 = arith.mulf %153, %152 : vector<16x128xf32>
    %cst_94 = arith.constant 8.99999984E-4 : f32
    %155 = vector.broadcast %cst_94 : f32 to vector<16x128xf32>
    %156 = arith.addf %154, %155 : vector<16x128xf32>
    %157 = arith.subf %146, %149 : vector<16x128xf32>
    %158 = arith.subf %147, %150 : vector<16x128xf32>
    %159 = arith.addf %157, %158 : vector<16x128xf32>
    %cst_95 = arith.constant 8.99999984E-4 : f32
    %160 = vector.broadcast %cst_95 : f32 to vector<16x128xf32>
    %161 = arith.addf %159, %160 : vector<16x128xf32>
    %162 = arith.divf %156, %161 : vector<16x128xf32>
    %cst_96 = arith.constant dense<0.000000e+00> : vector<16x1xf32>
    %163 = tpu.matmul %162, %132, %cst_96 {dimension_numbers = #tpu.dot_dimension_numbers<[1], [0], [0], [1], [0, 0, 1, 1], [], []>} : vector<16x128xf32>, vector<128x1xf32>, vector<16x1xf32> -> vector<16x1xf32>
    %cst_97 = arith.constant dense<0.000000e+00> : vector<4x1xf32>
    %164 = tpu.matmul %133, %163, %cst_97 {dimension_numbers = #tpu.dot_dimension_numbers<[1], [0], [0], [1], [0, 0, 1, 1], [], []>} : vector<4x16xf32>, vector<16x1xf32>, vector<4x1xf32> -> vector<4x1xf32>
    %c0_98 = arith.constant 0 : index
    %c0_99 = arith.constant 0 : index
    %165 = vector.load %arg25[%c0_98, %c0_99] : memref<24x48xf32, #tpu.memory_space<vmem>>, vector<24x48xf32>
    %c0_100 = arith.constant 0 : index
    %c0_101 = arith.constant 0 : index
    %166 = vector.load %arg26[%c0_100, %c0_101] : memref<6x3xf32, #tpu.memory_space<vmem>>, vector<6x3xf32>
    %167 = tpu.concatenate %128, %129 in 0 : vector<24x6xf32>, vector<24x6xf32> -> vector<48x6xf32>
    %cst_102 = arith.constant dense<0.000000e+00> : vector<24x6xf32>
    %168 = tpu.matmul %165, %167, %cst_102 {dimension_numbers = #tpu.dot_dimension_numbers<[1], [0], [0], [1], [0, 0, 1, 1], [], []>} : vector<24x48xf32>, vector<48x6xf32>, vector<24x6xf32> -> vector<24x6xf32>
    %cst_103 = arith.constant dense<0.000000e+00> : vector<24x3xf32>
    %169 = tpu.matmul %168, %166, %cst_103 {dimension_numbers = #tpu.dot_dimension_numbers<[1], [0], [0], [1], [0, 0, 1, 1], [], []>} : vector<24x6xf32>, vector<6x3xf32>, vector<24x3xf32> -> vector<24x3xf32>
    %170 = vector.extract_strided_slice %169 {offsets = [0, 0], sizes = [12, 3], strides = [1, 1]} : vector<24x3xf32> to vector<12x3xf32>
    %171 = vector.extract_strided_slice %169 {offsets = [12, 0], sizes = [12, 3], strides = [1, 1]} : vector<24x3xf32> to vector<12x3xf32>
    %c0_104 = arith.constant 0 : index
    %c0_105 = arith.constant 0 : index
    %172 = vector.load %arg27[%c0_104, %c0_105] : memref<3x128xf32, #tpu.memory_space<vmem>>, vector<3x128xf32>
    %c0_106 = arith.constant 0 : index
    %c0_107 = arith.constant 0 : index
    %173 = vector.load %arg28[%c0_106, %c0_107] : memref<4x12xf32, #tpu.memory_space<vmem>>, vector<4x12xf32>
    %c0_108 = arith.constant 0 : index
    %c0_109 = arith.constant 0 : index
    %174 = vector.load %arg29[%c0_108, %c0_109] : memref<128x1xf32, #tpu.memory_space<vmem>>, vector<128x1xf32>
    %c0_110 = arith.constant 0 : index
    %c0_111 = arith.constant 0 : index
    %175 = vector.load %arg30[%c0_110, %c0_111] : memref<4x4xf32, #tpu.memory_space<vmem>>, vector<4x4xf32>
    %176 = arith.mulf %170, %170 : vector<12x3xf32>
    %177 = arith.mulf %171, %171 : vector<12x3xf32>
    %178 = arith.mulf %170, %171 : vector<12x3xf32>
    %cst_112 = arith.constant dense<0.000000e+00> : vector<12x128xf32>
    %179 = tpu.matmul %170, %172, %cst_112 {dimension_numbers = #tpu.dot_dimension_numbers<[1], [0], [0], [1], [0, 0, 1, 1], [], []>} : vector<12x3xf32>, vector<3x128xf32>, vector<12x128xf32> -> vector<12x128xf32>
    %cst_113 = arith.constant dense<0.000000e+00> : vector<12x128xf32>
    %180 = tpu.matmul %171, %172, %cst_113 {dimension_numbers = #tpu.dot_dimension_numbers<[1], [0], [0], [1], [0, 0, 1, 1], [], []>} : vector<12x3xf32>, vector<3x128xf32>, vector<12x128xf32> -> vector<12x128xf32>
    %cst_114 = arith.constant dense<0.000000e+00> : vector<12x128xf32>
    %181 = tpu.matmul %176, %172, %cst_114 {dimension_numbers = #tpu.dot_dimension_numbers<[1], [0], [0], [1], [0, 0, 1, 1], [], []>} : vector<12x3xf32>, vector<3x128xf32>, vector<12x128xf32> -> vector<12x128xf32>
    %cst_115 = arith.constant dense<0.000000e+00> : vector<12x128xf32>
    %182 = tpu.matmul %177, %172, %cst_115 {dimension_numbers = #tpu.dot_dimension_numbers<[1], [0], [0], [1], [0, 0, 1, 1], [], []>} : vector<12x3xf32>, vector<3x128xf32>, vector<12x128xf32> -> vector<12x128xf32>
    %cst_116 = arith.constant dense<0.000000e+00> : vector<12x128xf32>
    %183 = tpu.matmul %178, %172, %cst_116 {dimension_numbers = #tpu.dot_dimension_numbers<[1], [0], [0], [1], [0, 0, 1, 1], [], []>} : vector<12x3xf32>, vector<3x128xf32>, vector<12x128xf32> -> vector<12x128xf32>
    %184 = tpu.concatenate %179, %180, %181, %182, %183 in 1 : vector<12x128xf32>, vector<12x128xf32>, vector<12x128xf32>, vector<12x128xf32>, vector<12x128xf32> -> vector<12x640xf32>
    %cst_117 = arith.constant dense<0.000000e+00> : vector<4x640xf32>
    %185 = tpu.matmul %173, %184, %cst_117 {dimension_numbers = #tpu.dot_dimension_numbers<[1], [0], [0], [1], [0, 0, 1, 1], [], []>} : vector<4x12xf32>, vector<12x640xf32>, vector<4x640xf32> -> vector<4x640xf32>
    %186 = vector.extract_strided_slice %185 {offsets = [0, 0], sizes = [4, 128], strides = [1, 1]} : vector<4x640xf32> to vector<4x128xf32>
    %187 = vector.extract_strided_slice %185 {offsets = [0, 128], sizes = [4, 128], strides = [1, 1]} : vector<4x640xf32> to vector<4x128xf32>
    %188 = vector.extract_strided_slice %185 {offsets = [0, 256], sizes = [4, 128], strides = [1, 1]} : vector<4x640xf32> to vector<4x128xf32>
    %189 = vector.extract_strided_slice %185 {offsets = [0, 384], sizes = [4, 128], strides = [1, 1]} : vector<4x640xf32> to vector<4x128xf32>
    %190 = vector.extract_strided_slice %185 {offsets = [0, 512], sizes = [4, 128], strides = [1, 1]} : vector<4x640xf32> to vector<4x128xf32>
    %191 = arith.mulf %186, %186 : vector<4x128xf32>
    %192 = arith.mulf %187, %187 : vector<4x128xf32>
    %193 = arith.mulf %186, %187 : vector<4x128xf32>
    %194 = arith.subf %190, %193 : vector<4x128xf32>
    %cst_118 = arith.constant 2.000000e+00 : f32
    %195 = vector.broadcast %cst_118 : f32 to vector<4x128xf32>
    %196 = arith.mulf %195, %194 : vector<4x128xf32>
    %cst_119 = arith.constant 8.99999984E-4 : f32
    %197 = vector.broadcast %cst_119 : f32 to vector<4x128xf32>
    %198 = arith.addf %196, %197 : vector<4x128xf32>
    %199 = arith.subf %188, %191 : vector<4x128xf32>
    %200 = arith.subf %189, %192 : vector<4x128xf32>
    %201 = arith.addf %199, %200 : vector<4x128xf32>
    %cst_120 = arith.constant 8.99999984E-4 : f32
    %202 = vector.broadcast %cst_120 : f32 to vector<4x128xf32>
    %203 = arith.addf %201, %202 : vector<4x128xf32>
    %204 = arith.divf %198, %203 : vector<4x128xf32>
    %cst_121 = arith.constant 2.000000e+00 : f32
    %205 = vector.broadcast %cst_121 : f32 to vector<4x128xf32>
    %206 = arith.mulf %205, %193 : vector<4x128xf32>
    %cst_122 = arith.constant 9.99999974E-5 : f32
    %207 = vector.broadcast %cst_122 : f32 to vector<4x128xf32>
    %208 = arith.addf %206, %207 : vector<4x128xf32>
    %209 = arith.addf %191, %192 : vector<4x128xf32>
    %cst_123 = arith.constant 9.99999974E-5 : f32
    %210 = vector.broadcast %cst_123 : f32 to vector<4x128xf32>
    %211 = arith.addf %209, %210 : vector<4x128xf32>
    %212 = arith.divf %208, %211 : vector<4x128xf32>
    %213 = arith.mulf %212, %204 : vector<4x128xf32>
    %cst_124 = arith.constant dense<0.000000e+00> : vector<4x1xf32>
    %214 = tpu.matmul %213, %174, %cst_124 {dimension_numbers = #tpu.dot_dimension_numbers<[1], [0], [0], [1], [0, 0, 1, 1], [], []>} : vector<4x128xf32>, vector<128x1xf32>, vector<4x1xf32> -> vector<4x1xf32>
    %cst_125 = arith.constant dense<0.000000e+00> : vector<4x1xf32>
    %215 = tpu.matmul %175, %214, %cst_125 {dimension_numbers = #tpu.dot_dimension_numbers<[1], [0], [0], [1], [0, 0, 1, 1], [], []>} : vector<4x4xf32>, vector<4x1xf32>, vector<4x1xf32> -> vector<4x1xf32>
    %216 = tpu.concatenate %38, %80, %122, %164, %215 in 1 : vector<4x1xf32>, vector<4x1xf32>, vector<4x1xf32>, vector<4x1xf32>, vector<4x1xf32> -> vector<4x5xf32>
    %c0_126 = arith.constant 0 : index
    %c0_127 = arith.constant 0 : index
    %c0_128 = arith.constant 0 : index
    %217 = vector.load %arg31[%c0_126, %c0_127, %c0_128] : memref<1x4x5xf32, #tpu.memory_space<vmem>>, vector<1x4x5xf32>
    %218 = vector.shape_cast %217 : vector<1x4x5xf32> to vector<4x5xf32>
    %219 = vector.shape_cast %216 : vector<4x5xf32> to vector<1x4x5xf32>
    tpu.vector_store %arg31[%c0_126, %c0_127, %c0_128], %219 {strides = array<i32>} : memref<1x4x5xf32, #tpu.memory_space<vmem>>, vector<1x4x5xf32>,
    return
  }
  func.func @transform_0(%arg0: i32) -> (i32, i32, i32) {
    %c0_i32 = arith.constant 0 : i32
    %c0_i32_0 = arith.constant 0 : i32
    %c0_i32_1 = arith.constant 0 : i32
    return %arg0, %c0_i32, %c0_i32_0 : i32, i32, i32
  }
  func.func @transform_1(%arg0: i32) -> (i32, i32, i32) {
    %c0_i32 = arith.constant 0 : i32
    %c0_i32_0 = arith.constant 0 : i32
    %c0_i32_1 = arith.constant 0 : i32
    return %arg0, %c0_i32, %c0_i32_0 : i32, i32, i32
  }
  func.func @transform_2(%arg0: i32) -> (i32, i32) {
    %c0_i32 = arith.constant 0 : i32
    %c0_i32_0 = arith.constant 0 : i32
    %c0_i32_1 = arith.constant 0 : i32
    return %c0_i32, %c0_i32_0 : i32, i32
  }
  func.func @transform_3(%arg0: i32) -> (i32, i32) {
    %c0_i32 = arith.constant 0 : i32
    %c0_i32_0 = arith.constant 0 : i32
    %c0_i32_1 = arith.constant 0 : i32
    return %c0_i32, %c0_i32_0 : i32, i32
  }
  func.func @transform_4(%arg0: i32) -> (i32, i32) {
    %c0_i32 = arith.constant 0 : i32
    %c0_i32_0 = arith.constant 0 : i32
    %c0_i32_1 = arith.constant 0 : i32
    return %c0_i32, %c0_i32_0 : i32, i32
  }
  func.func @transform_5(%arg0: i32) -> (i32, i32) {
    %c0_i32 = arith.constant 0 : i32
    %c0_i32_0 = arith.constant 0 : i32
    %c0_i32_1 = arith.constant 0 : i32
    return %c0_i32, %c0_i32_0 : i32, i32
  }
  func.func @transform_6(%arg0: i32) -> (i32, i32) {
    %c0_i32 = arith.constant 0 : i32
    %c0_i32_0 = arith.constant 0 : i32
    %c0_i32_1 = arith.constant 0 : i32
    return %c0_i32, %c0_i32_0 : i32, i32
  }
  func.func @transform_7(%arg0: i32) -> (i32, i32) {
    %c0_i32 = arith.constant 0 : i32
    %c0_i32_0 = arith.constant 0 : i32
    %c0_i32_1 = arith.constant 0 : i32
    return %c0_i32, %c0_i32_0 : i32, i32
  }
  func.func @transform_8(%arg0: i32) -> (i32, i32) {
    %c0_i32 = arith.constant 0 : i32
    %c0_i32_0 = arith.constant 0 : i32
    %c0_i32_1 = arith.constant 0 : i32
    return %c0_i32, %c0_i32_0 : i32, i32
  }
  func.func @transform_9(%arg0: i32) -> (i32, i32) {
    %c0_i32 = arith.constant 0 : i32
    %c0_i32_0 = arith.constant 0 : i32
    %c0_i32_1 = arith.constant 0 : i32
    return %c0_i32, %c0_i32_0 : i32, i32
  }
  func.func @transform_10(%arg0: i32) -> (i32, i32) {
    %c0_i32 = arith.constant 0 : i32
    %c0_i32_0 = arith.constant 0 : i32
    %c0_i32_1 = arith.constant 0 : i32
    return %c0_i32, %c0_i32_0 : i32, i32
  }
  func.func @transform_11(%arg0: i32) -> (i32, i32) {
    %c0_i32 = arith.constant 0 : i32
    %c0_i32_0 = arith.constant 0 : i32
    %c0_i32_1 = arith.constant 0 : i32
    return %c0_i32, %c0_i32_0 : i32, i32
  }
  func.func @transform_12(%arg0: i32) -> (i32, i32) {
    %c0_i32 = arith.constant 0 : i32
    %c0_i32_0 = arith.constant 0 : i32
    %c0_i32_1 = arith.constant 0 : i32
    return %c0_i32, %c0_i32_0 : i32, i32
  }
  func.func @transform_13(%arg0: i32) -> (i32, i32) {
    %c0_i32 = arith.constant 0 : i32
    %c0_i32_0 = arith.constant 0 : i32
    %c0_i32_1 = arith.constant 0 : i32
    return %c0_i32, %c0_i32_0 : i32, i32
  }
  func.func @transform_14(%arg0: i32) -> (i32, i32) {
    %c0_i32 = arith.constant 0 : i32
    %c0_i32_0 = arith.constant 0 : i32
    %c0_i32_1 = arith.constant 0 : i32
    return %c0_i32, %c0_i32_0 : i32, i32
  }
  func.func @transform_15(%arg0: i32) -> (i32, i32) {
    %c0_i32 = arith.constant 0 : i32
    %c0_i32_0 = arith.constant 0 : i32
    %c0_i32_1 = arith.constant 0 : i32
    return %c0_i32, %c0_i32_0 : i32, i32
  }
  func.func @transform_16(%arg0: i32) -> (i32, i32) {
    %c0_i32 = arith.constant 0 : i32
    %c0_i32_0 = arith.constant 0 : i32
    %c0_i32_1 = arith.constant 0 : i32
    return %c0_i32, %c0_i32_0 : i32, i32
  }
  func.func @transform_17(%arg0: i32) -> (i32, i32) {
    %c0_i32 = arith.constant 0 : i32
    %c0_i32_0 = arith.constant 0 : i32
    %c0_i32_1 = arith.constant 0 : i32
    return %c0_i32, %c0_i32_0 : i32, i32
  }
  func.func @transform_18(%arg0: i32) -> (i32, i32) {
    %c0_i32 = arith.constant 0 : i32
    %c0_i32_0 = arith.constant 0 : i32
    %c0_i32_1 = arith.constant 0 : i32
    return %c0_i32, %c0_i32_0 : i32, i32
  }
  func.func @transform_19(%arg0: i32) -> (i32, i32) {
    %c0_i32 = arith.constant 0 : i32
    %c0_i32_0 = arith.constant 0 : i32
    %c0_i32_1 = arith.constant 0 : i32
    return %c0_i32, %c0_i32_0 : i32, i32
  }
  func.func @transform_20(%arg0: i32) -> (i32, i32) {
    %c0_i32 = arith.constant 0 : i32
    %c0_i32_0 = arith.constant 0 : i32
    %c0_i32_1 = arith.constant 0 : i32
    return %c0_i32, %c0_i32_0 : i32, i32
  }
  func.func @transform_21(%arg0: i32) -> (i32, i32) {
    %c0_i32 = arith.constant 0 : i32
    %c0_i32_0 = arith.constant 0 : i32
    %c0_i32_1 = arith.constant 0 : i32
    return %c0_i32, %c0_i32_0 : i32, i32
  }
  func.func @transform_22(%arg0: i32) -> (i32, i32) {
    %c0_i32 = arith.constant 0 : i32
    %c0_i32_0 = arith.constant 0 : i32
    %c0_i32_1 = arith.constant 0 : i32
    return %c0_i32, %c0_i32_0 : i32, i32
  }
  func.func @transform_23(%arg0: i32) -> (i32, i32) {
    %c0_i32 = arith.constant 0 : i32
    %c0_i32_0 = arith.constant 0 : i32
    %c0_i32_1 = arith.constant 0 : i32
    return %c0_i32, %c0_i32_0 : i32, i32
  }
  func.func @transform_24(%arg0: i32) -> (i32, i32) {
    %c0_i32 = arith.constant 0 : i32
    %c0_i32_0 = arith.constant 0 : i32
    %c0_i32_1 = arith.constant 0 : i32
    return %c0_i32, %c0_i32_0 : i32, i32
  }
  func.func @transform_25(%arg0: i32) -> (i32, i32) {
    %c0_i32 = arith.constant 0 : i32
    %c0_i32_0 = arith.constant 0 : i32
    %c0_i32_1 = arith.constant 0 : i32
    return %c0_i32, %c0_i32_0 : i32, i32
  }
  func.func @transform_26(%arg0: i32) -> (i32, i32) {
    %c0_i32 = arith.constant 0 : i32
    %c0_i32_0 = arith.constant 0 : i32
    %c0_i32_1 = arith.constant 0 : i32
    return %c0_i32, %c0_i32_0 : i32, i32
  }
  func.func @transform_27(%arg0: i32) -> (i32, i32) {
    %c0_i32 = arith.constant 0 : i32
    %c0_i32_0 = arith.constant 0 : i32
    %c0_i32_1 = arith.constant 0 : i32
    return %c0_i32, %c0_i32_0 : i32, i32
  }
  func.func @transform_28(%arg0: i32) -> (i32, i32) {
    %c0_i32 = arith.constant 0 : i32
    %c0_i32_0 = arith.constant 0 : i32
    %c0_i32_1 = arith.constant 0 : i32
    return %c0_i32, %c0_i32_0 : i32, i32
  }
  func.func @transform_29(%arg0: i32) -> (i32, i32) {
    %c0_i32 = arith.constant 0 : i32
    %c0_i32_0 = arith.constant 0 : i32
    %c0_i32_1 = arith.constant 0 : i32
    return %c0_i32, %c0_i32_0 : i32, i32
  }
  func.func @transform_30(%arg0: i32) -> (i32, i32, i32) {
    %c0_i32 = arith.constant 0 : i32
    %c0_i32_0 = arith.constant 0 : i32
    %c0_i32_1 = arith.constant 0 : i32
    return %arg0, %c0_i32, %c0_i32_0 : i32, i32, i32
  }
}

</mosaic_0001>

<bundles_post_ra>
// kernel: tpu_custom_call.1
= control target key start
LH: loop header
LB: loop body
LE: loop exit
PB: predicated region body
PF: predicated region fallthrough
CT: control target
= control target key end

     0   :  { %6 = vsyncpa [#allocation3], 0  ;;  %s341_s0 = inlined_call_operand.hbm [shape: f32[8,128], index: 0, kind: input, shape index: {}]   ;;  %s342_s1 = inlined_call_operand.hbm [shape: f32[8,128], index: 1, kind: output, shape index: {}]  }
   0x1   :  { %7 = vsyncpa [#allocation4], 0  ;;  %s262_s6 = smov 0  }
   0x2 LB: > { %s145_s7 = sadd.s32 4294967295, %s248_s6   ;;  %p146_p0 = scmp.ge.s32.totalorder %s248_s6, 1  ;;  %s248_s6 = sphi %s262_s6, %s13_s6  }
   0x3   : > { %p60_p1 = scmp.lt.s32.totalorder %s248_s6, 3  ;;  %p276_p3 = scmp.eq.s32.totalorder %s145_s7, 0 }
   0x4   : > { %s250_s10 = smov [#allocation2]   ;;  %s180_s15 = scalar_lea.hbm %s341_s0, 128 }
   0x5   : > { %p270_p2 = pnand %p146_p0, %p60_p1  ;;  %s73_s11 = sshll.u32 %s250_s10, 4  ;;  %s74_s11 = int_to_ptr.vmem [resolvable:$true] %s73_s11 }
   0x6   : > { %s347_s9 = scalar_select %p276_p3, 1, 0 }
   0x7   : > { %s346_s8 = scalar_select %p270_p2, 1, 0 }
   0x8   : > { %p162_p4 = pneg %p270_p2  ;;  %p181_p6 = scmp.ne.s32.totalorder %s341_s0, %s180_s15 }
   0x9   : > { %p187_p10 = scmp.lt.u32.totalorder %s180_s15, %s341_s0 }
   0xa   : > { %p284_p5 = pnand %p276_p3, %p162_p4 }
   0xc   : > { %p182_p7 = pneg %p284_p5 }
   0xe   : > { %p183_p8 = pnand %p182_p7, %p181_p6 }
  0x10   : > { %p184_p9 = pneg %p183_p8 }
  0x12   : > { %p189_p11 = pnand %p187_p10, %p184_p9 }
  0x14   : > { %192 = shalt.err (!%p189_p11)
}
  0x15   : > { %s193_s20 = scalar_lea.vmem %s74_s11, 128  ;;  %p201_p1 = scmp.lt.s32.totalorder %s74_s11, %s74_s11 }
  0x16   : > { %p194_p12 = scmp.ne.s32.totalorder %s74_s11, %s193_s20  ;;  %p202_p4 = scmp.lt.s32.totalorder %s193_s20, %s193_s20 }
  0x18   : > { %p196_p13 = pnand %p194_p12, %p182_p7  ;;  %p203_p3 = por %p202_p4, %p201_p1 }
  0x1a   : > { %p197_p0 = pneg %p196_p13 }
  0x1c   : > { %p204_p2 = pnand %p203_p3, %p197_p0 }
  0x1e   : > { %207 = shalt.err (!%p204_p2)
}
  0x1f   : > { %165 = dma.hbm_to_vmem [thread:$0]  (!%p284_p5), %s341_s0, 128, %s74_s11, [#allocation3]  }
  0x20   : > { %p349_p6 = scmp.ne.s32.totalorder %s346_s8, 0 }
  0x21   : > { %p350_p8 = scmp.ne.s32.totalorder (!%p349_p6), %s347_s9, 0 }
  0x22   : > { %86 = sbr.rel (%p349_p6) target bundleno = 67 (0x43), region = 24 }
  0x29   : > { %239 = dma.done.wait (%p350_p8), [#allocation3], 128  }
  0x2a   : > { %241 = vsyncadd (%p350_p8), [#allocation3], 4294967168  ;;  %s251_s23 = smov [#allocation5]   ;;  %v96_v0 = vld [vmem:[#allocation2] sm:$0xff]  ;;  %p312_p2 = scmp.eq.s32.totalorder %s145_s7, 1 }
  0x2b   : > { %s106_s24 = sshll.u32 %s251_s23, 4  ;;  %v97_v1 = vadd.f32 1.0, %v96_v0  ;;  %s107_s24 = int_to_ptr.vmem [resolvable:$true] %s106_s24 }
  0x2c   : > { %s208_s26 = scalar_lea.vmem %s107_s24, 128  ;;  %p215_p9 = scmp.lt.s32.totalorder %s107_s24, %s107_s24 }
  0x2d   : > { %98 = vst [vmem:[#allocation5] sm:$0xff] %v97_v1  ;;  %p209_p3 = scmp.ne.s32.totalorder %s107_s24, %s208_s26  ;;  %p216_p10 = scmp.lt.s32.totalorder %s208_s26, %s208_s26 }
  0x2f   : > { %p210_p5 = pnand %p209_p3, %p312_p2  ;;  %p217_p11 = por %p216_p10, %p215_p9 }
  0x31   : > { %p211_p7 = pneg %p210_p5 }
  0x33   : > { %p218_p12 = pnand %p217_p11, %p211_p7 }
  0x35   : > { %221 = shalt.err (!%p218_p12)
}
  0x36   : > { %s222_s29 = scalar_lea.hbm %s342_s1, 128 }
  0x37   : > { %p223_p13 = scmp.ne.s32.totalorder %s342_s1, %s222_s29  ;;  %p228_p4 = scmp.lt.u32.totalorder %s222_s29, %s342_s1 }
  0x39   : > { %p224_p0 = pnand %p223_p13, %p312_p2 }
  0x3b   : > { %p225_p1 = pneg %p224_p0 }
  0x3d   : > { %p230_p6 = pnand %p228_p4, %p225_p1 }
  0x3f   : > { %233 = shalt.err (!%p230_p6)
}
  0x40   : > { %159 = dma.vmem_to_hbm [thread:$0]  (%p312_p2), %s107_s24, 128, %s342_s1, [#allocation4]  }
  0x41   : > { %243 = dma.done.wait (%p312_p2), [#allocation4], 128  }
  0x42   : > { %245 = vsyncadd (%p312_p2), [#allocation4], 4294967168 }
  0x43 PF: > { %s13_s6 = sadd.s32 1, %s248_s6  }
  0x44   : > { %p10_p8 = scmp.ge.s32.totalorder %s13_s6, 4  }
  0x46   :  { %12 = sbr.rel (!%p10_p8) target bundleno = 2 (0x2), region = 53 }
  0x4d   :  { %119 = vsyncpa [#allocation3], 1 }
  0x4e   :  { %121 = vsyncpa [#allocation3 + $0x1], 1 }
  0x4f   :  { %122 = vsyncpa [#allocation4], 1 }
  0x50   :  { %124 = vsyncpa [#allocation4 + $0x1], 1 }

// kernel: tpu_custom_call.1
= control target key start
LH: loop header
LB: loop body
LE: loop exit
PB: predicated region body
PF: predicated region fallthrough
CT: control target
= control target key end

     0   :  { %s12936_s6 = smov 1   ;;  %s12937_s10 = smov 2   ;;  %s15872_s0 = inlined_call_operand.smem [shape: u32[31], index: -1, kind: input, shape index: {}] }
   0x1   :  { %s12983_s5 = sld [smem:[%s15872_s0]]   ;;  %s12938_s14 = smov 3  }
   0x2   :  { %s12988_s9 = sld [smem:[%s15872_s0 + %s12936_s6]]   ;;  %s12939_s18 = smov 4  }
   0x3   :  { %s12993_s13 = sld [smem:[%s15872_s0 + %s12937_s10]]   ;;  %s12940_s22 = smov 5  }
   0x4   :  { %s12998_s17 = sld [smem:[%s15872_s0 + %s12938_s14]]   ;;  %s12941_s26 = smov 6  }
   0x5   :  { %s13003_s21 = sld [smem:[%s15872_s0 + %s12939_s18]]   ;;  %s12942_s30 = smov 7  }
   0x6   :  { %s13008_s25 = sld [smem:[%s15872_s0 + %s12940_s22]]   ;;  %s12943_s4 = smov 8  }
   0x7   :  { %15902 = sst [smem:[#allocation5_spill]] %s12983_s5  ;;  %s12944_s10 = smov 9  }
   0x8   :  { %15903 = sst [smem:[#allocation6_spill]] %s12988_s9  ;;  %s12945_s15 = smov 10  }
   0x9   :  { %15904 = sst [smem:[#allocation7_spill]] %s12993_s13  ;;  %s12946_s20 = smov 11  }
   0xa   :  { %s13013_s29 = sld [smem:[%s15872_s0 + %s12941_s26]]   ;;  %s12947_s26 = smov 12  }
   0xb   :  { %s13018_s3 = sld [smem:[%s15872_s0 + %s12942_s30]]   ;;  %s12948_s1 = smov 13  }
   0xc   :  { %s13023_s8 = sld [smem:[%s15872_s0 + %s12943_s4]]   ;;  %s12949_s7 = smov 14  }
   0xd   :  { %s13028_s14 = sld [smem:[%s15872_s0 + %s12944_s10]]   ;;  %s12951_s22 = smov 16  }
   0xe   :  { %s13033_s19 = sld [smem:[%s15872_s0 + %s12945_s15]]   ;;  %s12950_s15 = smov 15  }
   0xf   :  { %s13038_s24 = sld [smem:[%s15872_s0 + %s12946_s20]]   ;;  %s12952_s28 = smov 17  }
  0x10   :  { %s13043_s30 = sld [smem:[%s15872_s0 + %s12947_s26]]  }
  0x11   :  { %15905 = sst [smem:[#allocation8_spill]] %s13018_s3 }
  0x12   :  { %15906 = sst [smem:[#allocation9_spill]] %s13023_s8 }
  0x13   :  { %s13048_s6 = sld [smem:[%s15872_s0 + %s12948_s1]]  }
  0x14   :  { %s13053_s12 = sld [smem:[%s15872_s0 + %s12949_s7]]   ;;  %s12953_s7 = smov 18  }
  0x15   :  { %s13058_s20 = sld [smem:[%s15872_s0 + %s12950_s15]]   ;;  %s12954_s15 = smov 19  }
  0x16   :  { %s13063_s27 = sld [smem:[%s15872_s0 + %s12951_s22]]   ;;  %s12955_s22 = smov 20  }
  0x17   :  { %s13068_s4 = sld [smem:[%s15872_s0 + %s12952_s28]]   ;;  %s12956_s28 = smov 21  }
  0x19   :  { %15907 = sst [smem:[#allocation10_spill]] %s13048_s6 }
  0x1a   :  { %15908 = sst [smem:[#allocation11_spill]] %s13053_s12 }
  0x1b   :  { %15909 = sst [smem:[#allocation12_spill]] %s13058_s20 }
  0x1c   :  { %15910 = sst [smem:[#allocation13_spill]] %s13063_s27 }
  0x1d   :  { %15911 = sst [smem:[#allocation14_spill]] %s13068_s4 }
  0x1e   :  { %s13073_s12 = sld [smem:[%s15872_s0 + %s12953_s7]]   ;;  %s12957_s7 = smov 22  }
  0x1f   :  { %s13078_s20 = sld [smem:[%s15872_s0 + %s12954_s15]]   ;;  %s12958_s15 = smov 23  }
  0x20   :  { %s13083_s27 = sld [smem:[%s15872_s0 + %s12955_s22]]   ;;  %s12959_s22 = smov 24  }
  0x21   :  { %s13088_s4 = sld [smem:[%s15872_s0 + %s12956_s28]]   ;;  %s12960_s28 = smov 25  }
  0x24   :  { %15912 = sst [smem:[#allocation15_spill]] %s13073_s12 }
  0x25   :  { %15913 = sst [smem:[#allocation16_spill]] %s13078_s20 }
  0x26   :  { %15914 = sst [smem:[#allocation17_spill]] %s13083_s27 }
  0x27   :  { %15915 = sst [smem:[#allocation18_spill]] %s13088_s4 }
  0x28   :  { %s13093_s12 = sld [smem:[%s15872_s0 + %s12957_s7]]   ;;  %s12961_s7 = smov 26  }
  0x29   :  { %s13098_s20 = sld [smem:[%s15872_s0 + %s12958_s15]]   ;;  %s12962_s15 = smov 27  }
  0x2a   :  { %s13103_s27 = sld [smem:[%s15872_s0 + %s12959_s22]]   ;;  %s12963_s22 = smov 28  }
  0x2b   :  { %s13108_s4 = sld [smem:[%s15872_s0 + %s12960_s28]]   ;;  %s12964_s28 = smov 29  }
  0x2e   :  { %15916 = sst [smem:[#allocation19_spill]] %s13093_s12 }
  0x2f   :  { %15917 = sst [smem:[#allocation20_spill]] %s13098_s20 }
  0x30   :  { %15918 = sst [smem:[#allocation21_spill]] %s13103_s27 }
  0x31   :  { %15919 = sst [smem:[#allocation22_spill]] %s13108_s4 }
  0x32   :  { %s13113_s12 = sld [smem:[%s15872_s0 + %s12961_s7]]   ;;  %s12965_s7 = smov 30  }
  0x33   :  { %s13118_s20 = sld [smem:[%s15872_s0 + %s12962_s15]]  }
  0x34   :  { %s13123_s27 = sld [smem:[%s15872_s0 + %s12963_s22]]  }
  0x35   :  { %s13128_s4 = sld [smem:[%s15872_s0 + %s12964_s28]]  }
  0x38   :  { %15920 = sst [smem:[#allocation23_spill]] %s13113_s12 }
  0x39   :  { %s13133_s12 = sld [smem:[%s15872_s0 + %s12965_s7]]  }
  0x3b   :  { %15921 = sst [smem:[#allocation24_spill]] %s13128_s4 }
  0x3c   :  { %66 = vsyncpa [#allocation3], 0 }
  0x3d   :  { %68 = vsyncpa [#allocation3 + $0x1], 0  ;;  %s13135_s15 = smov 0   ;;  %s13137_s16 = smov 0  }
  0x3e   :  { %s13139_s18 = smov 0   ;;  %s13141_s22 = smov 0  }
  0x3f LB: > { %s15922_s13 = sld [smem:[#allocation7_spill]]  ;;  %s15923_s8 = sld [smem:[#allocation9_spill]]  ;;  %s12934_s22 = sphi %s13141_s22, %s15997_s22   ;;  %s12930_s18 = sphi %s13139_s18, %s15996_s18   ;;  %s12926_s16 = sphi %s13137_s16, %s15995_s16   ;;  %s12922_s15 = sphi %s13135_s15, %s15994_s15  }
  0x40   : > { %s15924_s6 = sld [smem:[#allocation10_spill]]  ;;  %s15925_s3 = sld [smem:[#allocation8_spill]] }
  0x41   : > { %s13156_s0 = sadd.s32 4294967295, %s12934_s22   ;;  %s9695_s23 = sadd.s32 4294967294, %s12934_s22  }
  0x42   : > { %s13160_s26 = sadd.s32 1, %s12934_s22   ;;  %s721_s28 = sadd.s32 1, %s12930_s18 }
  0x43   : > { %s718_s1 = ssub.s32 %s12934_s22, %s13160_s26  ;;  %p731_p0 = scmp.ne.s32.totalorder %s12930_s18, %s12926_s16 }
  0x44   : > { %p719_p1 = scmp.eq.s32.totalorder %s718_s1, 0  ;;  %p732_p2 = scmp.eq.s32.totalorder %s13156_s0, 1 }
  0x45   : > { %p737_p3 = scmp.ne.s32.totalorder %s12926_s16, %s12922_s15  ;;  %p738_p4 = scmp.eq.s32.totalorder %s9695_s23, 1 }
  0x46   : > { %s13171_s2 = scalar_select %p719_p1, %s12930_s18, %s721_s28  }
  0x47   : > { %p13173_p5 = por %p732_p2, %p731_p0  ;;  %p13177_p6 = por %p738_p4, %p737_p3 }
  0x48   : > { %p9698_p7 = scmp.ge.s32.totalorder %s12934_s22, 1  ;;  %p856_p8 = scmp.lt.s32.totalorder %s12934_s22, 3 }
  0x4a   : > { %p857_p9 = pnand %p9698_p7, %p856_p8 }
  0x4c   : > { %860 = sbr.rel (%p857_p9) target bundleno = 5606 (0x15e6), region = 140 }
  0x53   : > { %v997_v0 = vld [vmem:[%s15922_s13] sm:$0xff]  ;;  %v998_v1 = vld [vmem:[%s15922_s13 + $0x8] sm:$0xff]  ;;  %v999_v2 = vld [vmem:[%s15922_s13 + $0x10] sm:$0xff]  ;;  %p939_p10 = scmp.lt.s32.totalorder %s13156_s0, 1  ;;  %s15928_s5 = sld [smem:[#allocation5_spill]]  ;;  %vm1138_vm0 = vcmask 392192  }
  0x54   : > { %v13187_v3 = vpack.c.bf16 %v998_v1, %v997_v0  ;;  %v1000_v4 = vld [vmem:[%s15922_s13 + $0x18] sm:$0xff]  ;;  %v1001_v6 = vld [vmem:[%s15922_s13 + $0x20] sm:$0xff]  ;;  %s15929_s9 = sld [smem:[#allocation6_spill]]  ;;  %v1002_v7 = vld [vmem:[%s15922_s13 + $0x28] sm:$0xff]  ;;  %vm2424_vm1 = vcmask 523264   ;;  %vm12967_vm2 = vmmov 0  }
  0x55   : > { %v13190_v5 = vpack.c.bf16 %v1000_v4, %v999_v2  ;;  %s940_s11 = scalar_select %p939_p10, %s13156_s0, 1  ;;  %v13200_v8 = vpack.c.bf16 %v1002_v7, %v1001_v6  ;;  %vm3538_vm3 = vcmask 457728   ;;  %vm4383_vm4 = vcmask 195584  }
  0x56   : > { %11929 = vmatprep.subr.bf16.mxu0 %v13187_v3  ;;  %12653 = vmatprep.subr.bf16.mxu1 %v13187_v3  ;;  %vm5189_vm5 = vcmask 785408   ;;  %vm5857_vm6 = vcmask 719872   ;;  %vm6341_vm7 = vcmask 1043456   ;;  %vm12969_vm8 = vmmov 1   ;;  %s15992_s4 = sld [smem:[#allocation24_spill]] }
  0x57   : > { %11931 = vmatpush3.bf16.msra.mxu0 %v13187_v3  ;;  %s12659_s23 = smul.u32 192, %s940_s11  ;;  %12656 = vmatpush3.bf16.msra.mxu1 %v13187_v3  ;;  %s15977_s11 = sld [smem:[#allocation11_spill]]  ;;  %vm15364_vm9 = vmpackc.low %vm6341_vm7, %vm12969_vm8  ;;  %vm6322_vm10 = vcmask 97280   ;;  %vm7337_vm11 = vcmask 326656   ;;  %vm7687_vm12 = vcmask 1045504   ;;  %vm7677_vm13 = vcmask 48128  }
  0x58   : > { %11933 = vmatprep.subr.bf16.mxu0 %v13190_v5  ;;  %12654 = vmatprep.subr.bf16.mxu1 %v13190_v5  ;;  %vm8461_vm14 = vcmask 130048   ;;  %vm8757_vm15 = vcmask 1042432  }
  0x59   : > { %s13204_s28 = scalar_lea.vmem %s15928_s5, %s12659_s23  ;;  %s15985_s5 = sld [smem:[#allocation17_spill]] }
  0x5a   : > { %v13207_v9 = vld [vmem:[%s13204_s28] sm:$0xff]  ;;  %s13213_s1 = scalar_lea.vmem %s15929_s9, %s12659_s23  ;;  %v13223_v11 = vld [vmem:[%s13204_s28 + $0x8] sm:$0xff]  ;;  %v13228_v12 = vld [vmem:[%s13204_s28 + $0x10] sm:$0xff]  ;;  %s12970_s23 = smov 1  }
  0x5b   : > { %11935 = vmatpush3.bf16.msra.mxu0 %v13190_v5  ;;  %10784 = vmatprep.mubr.msk.f32.mxu0 %vm1138_vm0, %v13207_v9  ;;  %v13219_v10 = vld [vmem:[%s13213_s1 + $0x30] sm:$0xff]  ;;  %v13233_v13 = vld [vmem:[%s13213_s1 + $0x38] sm:$0xff]  ;;  %v13239_v14 = vld [vmem:[%s13213_s1 + $0x40] sm:$0xff]  ;;  %v1066_v6 = vmul.f32 %v13207_v9, %v13207_v9  ;;  %s12974_s9 = smov [#allocation2]  }
  0x5c   : > { %11937 = vmatprep.subr.bf16.mxu0 %v13200_v8  ;;  %12657 = vmatpush3.bf16.msra.mxu1 %v13190_v5  ;;  %v13244_v15 = vld [vmem:[%s13204_s28 + $0x18] sm:$0xff]  ;;  %v13248_v16 = vld [vmem:[%s13204_s28 + $0x20] sm:$0xff]  ;;  %v13256_v17 = vld [vmem:[%s13213_s1 + $0x48] sm:$0xff]  ;;  %v1096_v63 = vmul.f32 %v13219_v10, %v13219_v10  ;;  %v1097_v0 = vmul.f32 %v13233_v13, %v13233_v13  ;;  %v1098_v1 = vmul.f32 %v13239_v14, %v13239_v14 }
  0x5d   : > { %12655 = vmatprep.subr.bf16.mxu1 %v13200_v8  ;;  %10841 = vmatprep.mubr.msk.f32.mxu1 %vm1138_vm0, %v13219_v10  ;;  %v13262_v18 = vld [vmem:[%s13213_s1 + $0x50] sm:$0xff]  ;;  %v13268_v19 = vld [vmem:[%s13204_s28 + $0x28] sm:$0xff]  ;;  %v13280_v21 = vld [vmem:[%s13213_s1 + $0x58] sm:$0xff]  ;;  %v1099_v2 = vmul.f32 %v13256_v17, %v13256_v17 }
  0x5e   : > { %v13272_v20 = vld [vmem:[%s13204_s28 + $0x30] sm:$0xff]  ;;  %v13286_v22 = vld [vmem:[%s13213_s1 + $0x60] sm:$0xff]  ;;  %v13292_v23 = vld [vmem:[%s13204_s28 + $0x38] sm:$0xff]  ;;  %v1100_v4 = vmul.f32 %v13262_v18, %v13262_v18  ;;  %v1101_v7 = vmul.f32 %v13280_v21, %v13280_v21 }
  0x5f   : > { %11939 = vmatpush3.bf16.msra.mxu0 %v13200_v8  ;;  %v13296_v24 = vld [vmem:[%s13204_s28 + $0x40] sm:$0xff]  ;;  %v13304_v25 = vld [vmem:[%s13213_s1 + $0x68] sm:$0xff]  ;;  %v13310_v26 = vld [vmem:[%s13213_s1 + $0x70] sm:$0xff] }
  0x60   : > { %11941 = vmatprep.subr.bf16.mxu0 %v13187_v3  ;;  %12658 = vmatpush3.bf16.msra.mxu1 %v13200_v8  ;;  %v13315_v27 = vld [vmem:[%s13204_s28 + $0x48] sm:$0xff]  ;;  %v13318_v28 = vld [vmem:[%s13204_s28 + $0x50] sm:$0xff]  ;;  %v13325_v29 = vld [vmem:[%s13213_s1 + $0x78] sm:$0xff] }
  0x61   : > { %11965 = vmatprep.subr.bf16.mxu1 %v13187_v3  ;;  %v13330_v30 = vld [vmem:[%s13213_s1 + $0x80] sm:$0xff]  ;;  %v13335_v31 = vld [vmem:[%s13204_s28 + $0x58] sm:$0xff]  ;;  %v13345_v33 = vld [vmem:[%s13213_s1 + $0x88] sm:$0xff] }
  0x62   : > { %10785 = vmatmul.mubr.msk.f32.vlgmr.msra.gmra.mrb[0].mxu0 %vm1138_vm0, %v13223_v11  ;;  %v13338_v32 = vld [vmem:[%s13204_s28 + $0x60] sm:$0xff]  ;;  %v13350_v34 = vld [vmem:[%s13213_s1 + $0x90] sm:$0xff]  ;;  %v13355_v35 = vld [vmem:[%s13204_s28 + $0x68] sm:$0xff] }
  0x63   : > { %10787 = vmatprep.mubr.msk.f32.mxu0 %vm1138_vm0, %v13228_v12  ;;  %11943 = vmatpush3.bf16.msra.mxu0 %v13187_v3  ;;  %v13358_v36 = vld [vmem:[%s13204_s28 + $0x70] sm:$0xff]  ;;  %v13365_v37 = vld [vmem:[%s13213_s1 + $0x98] sm:$0xff]  ;;  %v13370_v38 = vld [vmem:[%s13213_s1 + $0xa0] sm:$0xff] }
  0x64   : > { %10842 = vmatmul.mubr.msk.f32.vlgmr.msra.gmra.mrb[0].mxu1 %vm1138_vm0, %v13233_v13  ;;  %11945 = vmatprep.subr.bf16.mxu0 %v13190_v5  ;;  %v13375_v39 = vld [vmem:[%s13204_s28 + $0x78] sm:$0xff]  ;;  %v13378_v40 = vld [vmem:[%s13204_s28 + $0x80] sm:$0xff]  ;;  %v13385_v41 = vld [vmem:[%s13213_s1 + $0xa8] sm:$0xff] }
  0x65   : > { %10844 = vmatprep.mubr.msk.f32.mxu1 %vm1138_vm0, %v13239_v14  ;;  %11967 = vmatpush3.bf16.msra.mxu1 %v13187_v3  ;;  %v13390_v42 = vld [vmem:[%s13213_s1 + $0xb0] sm:$0xff]  ;;  %v13395_v43 = vld [vmem:[%s13204_s28 + $0x88] sm:$0xff]  ;;  %v13401_v45 = vld [vmem:[%s13213_s1] sm:$0xff] }
  0x66   : > { %10788 = vmatmul.mubr.msk.f32.gmra.mrb[2].mxu0 %vm1138_vm0, %v13244_v15  ;;  %11969 = vmatprep.subr.bf16.mxu1 %v13190_v5  ;;  %v13398_v44 = vld [vmem:[%s13204_s28 + $0x90] sm:$0xff]  ;;  %v13408_v46 = vld [vmem:[%s13213_s1 + $0xb8] sm:$0xff]  ;;  %v1090_v47 = vmul.f32 %v13401_v45, %v13401_v45  ;;  %v13415_v48 = vld [vmem:[%s13213_s1 + $0x8] sm:$0xff] }
  0x67   : > { %10790 = vmatprep.mubr.msk.f32.mxu0 %vm1138_vm0, %v13248_v16  ;;  %11947 = vmatpush3.bf16.msra.mxu0 %v13190_v5  ;;  %v13420_v49 = vld [vmem:[%s13204_s28 + $0x98] sm:$0xff]  ;;  %v1091_v50 = vmul.f32 %v13415_v48, %v13415_v48  ;;  %v13425_v51 = vld [vmem:[%s13204_s28 + $0xa0] sm:$0xff]  ;;  %v13428_v52 = vld [vmem:[%s13213_s1 + $0x10] sm:$0xff] }
  0x68   : > { %10845 = vmatmul.mubr.msk.f32.gmra.mrb[2].mxu1 %vm1138_vm0, %v13256_v17  ;;  %11949 = vmatprep.subr.bf16.mxu0 %v13200_v8  ;;  %v1092_v53 = vmul.f32 %v13428_v52, %v13428_v52  ;;  %v13440_v54 = vld [vmem:[%s13204_s28 + $0xa8] sm:$0xff]  ;;  %v13443_v55 = vld [vmem:[%s13213_s1 + $0x18] sm:$0xff]  ;;  %v13446_v56 = vld [vmem:[%s13204_s28 + $0xb0] sm:$0xff] }
  0x69   : > { %10847 = vmatprep.mubr.msk.f32.mxu1 %vm1138_vm0, %v13262_v18  ;;  %11971 = vmatpush3.bf16.msra.mxu1 %v13190_v5  ;;  %v13449_v57 = vld [vmem:[%s13213_s1 + $0x20] sm:$0xff]  ;;  %v1093_v58 = vmul.f32 %v13443_v55, %v13443_v55  ;;  %v13462_v60 = vld [vmem:[%s13204_s28 + $0xb8] sm:$0xff]  ;;  %v13465_v61 = vld [vmem:[%s13213_s1 + $0x28] sm:$0xff] }
  0x6a   : > { %10791 = vmatmul.mubr.msk.f32.gmra.mrb[4].mxu0 %vm1138_vm0, %v13268_v19  ;;  %11973 = vmatprep.subr.bf16.mxu1 %v13200_v8  ;;  %v1094_v59 = vmul.f32 %v13449_v57, %v13449_v57  ;;  %v1095_v62 = vmul.f32 %v13465_v61, %v13465_v61 }
  0x6b   : > { %10793 = vmatprep.mubr.msk.f32.mxu0 %vm1138_vm0, %v13272_v20  ;;  %11951 = vmatpush3.bf16.msra.mxu0 %v13200_v8 }
  0x6c   : > { %10848 = vmatmul.mubr.msk.f32.gmra.mrb[4].mxu1 %vm1138_vm0, %v13280_v21  ;;  %11953 = vmatprep.subr.bf16.mxu0 %v13187_v3 }
  0x6d   : > { %10850 = vmatprep.mubr.msk.f32.mxu1 %vm1138_vm0, %v13286_v22  ;;  %11975 = vmatpush3.bf16.msra.mxu1 %v13200_v8 }
  0x6e   : > { %10794 = vmatmul.mubr.msk.f32.gmra.mrb[6].mxu0 %vm1138_vm0, %v13292_v23 }
  0x6f   : > { %10796 = vmatprep.mubr.msk.f32.mxu0 %vm1138_vm0, %v13296_v24 }
  0x70   : > { %10851 = vmatmul.mubr.msk.f32.gmra.mrb[6].mxu1 %vm1138_vm0, %v13304_v25 }
  0x71   : > { %10853 = vmatprep.mubr.msk.f32.mxu1 %vm1138_vm0, %v13310_v26 }
  0x72   : > { %10797 = vmatmul.mubr.msk.f32.gmra.mrb[8].mxu0 %vm1138_vm0, %v13315_v27 }
  0x73   : > { %10799 = vmatprep.mubr.msk.f32.mxu0 %vm1138_vm0, %v13318_v28 }
  0x74   : > { %10854 = vmatmul.mubr.msk.f32.gmra.mrb[8].mxu1 %vm1138_vm0, %v13325_v29 }
  0x75   : > { %10856 = vmatprep.mubr.msk.f32.mxu1 %vm1138_vm0, %v13330_v30 }
  0x76   : > { %10800 = vmatmul.mubr.msk.f32.gmra.mrb[10].mxu0 %vm1138_vm0, %v13335_v31 }
  0x77   : > { %10802 = vmatprep.mubr.msk.f32.mxu0 %vm1138_vm0, %v13338_v32 }
  0x78   : > { %10857 = vmatmul.mubr.msk.f32.gmra.mrb[10].mxu1 %vm1138_vm0, %v13345_v33 }
  0x79   : > { %10859 = vmatprep.mubr.msk.f32.mxu1 %vm1138_vm0, %v13350_v34 }
  0x7a   : > { %10803 = vmatmul.mubr.msk.f32.gmra.mrb[12].mxu0 %vm1138_vm0, %v13355_v35 }
  0x7b   : > { %10805 = vmatprep.mubr.msk.f32.mxu0 %vm1138_vm0, %v13358_v36 }
  0x7c   : > { %10860 = vmatmul.mubr.msk.f32.gmra.mrb[12].mxu1 %vm1138_vm0, %v13365_v37 }
  0x7d   : > { %10862 = vmatprep.mubr.msk.f32.mxu1 %vm1138_vm0, %v13370_v38 }
  0x7e   : > { %10806 = vmatmul.mubr.msk.f32.gmra.mrb[14].mxu0 %vm1138_vm0, %v13375_v39 }
  0x7f   : > { %10808 = vmatprep.mubr.msk.f32.mxu0 %vm1138_vm0, %v13378_v40 }
  0x80   : > { %10863 = vmatmul.mubr.msk.f32.gmra.mrb[14].mxu1 %vm1138_vm0, %v13385_v41 }
  0x81   : > { %10865 = vmatprep.mubr.msk.f32.mxu1 %vm1138_vm0, %v13390_v42 }
  0x82   : > { %10809 = vmatmul.mubr.msk.f32.gmra.mrb[16].mxu0 %vm1138_vm0, %v13395_v43 }
  0x83   : > { %10811 = vmatprep.mubr.msk.f32.mxu0 %vm1138_vm0, %v13398_v44 }
  0x84   : > { %10866 = vmatmul.mubr.msk.f32.gmra.mrb[16].mxu1 %vm1138_vm0, %v13408_v46 }
  0x85   : > { %10928 = vmatprep.mubr.msk.f32.mxu1 %vm1138_vm0, %v1090_v47  ;;  %v1102_v47 = vmul.f32 %v13286_v22, %v13286_v22 }
  0x86   : > { %10812 = vmatmul.mubr.msk.f32.gmra.mrb[18].mxu0 %vm1138_vm0, %v13420_v49 }
  0x87   : > { %10814 = vmatprep.mubr.msk.f32.mxu0 %vm1138_vm0, %v13425_v51 }
  0x88   : > { %10929 = vmatmul.mubr.msk.f32.vlgmr.msra.gmra.mrb[18].mxu1 %vm1138_vm0, %v1091_v50  ;;  %v1067_v50 = vmul.f32 %v13223_v11, %v13223_v11 }
  0x89   : > { %10931 = vmatprep.mubr.msk.f32.mxu1 %vm1138_vm0, %v1092_v53  ;;  %v1068_v53 = vmul.f32 %v13228_v12, %v13228_v12 }
  0x8a   : > { %10815 = vmatmul.mubr.msk.f32.gmra.mrb[20].mxu0 %vm1138_vm0, %v13440_v54 }
  0x8b   : > { %10817 = vmatprep.mubr.msk.f32.mxu0 %vm1138_vm0, %v13446_v56 }
  0x8c   : > { %10932 = vmatmul.mubr.msk.f32.gmra.mrb[20].mxu1 %vm1138_vm0, %v1093_v58  ;;  %v1103_v58 = vmul.f32 %v13304_v25, %v13304_v25 }
  0x8d   : > { %10934 = vmatprep.mubr.msk.f32.mxu1 %vm1138_vm0, %v1094_v59  ;;  %v1104_v59 = vmul.f32 %v13310_v26, %v13310_v26 }
  0x8e   : > { %10818 = vmatmul.mubr.msk.f32.gmra.mrb[22].mxu0 %vm1138_vm0, %v13462_v60 }
  0x8f   : > { %10832 = vmatprep.mubr.msk.f32.mxu0 %vm1138_vm0, %v13401_v45 }
  0x90   : > { %10935 = vmatmul.mubr.msk.f32.gmra.mrb[22].mxu1 %vm1138_vm0, %v1095_v62  ;;  %v1069_v62 = vmul.f32 %v13244_v15, %v13244_v15 }
  0x91   : > { %10937 = vmatprep.mubr.msk.f32.mxu1 %vm1138_vm0, %v1096_v63  ;;  %v1070_v63 = vmul.f32 %v13248_v16, %v13248_v16 }
  0x92   : > { %10833 = vmatmul.mubr.msk.f32.vlgmr.msra.gmra.mrb[24].mxu0 %vm1138_vm0, %v13415_v48 }
  0x93   : > { %11955 = vmatpush3.bf16.msra.mxu0 %v13187_v3  ;;  %10835 = vmatprep.mubr.msk.f32.mxu0 %vm1138_vm0, %v13428_v52 }
  0x94   : > { %11957 = vmatprep.subr.bf16.mxu0 %v13190_v5  ;;  %10938 = vmatmul.mubr.msk.f32.gmra.mrb[24].mxu1 %vm1138_vm0, %v1097_v0  ;;  %v1105_v0 = vmul.f32 %v13325_v29, %v13325_v29 }
  0x95   : > { %10940 = vmatprep.mubr.msk.f32.mxu1 %vm1138_vm0, %v1098_v1  ;;  %v1106_v1 = vmul.f32 %v13330_v30, %v13330_v30 }
  0x96   : > { %10836 = vmatmul.mubr.msk.f32.gmra.mrb[26].mxu0 %vm1138_vm0, %v13443_v55 }
  0x97   : > { %11959 = vmatpush3.bf16.msra.mxu0 %v13190_v5  ;;  %10838 = vmatprep.mubr.msk.f32.mxu0 %vm1138_vm0, %v13449_v57 }
  0x98   : > { %11961 = vmatprep.subr.bf16.mxu0 %v13200_v8  ;;  %10941 = vmatmul.mubr.msk.f32.gmra.mrb[26].mxu1 %vm1138_vm0, %v1099_v2  ;;  %v1071_v2 = vmul.f32 %v13268_v19, %v13268_v19 }
  0x99   : > { %10943 = vmatprep.mubr.msk.f32.mxu1 %vm1138_vm0, %v1100_v4  ;;  %v1107_v4 = vmul.f32 %v13345_v33, %v13345_v33 }
  0x9a   : > { %10839 = vmatmul.mubr.msk.f32.gmra.mrb[28].mxu0 %vm1138_vm0, %v13465_v61 }
  0x9b   : > { %11963 = vmatpush3.bf16.msra.mxu0 %v13200_v8  ;;  %10880 = vmatprep.mubr.msk.f32.mxu0 %vm1138_vm0, %v1066_v6  ;;  %v1108_v6 = vmul.f32 %v13350_v34, %v13350_v34 }
  0x9c   : > { %10944 = vmatmul.mubr.msk.f32.gmra.mrb[28].mxu1 %vm1138_vm0, %v1101_v7  ;;  %11977 = vmatprep.subr.bf16.mxu0 %v13187_v3  ;;  %v1073_v7 = vmul.f32 %v13292_v23, %v13292_v23 }
  0x9d   : > { %10946 = vmatprep.mubr.msk.f32.mxu1 %vm1138_vm0, %v1102_v47  ;;  %v1109_v47 = vmul.f32 %v13365_v37, %v13365_v37 }
  0x9e   : > { %10881 = vmatmul.mubr.msk.f32.vlgmr.msra.gmra.mrb[30].mxu0 %vm1138_vm0, %v1067_v50  ;;  %v1110_v50 = vmul.f32 %v13370_v38, %v13370_v38 }
  0x9f   : > { %10883 = vmatprep.mubr.msk.f32.mxu0 %vm1138_vm0, %v1068_v53  ;;  %11979 = vmatpush3.bf16.msra.mxu0 %v13187_v3  ;;  %v1072_v3 = vmul.f32 %v13272_v20, %v13272_v20  ;;  %v1075_v53 = vmul.f32 %v13315_v27, %v13315_v27 }
  0xa0   : > { %10947 = vmatmul.mubr.msk.f32.gmra.mrb[30].mxu1 %vm1138_vm0, %v1103_v58  ;;  %11981 = vmatprep.subr.bf16.mxu0 %v13190_v5  ;;  %v1111_v58 = vmul.f32 %v13385_v41, %v13385_v41 }
  0xa1   : > { %10949 = vmatprep.mubr.msk.f32.mxu1 %vm1138_vm0, %v1104_v59  ;;  %v1112_v59 = vmul.f32 %v13390_v42, %v13390_v42 }
  0xa2   : > { %10884 = vmatmul.mubr.msk.f32.gmra.mrb[32].mxu0 %vm1138_vm0, %v1069_v62  ;;  %v1077_v62 = vmul.f32 %v13335_v31, %v13335_v31 }
  0xa3   : > { %10886 = vmatprep.mubr.msk.f32.mxu0 %vm1138_vm0, %v1070_v63  ;;  %11983 = vmatpush3.bf16.msra.mxu0 %v13190_v5  ;;  %v1074_v5 = vmul.f32 %v13296_v24, %v13296_v24  ;;  %v1078_v63 = vmul.f32 %v13338_v32, %v13338_v32 }
  0xa4   : > { %10950 = vmatmul.mubr.msk.f32.gmra.mrb[32].mxu1 %vm1138_vm0, %v1105_v0  ;;  %11985 = vmatprep.subr.bf16.mxu0 %v13200_v8  ;;  %v1113_v0 = vmul.f32 %v13408_v46, %v13408_v46 }
  0xa5   : > { %10952 = vmatprep.mubr.msk.f32.mxu1 %vm1138_vm0, %v1106_v1  ;;  %v1079_v1 = vmul.f32 %v13355_v35, %v13355_v35 }
  0xa6   : > { %10887 = vmatmul.mubr.msk.f32.gmra.mrb[34].mxu0 %vm1138_vm0, %v1071_v2  ;;  %v1080_v2 = vmul.f32 %v13358_v36, %v13358_v36 }
  0xa7   : > { %10889 = vmatprep.mubr.msk.f32.mxu0 %vm1138_vm0, %v1072_v3  ;;  %11987 = vmatpush3.bf16.msra.mxu0 %v13200_v8  ;;  %v1076_v8 = vmul.f32 %v13318_v28, %v13318_v28  ;;  %v1081_v3 = vmul.f32 %v13375_v39, %v13375_v39 }
  0xa8   : > { %10953 = vmatmul.mubr.msk.f32.gmra.mrb[34].mxu1 %vm1138_vm0, %v1107_v4  ;;  %v1082_v4 = vmul.f32 %v13378_v40, %v13378_v40 }
  0xa9   : > { %10955 = vmatprep.mubr.msk.f32.mxu1 %vm1138_vm0, %v1108_v6  ;;  %v1083_v6 = vmul.f32 %v13395_v43, %v13395_v43 }
  0xaa   : > { %10890 = vmatmul.mubr.msk.f32.gmra.mrb[36].mxu0 %vm1138_vm0, %v1073_v7  ;;  %v1084_v7 = vmul.f32 %v13398_v44, %v13398_v44 }
  0xab   : > { %10892 = vmatprep.mubr.msk.f32.mxu0 %vm1138_vm0, %v1074_v5  ;;  %v1085_v5 = vmul.f32 %v13420_v49, %v13420_v49 }
  0xac   : > { %10956 = vmatmul.mubr.msk.f32.gmra.mrb[36].mxu1 %vm1138_vm0, %v1109_v47  ;;  %v1086_v47 = vmul.f32 %v13425_v51, %v13425_v51 }
  0xad   : > { %10958 = vmatprep.mubr.msk.f32.mxu1 %vm1138_vm0, %v1110_v50  ;;  %v1087_v50 = vmul.f32 %v13440_v54, %v13440_v54 }
  0xae   : > { %10893 = vmatmul.mubr.msk.f32.gmra.mrb[38].mxu0 %vm1138_vm0, %v1075_v53  ;;  %v1088_v53 = vmul.f32 %v13446_v56, %v13446_v56 }
  0xaf   : > { %10895 = vmatprep.mubr.msk.f32.mxu0 %vm1138_vm0, %v1076_v8  ;;  %v1089_v8 = vmul.f32 %v13462_v60, %v13462_v60 }
  0xb0   : > { %10959 = vmatmul.mubr.msk.f32.gmra.mrb[38].mxu1 %vm1138_vm0, %v1111_v58  ;;  %v1114_v58 = vmul.f32 %v13401_v45, %v13207_v9  ;;  %v1118_v9 = vmul.f32 %v13449_v57, %v13248_v16  ;;  %v1122_v16 = vmul.f32 %v13239_v14, %v13296_v24  ;;  %v1126_v14 = vmul.f32 %v13286_v22, %v13338_v32 }
  0xb1   : > { %10961 = vmatprep.mubr.msk.f32.mxu1 %vm1138_vm0, %v1112_v59  ;;  %v1115_v59 = vmul.f32 %v13415_v48, %v13223_v11  ;;  %v1119_v11 = vmul.f32 %v13465_v61, %v13268_v19  ;;  %v1123_v19 = vmul.f32 %v13256_v17, %v13315_v27  ;;  %v1127_v17 = vmul.f32 %v13304_v25, %v13355_v35 }
  0xb2   : > { %10896 = vmatmul.mubr.msk.f32.gmra.mrb[40].mxu0 %vm1138_vm0, %v1077_v62  ;;  %v1116_v62 = vmul.f32 %v13428_v52, %v13228_v12  ;;  %v1120_v12 = vmul.f32 %v13219_v10, %v13272_v20  ;;  %v1124_v10 = vmul.f32 %v13262_v18, %v13318_v28  ;;  %v1128_v18 = vmul.f32 %v13310_v26, %v13358_v36 }
  0xb3   : > { %10898 = vmatprep.mubr.msk.f32.mxu0 %vm1138_vm0, %v1078_v63  ;;  %v1117_v63 = vmul.f32 %v13443_v55, %v13244_v15  ;;  %v1121_v15 = vmul.f32 %v13233_v13, %v13292_v23  ;;  %v1125_v13 = vmul.f32 %v13280_v21, %v13335_v31  ;;  %v1129_v20 = vmul.f32 %v13325_v29, %v13375_v39  ;;  %v13696_v29 = vld [vmem:[%s12998_s17 + $0x8] sm:$0xff] }
  0xb4   : > { %10962 = vmatmul.mubr.msk.f32.gmra.mrb[40].mxu1 %vm1138_vm0, %v1113_v0  ;;  %v1130_v21 = vmul.f32 %v13330_v30, %v13378_v40  ;;  %v1131_v22 = vmul.f32 %v13345_v33, %v13395_v43  ;;  %v1132_v23 = vmul.f32 %v13350_v34, %v13398_v44  ;;  %v1133_v24 = vmul.f32 %v13365_v37, %v13420_v49 }
  0xb5   : > { %v1134_v25 = vmul.f32 %v13370_v38, %v13425_v51  ;;  %v1135_v26 = vmul.f32 %v13385_v41, %v13440_v54  ;;  %v1136_v27 = vmul.f32 %v13390_v42, %v13446_v56  ;;  %v1137_v28 = vmul.f32 %v13408_v46, %v13462_v60  ;;  %9822 = vmatprep.mubr.msk.f32.mxu1 %vm2424_vm1, %v13696_v29 }
  0xb6   : > { %10899 = vmatmul.mubr.msk.f32.gmra.mrb[42].mxu0 %vm1138_vm0, %v1079_v1 }
  0xb7   : > { %10901 = vmatprep.mubr.msk.f32.mxu0 %vm1138_vm0, %v1080_v2 }
  0xba   : > { %10902 = vmatmul.mubr.msk.f32.gmra.mrb[44].mxu0 %vm1138_vm0, %v1081_v3 }
  0xbb   : > { %10904 = vmatprep.mubr.msk.f32.mxu0 %vm1138_vm0, %v1082_v4 }
  0xbe   : > { %10905 = vmatmul.mubr.msk.f32.gmra.mrb[46].mxu0 %vm1138_vm0, %v1083_v6 }
  0xbf   : > { %10907 = vmatprep.mubr.msk.f32.mxu0 %vm1138_vm0, %v1084_v7 }
  0xc2   : > { %10908 = vmatmul.mubr.msk.f32.gmra.mrb[48].mxu0 %vm1138_vm0, %v1085_v5 }
  0xc3   : > { %10910 = vmatprep.mubr.msk.f32.mxu0 %vm1138_vm0, %v1086_v47 }
  0xc6   : > { %10911 = vmatmul.mubr.msk.f32.gmra.mrb[50].mxu0 %vm1138_vm0, %v1087_v50 }
  0xc7   : > { %10913 = vmatprep.mubr.msk.f32.mxu0 %vm1138_vm0, %v1088_v53 }
  0xca   : > { %10914 = vmatmul.mubr.msk.f32.gmra.mrb[52].mxu0 %vm1138_vm0, %v1089_v8 }
  0xcb   : > { %10976 = vmatprep.mubr.msk.f32.mxu0 %vm1138_vm0, %v1114_v58 }
  0xce   : > { %10977 = vmatmul.mubr.msk.f32.vlgmr.msra.gmra.mrb[54].mxu0 %vm1138_vm0, %v1115_v59 }
  0xcf   : > { %10979 = vmatprep.mubr.msk.f32.mxu0 %vm1138_vm0, %v1116_v62 }
  0xd2   : > { %10980 = vmatmul.mubr.msk.f32.gmra.mrb[56].mxu0 %vm1138_vm0, %v1117_v63 }
  0xd3   : > { %10982 = vmatprep.mubr.msk.f32.mxu0 %vm1138_vm0, %v1118_v9 }
  0xd6   : > { %10983 = vmatmul.mubr.msk.f32.gmra.mrb[58].mxu0 %vm1138_vm0, %v1119_v11 }
  0xd7   : > { %10985 = vmatprep.mubr.msk.f32.mxu0 %vm1138_vm0, %v1120_v12 }
  0xda   : > { %10986 = vmatmul.mubr.msk.f32.gmra.mrb[60].mxu0 %vm1138_vm0, %v1121_v15 }
  0xdb   : > { %10988 = vmatprep.mubr.msk.f32.mxu0 %vm1138_vm0, %v1122_v16 }
  0xde   : > { %10989 = vmatmul.mubr.msk.f32.gmra.mrb[62].mxu0 %vm1138_vm0, %v1123_v19 }
  0xdf   : > { %10991 = vmatprep.mubr.msk.f32.mxu0 %vm1138_vm0, %v1124_v10 }
  0xe2   : > { %10992 = vmatmul.mubr.msk.f32.gmra.mrb[64].mxu0 %vm1138_vm0, %v1125_v13 }
  0xe3   : > { %10994 = vmatprep.mubr.msk.f32.mxu0 %vm1138_vm0, %v1126_v14 }
  0xe6   : > { %10995 = vmatmul.mubr.msk.f32.gmra.mrb[66].mxu0 %vm1138_vm0, %v1127_v17 }
  0xe7   : > { %10997 = vmatprep.mubr.msk.f32.mxu0 %vm1138_vm0, %v1128_v18 }
  0xea   : > { %10998 = vmatmul.mubr.msk.f32.gmra.mrb[68].mxu0 %vm1138_vm0, %v1129_v20 }
  0xeb   : > { %11000 = vmatprep.mubr.msk.f32.mxu0 %vm1138_vm0, %v1130_v21 }
  0xee   : > { %11001 = vmatmul.mubr.msk.f32.gmra.mrb[70].mxu0 %vm1138_vm0, %v1131_v22 }
  0xef   : > { %11003 = vmatprep.mubr.msk.f32.mxu0 %vm1138_vm0, %v1132_v23 }
  0xf2   : > { %11004 = vmatmul.mubr.msk.f32.gmra.mrb[72].mxu0 %vm1138_vm0, %v1133_v24 }
  0xf3   : > { %11006 = vmatprep.mubr.msk.f32.mxu0 %vm1138_vm0, %v1134_v25 }
  0xf6   : > { %11007 = vmatmul.mubr.msk.f32.gmra.mrb[74].mxu0 %vm1138_vm0, %v1135_v26 }
  0xf7   : > { %11009 = vmatprep.mubr.msk.f32.mxu0 %vm1138_vm0, %v1136_v27 }
  0xfa   : > { %11010 = vmatmul.mubr.msk.f32.gmra.mrb[76].mxu0 %vm1138_vm0, %v1137_v28 }
  0xfb   : > { %9845 = vmatprep.mubr.msk.f32.mxu0 %vm2424_vm1, %v13696_v29 }
 0x135   : > { %v13702_v30 = vpop.f32.mrb[0].mxu0 }
 0x136   : > { %v13704_v31 = vpop.f32.mrb[1].mxu0 }
 0x137   : > { %v11990_v32 = vpack.c.bf16 %v13702_v30, %v13704_v31  ;;  %v13708_v33 = vpop.f32.mrb[0].mxu1 }
 0x138   : > { %v13710_v34 = vpop.f32.mrb[1].mxu1 }
 0x139   : > { %v13712_v35 = vpop.f32.mrb[2].mxu0  ;;  %v15930_v31 = vpack.c.bf16 %v13708_v33, %v13710_v34 }
 0x13a   : > { %v13716_v37 = vpop.f32.mrb[3].mxu0 }
 0x13b   : > { %v11994_v38 = vpack.c.bf16 %v13712_v35, %v13716_v37  ;;  %v13720_v39 = vpop.f32.mrb[2].mxu1 }
 0x13c   : > { %v13722_v40 = vpop.f32.mrb[3].mxu1 }
 0x13d   : > { %v13724_v41 = vpop.f32.mrb[4].mxu0 }
 0x13e   : > { %v13728_v43 = vpop.f32.mrb[5].mxu0 }
 0x13f   : > { %v11998_v44 = vpack.c.bf16 %v13724_v41, %v13728_v43  ;;  %v13732_v45 = vpop.f32.mrb[4].mxu1  ;;  %v15932_v41 = vpack.c.bf16 %v13720_v39, %v13722_v40 }
 0x140   : > { %v13734_v46 = vpop.f32.mrb[5].mxu1 }
 0x141   : > { %v13736_v48 = vpop.f32.mrb[6].mxu0 }
 0x142   : > { %v13740_v51 = vpop.f32.mrb[7].mxu0 }
 0x143   : > { %v13744_v54 = vpop.f32.mrb[6].mxu1 }
 0x144   : > { %v13746_v55 = vpop.f32.mrb[7].mxu1 }
 0x145   : > { %v13748_v56 = vpop.f32.mrb[8].mxu0 }
 0x146   : > { %v13752_v60 = vpop.f32.mrb[9].mxu0 }
 0x147   : > { %v13756_v0 = vpop.f32.mrb[8].mxu1 }
 0x148   : > { %v13758_v1 = vpop.f32.mrb[9].mxu1 }
 0x149   : > { %v13760_v2 = vpop.f32.mrb[10].mxu0 }
 0x14a   : > { %v13764_v4 = vpop.f32.mrb[11].mxu0 }
 0x14b   : > { %v13768_v7 = vpop.f32.mrb[10].mxu1 }
 0x14c   : > { %v13770_v5 = vpop.f32.mrb[11].mxu1 }
 0x14d   : > { %v13772_v47 = vpop.f32.mrb[12].mxu0 }
 0x14e   : > { %v13776_v53 = vpop.f32.mrb[13].mxu0 }
 0x14f   : > { %v13780_v58 = vpop.f32.mrb[12].mxu1 }
 0x150   : > { %v13782_v59 = vpop.f32.mrb[13].mxu1 }
 0x151   : > { %v13784_v62 = vpop.f32.mrb[14].mxu0 }
 0x152   : > { %v13788_v9 = vpop.f32.mrb[15].mxu0 }
 0x153   : > { %v13792_v12 = vpop.f32.mrb[14].mxu1 }
 0x154   : > { %v13794_v15 = vpop.f32.mrb[15].mxu1 }
 0x155   : > { %v13796_v16 = vpop.f32.mrb[16].mxu0 }
 0x156   : > { %v13800_v10 = vpop.f32.mrb[17].mxu0 }
 0x157   : > { %v13804_v14 = vpop.f32.mrb[16].mxu1 }
 0x158   : > { %v13806_v17 = vpop.f32.mrb[17].mxu1 }
 0x159   : > { %v13808_v18 = vpop.f32.mrb[18].mxu0 }
 0x15a   : > { %v13812_v21 = vpop.f32.mrb[19].mxu0 }
 0x15b   : > { %v10930_v23 = vpop.f32.mrb[18].mxu1 }
 0x15c   : > { %v2048_v24 = vpop.f32.mrb[19].mxu1 }
 0x15d   : > { %v13816_v25 = vpop.f32.mrb[20].mxu0  ;;  %v12036_v26 = vpack.c.bf16 %v10930_v23, %v2048_v24 }
 0x15e   : > { %v13818_v27 = vpop.f32.mrb[21].mxu0 }
 0x15f   : > { %v10933_v19 = vpop.f32.mrb[20].mxu1  ;;  %12037 = vmatprep.subr.bf16.mxu0 %v12036_v26 }
 0x160   : > { %v2058_v63 = vpop.f32.mrb[21].mxu1 }
 0x161   : > { %v13822_v13 = vpop.f32.mrb[22].mxu0  ;;  %v12040_v20 = vpack.c.bf16 %v10933_v19, %v2058_v63 }
 0x162   : > { %v13824_v50 = vpop.f32.mrb[23].mxu0 }
 0x163   : > { %v10936_v11 = vpop.f32.mrb[22].mxu1 }
 0x164   : > { %v2068_v3 = vpop.f32.mrb[23].mxu1 }
 0x165   : > { %v10834_v8 = vpop.f32.mrb[24].mxu0  ;;  %v12044_v23 = vpack.c.bf16 %v10936_v11, %v2068_v3 }
 0x166   : > { %v1534_v24 = vpop.f32.mrb[25].mxu0 }
 0x167   : > { %v11988_v57 = vpack.c.bf16 %v10834_v8, %v1534_v24  ;;  %v10939_v6 = vpop.f32.mrb[24].mxu1 }
 0x168   : > { %v2078_v49 = vpop.f32.mrb[25].mxu1 }
 0x169   : > { %v10837_v28 = vpop.f32.mrb[26].mxu0  ;;  %11989 = vmatprep.subr.bf16.mxu1 %v11988_v57  ;;  %v12048_v26 = vpack.c.bf16 %v10939_v6, %v2078_v49 }
 0x16a   : > { %v1544_v61 = vpop.f32.mrb[27].mxu0  ;;  %11991 = vmatpush1.bf16.msra.mxu1 %v11990_v32 }
 0x16b   : > { %v11992_v63 = vpack.c.bf16 %v10837_v28, %v1544_v61  ;;  %v10942_v19 = vpop.f32.mrb[26].mxu1  ;;  %v15933_v28 = vpack.c.bf16 %v13748_v56, %v13752_v60  ;;  %v15936_v56 = vpack.c.bf16 %v13744_v54, %v13746_v55 }
 0x16c   : > { %v2088_v42 = vpop.f32.mrb[27].mxu1 }
 0x16d   : > { %v10840_v22 = vpop.f32.mrb[28].mxu0  ;;  %11993 = vmatprep.subr.bf16.mxu1 %v11992_v63  ;;  %v12052_v52 = vpack.c.bf16 %v10942_v19, %v2088_v42  ;;  %v15935_v19 = vpack.c.bf16 %v13760_v2, %v13764_v4  ;;  %v15938_v2 = vpack.c.bf16 %v13756_v0, %v13758_v1 }
 0x16e   : > { %v1554_v36 = vpop.f32.mrb[29].mxu0  ;;  %11995 = vmatpush1.bf16.msra.mxu1 %v11994_v38  ;;  %v15931_v38 = vpack.c.bf16 %v13736_v48, %v13740_v51  ;;  %v15934_v48 = vpack.c.bf16 %v13732_v45, %v13734_v46 }
 0x16f   : > { %v11996_v3 = vpack.c.bf16 %v10840_v22, %v1554_v36  ;;  %v10945_v8 = vpop.f32.mrb[28].mxu1 }
 0x170   : > { %v2098_v57 = vpop.f32.mrb[29].mxu1 }
 0x171   : > { %v10882_v49 = vpop.f32.mrb[30].mxu0  ;;  %11997 = vmatprep.subr.bf16.mxu1 %v11996_v3  ;;  %v12056_v6 = vpack.c.bf16 %v10945_v8, %v2098_v57  ;;  %v15937_v57 = vpack.c.bf16 %v13772_v47, %v13776_v53 }
 0x172   : > { %v1791_v11 = vpop.f32.mrb[31].mxu0  ;;  %11999 = vmatpush1.bf16.msra.mxu1 %v11998_v44 }
 0x173   : > { %v12038_v30 = vpack.c.bf16 %v10882_v49, %v1791_v11  ;;  %12001 = vmatprep.subr.bf16.mxu1 %v15930_v31  ;;  %v10948_v32 = vpop.f32.mrb[30].mxu1 }
 0x174   : > { %v2108_v42 = vpop.f32.mrb[31].mxu1 }
 0x175   : > { %v10885_v35 = vpop.f32.mrb[32].mxu0  ;;  %12039 = vmatpush1.bf16.msra.mxu0 %v12038_v30  ;;  %v12060_v36 = vpack.c.bf16 %v10948_v32, %v2108_v42  ;;  %v15939_v30 = vpack.c.bf16 %v13784_v62, %v13788_v9  ;;  %v15941_v42 = vpack.c.bf16 %v13796_v16, %v13800_v10  ;;  %v15942_v62 = vpack.c.bf16 %v13780_v58, %v13782_v59 }
 0x176   : > { %v1801_v37 = vpop.f32.mrb[33].mxu0  ;;  %12003 = vmatpush1.bf16.msra.mxu1 %v15931_v38  ;;  %12041 = vmatprep.subr.bf16.mxu0 %v12040_v20  ;;  %v15944_v16 = vpack.c.bf16 %v13792_v12, %v13794_v15  ;;  %v15945_v58 = vpack.c.bf16 %v13816_v25, %v13818_v27  ;;  %v15947_v12 = vpack.c.bf16 %v13822_v13, %v13824_v50  ;;  %v13892_v15 = vld [vmem:[%s12998_s17] sm:$0xff]  ;;  %v13895_v27 = vld [vmem:[%s12998_s17 + $0x18] sm:$0xff]  ;;  %v15881_v38 = vmov 0.0|0.0   ;;  %v13902_v50 = vld [vmem:[%s12998_s17 + $0x10] sm:$0xff] }
 0x177   : > { %v12042_v61 = vpack.c.bf16 %v10885_v35, %v1801_v37  ;;  %12005 = vmatprep.subr.bf16.mxu1 %v15932_v41  ;;  %v10951_v43 = vpop.f32.mrb[32].mxu1 }
 0x178   : > { %v2118_v44 = vpop.f32.mrb[33].mxu1 }
 0x179   : > { %v10888_v33 = vpop.f32.mrb[34].mxu0  ;;  %12043 = vmatpush1.bf16.msra.mxu0 %v12042_v61  ;;  %v12064_v34 = vpack.c.bf16 %v10951_v43, %v2118_v44  ;;  %v13905_v61 = vld [vmem:[%s12998_s17 + $0x28] sm:$0xff]  ;;  %v13911_v44 = vld [vmem:[%s12998_s17 + $0x20] sm:$0xff] }
 0x17a   : > { %v1811_v22 = vpop.f32.mrb[35].mxu0  ;;  %12007 = vmatpush1.bf16.msra.mxu1 %v15933_v28  ;;  %12045 = vmatprep.subr.bf16.mxu0 %v12044_v23 }
 0x17b   : > { %v12046_v24 = vpack.c.bf16 %v10888_v33, %v1811_v22  ;;  %12009 = vmatprep.subr.bf16.mxu1 %v15934_v48  ;;  %v10954_v51 = vpop.f32.mrb[34].mxu1 }
 0x17c   : > { %v2128_v20 = vpop.f32.mrb[35].mxu1 }
 0x17d   : > { %v10891_v39 = vpop.f32.mrb[36].mxu0  ;;  %12047 = vmatpush1.bf16.msra.mxu0 %v12046_v24  ;;  %v12068_v40 = vpack.c.bf16 %v10954_v51, %v2128_v20  ;;  %v13920_v24 = vld [vmem:[%s12998_s17 + $0x30] sm:$0xff]  ;;  %v13924_v51 = vld [vmem:[%s12998_s17 + $0x48] sm:$0xff] }
 0x17e   : > { %v1821_v63 = vpop.f32.mrb[37].mxu0  ;;  %12011 = vmatpush1.bf16.msra.mxu1 %v15935_v19  ;;  %12049 = vmatprep.subr.bf16.mxu0 %v12048_v26  ;;  %v13937_v19 = vld [vmem:[%s12998_s17 + $0x58] sm:$0xff] }
 0x17f   : > { %v12050_v3 = vpack.c.bf16 %v10891_v39, %v1821_v63  ;;  %12013 = vmatprep.subr.bf16.mxu1 %v15936_v56  ;;  %v10957_v60 = vpop.f32.mrb[36].mxu1  ;;  %v13946_v56 = vld [vmem:[%s12998_s17 + $0x50] sm:$0xff] }
 0x180   : > { %v2138_v23 = vpop.f32.mrb[37].mxu1 }
 0x181   : > { %v10894_v45 = vpop.f32.mrb[38].mxu0  ;;  %12051 = vmatpush1.bf16.msra.mxu0 %v12050_v3  ;;  %v12072_v46 = vpack.c.bf16 %v10957_v60, %v2138_v23  ;;  %v13949_v23 = vld [vmem:[%s12998_s17 + $0x68] sm:$0xff] }
 0x182   : > { %v1831_v8 = vpop.f32.mrb[39].mxu0  ;;  %12015 = vmatpush1.bf16.msra.mxu1 %v15937_v57  ;;  %12053 = vmatprep.subr.bf16.mxu0 %v12052_v52  ;;  %v15940_v52 = vpack.c.bf16 %v13768_v7, %v13770_v5  ;;  %v15943_v5 = vpack.c.bf16 %v13808_v18, %v13812_v21  ;;  %v15946_v18 = vpack.c.bf16 %v13804_v14, %v13806_v17 }
 0x183   : > { %v12054_v49 = vpack.c.bf16 %v10894_v45, %v1831_v8  ;;  %12017 = vmatprep.subr.bf16.mxu1 %v15938_v2  ;;  %v10960_v4 = vpop.f32.mrb[38].mxu1  ;;  %v13959_v8 = vld [vmem:[%s12998_s17 + $0x60] sm:$0xff] }
 0x184   : > { %v2148_v26 = vpop.f32.mrb[39].mxu1 }
 0x185   : > { %v10897_v54 = vpop.f32.mrb[40].mxu0  ;;  %12055 = vmatpush1.bf16.msra.mxu0 %v12054_v49  ;;  %v12076_v55 = vpack.c.bf16 %v10960_v4, %v2148_v26  ;;  %v13962_v49 = vld [vmem:[%s12998_s17 + $0x78] sm:$0xff]  ;;  %v13972_v26 = vld [vmem:[%s12998_s17 + $0x70] sm:$0xff] }
 0x186   : > { %v1841_v11 = vpop.f32.mrb[41].mxu0  ;;  %12019 = vmatpush1.bf16.msra.mxu1 %v15939_v30  ;;  %12057 = vmatprep.subr.bf16.mxu0 %v12056_v6 }
 0x187   : > { %v12058_v31 = vpack.c.bf16 %v10897_v54, %v1841_v11  ;;  %12021 = vmatprep.subr.bf16.mxu1 %v15940_v52  ;;  %v10963_v47 = vpop.f32.mrb[40].mxu1 }
 0x188   : > { %v2158_v53 = vpop.f32.mrb[41].mxu1 }
 0x189   : > { %v10900_v0 = vpop.f32.mrb[42].mxu0  ;;  %12059 = vmatpush1.bf16.msra.mxu0 %v12058_v31  ;;  %v12080_v1 = vpack.c.bf16 %v10963_v47, %v2158_v53  ;;  %v13985_v31 = vld [vmem:[%s12998_s17 + $0x80] sm:$0xff]  ;;  %v13988_v47 = vld [vmem:[%s12998_s17 + $0x98] sm:$0xff] }
 0x18a   : > { %v1851_v32 = vpop.f32.mrb[43].mxu0  ;;  %12023 = vmatpush1.bf16.msra.mxu1 %v15941_v42  ;;  %12061 = vmatprep.subr.bf16.mxu0 %v12060_v36  ;;  %v14001_v42 = vld [vmem:[%s12998_s17 + $0xa8] sm:$0xff] }
 0x18b   : > { %v12062_v35 = vpack.c.bf16 %v10900_v0, %v1851_v32  ;;  %12025 = vmatprep.subr.bf16.mxu1 %v15942_v62 }
 0x18d   : > { %v10903_v9 = vpop.f32.mrb[44].mxu0  ;;  %12063 = vmatpush1.bf16.msra.mxu0 %v12062_v35 }
 0x18e   : > { %v1861_v7 = vpop.f32.mrb[45].mxu0  ;;  %12027 = vmatpush1.bf16.msra.mxu1 %v15943_v5  ;;  %12065 = vmatprep.subr.bf16.mxu0 %v12064_v34  ;;  %v13914_v34 = vld [vmem:[%s12998_s17 + $0x38] sm:$0xff] }
 0x18f   : > { %v12066_v6 = vpack.c.bf16 %v10903_v9, %v1861_v7  ;;  %12029 = vmatprep.subr.bf16.mxu1 %v15944_v16  ;;  %v14011_v9 = vld [vmem:[%s12998_s17 + $0xa0] sm:$0xff]  ;;  %v14014_v5 = vld [vmem:[%s12998_s17 + $0xb8] sm:$0xff] }
 0x191   : > { %v10906_v10 = vpop.f32.mrb[46].mxu0  ;;  %12067 = vmatpush1.bf16.msra.mxu0 %v12066_v6 }
 0x192   : > { %v1871_v36 = vpop.f32.mrb[47].mxu0  ;;  %12031 = vmatpush1.bf16.msra.mxu1 %v15945_v58  ;;  %12069 = vmatprep.subr.bf16.mxu0 %v12068_v40  ;;  %v13933_v40 = vld [vmem:[%s12998_s17 + $0x40] sm:$0xff]  ;;  %v14027_v58 = vld [vmem:[%s12998_s17 + $0xc8] sm:$0xff] }
 0x193   : > { %v12070_v59 = vpack.c.bf16 %v10906_v10, %v1871_v36  ;;  %12033 = vmatprep.subr.bf16.mxu1 %v15946_v18  ;;  %v14024_v10 = vld [vmem:[%s12998_s17 + $0xb0] sm:$0xff] }
 0x195   : > { %v10909_v21 = vpop.f32.mrb[48].mxu0  ;;  %12071 = vmatpush1.bf16.msra.mxu0 %v12070_v59 }
 0x196   : > { %v1881_v37 = vpop.f32.mrb[49].mxu0  ;;  %12035 = vmatpush1.bf16.msra.mxu1 %v15947_v12  ;;  %12073 = vmatprep.subr.bf16.mxu0 %v12072_v46  ;;  %v14040_v12 = vld [vmem:[%s12998_s17 + $0xd8] sm:$0xff] }
 0x197   : > { %v12074_v25 = vpack.c.bf16 %v10909_v21, %v1881_v37  ;;  %12084 = vmatprep.subr.bf16.mxu1 %v15881_v38  ;;  %v14037_v21 = vld [vmem:[%s12998_s17 + $0xc0] sm:$0xff] }
 0x199   : > { %v10912_v14 = vpop.f32.mrb[50].mxu0  ;;  %2559 = vmatmul.mubr.f32.vlgmr.msra.gmra.mrb[42].mxu1 %v13892_v15  ;;  %12075 = vmatpush1.bf16.msra.mxu0 %v12074_v25 }
 0x19a   : > { %v1891_v17 = vpop.f32.mrb[51].mxu0  ;;  %9823 = vmatprep.mubr.msk.f32.mxu1 %vm2424_vm1, %v13895_v27  ;;  %12077 = vmatprep.subr.bf16.mxu0 %v12076_v55  ;;  %v13975_v55 = vld [vmem:[%s12998_s17 + $0x88] sm:$0xff] }
 0x19b   : > { %v12078_v13 = vpack.c.bf16 %v10912_v14, %v1891_v17  ;;  %v14050_v17 = vld [vmem:[%s12998_s17 + $0xd0] sm:$0xff] }
 0x19d   : > { %v10915_v41 = vpop.f32.mrb[52].mxu0  ;;  %2565 = vmatmul.mubr.f32.gmra.mrb[44].mxu1 %v13902_v50  ;;  %12079 = vmatpush1.bf16.msra.mxu0 %v12078_v13 }
 0x19e   : > { %v1901_v43 = vpop.f32.mrb[53].mxu0  ;;  %9824 = vmatprep.mubr.msk.f32.mxu1 %vm2424_vm1, %v13905_v61  ;;  %12081 = vmatprep.subr.bf16.mxu0 %v12080_v1  ;;  %v13998_v1 = vld [vmem:[%s12998_s17 + $0x90] sm:$0xff] }
 0x19f   : > { %v12082_v33 = vpack.c.bf16 %v10915_v41, %v1901_v43  ;;  %v14053_v41 = vld [vmem:[%s12998_s17 + $0xe8] sm:$0xff] }
 0x1a1   : > { %v10978_v22 = vpop.f32.mrb[54].mxu0  ;;  %2571 = vmatmul.mubr.f32.gmra.mrb[46].mxu1 %v13911_v44  ;;  %12083 = vmatpush1.bf16.msra.mxu0 %v12082_v33 }
 0x1a2   : > { %v2305_v28 = vpop.f32.mrb[55].mxu0  ;;  %9825 = vmatprep.mubr.msk.f32.mxu1 %vm2424_vm1, %v13914_v34  ;;  %12120 = vmatprep.subr.bf16.mxu0 %v15881_v38 }
 0x1a3   : > { %v12085_v48 = vpack.c.bf16 %v10978_v22, %v2305_v28  ;;  %v14063_v22 = vld [vmem:[%s12998_s17 + $0xe0] sm:$0xff] }
 0x1a4   : > { %2762 = vmatmul.mubr.f32.vlgmr.msra.gmra.mrb[78].mxu0 %v13892_v15 }
 0x1a5   : > { %2577 = vmatmul.mubr.f32.gmra.mrb[48].mxu1 %v13920_v24  ;;  %9846 = vmatprep.mubr.msk.f32.mxu0 %vm2424_vm1, %v13895_v27  ;;  %v10981_v20 = vpop.f32.mrb[56].mxu0 }
 0x1a6   : > { %12086 = vmatpush1.bf16.msra.mxu1 %v12085_v48  ;;  %9826 = vmatprep.mubr.msk.f32.mxu1 %vm2424_vm1, %v13924_v51  ;;  %v2315_v39 = vpop.f32.mrb[57].mxu0  ;;  %v14066_v48 = vld [vmem:[%s12998_s17 + $0xf8] sm:$0xff] }
 0x1a7   : > { %v12088_v63 = vpack.c.bf16 %v10981_v20, %v2315_v39  ;;  %12087 = vmatprep.subr.bf16.mxu1 %v15881_v38  ;;  %v14076_v39 = vld [vmem:[%s12998_s17 + $0xf0] sm:$0xff] }
 0x1a8   : > { %2768 = vmatmul.mubr.f32.gmra.mrb[80].mxu0 %v13902_v50 }
 0x1a9   : > { %2583 = vmatmul.mubr.f32.gmra.mrb[50].mxu1 %v13933_v40  ;;  %9847 = vmatprep.mubr.msk.f32.mxu0 %vm2424_vm1, %v13905_v61  ;;  %v10984_v3 = vpop.f32.mrb[58].mxu0 }
 0x1aa   : > { %9827 = vmatprep.mubr.msk.f32.mxu1 %vm2424_vm1, %v13937_v19  ;;  %12089 = vmatpush1.bf16.msra.mxu1 %v12088_v63  ;;  %v2325_v60 = vpop.f32.mrb[59].mxu0  ;;  %v14079_v63 = vld [vmem:[%s12998_s17 + $0x108] sm:$0xff] }
 0x1ab   : > { %v12091_v45 = vpack.c.bf16 %v10984_v3, %v2325_v60  ;;  %12090 = vmatprep.subr.bf16.mxu1 %v15881_v38  ;;  %v14089_v3 = vld [vmem:[%s12998_s17 + $0x100] sm:$0xff]  ;;  %v14092_v60 = vld [vmem:[%s12998_s17 + $0x118] sm:$0xff] }
 0x1ac   : > { %2774 = vmatmul.mubr.f32.gmra.mrb[82].mxu0 %v13911_v44 }
 0x1ad   : > { %2589 = vmatmul.mubr.f32.gmra.mrb[52].mxu1 %v13946_v56  ;;  %9848 = vmatprep.mubr.msk.f32.mxu0 %vm2424_vm1, %v13914_v34  ;;  %v10987_v46 = vpop.f32.mrb[60].mxu0 }
 0x1ae   : > { %9828 = vmatprep.mubr.msk.f32.mxu1 %vm2424_vm1, %v13949_v23  ;;  %12092 = vmatpush1.bf16.msra.mxu1 %v12091_v45  ;;  %v2335_v57 = vpop.f32.mrb[61].mxu0  ;;  %v14101_v45 = vld [vmem:[%s12998_s17 + $0x110] sm:$0xff] }
 0x1af   : > { %v12094_v2 = vpack.c.bf16 %v10987_v46, %v2335_v57  ;;  %12093 = vmatprep.subr.bf16.mxu1 %v15881_v38  ;;  %v14104_v46 = vld [vmem:[%s12998_s17 + $0x128] sm:$0xff]  ;;  %v14113_v57 = vld [vmem:[%s12998_s17 + $0x120] sm:$0xff] }
 0x1b0   : > { %2780 = vmatmul.mubr.f32.gmra.mrb[84].mxu0 %v13920_v24 }
 0x1b1   : > { %2595 = vmatmul.mubr.f32.gmra.mrb[54].mxu1 %v13959_v8  ;;  %9849 = vmatprep.mubr.msk.f32.mxu0 %vm2424_vm1, %v13924_v51  ;;  %v10990_v4 = vpop.f32.mrb[62].mxu0 }
 0x1b2   : > { %9829 = vmatprep.mubr.msk.f32.mxu1 %vm2424_vm1, %v13962_v49  ;;  %12095 = vmatpush1.bf16.msra.mxu1 %v12094_v2  ;;  %v2345_v54 = vpop.f32.mrb[63].mxu0  ;;  %v14116_v2 = vld [vmem:[%s12998_s17 + $0x138] sm:$0xff] }
 0x1b3   : > { %v12097_v11 = vpack.c.bf16 %v10990_v4, %v2345_v54  ;;  %12096 = vmatprep.subr.bf16.mxu1 %v15881_v38  ;;  %v14125_v4 = vld [vmem:[%s12998_s17 + $0x130] sm:$0xff]  ;;  %v14128_v54 = vld [vmem:[%s12998_s17 + $0x148] sm:$0xff] }
 0x1b4   : > { %2786 = vmatmul.mubr.f32.gmra.mrb[86].mxu0 %v13933_v40 }
 0x1b5   : > { %2601 = vmatmul.mubr.f32.gmra.mrb[56].mxu1 %v13972_v26  ;;  %9850 = vmatprep.mubr.msk.f32.mxu0 %vm2424_vm1, %v13937_v19  ;;  %v10993_v30 = vpop.f32.mrb[64].mxu0 }
 0x1b6   : > { %9830 = vmatprep.mubr.msk.f32.mxu1 %vm2424_vm1, %v13975_v55  ;;  %12098 = vmatpush1.bf16.msra.mxu1 %v12097_v11  ;;  %v2355_v52 = vpop.f32.mrb[65].mxu0  ;;  %v14137_v11 = vld [vmem:[%s12998_s17 + $0x140] sm:$0xff] }
 0x1b7   : > { %v12100_v53 = vpack.c.bf16 %v10993_v30, %v2355_v52  ;;  %12099 = vmatprep.subr.bf16.mxu1 %v15881_v38  ;;  %v14140_v30 = vld [vmem:[%s12998_s17 + $0x158] sm:$0xff]  ;;  %v14149_v52 = vld [vmem:[%s12998_s17 + $0x150] sm:$0xff] }
 0x1b8   : > { %2792 = vmatmul.mubr.f32.gmra.mrb[88].mxu0 %v13946_v56 }
 0x1b9   : > { %2607 = vmatmul.mubr.f32.gmra.mrb[58].mxu1 %v13985_v31  ;;  %9851 = vmatprep.mubr.msk.f32.mxu0 %vm2424_vm1, %v13949_v23  ;;  %v10996_v0 = vpop.f32.mrb[66].mxu0 }
 0x1ba   : > { %9831 = vmatprep.mubr.msk.f32.mxu1 %vm2424_vm1, %v13988_v47  ;;  %12101 = vmatpush1.bf16.msra.mxu1 %v12100_v53  ;;  %v2365_v32 = vpop.f32.mrb[67].mxu0  ;;  %v14152_v53 = vld [vmem:[%s12998_s17 + $0x168] sm:$0xff] }
 0x1bb   : > { %v12103_v35 = vpack.c.bf16 %v10996_v0, %v2365_v32  ;;  %12102 = vmatprep.subr.bf16.mxu1 %v15881_v38  ;;  %v14161_v0 = vld [vmem:[%s12998_s17 + $0x160] sm:$0xff] }
 0x1bc   : > { %2798 = vmatmul.mubr.f32.gmra.mrb[90].mxu0 %v13959_v8 }
 0x1bd   : > { %2613 = vmatmul.mubr.f32.gmra.mrb[60].mxu1 %v13998_v1  ;;  %9852 = vmatprep.mubr.msk.f32.mxu0 %vm2424_vm1, %v13962_v49  ;;  %v10999_v62 = vpop.f32.mrb[68].mxu0 }
 0x1be   : > { %9832 = vmatprep.mubr.msk.f32.mxu1 %vm2424_vm1, %v14001_v42  ;;  %12104 = vmatpush1.bf16.msra.mxu1 %v12103_v35  ;;  %v2375_v7 = vpop.f32.mrb[69].mxu0  ;;  %v1064_v35 = vld [vmem:[%s13003_s21 + $0x78] sm:$0xff] }
 0x1bf   : > { %v12106_v6 = vpack.c.bf16 %v10999_v62, %v2375_v7  ;;  %12105 = vmatprep.subr.bf16.mxu1 %v15881_v38 }
 0x1c0   : > { %2804 = vmatmul.mubr.f32.gmra.mrb[92].mxu0 %v13972_v26 }
 0x1c1   : > { %2619 = vmatmul.mubr.f32.gmra.mrb[62].mxu1 %v14011_v9  ;;  %9853 = vmatprep.mubr.msk.f32.mxu0 %vm2424_vm1, %v13975_v55  ;;  %v11002_v16 = vpop.f32.mrb[70].mxu0 }
 0x1c2   : > { %9833 = vmatprep.mubr.msk.f32.mxu1 %vm2424_vm1, %v14014_v5  ;;  %12107 = vmatpush1.bf16.msra.mxu1 %v12106_v6  ;;  %v2385_v36 = vpop.f32.mrb[71].mxu0 }
 0x1c3   : > { %v12109_v59 = vpack.c.bf16 %v11002_v16, %v2385_v36  ;;  %12108 = vmatprep.subr.bf16.mxu1 %v15881_v38 }
 0x1c4   : > { %2810 = vmatmul.mubr.f32.gmra.mrb[94].mxu0 %v13985_v31 }
 0x1c5   : > { %2625 = vmatmul.mubr.f32.gmra.mrb[64].mxu1 %v14024_v10  ;;  %9854 = vmatprep.mubr.msk.f32.mxu0 %vm2424_vm1, %v13988_v47  ;;  %v11005_v18 = vpop.f32.mrb[72].mxu0 }
 0x1c6   : > { %9834 = vmatprep.mubr.msk.f32.mxu1 %vm2424_vm1, %v14027_v58  ;;  %12110 = vmatpush1.bf16.msra.mxu1 %v12109_v59  ;;  %v2395_v37 = vpop.f32.mrb[73].mxu0 }
 0x1c7   : > { %v12112_v25 = vpack.c.bf16 %v11005_v18, %v2395_v37  ;;  %12111 = vmatprep.subr.bf16.mxu1 %v15881_v38 }
 0x1c8   : > { %2816 = vmatmul.mubr.f32.gmra.mrb[96].mxu0 %v13998_v1 }
 0x1c9   : > { %2631 = vmatmul.mubr.f32.gmra.mrb[66].mxu1 %v14037_v21  ;;  %9855 = vmatprep.mubr.msk.f32.mxu0 %vm2424_vm1, %v14001_v42  ;;  %v11008_v14 = vpop.f32.mrb[74].mxu0 }
 0x1ca   : > { %9835 = vmatprep.mubr.msk.f32.mxu1 %vm2424_vm1, %v14040_v12  ;;  %12113 = vmatpush1.bf16.msra.mxu1 %v12112_v25  ;;  %v2405_v13 = vpop.f32.mrb[75].mxu0 }
 0x1cb   : > { %v12115_v43 = vpack.c.bf16 %v11008_v14, %v2405_v13  ;;  %12114 = vmatprep.subr.bf16.mxu1 %v15881_v38 }
 0x1cc   : > { %2822 = vmatmul.mubr.f32.gmra.mrb[98].mxu0 %v14011_v9 }
 0x1cd   : > { %2637 = vmatmul.mubr.f32.gmra.mrb[68].mxu1 %v14050_v17  ;;  %9856 = vmatprep.mubr.msk.f32.mxu0 %vm2424_vm1, %v14014_v5  ;;  %v11011_v33 = vpop.f32.mrb[76].mxu0 }
 0x1ce   : > { %9836 = vmatprep.mubr.msk.f32.mxu1 %vm2424_vm1, %v14053_v41  ;;  %12116 = vmatpush1.bf16.msra.mxu1 %v12115_v43  ;;  %v2415_v28 = vpop.f32.mrb[77].mxu0 }
 0x1cf   : > { %v12118_v20 = vpack.c.bf16 %v11011_v33, %v2415_v28  ;;  %12117 = vmatprep.subr.bf16.mxu1 %v15881_v38 }
 0x1d0   : > { %2828 = vmatmul.mubr.f32.gmra.mrb[100].mxu0 %v14024_v10 }
 0x1d1   : > { %2643 = vmatmul.mubr.f32.gmra.mrb[70].mxu1 %v14063_v22  ;;  %9857 = vmatprep.mubr.msk.f32.mxu0 %vm2424_vm1, %v14027_v58 }
 0x1d2   : > { %9837 = vmatprep.mubr.msk.f32.mxu1 %vm2424_vm1, %v14066_v48  ;;  %12119 = vmatpush1.bf16.msra.mxu1 %v12118_v20 }
 0x1d3   : > { %12144 = vmatprep.subr.bf16.mxu1 %v15881_v38 }
 0x1d4   : > { %2834 = vmatmul.mubr.f32.gmra.mrb[102].mxu0 %v14037_v21 }
 0x1d5   : > { %2649 = vmatmul.mubr.f32.gmra.mrb[72].mxu1 %v14076_v39  ;;  %9858 = vmatprep.mubr.msk.f32.mxu0 %vm2424_vm1, %v14040_v12 }
 0x1d6   : > { %9838 = vmatprep.mubr.msk.f32.mxu1 %vm2424_vm1, %v14079_v63 }
 0x1d8   : > { %2840 = vmatmul.mubr.f32.gmra.mrb[104].mxu0 %v14050_v17 }
 0x1d9   : > { %2655 = vmatmul.mubr.f32.gmra.mrb[74].mxu1 %v14089_v3  ;;  %9859 = vmatprep.mubr.msk.f32.mxu0 %vm2424_vm1, %v14053_v41 }
 0x1da   : > { %9839 = vmatprep.mubr.msk.f32.mxu1 %vm2424_vm1, %v14092_v60 }
 0x1dc   : > { %2846 = vmatmul.mubr.f32.gmra.mrb[106].mxu0 %v14063_v22 }
 0x1dd   : > { %2661 = vmatmul.mubr.f32.gmra.mrb[76].mxu1 %v14101_v45  ;;  %9860 = vmatprep.mubr.msk.f32.mxu0 %vm2424_vm1, %v14066_v48 }
 0x1de   : > { %9840 = vmatprep.mubr.msk.f32.mxu1 %vm2424_vm1, %v14104_v46 }
 0x1e0   : > { %2852 = vmatmul.mubr.f32.gmra.mrb[108].mxu0 %v14076_v39 }
 0x1e1   : > { %2667 = vmatmul.mubr.f32.gmra.mrb[78].mxu1 %v14113_v57  ;;  %9861 = vmatprep.mubr.msk.f32.mxu0 %vm2424_vm1, %v14079_v63 }
 0x1e2   : > { %9841 = vmatprep.mubr.msk.f32.mxu1 %vm2424_vm1, %v14116_v2 }
 0x1e4   : > { %2858 = vmatmul.mubr.f32.gmra.mrb[110].mxu0 %v14089_v3 }
 0x1e5   : > { %2673 = vmatmul.mubr.f32.gmra.mrb[80].mxu1 %v14125_v4  ;;  %9862 = vmatprep.mubr.msk.f32.mxu0 %vm2424_vm1, %v14092_v60 }
 0x1e6   : > { %9842 = vmatprep.mubr.msk.f32.mxu1 %vm2424_vm1, %v14128_v54 }
 0x1e8   : > { %2864 = vmatmul.mubr.f32.gmra.mrb[112].mxu0 %v14101_v45 }
 0x1e9   : > { %2679 = vmatmul.mubr.f32.gmra.mrb[82].mxu1 %v14137_v11  ;;  %9863 = vmatprep.mubr.msk.f32.mxu0 %vm2424_vm1, %v14104_v46 }
 0x1ea   : > { %9843 = vmatprep.mubr.msk.f32.mxu1 %vm2424_vm1, %v14140_v30 }
 0x1ec   : > { %2870 = vmatmul.mubr.f32.gmra.mrb[114].mxu0 %v14113_v57 }
 0x1ed   : > { %2685 = vmatmul.mubr.f32.gmra.mrb[84].mxu1 %v14149_v52  ;;  %9864 = vmatprep.mubr.msk.f32.mxu0 %vm2424_vm1, %v14116_v2 }
 0x1ee   : > { %9844 = vmatprep.mubr.msk.f32.mxu1 %vm2424_vm1, %v14152_v53 }
 0x1f0   : > { %2876 = vmatmul.mubr.f32.gmra.mrb[116].mxu0 %v14125_v4 }
 0x1f1   : > { %2691 = vmatmul.mubr.f32.gmra.mrb[86].mxu1 %v14161_v0  ;;  %9865 = vmatprep.mubr.msk.f32.mxu0 %vm2424_vm1, %v14128_v54 }
 0x1f2   : > { %9868 = vmatprep.mubr.msk.f32.mxu1 %vm2424_vm1, %v13696_v29  ;;  %v1049_v29 = vld [vmem:[%s13003_s21] sm:$0xff] }
 0x1f4   : > { %2882 = vmatmul.mubr.f32.gmra.mrb[118].mxu0 %v14137_v11 }
 0x1f5   : > { %2965 = vmatmul.mubr.f32.vlgmr.msra.gmra.mrb[88].mxu1 %v13892_v15  ;;  %9866 = vmatprep.mubr.msk.f32.mxu0 %vm2424_vm1, %v14140_v30  ;;  %v1050_v15 = vld [vmem:[%s13003_s21 + $0x8] sm:$0xff] }
 0x1f6   : > { %9869 = vmatprep.mubr.msk.f32.mxu1 %vm2424_vm1, %v13895_v27  ;;  %v12121_v27 = vpack.c.bf16 %v1050_v15, %v1049_v29 }
 0x1f8   : > { %2888 = vmatmul.mubr.f32.gmra.mrb[120].mxu0 %v14149_v52 }
 0x1f9   : > { %2970 = vmatmul.mubr.f32.gmra.mrb[90].mxu1 %v13902_v50  ;;  %9867 = vmatprep.mubr.msk.f32.mxu0 %vm2424_vm1, %v14152_v53  ;;  %v1051_v50 = vld [vmem:[%s13003_s21 + $0x10] sm:$0xff] }
 0x1fa   : > { %9870 = vmatprep.mubr.msk.f32.mxu1 %vm2424_vm1, %v13905_v61  ;;  %12122 = vmatpush3.bf16.msra.mxu0 %v12121_v27  ;;  %v1052_v61 = vld [vmem:[%s13003_s21 + $0x18] sm:$0xff] }
 0x1fb   : > { %12123 = vmatprep.subr.bf16.mxu0 %v15881_v38 }
 0x1fc   : > { %2894 = vmatmul.mubr.f32.gmra.mrb[122].mxu0 %v14161_v0 }
 0x1fd   : > { %2975 = vmatmul.mubr.f32.gmra.mrb[92].mxu1 %v13911_v44  ;;  %v12124_v44 = vpack.c.bf16 %v1052_v61, %v1051_v50 }
 0x1fe   : > { %9871 = vmatprep.mubr.msk.f32.mxu1 %vm2424_vm1, %v13914_v34  ;;  %v1053_v34 = vld [vmem:[%s13003_s21 + $0x20] sm:$0xff] }
 0x1ff   : > { %12125 = vmatpush3.bf16.msra.mxu0 %v12124_v44 }
 0x200   : > { %12126 = vmatprep.subr.bf16.mxu0 %v15881_v38 }
 0x201   : > { %2980 = vmatmul.mubr.f32.gmra.mrb[94].mxu1 %v13920_v24  ;;  %v1054_v24 = vld [vmem:[%s13003_s21 + $0x28] sm:$0xff] }
 0x202   : > { %9872 = vmatprep.mubr.msk.f32.mxu1 %vm2424_vm1, %v13924_v51  ;;  %v12127_v51 = vpack.c.bf16 %v1054_v24, %v1053_v34 }
 0x204   : > { %12128 = vmatpush3.bf16.msra.mxu0 %v12127_v51 }
 0x205   : > { %2985 = vmatmul.mubr.f32.gmra.mrb[96].mxu1 %v13933_v40  ;;  %12129 = vmatprep.subr.bf16.mxu0 %v15881_v38  ;;  %v1055_v40 = vld [vmem:[%s13003_s21 + $0x30] sm:$0xff] }
 0x206   : > { %9873 = vmatprep.mubr.msk.f32.mxu1 %vm2424_vm1, %v13937_v19  ;;  %v1056_v19 = vld [vmem:[%s13003_s21 + $0x38] sm:$0xff] }
 0x209   : > { %2990 = vmatmul.mubr.f32.gmra.mrb[98].mxu1 %v13946_v56  ;;  %v12130_v56 = vpack.c.bf16 %v1056_v19, %v1055_v40 }
 0x20a   : > { %9874 = vmatprep.mubr.msk.f32.mxu1 %vm2424_vm1, %v13949_v23  ;;  %v1057_v23 = vld [vmem:[%s13003_s21 + $0x40] sm:$0xff] }
 0x20b   : > { %12131 = vmatpush3.bf16.msra.mxu0 %v12130_v56 }
 0x20c   : > { %12132 = vmatprep.subr.bf16.mxu0 %v15881_v38 }
 0x20d   : > { %2995 = vmatmul.mubr.f32.gmra.mrb[100].mxu1 %v13959_v8  ;;  %v1058_v8 = vld [vmem:[%s13003_s21 + $0x48] sm:$0xff] }
 0x20e   : > { %9875 = vmatprep.mubr.msk.f32.mxu1 %vm2424_vm1, %v13962_v49  ;;  %v12133_v49 = vpack.c.bf16 %v1058_v8, %v1057_v23 }
 0x210   : > { %12134 = vmatpush3.bf16.msra.mxu0 %v12133_v49 }
 0x211   : > { %3000 = vmatmul.mubr.f32.gmra.mrb[102].mxu1 %v13972_v26  ;;  %12135 = vmatprep.subr.bf16.mxu0 %v15881_v38  ;;  %v1059_v26 = vld [vmem:[%s13003_s21 + $0x50] sm:$0xff] }
 0x212   : > { %9876 = vmatprep.mubr.msk.f32.mxu1 %vm2424_vm1, %v13975_v55  ;;  %v1060_v55 = vld [vmem:[%s13003_s21 + $0x58] sm:$0xff] }
 0x215   : > { %3005 = vmatmul.mubr.f32.gmra.mrb[104].mxu1 %v13985_v31  ;;  %v12136_v31 = vpack.c.bf16 %v1060_v55, %v1059_v26 }
 0x216   : > { %9877 = vmatprep.mubr.msk.f32.mxu1 %vm2424_vm1, %v13988_v47  ;;  %v1061_v47 = vld [vmem:[%s13003_s21 + $0x60] sm:$0xff] }
 0x217   : > { %12137 = vmatpush3.bf16.msra.mxu0 %v12136_v31 }
 0x218   : > { %12138 = vmatprep.subr.bf16.mxu0 %v15881_v38 }
 0x219   : > { %3010 = vmatmul.mubr.f32.gmra.mrb[106].mxu1 %v13998_v1  ;;  %v1062_v1 = vld [vmem:[%s13003_s21 + $0x68] sm:$0xff] }
 0x21a   : > { %9878 = vmatprep.mubr.msk.f32.mxu1 %vm2424_vm1, %v14001_v42  ;;  %v12139_v32 = vpack.c.bf16 %v1062_v1, %v1061_v47  ;;  %v1063_v42 = vld [vmem:[%s13003_s21 + $0x70] sm:$0xff] }
 0x21b   : > { %v12142_v62 = vpack.c.bf16 %v1064_v35, %v1063_v42 }
 0x21c   : > { %12140 = vmatpush3.bf16.msra.mxu0 %v12139_v32 }
 0x21d   : > { %3015 = vmatmul.mubr.f32.gmra.mrb[108].mxu1 %v14011_v9  ;;  %12141 = vmatprep.subr.bf16.mxu0 %v15881_v38  ;;  %v15883_v9 = vmov 0.0  }
 0x21e   : > { %9879 = vmatprep.mubr.msk.f32.mxu1 %vm2424_vm1, %v14014_v5  ;;  %11044 = vmatprep.mubr.msk.f32.mxu0 %vm12967_vm2, %v15883_v9 }
 0x220   : > { %12143 = vmatpush3.bf16.msra.mxu0 %v12142_v62 }
 0x221   : > { %3020 = vmatmul.mubr.f32.gmra.mrb[110].mxu1 %v14024_v10  ;;  %12177 = vmatprep.subr.bf16.mxu0 %v15881_v38 }
 0x222   : > { %9880 = vmatprep.mubr.msk.f32.mxu1 %vm2424_vm1, %v14027_v58 }
 0x225   : > { %3025 = vmatmul.mubr.f32.gmra.mrb[112].mxu1 %v14037_v21 }
 0x226   : > { %9881 = vmatprep.mubr.msk.f32.mxu1 %vm2424_vm1, %v14040_v12 }
 0x229   : > { %3030 = vmatmul.mubr.f32.gmra.mrb[114].mxu1 %v14050_v17 }
 0x22a   : > { %9882 = vmatprep.mubr.msk.f32.mxu1 %vm2424_vm1, %v14053_v41 }
 0x22d   : > { %3035 = vmatmul.mubr.f32.gmra.mrb[116].mxu1 %v14063_v22 }
 0x22e   : > { %9883 = vmatprep.mubr.msk.f32.mxu1 %vm2424_vm1, %v14066_v48 }
 0x231   : > { %3040 = vmatmul.mubr.f32.gmra.mrb[118].mxu1 %v14076_v39 }
 0x232   : > { %9884 = vmatprep.mubr.msk.f32.mxu1 %vm2424_vm1, %v14079_v63 }
 0x235   : > { %3045 = vmatmul.mubr.f32.gmra.mrb[120].mxu1 %v14089_v3 }
 0x236   : > { %9885 = vmatprep.mubr.msk.f32.mxu1 %vm2424_vm1, %v14092_v60 }
 0x239   : > { %3050 = vmatmul.mubr.f32.gmra.mrb[122].mxu1 %v14101_v45 }
 0x23a   : > { %9886 = vmatprep.mubr.msk.f32.mxu1 %vm2424_vm1, %v14104_v46 }
 0x23d   : > { %3055 = vmatmul.mubr.f32.gmra.mrb[124].mxu1 %v14113_v57 }
 0x23e   : > { %9887 = vmatprep.mubr.msk.f32.mxu1 %vm2424_vm1, %v14116_v2 }
 0x241   : > { %3060 = vmatmul.mubr.f32.gmra.mrb[126].mxu1 %v14125_v4 }
 0x242   : > { %9888 = vmatprep.mubr.msk.f32.mxu1 %vm2424_vm1, %v14128_v54 }
 0x245   : > { %3065 = vmatmul.mubr.f32.gmra.mrb[128].mxu1 %v14137_v11 }
 0x246   : > { %9889 = vmatprep.mubr.msk.f32.mxu1 %vm2424_vm1, %v14140_v30 }
 0x249   : > { %3070 = vmatmul.mubr.f32.gmra.mrb[130].mxu1 %v14149_v52 }
 0x24a   : > { %9890 = vmatprep.mubr.msk.f32.mxu1 %vm2424_vm1, %v14152_v53 }
 0x24d   : > { %3075 = vmatmul.mubr.f32.gmra.mrb[132].mxu1 %v14161_v0 }
 0x26c   : > { %v2560_v7 = vpop.f32.mrb[42].mxu1 }
 0x26d   : > { %v2562_v5 = vpop.f32.mrb[43].mxu1  ;;  %v3080_v18 = vmul.f32 %v2560_v7, %v2560_v7 }
 0x26e   : > { %v14269_v6 = vmul.f32 %v2562_v5, %v2560_v7  ;;  %v3103_v12 = vmul.f32 %v2562_v5, %v2562_v5 }
 0x270   : > { %v2566_v16 = vpop.f32.mrb[44].mxu1 }
 0x271   : > { %v2568_v10 = vpop.f32.mrb[45].mxu1  ;;  %v3081_v43 = vmul.f32 %v2566_v16, %v2566_v16 }
 0x272   : > { %v14271_v36 = vmul.f32 %v2568_v10, %v2566_v16  ;;  %v3104_v48 = vmul.f32 %v2568_v10, %v2568_v10 }
 0x274   : > { %v2572_v58 = vpop.f32.mrb[46].mxu1 }
 0x275   : > { %v2574_v59 = vpop.f32.mrb[47].mxu1  ;;  %v3082_v45 = vmul.f32 %v2572_v58, %v2572_v58 }
 0x276   : > { %v14273_v21 = vmul.f32 %v2574_v59, %v2572_v58  ;;  %v3105_v4 = vmul.f32 %v2574_v59, %v2574_v59 }
 0x277   : > { %v2763_v37 = vpop.f32.mrb[78].mxu0 }
 0x278   : > { %v3218_v25 = vsub.f32 %v2763_v37, %v3080_v18  ;;  %v2765_v14 = vpop.f32.mrb[79].mxu0  ;;  %v2578_v17 = vpop.f32.mrb[48].mxu1 }
 0x279   : > { %v3241_v13 = vsub.f32 %v2765_v14, %v3103_v12  ;;  %v2580_v41 = vpop.f32.mrb[49].mxu1  ;;  %v3083_v0 = vmul.f32 %v2578_v17, %v2578_v17 }
 0x27a   : > { %v14275_v33 = vmul.f32 %v2580_v41, %v2578_v17  ;;  %v3106_v50 = vmul.f32 %v2580_v41, %v2580_v41 }
 0x27b   : > { %v14277_v22 = vadd.f32 %v3241_v13, %v3218_v25  ;;  %v2769_v28 = vpop.f32.mrb[80].mxu0 }
 0x27c   : > { %v3219_v20 = vsub.f32 %v2769_v28, %v3081_v43  ;;  %v2771_v39 = vpop.f32.mrb[81].mxu0  ;;  %v2584_v63 = vpop.f32.mrb[50].mxu1 }
 0x27d   : > { %v3242_v3 = vsub.f32 %v2771_v39, %v3104_v48  ;;  %v2586_v60 = vpop.f32.mrb[51].mxu1  ;;  %v3084_v40 = vmul.f32 %v2584_v63, %v2584_v63 }
 0x27e   : > { %v14279_v46 = vmul.f32 %v2586_v60, %v2584_v63  ;;  %v3107_v8 = vmul.f32 %v2586_v60, %v2586_v60 }
 0x27f   : > { %v14281_v57 = vadd.f32 %v3242_v3, %v3219_v20  ;;  %v2775_v2 = vpop.f32.mrb[82].mxu0 }
 0x280   : > { %v3220_v54 = vsub.f32 %v2775_v2, %v3082_v45  ;;  %v2777_v11 = vpop.f32.mrb[83].mxu0  ;;  %v2590_v30 = vpop.f32.mrb[52].mxu1 }
 0x281   : > { %v3243_v52 = vsub.f32 %v2777_v11, %v3105_v4  ;;  %v2592_v53 = vpop.f32.mrb[53].mxu1  ;;  %v3085_v1 = vmul.f32 %v2590_v30, %v2590_v30 }
 0x282   : > { %v14283_v29 = vmul.f32 %v2592_v53, %v2590_v30  ;;  %v3108_v62 = vmul.f32 %v2592_v53, %v2592_v53 }
 0x283   : > { %v14285_v15 = vadd.f32 %v3243_v52, %v3220_v54  ;;  %v2781_v27 = vpop.f32.mrb[84].mxu0 }
 0x284   : > { %v3221_v61 = vsub.f32 %v2781_v27, %v3083_v0  ;;  %v2783_v44 = vpop.f32.mrb[85].mxu0  ;;  %v2596_v34 = vpop.f32.mrb[54].mxu1 }
 0x285   : > { %v3244_v24 = vsub.f32 %v2783_v44, %v3106_v50  ;;  %v2598_v51 = vpop.f32.mrb[55].mxu1  ;;  %v3086_v59 = vmul.f32 %v2596_v34, %v2596_v34 }
 0x286   : > { %v14287_v19 = vmul.f32 %v2598_v51, %v2596_v34  ;;  %v3109_v25 = vmul.f32 %v2598_v51, %v2598_v51 }
 0x287   : > { %v14289_v56 = vadd.f32 %v3244_v24, %v3221_v61  ;;  %v2787_v23 = vpop.f32.mrb[86].mxu0 }
 0x288   : > { %v3222_v49 = vsub.f32 %v2787_v23, %v3084_v40  ;;  %v2789_v26 = vpop.f32.mrb[87].mxu0  ;;  %v2602_v55 = vpop.f32.mrb[56].mxu1 }
 0x289   : > { %v3245_v31 = vsub.f32 %v2789_v26, %v3107_v8  ;;  %v2604_v47 = vpop.f32.mrb[57].mxu1  ;;  %v3087_v28 = vmul.f32 %v2602_v55, %v2602_v55 }
 0x28a   : > { %v14291_v32 = vmul.f32 %v2604_v47, %v2602_v55  ;;  %v3110_v63 = vmul.f32 %v2604_v47, %v2604_v47 }
 0x28b   : > { %v14293_v42 = vadd.f32 %v3245_v31, %v3222_v49  ;;  %v2793_v35 = vpop.f32.mrb[88].mxu0 }
 0x28c   : > { %v3223_v7 = vsub.f32 %v2793_v35, %v3085_v1  ;;  %v2795_v5 = vpop.f32.mrb[89].mxu0  ;;  %v2608_v16 = vpop.f32.mrb[58].mxu1 }
 0x28d   : > { %v3246_v10 = vsub.f32 %v2795_v5, %v3108_v62  ;;  %v2610_v58 = vpop.f32.mrb[59].mxu1  ;;  %v3088_v54 = vmul.f32 %v2608_v16, %v2608_v16 }
 0x28e   : > { %v14295_v18 = vmul.f32 %v2610_v58, %v2608_v16  ;;  %v3111_v53 = vmul.f32 %v2610_v58, %v2610_v58 }
 0x28f   : > { %v14297_v37 = vadd.f32 %v3246_v10, %v3223_v7  ;;  %v2799_v12 = vpop.f32.mrb[90].mxu0 }
 0x290   : > { %v3224_v14 = vsub.f32 %v2799_v12, %v3086_v59  ;;  %v2801_v17 = vpop.f32.mrb[91].mxu0  ;;  %v2614_v13 = vpop.f32.mrb[60].mxu1 }
 0x291   : > { %v3247_v41 = vsub.f32 %v2801_v17, %v3109_v25  ;;  %v2616_v43 = vpop.f32.mrb[61].mxu1  ;;  %v3089_v34 = vmul.f32 %v2614_v13, %v2614_v13 }
 0x292   : > { %v14299_v48 = vmul.f32 %v2616_v43, %v2614_v13  ;;  %v3112_v23 = vmul.f32 %v2616_v43, %v2616_v43 }
 0x293   : > { %v14301_v20 = vadd.f32 %v3247_v41, %v3224_v14  ;;  %v2805_v39 = vpop.f32.mrb[92].mxu0 }
 0x294   : > { %v3225_v3 = vsub.f32 %v2805_v39, %v3087_v28  ;;  %v2807_v60 = vpop.f32.mrb[93].mxu0  ;;  %v2620_v45 = vpop.f32.mrb[62].mxu1 }
 0x295   : > { %v3248_v2 = vsub.f32 %v2807_v60, %v3110_v63  ;;  %v2622_v4 = vpop.f32.mrb[63].mxu1  ;;  %v3090_v47 = vmul.f32 %v2620_v45, %v2620_v45 }
 0x296   : > { %v14303_v11 = vmul.f32 %v2622_v4, %v2620_v45  ;;  %v3113_v7 = vmul.f32 %v2622_v4, %v2622_v4 }
 0x297   : > { %v14305_v30 = vadd.f32 %v3248_v2, %v3225_v3  ;;  %v2811_v52 = vpop.f32.mrb[94].mxu0 }
 0x298   : > { %v3226_v0 = vsub.f32 %v2811_v52, %v3088_v54  ;;  %v2813_v27 = vpop.f32.mrb[95].mxu0  ;;  %v2626_v50 = vpop.f32.mrb[64].mxu1 }
 0x299   : > { %v3249_v61 = vsub.f32 %v2813_v27, %v3111_v53  ;;  %v2628_v44 = vpop.f32.mrb[65].mxu1  ;;  %v3091_v12 = vmul.f32 %v2626_v50, %v2626_v50 }
 0x29a   : > { %v14307_v24 = vmul.f32 %v2628_v44, %v2626_v50  ;;  %v3114_v13 = vmul.f32 %v2628_v44, %v2628_v44 }
 0x29b   : > { %v14309_v51 = vadd.f32 %v3249_v61, %v3226_v0  ;;  %v2817_v40 = vpop.f32.mrb[96].mxu0 }
 0x29c   : > { %v3227_v8 = vsub.f32 %v2817_v40, %v3089_v34  ;;  %v2819_v49 = vpop.f32.mrb[97].mxu0  ;;  %v2632_v26 = vpop.f32.mrb[66].mxu1 }
 0x29d   : > { %v3250_v55 = vsub.f32 %v2819_v49, %v3112_v23  ;;  %v2634_v31 = vpop.f32.mrb[67].mxu1  ;;  %v3092_v3 = vmul.f32 %v2632_v26, %v2632_v26 }
 0x29e   : > { %v14311_v1 = vmul.f32 %v2634_v31, %v2632_v26  ;;  %v3115_v4 = vmul.f32 %v2634_v31, %v2634_v31 }
 0x29f   : > { %v14313_v35 = vadd.f32 %v3250_v55, %v3227_v8  ;;  %v2823_v62 = vpop.f32.mrb[98].mxu0 }
 0x2a0   : > { %v3228_v5 = vsub.f32 %v2823_v62, %v3090_v47  ;;  %v2825_v16 = vpop.f32.mrb[99].mxu0  ;;  %v2638_v10 = vpop.f32.mrb[68].mxu1 }
 0x2a1   : > { %v3251_v58 = vsub.f32 %v2825_v16, %v3113_v7  ;;  %v2640_v59 = vpop.f32.mrb[69].mxu1  ;;  %v3093_v50 = vmul.f32 %v2638_v10, %v2638_v10 }
 0x2a2   : > { %v14315_v25 = vmul.f32 %v2640_v59, %v2638_v10  ;;  %v3116_v40 = vmul.f32 %v2640_v59, %v2640_v59 }
 0x2a3   : > { %v14317_v14 = vadd.f32 %v3251_v58, %v3228_v5  ;;  %v2829_v17 = vpop.f32.mrb[100].mxu0 }
 0x2a4   : > { %v3229_v41 = vsub.f32 %v2829_v17, %v3091_v12  ;;  %v2831_v43 = vpop.f32.mrb[101].mxu0  ;;  %v2644_v28 = vpop.f32.mrb[70].mxu1 }
 0x2a5   : > { %v3252_v39 = vsub.f32 %v2831_v43, %v3114_v13  ;;  %v2646_v63 = vpop.f32.mrb[71].mxu1  ;;  %v3094_v47 = vmul.f32 %v2644_v28, %v2644_v28 }
 0x2a6   : > { %v14319_v60 = vmul.f32 %v2646_v63, %v2644_v28  ;;  %v3117_v5 = vmul.f32 %v2646_v63, %v2646_v63 }
 0x2a7   : > { %v14321_v45 = vadd.f32 %v3252_v39, %v3229_v41  ;;  %v2835_v2 = vpop.f32.mrb[102].mxu0 }
 0x2a8   : > { %v3230_v54 = vsub.f32 %v2835_v2, %v3092_v3  ;;  %v2837_v52 = vpop.f32.mrb[103].mxu0  ;;  %v2650_v53 = vpop.f32.mrb[72].mxu1 }
 0x2a9   : > { %v3253_v0 = vsub.f32 %v2837_v52, %v3115_v4  ;;  %v2652_v27 = vpop.f32.mrb[73].mxu1  ;;  %v3095_v13 = vmul.f32 %v2650_v53, %v2650_v53 }
 0x2aa   : > { %v14323_v61 = vmul.f32 %v2652_v27, %v2650_v53  ;;  %v3118_v39 = vmul.f32 %v2652_v27, %v2652_v27 }
 0x2ab   : > { %v14325_v44 = vadd.f32 %v3253_v0, %v3230_v54  ;;  %v2841_v34 = vpop.f32.mrb[104].mxu0 }
 0x2ac   : > { %v3231_v23 = vsub.f32 %v2841_v34, %v3093_v50  ;;  %v2843_v8 = vpop.f32.mrb[105].mxu0  ;;  %v2656_v49 = vpop.f32.mrb[74].mxu1 }
 0x2ad   : > { %v3254_v26 = vsub.f32 %v2843_v8, %v3116_v40  ;;  %v2658_v55 = vpop.f32.mrb[75].mxu1  ;;  %v3096_v52 = vmul.f32 %v2656_v49, %v2656_v49 }
 0x2ae   : > { %v14327_v62 = vmul.f32 %v2658_v55, %v2656_v49  ;;  %v3119_v34 = vmul.f32 %v2658_v55, %v2658_v55 }
 0x2af   : > { %v14329_v31 = vadd.f32 %v3254_v26, %v3231_v23  ;;  %v2847_v7 = vpop.f32.mrb[106].mxu0 }
 0x2b0   : > { %v3232_v16 = vsub.f32 %v2847_v7, %v3094_v47  ;;  %v2849_v10 = vpop.f32.mrb[107].mxu0  ;;  %v2662_v58 = vpop.f32.mrb[76].mxu1 }
 0x2b1   : > { %v3255_v12 = vsub.f32 %v2849_v10, %v3117_v5  ;;  %v2664_v17 = vpop.f32.mrb[77].mxu1  ;;  %v3097_v47 = vmul.f32 %v2662_v58, %v2662_v58 }
 0x2b2   : > { %v14331_v41 = vmul.f32 %v2664_v17, %v2662_v58  ;;  %v3287_v58 = vadd.f32 0.0009, %v14277_v22 }
 0x2b3   : > { %v14333_v59 = vadd.f32 %v3255_v12, %v3232_v16  ;;  %v2853_v43 = vpop.f32.mrb[108].mxu0  ;;  %v3120_v16 = vmul.f32 %v2664_v17, %v2664_v17 }
 0x2b4   : > { %v3233_v3 = vsub.f32 %v2853_v43, %v3095_v13  ;;  %v2855_v28 = vpop.f32.mrb[109].mxu0  ;;  %v2668_v2 = vpop.f32.mrb[78].mxu1  ;;  %12738 = vrcp.f32 %v3287_v58 }
 0x2b5   : > { %v3256_v4 = vsub.f32 %v2855_v28, %v3118_v39  ;;  %v2670_v54 = vpop.f32.mrb[79].mxu1  ;;  %v3098_v39 = vmul.f32 %v2668_v2, %v2668_v2 }
 0x2b6   : > { %v14335_v0 = vmul.f32 %v2670_v54, %v2668_v2 }
 0x2b7   : > { %v14337_v63 = vadd.f32 %v3256_v4, %v3233_v3  ;;  %v2859_v50 = vpop.f32.mrb[110].mxu0  ;;  %v3121_v4 = vmul.f32 %v2670_v54, %v2670_v54 }
 0x2b8   : > { %v3234_v40 = vsub.f32 %v2859_v50, %v3096_v52  ;;  %v2861_v53 = vpop.f32.mrb[111].mxu0  ;;  %v2674_v23 = vpop.f32.mrb[80].mxu1 }
 0x2b9   : > { %v3257_v8 = vsub.f32 %v2861_v53, %v3119_v34  ;;  %v2676_v26 = vpop.f32.mrb[81].mxu1  ;;  %v3099_v17 = vmul.f32 %v2674_v23, %v2674_v23 }
 0x2ba   : > { %v14339_v7 = vmul.f32 %v2676_v26, %v2674_v23  ;;  %v3122_v2 = vmul.f32 %v2676_v26, %v2676_v26 }
 0x2bb   : > { %v14341_v27 = vadd.f32 %v3257_v8, %v3234_v40  ;;  %v2865_v5 = vpop.f32.mrb[112].mxu0 }
 0x2bc   : > { %v3235_v10 = vsub.f32 %v2865_v5, %v3097_v47  ;;  %v2867_v49 = vpop.f32.mrb[113].mxu0  ;;  %v2680_v12 = vpop.f32.mrb[82].mxu1 }
 0x2bd   : > { %v3258_v13 = vsub.f32 %v2867_v49, %v3120_v16  ;;  %v2682_v43 = vpop.f32.mrb[83].mxu1  ;;  %v3288_v16 = vadd.f32 0.0009, %v14281_v57 }
 0x2be   : > { %v14343_v3 = vmul.f32 %v2682_v43, %v2680_v12 }
 0x2bf   : > { %v14345_v55 = vadd.f32 %v3258_v13, %v3235_v10  ;;  %v2871_v28 = vpop.f32.mrb[114].mxu0  ;;  %12740 = vrcp.f32 %v3288_v16 }
 0x2c0   : > { %v3236_v52 = vsub.f32 %v2871_v28, %v3098_v39  ;;  %v2873_v50 = vpop.f32.mrb[115].mxu0  ;;  %v2686_v34 = vpop.f32.mrb[84].mxu1  ;;  %v3100_v39 = vmul.f32 %v2680_v12, %v2680_v12 }
 0x2c1   : > { %v3259_v40 = vsub.f32 %v2873_v50, %v3121_v4  ;;  %v2688_v53 = vpop.f32.mrb[85].mxu1  ;;  %v3123_v50 = vmul.f32 %v2682_v43, %v2682_v43  ;;  %v3290_v43 = vadd.f32 0.0009, %v14289_v56  ;;  %v3291_v56 = vadd.f32 0.0009, %v14293_v42 }
 0x2c2   : > { %v14348_v8 = vmul.f32 %v2688_v53, %v2686_v34  ;;  %v3292_v42 = vadd.f32 0.0009, %v14297_v37 }
 0x2c3   : > { %v14350_v47 = vadd.f32 %v3259_v40, %v3236_v52  ;;  %v2877_v5 = vpop.f32.mrb[116].mxu0  ;;  %v3289_v52 = vadd.f32 0.0009, %v14285_v15 }
 0x2c4   : > { %v3237_v10 = vsub.f32 %v2877_v5, %v3099_v17  ;;  %v2879_v49 = vpop.f32.mrb[117].mxu0  ;;  %v2692_v54 = vpop.f32.mrb[86].mxu1  ;;  %v3101_v5 = vmul.f32 %v2686_v34, %v2686_v34 }
 0x2c5   : > { %v3260_v13 = vsub.f32 %v2879_v49, %v3122_v2  ;;  %v2694_v22 = vpop.f32.mrb[87].mxu1  ;;  %v3124_v49 = vmul.f32 %v2688_v53, %v2688_v53  ;;  %12742 = vrcp.f32 %v3289_v52  ;;  %v3102_v34 = vmul.f32 %v2692_v54, %v2692_v54 }
 0x2c6   : > { %v14353_v28 = vmul.f32 %v2694_v22, %v2692_v54  ;;  %v3125_v9 = vmul.f32 %v2694_v22, %v2694_v22  ;;  %12744 = vrcp.f32 %v3290_v43 }
 0x2c7   : > { %v14355_v4 = vadd.f32 %v3260_v13, %v3237_v10  ;;  %v2883_v23 = vpop.f32.mrb[118].mxu0  ;;  %12746 = vrcp.f32 %v3291_v56 }
 0x2c8   : > { %v3238_v40 = vsub.f32 %v2883_v23, %v3100_v39  ;;  %v2885_v26 = vpop.f32.mrb[119].mxu0  ;;  %v2966_v58 = vpop.f32.mrb[88].mxu1  ;;  %12748 = vrcp.f32 %v3292_v42 }
 0x2c9   : > { %v3261_v38 = vsub.f32 %v2885_v26, %v3123_v50  ;;  %v3149_v57 = vsub.f32 %v2966_v58, %v14269_v6  ;;  %v2968_v17 = vpop.f32.mrb[89].mxu1  ;;  %v12739_v26 = vpop.eup %12738  ;;  %v12824_v58 = vld [vmem:[%s13204_s28] sm:$0xff] }
 0x2cb   : > { %v14359_v2 = vadd.f32 %v3261_v38, %v3238_v40  ;;  %v3172_v12 = vmul.f32 2.0, %v3149_v57  ;;  %v2889_v10 = vpop.f32.mrb[120].mxu0  ;;  %v12825_v38 = vld [vmem:[%s13204_s28 + $0x8] sm:$0xff] }
 0x2cc   : > { %v3239_v16 = vsub.f32 %v2889_v10, %v3101_v5  ;;  %v2891_v15 = vpop.f32.mrb[121].mxu0  ;;  %v2971_v13 = vpop.f32.mrb[90].mxu1  ;;  %v12178_v40 = vpack.c.bf16 %v12825_v38, %v12824_v58  ;;  %v3293_v38 = vadd.f32 0.0009, %v14301_v20 }
 0x2cd   : > { %v3195_v39 = vadd.f32 0.0009, %v3172_v12  ;;  %v3262_v23 = vsub.f32 %v2891_v15, %v3124_v49  ;;  %v3150_v50 = vsub.f32 %v2971_v13, %v14271_v36  ;;  %v2973_v6 = vpop.f32.mrb[91].mxu1  ;;  %v12741_v13 = vpop.eup %12740 }
 0x2ce   : > { %v15948_v6 = vmov 0.0   ;;  %12750 = vrcp.f32 %v3293_v38  ;;  %v3297_v38 = vadd.f32 0.0009, %v14317_v14 }
 0x2cf   : > { %v3311_v17 = vmul.f32 %v12739_v26, %v3195_v39  ;;  %v14365_v57 = vadd.f32 %v3262_v23, %v3239_v16  ;;  %v3173_v53 = vmul.f32 2.0, %v3150_v50  ;;  %v2895_v52 = vpop.f32.mrb[122].mxu0  ;;  %v15949_v39 = vmov 0.0|0.0   ;;  %v12743_v26 = vpop.eup %12742 }
 0x2d0   : > { %v3240_v5 = vsub.f32 %v2895_v52, %v3102_v34  ;;  %v2897_v12 = vpop.f32.mrb[123].mxu0  ;;  %v2976_v10 = vpop.f32.mrb[92].mxu1 }
 0x2d1   : > { %v3196_v49 = vadd.f32 0.0009, %v3173_v53  ;;  %v3263_v36 = vsub.f32 %v2897_v12, %v3125_v9  ;;  %v3151_v15 = vsub.f32 %v2976_v10, %v14273_v21  ;;  %11045 = vmatmul.mubr.f32.vlgmr.msra.gmra.mrb[124].mxu0 %v3311_v17  ;;  %v2978_v54 = vpop.f32.mrb[93].mxu1  ;;  %v12745_v52 = vpop.eup %12744 }
 0x2d2   : > { %11047 = vmatprep.mubr.msk.f32.mxu0 %vm12967_vm2, %v15948_v6  ;;  %12179 = vmatpush1.bf16.msra.mxu0 %v12178_v40  ;;  %v3295_v54 = vadd.f32 0.0009, %v14309_v51 }
 0x2d3   : > { %v14371_v16 = vadd.f32 %v3263_v36, %v3240_v5  ;;  %v3174_v22 = vmul.f32 2.0, %v3151_v15  ;;  %v3313_v43 = vmul.f32 %v12741_v13, %v3196_v49  ;;  %12180 = vmatprep.subr.bf16.mxu0 %v15949_v39  ;;  %v3294_v5 = vadd.f32 0.0009, %v14305_v30  ;;  %v12747_v36 = vpop.eup %12746 }
 0x2d4   : > { %v2981_v23 = vpop.f32.mrb[94].mxu1  ;;  %v12749_v42 = vpop.eup %12748 }
 0x2d5   : > { %v3197_v9 = vadd.f32 0.0009, %v3174_v22  ;;  %v3152_v21 = vsub.f32 %v2981_v23, %v14275_v33  ;;  %11048 = vmatmul.mubr.f32.gmra.mrb[126].mxu0 %v3313_v43  ;;  %v2983_v50 = vpop.f32.mrb[95].mxu1  ;;  %12752 = vrcp.f32 %v3294_v5 }
 0x2d6   : > { %11050 = vmatprep.mubr.msk.f32.mxu0 %vm12967_vm2, %v15948_v6  ;;  %12754 = vrcp.f32 %v3295_v54 }
 0x2d7   : > { %v3175_v34 = vmul.f32 2.0, %v3152_v21  ;;  %v3315_v58 = vmul.f32 %v12743_v26, %v3197_v9  ;;  %v3296_v9 = vadd.f32 0.0009, %v14313_v35 }
 0x2d8   : > { %v2986_v40 = vpop.f32.mrb[96].mxu1 }
 0x2d9   : > { %v3198_v17 = vadd.f32 0.0009, %v3175_v34  ;;  %v3153_v53 = vsub.f32 %v2986_v40, %v14279_v46  ;;  %11051 = vmatmul.mubr.f32.gmra.mrb[128].mxu0 %v3315_v58  ;;  %v2988_v37 = vpop.f32.mrb[97].mxu1  ;;  %v12751_v34 = vpop.eup %12750  ;;  %12756 = vrcp.f32 %v3296_v9  ;;  %v3301_v9 = vadd.f32 0.0009, %v14333_v59 }
 0x2da   : > { %11053 = vmatprep.mubr.msk.f32.mxu0 %vm12967_vm2, %v15948_v6  ;;  %12758 = vrcp.f32 %v3297_v38 }
 0x2db   : > { %v3176_v33 = vmul.f32 2.0, %v3153_v53  ;;  %v3317_v56 = vmul.f32 %v12745_v52, %v3198_v17 }
 0x2dc   : > { %v2991_v12 = vpop.f32.mrb[98].mxu1 }
 0x2dd   : > { %v3199_v10 = vadd.f32 0.0009, %v3176_v33  ;;  %v3154_v49 = vsub.f32 %v2991_v12, %v14283_v29  ;;  %11054 = vmatmul.mubr.f32.gmra.mrb[130].mxu0 %v3317_v56  ;;  %v2993_v20 = vpop.f32.mrb[99].mxu1  ;;  %v3298_v33 = vadd.f32 0.0009, %v14321_v45 }
 0x2de   : > { %11056 = vmatprep.mubr.msk.f32.mxu0 %vm12967_vm2, %v15948_v6  ;;  %v3299_v20 = vadd.f32 0.0009, %v14325_v44 }
 0x2df   : > { %v3177_v46 = vmul.f32 2.0, %v3154_v49  ;;  %v3319_v15 = vmul.f32 %v12747_v36, %v3199_v10  ;;  %v12753_v37 = vpop.eup %12752  ;;  %12760 = vrcp.f32 %v3298_v33 }
 0x2e0   : > { %v2996_v13 = vpop.f32.mrb[100].mxu1  ;;  %v12755_v10 = vpop.eup %12754  ;;  %12762 = vrcp.f32 %v3299_v20  ;;  %v3305_v20 = vadd.f32 0.0009, %v14350_v47 }
 0x2e1   : > { %v3200_v22 = vadd.f32 0.0009, %v3177_v46  ;;  %v3155_v43 = vsub.f32 %v2996_v13, %v14287_v19  ;;  %11057 = vmatmul.mubr.f32.gmra.mrb[132].mxu0 %v3319_v15  ;;  %v2998_v30 = vpop.f32.mrb[101].mxu1 }
 0x2e2   : > { %11059 = vmatprep.mubr.msk.f32.mxu0 %vm12967_vm2, %v15948_v6 }
 0x2e3   : > { %v3178_v29 = vmul.f32 2.0, %v3155_v43  ;;  %v3321_v23 = vmul.f32 %v12749_v42, %v3200_v22  ;;  %v12757_v54 = vpop.eup %12756  ;;  %v3300_v22 = vadd.f32 0.0009, %v14329_v31 }
 0x2e4   : > { %v3001_v21 = vpop.f32.mrb[102].mxu1 }
 0x2e5   : > { %v3201_v50 = vadd.f32 0.0009, %v3178_v29  ;;  %v3156_v26 = vsub.f32 %v3001_v21, %v14291_v32  ;;  %11060 = vmatmul.mubr.f32.gmra.mrb[134].mxu0 %v3321_v23  ;;  %v3003_v51 = vpop.f32.mrb[103].mxu1  ;;  %v12759_v29 = vpop.eup %12758  ;;  %12764 = vrcp.f32 %v3300_v22 }
 0x2e6   : > { %11062 = vmatprep.mubr.msk.f32.mxu0 %vm12967_vm2, %v15948_v6  ;;  %12766 = vrcp.f32 %v3301_v9 }
 0x2e7   : > { %v3179_v19 = vmul.f32 2.0, %v3156_v26  ;;  %v3323_v58 = vmul.f32 %v12751_v34, %v3201_v50 }
 0x2e8   : > { %v3006_v40 = vpop.f32.mrb[104].mxu1 }
 0x2e9   : > { %v3202_v17 = vadd.f32 0.0009, %v3179_v19  ;;  %v3157_v53 = vsub.f32 %v3006_v40, %v14295_v18  ;;  %11063 = vmatmul.mubr.f32.gmra.mrb[136].mxu0 %v3323_v58  ;;  %v3008_v35 = vpop.f32.mrb[105].mxu1  ;;  %v12761_v51 = vpop.eup %12760  ;;  %v3302_v19 = vadd.f32 0.0009, %v14337_v63 }
 0x2ea   : > { %11065 = vmatprep.mubr.msk.f32.mxu0 %vm12967_vm2, %v15948_v6  ;;  %v3303_v35 = vadd.f32 0.0009, %v14341_v27 }
 0x2eb   : > { %v3180_v32 = vmul.f32 2.0, %v3157_v53  ;;  %v3325_v52 = vmul.f32 %v12753_v37, %v3202_v17  ;;  %v12763_v17 = vpop.eup %12762  ;;  %12768 = vrcp.f32 %v3302_v19  ;;  %v3309_v19 = vadd.f32 0.0009, %v14371_v16 }
 0x2ec   : > { %v3011_v56 = vpop.f32.mrb[106].mxu1  ;;  %12770 = vrcp.f32 %v3303_v35 }
 0x2ed   : > { %v3203_v5 = vadd.f32 0.0009, %v3180_v32  ;;  %v3158_v12 = vsub.f32 %v3011_v56, %v14299_v48  ;;  %11066 = vmatmul.mubr.f32.gmra.mrb[138].mxu0 %v3325_v52  ;;  %v3013_v14 = vpop.f32.mrb[107].mxu1 }
 0x2ee   : > { %11068 = vmatprep.mubr.msk.f32.mxu0 %vm12967_vm2, %v15948_v6 }
 0x2ef   : > { %v3181_v18 = vmul.f32 2.0, %v3158_v12  ;;  %v3327_v49 = vmul.f32 %v12755_v10, %v3203_v5  ;;  %v12765_v33 = vpop.eup %12764  ;;  %v3304_v5 = vadd.f32 0.0009, %v14345_v55 }
 0x2f0   : > { %v3016_v36 = vpop.f32.mrb[108].mxu1 }
 0x2f1   : > { %v3204_v46 = vadd.f32 0.0009, %v3181_v18  ;;  %v3159_v15 = vsub.f32 %v3016_v36, %v14303_v11  ;;  %11069 = vmatmul.mubr.f32.gmra.mrb[140].mxu0 %v3327_v49  ;;  %v3018_v45 = vpop.f32.mrb[109].mxu1  ;;  %v12767_v18 = vpop.eup %12766  ;;  %12772 = vrcp.f32 %v3304_v5 }
 0x2f2   : > { %11071 = vmatprep.mubr.msk.f32.mxu0 %vm12967_vm2, %v15948_v6  ;;  %12774 = vrcp.f32 %v3305_v20 }
 0x2f3   : > { %v3182_v48 = vmul.f32 2.0, %v3159_v15  ;;  %v3329_v13 = vmul.f32 %v12757_v54, %v3204_v46 }
 0x2f4   : > { %v3021_v43 = vpop.f32.mrb[110].mxu1 }
 0x2f5   : > { %v3205_v30 = vadd.f32 0.0009, %v3182_v48  ;;  %v3160_v42 = vsub.f32 %v3021_v43, %v14307_v24  ;;  %11072 = vmatmul.mubr.f32.gmra.mrb[142].mxu0 %v3329_v13  ;;  %v3023_v44 = vpop.f32.mrb[111].mxu1  ;;  %v12769_v45 = vpop.eup %12768  ;;  %v3306_v48 = vadd.f32 0.0009, %v14355_v4 }
 0x2f6   : > { %11074 = vmatprep.mubr.msk.f32.mxu0 %vm12967_vm2, %v15948_v6  ;;  %v3307_v44 = vadd.f32 0.0009, %v14359_v2 }
 0x2f7   : > { %v3183_v11 = vmul.f32 2.0, %v3160_v42  ;;  %v3331_v23 = vmul.f32 %v12759_v29, %v3205_v30  ;;  %v12771_v30 = vpop.eup %12770  ;;  %12776 = vrcp.f32 %v3306_v48  ;;  %v12835_v48 = vld [vmem:[%s13204_s28 + $0x58] sm:$0xff] }
 0x2f8   : > { %v3026_v21 = vpop.f32.mrb[112].mxu1  ;;  %12778 = vrcp.f32 %v3307_v44  ;;  %v12840_v44 = vld [vmem:[%s13204_s28 + $0x80] sm:$0xff] }
 0x2f9   : > { %v3206_v50 = vadd.f32 0.0009, %v3183_v11  ;;  %v3161_v26 = vsub.f32 %v3026_v21, %v14311_v1  ;;  %11075 = vmatmul.mubr.f32.gmra.mrb[144].mxu0 %v3331_v23  ;;  %v3028_v31 = vpop.f32.mrb[113].mxu1 }
 0x2fa   : > { %11077 = vmatprep.mubr.msk.f32.mxu0 %vm12967_vm2, %v15948_v6 }
 0x2fb   : > { %v3184_v24 = vmul.f32 2.0, %v3161_v26  ;;  %v3333_v34 = vmul.f32 %v12761_v51, %v3206_v50  ;;  %v12773_v9 = vpop.eup %12772  ;;  %v3308_v50 = vadd.f32 0.0009, %v14365_v57 }
 0x2fc   : > { %v3031_v58 = vpop.f32.mrb[114].mxu1 }
 0x2fd   : > { %v3207_v38 = vadd.f32 0.0009, %v3184_v24  ;;  %v3162_v40 = vsub.f32 %v3031_v58, %v14315_v25  ;;  %11078 = vmatmul.mubr.f32.gmra.mrb[146].mxu0 %v3333_v34  ;;  %v3033_v59 = vpop.f32.mrb[115].mxu1  ;;  %v12775_v24 = vpop.eup %12774  ;;  %12780 = vrcp.f32 %v3308_v50 }
 0x2fe   : > { %11080 = vmatprep.mubr.msk.f32.mxu0 %vm12967_vm2, %v15948_v6  ;;  %12782 = vrcp.f32 %v3309_v19  ;;  %v12851_v19 = vld [vmem:[%s13213_s1 + $0x18] sm:$0xff] }
 0x2ff   : > { %v3335_v1 = vmul.f32 %v12763_v17, %v3207_v38  ;;  %v3185_v53 = vmul.f32 2.0, %v3162_v40 }
 0x300   : > { %v3036_v37 = vpop.f32.mrb[116].mxu1 }
 0x301   : > { %v3208_v32 = vadd.f32 0.0009, %v3185_v53  ;;  %v3163_v52 = vsub.f32 %v3036_v37, %v14319_v60  ;;  %11081 = vmatmul.mubr.f32.gmra.mrb[148].mxu0 %v3335_v1  ;;  %v3038_v63 = vpop.f32.mrb[117].mxu1  ;;  %v12777_v59 = vpop.eup %12776 }
 0x302   : > { %11083 = vmatprep.mubr.msk.f32.mxu0 %vm12967_vm2, %v15948_v6  ;;  %v12779_v16 = vpop.eup %12778 }
 0x303   : > { %v3337_v25 = vmul.f32 %v12765_v33, %v3208_v32  ;;  %v3186_v56 = vmul.f32 2.0, %v3163_v52 }
 0x304   : > { %v3041_v12 = vpop.f32.mrb[118].mxu1 }
 0x305   : > { %v3209_v14 = vadd.f32 0.0009, %v3186_v56  ;;  %v3164_v10 = vsub.f32 %v3041_v12, %v14323_v61  ;;  %11084 = vmatmul.mubr.f32.gmra.mrb[150].mxu0 %v3337_v25  ;;  %v3043_v27 = vpop.f32.mrb[119].mxu1 }
 0x306   : > { %11086 = vmatprep.mubr.msk.f32.mxu0 %vm12967_vm2, %v15948_v6  ;;  %v12827_v27 = vld [vmem:[%s13204_s28 + $0x18] sm:$0xff] }
 0x307   : > { %v3339_v60 = vmul.f32 %v12767_v18, %v3209_v14  ;;  %v3187_v49 = vmul.f32 2.0, %v3164_v10  ;;  %v12781_v56 = vpop.eup %12780 }
 0x308   : > { %v3046_v36 = vpop.f32.mrb[120].mxu1  ;;  %v12783_v14 = vpop.eup %12782 }
 0x309   : > { %v3210_v46 = vadd.f32 0.0009, %v3187_v49  ;;  %v3165_v15 = vsub.f32 %v3046_v36, %v14327_v62  ;;  %11087 = vmatmul.mubr.f32.gmra.mrb[152].mxu0 %v3339_v60  ;;  %v3048_v55 = vpop.f32.mrb[121].mxu1  ;;  %v12828_v60 = vld [vmem:[%s13204_s28 + $0x20] sm:$0xff]  ;;  %v12829_v49 = vld [vmem:[%s13204_s28 + $0x28] sm:$0xff]  ;;  %v12830_v36 = vld [vmem:[%s13204_s28 + $0x30] sm:$0xff] }
 0x30a   : > { %11089 = vmatprep.mubr.msk.f32.mxu0 %vm12967_vm2, %v15948_v6  ;;  %v12184_v20 = vpack.c.bf16 %v12829_v49, %v12828_v60  ;;  %v12832_v55 = vld [vmem:[%s13204_s28 + $0x40] sm:$0xff]  ;;  %v3638_v49 = vld [vmem:[%s13013_s29 + $0xd8] sm:$0xff] }
 0x30b   : > { %v3341_v61 = vmul.f32 %v12769_v45, %v3210_v46  ;;  %v3188_v54 = vmul.f32 2.0, %v3165_v15  ;;  %v12831_v46 = vld [vmem:[%s13204_s28 + $0x38] sm:$0xff]  ;;  %v12833_v45 = vld [vmem:[%s13204_s28 + $0x48] sm:$0xff]  ;;  %v3639_v60 = vld [vmem:[%s13013_s29 + $0xe0] sm:$0xff] }
 0x30c   : > { %v3051_v13 = vpop.f32.mrb[122].mxu1  ;;  %v12187_v15 = vpack.c.bf16 %v12831_v46, %v12830_v36  ;;  %v3641_v36 = vld [vmem:[%s13013_s29 + $0xf0] sm:$0xff] }
 0x30d   : > { %v3211_v22 = vadd.f32 0.0009, %v3188_v54  ;;  %v3166_v43 = vsub.f32 %v3051_v13, %v14331_v41  ;;  %11090 = vmatmul.mubr.f32.gmra.mrb[154].mxu0 %v3341_v61  ;;  %v3053_v47 = vpop.f32.mrb[123].mxu1  ;;  %v12190_v61 = vpack.c.bf16 %v12833_v45, %v12832_v55  ;;  %v12834_v54 = vld [vmem:[%s13204_s28 + $0x50] sm:$0xff]  ;;  %v3648_v55 = vld [vmem:[%s13013_s29 + $0x128] sm:$0xff]  ;;  %v3647_v45 = vld [vmem:[%s13013_s29 + $0x120] sm:$0xff] }
 0x30e   : > { %11092 = vmatprep.mubr.msk.f32.mxu0 %vm12967_vm2, %v15948_v6  ;;  %v12193_v13 = vpack.c.bf16 %v12835_v48, %v12834_v54  ;;  %v3645_v46 = vld [vmem:[%s13013_s29 + $0x110] sm:$0xff]  ;;  %v3650_v54 = vld [vmem:[%s13013_s29 + $0x138] sm:$0xff] }
 0x30f   : > { %v3343_v62 = vmul.f32 %v12771_v30, %v3211_v22  ;;  %v3189_v42 = vmul.f32 2.0, %v3166_v43  ;;  %v12836_v22 = vld [vmem:[%s13204_s28 + $0x60] sm:$0xff]  ;;  %v12837_v43 = vld [vmem:[%s13204_s28 + $0x68] sm:$0xff]  ;;  %v12838_v30 = vld [vmem:[%s13204_s28 + $0x70] sm:$0xff] }
 0x310   : > { %v3056_v29 = vpop.f32.mrb[124].mxu1  ;;  %v12196_v47 = vpack.c.bf16 %v12837_v43, %v12836_v22  ;;  %v3654_v22 = vld [vmem:[%s13013_s29 + $0x158] sm:$0xff]  ;;  %v3653_v43 = vld [vmem:[%s13013_s29 + $0x150] sm:$0xff] }
 0x311   : > { %v3212_v11 = vadd.f32 0.0009, %v3189_v42  ;;  %v3167_v23 = vsub.f32 %v3056_v29, %v14335_v0  ;;  %11093 = vmatmul.mubr.f32.gmra.mrb[156].mxu0 %v3343_v62  ;;  %v3058_v4 = vpop.f32.mrb[125].mxu1  ;;  %v12839_v62 = vld [vmem:[%s13204_s28 + $0x78] sm:$0xff]  ;;  %v12841_v29 = vld [vmem:[%s13204_s28 + $0x88] sm:$0xff] }
 0x312   : > { %11095 = vmatprep.mubr.msk.f32.mxu0 %vm12967_vm2, %v15948_v6  ;;  %v12199_v42 = vpack.c.bf16 %v12839_v62, %v12838_v30  ;;  %v12843_v4 = vld [vmem:[%s13204_s28 + $0x98] sm:$0xff] }
 0x313   : > { %v3345_v41 = vmul.f32 %v12773_v9, %v3212_v11  ;;  %v3190_v21 = vmul.f32 2.0, %v3167_v23  ;;  %v12202_v11 = vpack.c.bf16 %v12841_v29, %v12840_v44  ;;  %v12842_v23 = vld [vmem:[%s13204_s28 + $0x90] sm:$0xff]  ;;  %v3656_v44 = vld [vmem:[%s13013_s29 + $0x168] sm:$0xff] }
 0x314   : > { %v3061_v26 = vpop.f32.mrb[126].mxu1  ;;  %v12205_v9 = vpack.c.bf16 %v12843_v4, %v12842_v23  ;;  %v3660_v23 = vld [vmem:[%s13013_s29 + $0x188] sm:$0xff]  ;;  %v3659_v4 = vld [vmem:[%s13013_s29 + $0x180] sm:$0xff] }
 0x315   : > { %v3213_v31 = vadd.f32 0.0009, %v3190_v21  ;;  %v3168_v51 = vsub.f32 %v3061_v26, %v14339_v7  ;;  %11096 = vmatmul.mubr.f32.gmra.mrb[158].mxu0 %v3345_v41  ;;  %v3063_v2 = vpop.f32.mrb[127].mxu1  ;;  %v12844_v41 = vld [vmem:[%s13204_s28 + $0xa0] sm:$0xff]  ;;  %v12845_v21 = vld [vmem:[%s13204_s28 + $0xa8] sm:$0xff]  ;;  %v12846_v26 = vld [vmem:[%s13204_s28 + $0xb0] sm:$0xff] }
 0x316   : > { %11098 = vmatprep.mubr.msk.f32.mxu0 %vm12967_vm2, %v15948_v6  ;;  %v12208_v50 = vpack.c.bf16 %v12845_v21, %v12844_v41  ;;  %v12848_v2 = vld [vmem:[%s13213_s1] sm:$0xff] }
 0x317   : > { %v3347_v0 = vmul.f32 %v12775_v24, %v3213_v31  ;;  %v3191_v34 = vmul.f32 2.0, %v3168_v51  ;;  %v12847_v31 = vld [vmem:[%s13204_s28 + $0xb8] sm:$0xff]  ;;  %v12849_v24 = vld [vmem:[%s13213_s1 + $0x8] sm:$0xff] }
 0x318   : > { %v3066_v58 = vpop.f32.mrb[128].mxu1  ;;  %v12211_v51 = vpack.c.bf16 %v12847_v31, %v12846_v26  ;;  %v3662_v26 = vld [vmem:[%s13013_s29 + $0x198] sm:$0xff] }
 0x319   : > { %v3214_v38 = vadd.f32 0.0009, %v3191_v34  ;;  %v3169_v40 = vsub.f32 %v3066_v58, %v14343_v3  ;;  %11099 = vmatmul.mubr.f32.gmra.mrb[160].mxu0 %v3347_v0  ;;  %v3068_v57 = vpop.f32.mrb[129].mxu1  ;;  %v12214_v0 = vpack.c.bf16 %v12849_v24, %v12848_v2  ;;  %v12850_v34 = vld [vmem:[%s13213_s1 + $0x10] sm:$0xff]  ;;  %v3666_v2 = vld [vmem:[%s13013_s29 + $0x1b8] sm:$0xff] }
 0x31a   : > { %11101 = vmatprep.mubr.msk.f32.mxu0 %vm12967_vm2, %v15948_v6  ;;  %v12217_v58 = vpack.c.bf16 %v12851_v19, %v12850_v34  ;;  %v3665_v24 = vld [vmem:[%s13013_s29 + $0x1b0] sm:$0xff] }
 0x31b   : > { %v3349_v7 = vmul.f32 %v12777_v59, %v3214_v38  ;;  %v3192_v17 = vmul.f32 2.0, %v3169_v40  ;;  %v12852_v38 = vld [vmem:[%s13213_s1 + $0x20] sm:$0xff]  ;;  %v12853_v40 = vld [vmem:[%s13213_s1 + $0x28] sm:$0xff]  ;;  %v12854_v59 = vld [vmem:[%s13213_s1 + $0x30] sm:$0xff] }
 0x31c   : > { %v3071_v1 = vpop.f32.mrb[130].mxu1  ;;  %v12220_v57 = vpack.c.bf16 %v12853_v40, %v12852_v38  ;;  %v3668_v38 = vld [vmem:[%s13013_s29 + $0x1c8] sm:$0xff] }
 0x31d   : > { %v3215_v53 = vadd.f32 0.0009, %v3192_v17  ;;  %v3170_v35 = vsub.f32 %v3071_v1, %v14348_v8  ;;  %11102 = vmatmul.mubr.f32.gmra.mrb[162].mxu0 %v3349_v7  ;;  %v3073_v37 = vpop.f32.mrb[131].mxu1  ;;  %v12855_v7 = vld [vmem:[%s13213_s1 + $0x38] sm:$0xff]  ;;  %v3612_v1 = vld [vmem:[%s13013_s29 + $0x8] sm:$0xff] }
 0x31e   : > { %11104 = vmatprep.mubr.msk.f32.mxu0 %vm12967_vm2, %v15948_v6  ;;  %v12223_v17 = vpack.c.bf16 %v12855_v7, %v12854_v59  ;;  %v3614_v37 = vld [vmem:[%s13013_s29 + $0x18] sm:$0xff]  ;;  %v3672_v59 = vld [vmem:[%s13013_s29 + $0x1e8] sm:$0xff]  ;;  %v3671_v7 = vld [vmem:[%s13013_s29 + $0x1e0] sm:$0xff] }
 0x31f   : > { %v3351_v3 = vmul.f32 %v12779_v16, %v3215_v53  ;;  %v3193_v32 = vmul.f32 2.0, %v3170_v35  ;;  %v3611_v53 = vld [vmem:[%s13013_s29] sm:$0xff]  ;;  %v3618_v16 = vld [vmem:[%s13013_s29 + $0x38] sm:$0xff] }
 0x320   : > { %v3076_v52 = vpop.f32.mrb[132].mxu1  ;;  %v3615_v35 = vld [vmem:[%s13013_s29 + $0x20] sm:$0xff] }
 0x321   : > { %v3216_v63 = vadd.f32 0.0009, %v3193_v32  ;;  %v3171_v33 = vsub.f32 %v3076_v52, %v14353_v28  ;;  %11105 = vmatmul.mubr.f32.gmra.mrb[164].mxu0 %v3351_v3  ;;  %v3078_v25 = vpop.f32.mrb[133].mxu1  ;;  %v12826_v28 = vld [vmem:[%s13204_s28 + $0x10] sm:$0xff]  ;;  %v3620_v52 = vld [vmem:[%s13013_s29 + $0x48] sm:$0xff]  ;;  %s15980_s28 = sld [smem:[#allocation12_spill]] }
 0x322   : > { %11107 = vmatprep.mubr.msk.f32.mxu0 %vm12967_vm2, %v15948_v6  ;;  %v12181_v18 = vpack.c.bf16 %v12827_v27, %v12826_v28  ;;  %v3617_v3 = vld [vmem:[%s13013_s29 + $0x30] sm:$0xff]  ;;  %v3624_v25 = vld [vmem:[%s13013_s29 + $0x68] sm:$0xff] }
 0x323   : > { %v3353_v8 = vmul.f32 %v12781_v56, %v3216_v63  ;;  %v3194_v5 = vmul.f32 2.0, %v3171_v33  ;;  %v3621_v32 = vld [vmem:[%s13013_s29 + $0x50] sm:$0xff]  ;;  %v14507_v63 = vld [vmem:[%s13008_s25] sm:$0xff]  ;;  %v3632_v28 = vld [vmem:[%s13013_s29 + $0xa8] sm:$0xff] }
 0x324   : > { %12182 = vmatpush1.bf16.msra.mxu0 %v12181_v18  ;;  %v3537_v33 = vcombine.high %v14507_v63, %v14507_v63  ;;  %v3623_v56 = vld [vmem:[%s13013_s29 + $0x60] sm:$0xff]  ;;  %v3636_v27 = vld [vmem:[%s13013_s29 + $0xc8] sm:$0xff] }
 0x325   : > { %v3217_v12 = vadd.f32 0.0009, %v3194_v5  ;;  %11108 = vmatmul.mubr.f32.gmra.mrb[166].mxu0 %v3353_v8  ;;  %12183 = vmatprep.subr.bf16.mxu0 %v15949_v39  ;;  %v3627_v8 = vld [vmem:[%s13013_s29 + $0x80] sm:$0xff]  ;;  %v3626_v5 = vld [vmem:[%s13013_s29 + $0x78] sm:$0xff] }
 0x326   : > { %11110 = vmatprep.mubr.msk.f32.mxu0 %vm12967_vm2, %v15948_v6  ;;  %9891 = vmatprep.mubr.msk.f32.mxu1 %vm3538_vm3, %v3537_v33  ;;  %v3635_v18 = vld [vmem:[%s13013_s29 + $0xc0] sm:$0xff]  ;;  %vm9574_vm3 = vcmask 15360  }
 0x327   : > { %v3355_v10 = vmul.f32 %v12783_v14, %v3217_v12  ;;  %v3630_v12 = vld [vmem:[%s13013_s29 + $0x98] sm:$0xff]  ;;  %v3629_v14 = vld [vmem:[%s13013_s29 + $0x90] sm:$0xff] }
 0x328   : > { %12185 = vmatpush1.bf16.msra.mxu0 %v12184_v20  ;;  %v3642_v20 = vld [vmem:[%s13013_s29 + $0xf8] sm:$0xff] }
 0x329   : > { %11111 = vmatmul.mubr.f32.gmra.mrb[168].mxu0 %v3355_v10  ;;  %12186 = vmatprep.subr.bf16.mxu0 %v15949_v39  ;;  %v3633_v10 = vld [vmem:[%s13013_s29 + $0xb0] sm:$0xff] }
 0x32a   : > { %3753 = vmatprep.mubr.f32.mxu0 %v3612_v1 }
 0x32c   : > { %12188 = vmatpush1.bf16.msra.mxu0 %v12187_v15  ;;  %v3644_v15 = vld [vmem:[%s13013_s29 + $0x108] sm:$0xff] }
 0x32d   : > { %12189 = vmatprep.subr.bf16.mxu0 %v15949_v39 }
 0x330   : > { %12191 = vmatpush1.bf16.msra.mxu0 %v12190_v61  ;;  %v3651_v61 = vld [vmem:[%s13013_s29 + $0x140] sm:$0xff] }
 0x331   : > { %12192 = vmatprep.subr.bf16.mxu0 %v15949_v39 }
 0x334   : > { %12194 = vmatpush1.bf16.msra.mxu0 %v12193_v13 }
 0x335   : > { %12195 = vmatprep.subr.bf16.mxu0 %v15949_v39 }
 0x338   : > { %12197 = vmatpush1.bf16.msra.mxu0 %v12196_v47 }
 0x339   : > { %12198 = vmatprep.subr.bf16.mxu0 %v15949_v39 }
 0x33c   : > { %12200 = vmatpush1.bf16.msra.mxu0 %v12199_v42  ;;  %v3657_v42 = vld [vmem:[%s13013_s29 + $0x170] sm:$0xff] }
 0x33d   : > { %12201 = vmatprep.subr.bf16.mxu0 %v15949_v39 }
 0x340   : > { %12203 = vmatpush1.bf16.msra.mxu0 %v12202_v11 }
 0x341   : > { %12204 = vmatprep.subr.bf16.mxu0 %v15949_v39 }
 0x344   : > { %12206 = vmatpush1.bf16.msra.mxu0 %v12205_v9 }
 0x345   : > { %12207 = vmatprep.subr.bf16.mxu0 %v15949_v39 }
 0x348   : > { %12209 = vmatpush1.bf16.msra.mxu0 %v12208_v50  ;;  %v3663_v50 = vld [vmem:[%s13013_s29 + $0x1a0] sm:$0xff] }
 0x349   : > { %12210 = vmatprep.subr.bf16.mxu0 %v15949_v39 }
 0x34c   : > { %12212 = vmatpush1.bf16.msra.mxu0 %v12211_v51 }
 0x34d   : > { %12213 = vmatprep.subr.bf16.mxu0 %v15949_v39 }
 0x350   : > { %12215 = vmatpush1.bf16.msra.mxu0 %v12214_v0 }
 0x351   : > { %12216 = vmatprep.subr.bf16.mxu0 %v15949_v39 }
 0x354   : > { %12218 = vmatpush1.bf16.msra.mxu0 %v12217_v58  ;;  %v3669_v58 = vld [vmem:[%s13013_s29 + $0x1d0] sm:$0xff] }
 0x355   : > { %12219 = vmatprep.subr.bf16.mxu0 %v15949_v39 }
 0x358   : > { %12221 = vmatpush1.bf16.msra.mxu0 %v12220_v57 }
 0x359   : > { %12222 = vmatprep.subr.bf16.mxu0 %v15949_v39 }
 0x35c   : > { %12224 = vmatpush1.bf16.msra.mxu0 %v12223_v17 }
 0x35f   : > { %3754 = vmatmul.mubr.f32.vlgmr.msra.gmra.mrb[170].mxu0 %v3611_v53 }
 0x360   : > { %3758 = vmatprep.mubr.f32.mxu0 %v3615_v35  ;;  %v3675_v35 = vld [vmem:[%s13013_s29 + $0x200] sm:$0xff] }
 0x363   : > { %3759 = vmatmul.mubr.f32.gmra.mrb[172].mxu0 %v3614_v37  ;;  %v3674_v37 = vld [vmem:[%s13013_s29 + $0x1f8] sm:$0xff] }
 0x364   : > { %3763 = vmatprep.mubr.f32.mxu0 %v3618_v16 }
 0x367   : > { %3764 = vmatmul.mubr.f32.gmra.mrb[174].mxu0 %v3617_v3 }
 0x368   : > { %3768 = vmatprep.mubr.f32.mxu0 %v3621_v32  ;;  %v3678_v32 = vld [vmem:[%s13013_s29 + $0x218] sm:$0xff] }
 0x36b   : > { %3769 = vmatmul.mubr.f32.gmra.mrb[176].mxu0 %v3620_v52  ;;  %v3677_v52 = vld [vmem:[%s13013_s29 + $0x210] sm:$0xff] }
 0x36c   : > { %3773 = vmatprep.mubr.f32.mxu0 %v3624_v25 }
 0x36f   : > { %3774 = vmatmul.mubr.f32.gmra.mrb[178].mxu0 %v3623_v56 }
 0x370   : > { %3778 = vmatprep.mubr.f32.mxu0 %v3627_v8  ;;  %v3681_v8 = vld [vmem:[%s13013_s29 + $0x230] sm:$0xff] }
 0x373   : > { %3779 = vmatmul.mubr.f32.gmra.mrb[180].mxu0 %v3626_v5  ;;  %v3680_v5 = vld [vmem:[%s13013_s29 + $0x228] sm:$0xff] }
 0x374   : > { %3783 = vmatprep.mubr.f32.mxu0 %v3630_v12 }
 0x377   : > { %3784 = vmatmul.mubr.f32.gmra.mrb[182].mxu0 %v3629_v14 }
 0x378   : > { %3788 = vmatprep.mubr.f32.mxu0 %v3633_v10 }
 0x37b   : > { %3789 = vmatmul.mubr.f32.gmra.mrb[184].mxu0 %v3632_v28 }
 0x37c   : > { %3793 = vmatprep.mubr.f32.mxu0 %v3636_v27 }
 0x37f   : > { %3794 = vmatmul.mubr.f32.gmra.mrb[186].mxu0 %v3635_v18 }
 0x380   : > { %3798 = vmatprep.mubr.f32.mxu0 %v3639_v60 }
 0x383   : > { %3799 = vmatmul.mubr.f32.gmra.mrb[188].mxu0 %v3638_v49 }
 0x384   : > { %3803 = vmatprep.mubr.f32.mxu0 %v3642_v20 }
 0x387   : > { %3804 = vmatmul.mubr.f32.gmra.mrb[190].mxu0 %v3641_v36 }
 0x388   : > { %3808 = vmatprep.mubr.f32.mxu0 %v3645_v46 }
 0x38b   : > { %3809 = vmatmul.mubr.f32.gmra.mrb[192].mxu0 %v3644_v15 }
 0x38c   : > { %3813 = vmatprep.mubr.f32.mxu0 %v3648_v55 }
 0x38f   : > { %3814 = vmatmul.mubr.f32.gmra.mrb[194].mxu0 %v3647_v45 }
 0x390   : > { %3818 = vmatprep.mubr.f32.mxu0 %v3651_v61 }
 0x393   : > { %3819 = vmatmul.mubr.f32.gmra.mrb[196].mxu0 %v3650_v54 }
 0x394   : > { %3823 = vmatprep.mubr.f32.mxu0 %v3654_v22 }
 0x397   : > { %3824 = vmatmul.mubr.f32.gmra.mrb[198].mxu0 %v3653_v43 }
 0x398   : > { %3828 = vmatprep.mubr.f32.mxu0 %v3657_v42 }
 0x39b   : > { %3829 = vmatmul.mubr.f32.gmra.mrb[200].mxu0 %v3656_v44 }
 0x39c   : > { %3833 = vmatprep.mubr.f32.mxu0 %v3660_v23 }
 0x39f   : > { %3834 = vmatmul.mubr.f32.gmra.mrb[202].mxu0 %v3659_v4 }
 0x3a0   : > { %3838 = vmatprep.mubr.f32.mxu0 %v3663_v50  ;;  %v12857_v50 = vld [vmem:[%s13213_s1 + $0x48] sm:$0xff] }
 0x3a3   : > { %3839 = vmatmul.mubr.f32.gmra.mrb[204].mxu0 %v3662_v26 }
 0x3a4   : > { %v3422_v48 = vpop.f32.mrb[124].mxu0  ;;  %3843 = vmatprep.mubr.f32.mxu0 %v3666_v2  ;;  %v12859_v2 = vld [vmem:[%s13213_s1 + $0x58] sm:$0xff] }
 0x3a5   : > { %v11046_v13 = vpop.f32.mrb[125].mxu0 }
 0x3a7   : > { %3844 = vmatmul.mubr.f32.gmra.mrb[206].mxu0 %v3665_v24 }
 0x3a8   : > { %v3427_v47 = vpop.f32.mrb[126].mxu0  ;;  %3848 = vmatprep.mubr.f32.mxu0 %v3669_v58 }
 0x3a9   : > { %v12145_v30 = vpack.c.bf16 %v3427_v47, %v3422_v48  ;;  %v11049_v62 = vpop.f32.mrb[127].mxu0 }
 0x3ab   : > { %12146 = vmatpush1.bf16.msra.mxu1 %v12145_v30  ;;  %3849 = vmatmul.mubr.f32.gmra.mrb[208].mxu0 %v3668_v38  ;;  %v12862_v38 = vld [vmem:[%s13213_s1 + $0x70] sm:$0xff] }
 0x3ac   : > { %v3432_v29 = vpop.f32.mrb[128].mxu0  ;;  %12147 = vmatprep.subr.bf16.mxu1 %v15949_v39  ;;  %3853 = vmatprep.mubr.f32.mxu0 %v3672_v59  ;;  %v12864_v59 = vld [vmem:[%s13213_s1 + $0x80] sm:$0xff] }
 0x3ad   : > { %v11052_v11 = vpop.f32.mrb[129].mxu0 }
 0x3af   : > { %3854 = vmatmul.mubr.f32.gmra.mrb[210].mxu0 %v3671_v7 }
 0x3b0   : > { %v3437_v9 = vpop.f32.mrb[130].mxu0  ;;  %3858 = vmatprep.mubr.f32.mxu0 %v3675_v35  ;;  %v12868_v35 = vld [vmem:[%s13213_s1 + $0xa0] sm:$0xff] }
 0x3b1   : > { %v12148_v41 = vpack.c.bf16 %v3437_v9, %v3432_v29  ;;  %v11055_v21 = vpop.f32.mrb[131].mxu0 }
 0x3b2   : > { %v12856_v21 = vld [vmem:[%s13213_s1 + $0x40] sm:$0xff] }
 0x3b3   : > { %12149 = vmatpush1.bf16.msra.mxu1 %v12148_v41  ;;  %3859 = vmatmul.mubr.f32.gmra.mrb[212].mxu0 %v3674_v37  ;;  %v12225_v26 = vpack.c.bf16 %v12857_v50, %v12856_v21  ;;  %v12869_v37 = vld [vmem:[%s13213_s1 + $0xa8] sm:$0xff]  ;;  %v3686_v21 = vld [vmem:[%s15925_s3 + $0x18] sm:$0xff] }
 0x3b4   : > { %v3442_v31 = vpop.f32.mrb[132].mxu0  ;;  %12150 = vmatprep.subr.bf16.mxu1 %v15949_v39  ;;  %3863 = vmatprep.mubr.f32.mxu0 %v3678_v32  ;;  %v12871_v32 = vld [vmem:[%s13213_s1 + $0xb8] sm:$0xff] }
 0x3b5   : > { %v11058_v51 = vpop.f32.mrb[133].mxu0 }
 0x3b6   : > { %v12858_v51 = vld [vmem:[%s13213_s1 + $0x50] sm:$0xff] }
 0x3b7   : > { %3864 = vmatmul.mubr.f32.gmra.mrb[214].mxu0 %v3677_v52  ;;  %v12229_v24 = vpack.c.bf16 %v12859_v2, %v12858_v51 }
 0x3b8   : > { %v3447_v0 = vpop.f32.mrb[134].mxu0  ;;  %3868 = vmatprep.mubr.f32.mxu0 %v3681_v8  ;;  %v3616_v8 = vld [vmem:[%s13013_s29 + $0x28] sm:$0xff] }
 0x3b9   : > { %v12151_v34 = vpack.c.bf16 %v3447_v0, %v3442_v31  ;;  %v11061_v19 = vpop.f32.mrb[135].mxu0  ;;  %v3613_v0 = vld [vmem:[%s13013_s29 + $0x10] sm:$0xff] }
 0x3ba   : > { %v12861_v19 = vld [vmem:[%s13213_s1 + $0x68] sm:$0xff] }
 0x3bb   : > { %12152 = vmatpush1.bf16.msra.mxu1 %v12151_v34  ;;  %3869 = vmatmul.mubr.f32.gmra.mrb[216].mxu0 %v3680_v5  ;;  %v12860_v34 = vld [vmem:[%s13213_s1 + $0x60] sm:$0xff] }
 0x3bc   : > { %v3452_v40 = vpop.f32.mrb[136].mxu0  ;;  %12153 = vmatprep.subr.bf16.mxu1 %v15949_v39  ;;  %v12233_v58 = vpack.c.bf16 %v12861_v19, %v12860_v34  ;;  %v3619_v5 = vld [vmem:[%s13013_s29 + $0x40] sm:$0xff] }
 0x3bd   : > { %v11064_v57 = vpop.f32.mrb[137].mxu0 }
 0x3c0   : > { %v3457_v17 = vpop.f32.mrb[138].mxu0 }
 0x3c1   : > { %v12154_v1 = vpack.c.bf16 %v3457_v17, %v3452_v40  ;;  %v11067_v53 = vpop.f32.mrb[139].mxu0  ;;  %v12863_v40 = vld [vmem:[%s13213_s1 + $0x78] sm:$0xff]  ;;  %v12866_v17 = vld [vmem:[%s13213_s1 + $0x90] sm:$0xff] }
 0x3c2   : > { %v12237_v57 = vpack.c.bf16 %v12863_v40, %v12862_v38 }
 0x3c3   : > { %12155 = vmatpush1.bf16.msra.mxu1 %v12154_v1  ;;  %v12867_v1 = vld [vmem:[%s13213_s1 + $0x98] sm:$0xff] }
 0x3c4   : > { %v3462_v16 = vpop.f32.mrb[140].mxu0  ;;  %12156 = vmatprep.subr.bf16.mxu1 %v15949_v39  ;;  %v12245_v53 = vpack.c.bf16 %v12867_v1, %v12866_v17  ;;  %v3687_v17 = vld [vmem:[%s15925_s3 + $0x20] sm:$0xff]  ;;  %v3688_v1 = vld [vmem:[%s15925_s3 + $0x28] sm:$0xff] }
 0x3c5   : > { %v11070_v3 = vpop.f32.mrb[141].mxu0 }
 0x3c6   : > { %v12870_v3 = vld [vmem:[%s13213_s1 + $0xb0] sm:$0xff] }
 0x3c7   : > { %v12253_v52 = vpack.c.bf16 %v12871_v32, %v12870_v3 }
 0x3c8   : > { %v3467_v33 = vpop.f32.mrb[142].mxu0 }
 0x3c9   : > { %v12157_v25 = vpack.c.bf16 %v3467_v33, %v3462_v16  ;;  %v11073_v56 = vpop.f32.mrb[143].mxu0  ;;  %v12249_v16 = vpack.c.bf16 %v12869_v37, %v12868_v35  ;;  %v3683_v33 = vld [vmem:[%s15925_s3] sm:$0xff] }
 0x3cb   : > { %12158 = vmatpush1.bf16.msra.mxu1 %v12157_v25  ;;  %v3684_v25 = vld [vmem:[%s15925_s3 + $0x8] sm:$0xff] }
 0x3cc   : > { %v3472_v12 = vpop.f32.mrb[144].mxu0  ;;  %12159 = vmatprep.subr.bf16.mxu1 %v15949_v39  ;;  %v12257_v56 = vpack.c.bf16 %v3684_v25, %v3683_v33 }
 0x3cd   : > { %v11076_v14 = vpop.f32.mrb[145].mxu0 }
 0x3ce   : > { %v3625_v14 = vld [vmem:[%s13013_s29 + $0x70] sm:$0xff] }
 0x3d0   : > { %v3477_v10 = vpop.f32.mrb[146].mxu0 }
 0x3d1   : > { %v12160_v28 = vpack.c.bf16 %v3477_v10, %v3472_v12  ;;  %v11079_v27 = vpop.f32.mrb[147].mxu0  ;;  %v3622_v12 = vld [vmem:[%s13013_s29 + $0x58] sm:$0xff]  ;;  %v3628_v10 = vld [vmem:[%s13013_s29 + $0x88] sm:$0xff] }
 0x3d2   : > { %v3634_v27 = vld [vmem:[%s13013_s29 + $0xb8] sm:$0xff] }
 0x3d3   : > { %12161 = vmatpush1.bf16.msra.mxu1 %v12160_v28  ;;  %v3631_v28 = vld [vmem:[%s13013_s29 + $0xa0] sm:$0xff] }
 0x3d4   : > { %v3482_v18 = vpop.f32.mrb[148].mxu0  ;;  %12162 = vmatprep.subr.bf16.mxu1 %v15949_v39 }
 0x3d5   : > { %v11082_v60 = vpop.f32.mrb[149].mxu0 }
 0x3d6   : > { %v3640_v60 = vld [vmem:[%s13013_s29 + $0xe8] sm:$0xff] }
 0x3d8   : > { %v3487_v49 = vpop.f32.mrb[150].mxu0 }
 0x3d9   : > { %v12163_v20 = vpack.c.bf16 %v3487_v49, %v3482_v18  ;;  %v11085_v36 = vpop.f32.mrb[151].mxu0  ;;  %v3637_v18 = vld [vmem:[%s13013_s29 + $0xd0] sm:$0xff]  ;;  %v3643_v49 = vld [vmem:[%s13013_s29 + $0x100] sm:$0xff] }
 0x3da   : > { %v3649_v36 = vld [vmem:[%s13013_s29 + $0x130] sm:$0xff] }
 0x3db   : > { %12164 = vmatpush1.bf16.msra.mxu1 %v12163_v20  ;;  %v3646_v20 = vld [vmem:[%s13013_s29 + $0x118] sm:$0xff] }
 0x3dc   : > { %v3492_v46 = vpop.f32.mrb[152].mxu0  ;;  %12165 = vmatprep.subr.bf16.mxu1 %v15949_v39 }
 0x3dd   : > { %v11088_v15 = vpop.f32.mrb[153].mxu0 }
 0x3de   : > { %v3655_v15 = vld [vmem:[%s13013_s29 + $0x160] sm:$0xff] }
 0x3e0   : > { %v3497_v55 = vpop.f32.mrb[154].mxu0 }
 0x3e1   : > { %v12166_v45 = vpack.c.bf16 %v3497_v55, %v3492_v46  ;;  %v11091_v61 = vpop.f32.mrb[155].mxu0  ;;  %v3652_v46 = vld [vmem:[%s13013_s29 + $0x148] sm:$0xff]  ;;  %v3658_v55 = vld [vmem:[%s13013_s29 + $0x178] sm:$0xff] }
 0x3e2   : > { %v3664_v61 = vld [vmem:[%s13013_s29 + $0x1a8] sm:$0xff] }
 0x3e3   : > { %12167 = vmatpush1.bf16.msra.mxu1 %v12166_v45  ;;  %v3661_v45 = vld [vmem:[%s13013_s29 + $0x190] sm:$0xff] }
 0x3e4   : > { %v3502_v54 = vpop.f32.mrb[156].mxu0  ;;  %12168 = vmatprep.subr.bf16.mxu1 %v15949_v39 }
 0x3e5   : > { %v11094_v48 = vpop.f32.mrb[157].mxu0 }
 0x3e6   : > { %v3670_v48 = vld [vmem:[%s13013_s29 + $0x1d8] sm:$0xff] }
 0x3e8   : > { %v3507_v13 = vpop.f32.mrb[158].mxu0 }
 0x3e9   : > { %v12169_v22 = vpack.c.bf16 %v3507_v13, %v3502_v54  ;;  %v11097_v43 = vpop.f32.mrb[159].mxu0  ;;  %v3667_v54 = vld [vmem:[%s13013_s29 + $0x1c0] sm:$0xff]  ;;  %v3673_v13 = vld [vmem:[%s13013_s29 + $0x1f0] sm:$0xff] }
 0x3eb   : > { %12170 = vmatpush1.bf16.msra.mxu1 %v12169_v22 }
 0x3ec   : > { %v3512_v47 = vpop.f32.mrb[160].mxu0  ;;  %12171 = vmatprep.subr.bf16.mxu1 %v15949_v39 }
 0x3ed   : > { %v11100_v30 = vpop.f32.mrb[161].mxu0 }
 0x3ee   : > { %v3679_v30 = vld [vmem:[%s13013_s29 + $0x220] sm:$0xff] }
 0x3f0   : > { %v3517_v62 = vpop.f32.mrb[162].mxu0 }
 0x3f1   : > { %v12172_v42 = vpack.c.bf16 %v3517_v62, %v3512_v47  ;;  %v11103_v44 = vpop.f32.mrb[163].mxu0  ;;  %v3676_v47 = vld [vmem:[%s13013_s29 + $0x208] sm:$0xff] }
 0x3f2   : > { %v3682_v44 = vld [vmem:[%s13013_s29 + $0x238] sm:$0xff] }
 0x3f3   : > { %12173 = vmatpush1.bf16.msra.mxu1 %v12172_v42 }
 0x3f4   : > { %v3522_v29 = vpop.f32.mrb[164].mxu0  ;;  %12174 = vmatprep.subr.bf16.mxu1 %v15949_v39 }
 0x3f5   : > { %v11106_v11 = vpop.f32.mrb[165].mxu0 }
 0x3f8   : > { %v3527_v23 = vpop.f32.mrb[166].mxu0 }
 0x3f9   : > { %v12175_v4 = vpack.c.bf16 %v3527_v23, %v3522_v29  ;;  %v11109_v9 = vpop.f32.mrb[167].mxu0 }
 0x3fb   : > { %12176 = vmatpush1.bf16.msra.mxu1 %v12175_v4 }
 0x3fc   : > { %v3532_v41 = vpop.f32.mrb[168].mxu0  ;;  %3585 = vmatprep.subr.mxu1 %v15948_v6 }
 0x3fd   : > { %v11112_v31 = vpop.f32.mrb[169].mxu0 }
 0x3ff   : > { %3586 = vmatpush1.msra.mxu1 %v3532_v41  ;;  %v3685_v41 = vld [vmem:[%s15925_s3 + $0x10] sm:$0xff]  ;;  %s15984_s3 = sld [smem:[#allocation14_spill]] }
 0x400   : > { %12226 = vmatprep.subr.bf16.mxu1 %v12225_v26  ;;  %3606 = vmatmul.mubr.f32.vlgmr.msra.gmra.mrb[134].mxu1 %v14507_v63  ;;  %v12865_v63 = vld [vmem:[%s13213_s1 + $0x88] sm:$0xff]  ;;  %s15981_s1 = sld [smem:[#allocation13_spill]] }
 0x401   : > { %12228 = vmatpush3.bf16.msra.mxu1 %v12225_v26  ;;  %11145 = vmatprep.mubr.f32.mxu1 %v3613_v0  ;;  %v12241_v7 = vpack.c.bf16 %v12865_v63, %v12864_v59  ;;  %v12261_v26 = vpack.c.bf16 %v3686_v21, %v3685_v41 }
 0x402   : > { %12230 = vmatprep.subr.bf16.mxu1 %v12229_v24 }
 0x405   : > { %12232 = vmatpush3.bf16.msra.mxu1 %v12229_v24 }
 0x406   : > { %12234 = vmatprep.subr.bf16.mxu1 %v12233_v58 }
 0x409   : > { %12236 = vmatpush3.bf16.msra.mxu1 %v12233_v58 }
 0x40a   : > { %12238 = vmatprep.subr.bf16.mxu1 %v12237_v57 }
 0x40d   : > { %12240 = vmatpush3.bf16.msra.mxu1 %v12237_v57 }
 0x40e   : > { %12242 = vmatprep.subr.bf16.mxu1 %v12241_v7 }
 0x411   : > { %12244 = vmatpush3.bf16.msra.mxu1 %v12241_v7 }
 0x412   : > { %12246 = vmatprep.subr.bf16.mxu1 %v12245_v53 }
 0x415   : > { %12248 = vmatpush3.bf16.msra.mxu1 %v12245_v53  ;;  %v12265_v53 = vpack.c.bf16 %v3688_v1, %v3687_v17 }
 0x416   : > { %12250 = vmatprep.subr.bf16.mxu1 %v12249_v16 }
 0x419   : > { %12252 = vmatpush3.bf16.msra.mxu1 %v12249_v16 }
 0x41a   : > { %12254 = vmatprep.subr.bf16.mxu1 %v12253_v52 }
 0x41d   : > { %12256 = vmatpush3.bf16.msra.mxu1 %v12253_v52 }
 0x41e   : > { %12258 = vmatprep.subr.bf16.mxu1 %v12257_v56 }
 0x420   : > { %11146 = vmatmul.mubr.f32.vlgmr.msra.gmra.mrb[136].mxu1 %v3616_v8 }
 0x421   : > { %11148 = vmatprep.mubr.f32.mxu1 %v3619_v5  ;;  %12260 = vmatpush3.bf16.msra.mxu1 %v12257_v56 }
 0x422   : > { %12262 = vmatprep.subr.bf16.mxu1 %v12261_v26 }
 0x424   : > { %11149 = vmatmul.mubr.f32.gmra.mrb[138].mxu1 %v3622_v12 }
 0x425   : > { %11151 = vmatprep.mubr.f32.mxu1 %v3625_v14  ;;  %12264 = vmatpush3.bf16.msra.mxu1 %v12261_v26 }
 0x426   : > { %12266 = vmatprep.subr.bf16.mxu1 %v12265_v53 }
 0x428   : > { %11152 = vmatmul.mubr.f32.gmra.mrb[140].mxu1 %v3628_v10 }
 0x429   : > { %11154 = vmatprep.mubr.f32.mxu1 %v3631_v28  ;;  %12268 = vmatpush3.bf16.msra.mxu1 %v12265_v53 }
 0x42c   : > { %11155 = vmatmul.mubr.f32.gmra.mrb[142].mxu1 %v3634_v27 }
 0x42d   : > { %11157 = vmatprep.mubr.f32.mxu1 %v3637_v18 }
 0x430   : > { %11158 = vmatmul.mubr.f32.gmra.mrb[144].mxu1 %v3640_v60 }
 0x431   : > { %11160 = vmatprep.mubr.f32.mxu1 %v3643_v49 }
 0x432   : > { %v14602_v22 = vpop.f32.mrb[170].mxu0 }
 0x433   : > { %v3757_v43 = vpop.f32.mrb[171].mxu0 }
 0x434   : > { %11161 = vmatmul.mubr.f32.gmra.mrb[146].mxu1 %v3646_v20 }
 0x435   : > { %11163 = vmatprep.mubr.f32.mxu1 %v3649_v36 }
 0x436   : > { %v14606_v62 = vpop.f32.mrb[172].mxu0 }
 0x437   : > { %v3762_v42 = vpop.f32.mrb[173].mxu0 }
 0x438   : > { %11164 = vmatmul.mubr.f32.gmra.mrb[148].mxu1 %v3652_v46 }
 0x439   : > { %11166 = vmatprep.mubr.f32.mxu1 %v3655_v15 }
 0x43a   : > { %v14609_v29 = vpop.f32.mrb[174].mxu0 }
 0x43b   : > { %v3767_v11 = vpop.f32.mrb[175].mxu0 }
 0x43c   : > { %11167 = vmatmul.mubr.f32.gmra.mrb[150].mxu1 %v3658_v55 }
 0x43d   : > { %11169 = vmatprep.mubr.f32.mxu1 %v3661_v45  ;;  %v4316_v45 = vld [vmem:[%s15923_s8] sm:$0xff] }
 0x43e   : > { %v14611_v23 = vpop.f32.mrb[176].mxu0 }
 0x43f   : > { %v3772_v4 = vpop.f32.mrb[177].mxu0 }
 0x440   : > { %11170 = vmatmul.mubr.f32.gmra.mrb[152].mxu1 %v3664_v61  ;;  %v4317_v61 = vld [vmem:[%s15923_s8 + $0x8] sm:$0xff] }
 0x441   : > { %11172 = vmatprep.mubr.f32.mxu1 %v3667_v54  ;;  %v14659_v54 = vpack.c.bf16 %v4317_v61, %v4316_v45 }
 0x442   : > { %v14613_v9 = vpop.f32.mrb[178].mxu0 }
 0x443   : > { %v3777_v50 = vpop.f32.mrb[179].mxu0  ;;  %12274 = vmatprep.subr.bf16.mxu0 %v14659_v54  ;;  %12270 = vmatprep.subr.bf16.mxu1 %v14659_v54 }
 0x444   : > { %11173 = vmatmul.mubr.f32.gmra.mrb[154].mxu1 %v3670_v48  ;;  %12276 = vmatpush3.bf16.msra.mxu0 %v14659_v54  ;;  %v14665_v48 = vld [vmem:[%s15923_s8 + $0x10] sm:$0xff] }
 0x445   : > { %11175 = vmatprep.mubr.f32.mxu1 %v3673_v13  ;;  %11257 = vmatprep.subr.mxu0 %v14665_v48 }
 0x446   : > { %v14617_v31 = vpop.f32.mrb[180].mxu0 }
 0x447   : > { %v3782_v51 = vpop.f32.mrb[181].mxu0 }
 0x448   : > { %11176 = vmatmul.mubr.f32.gmra.mrb[156].mxu1 %v3676_v47  ;;  %11258 = vmatpush3.msra.mxu0 %v14665_v48 }
 0x449   : > { %11178 = vmatprep.mubr.f32.mxu1 %v3679_v30  ;;  %12282 = vmatprep.subr.bf16.mxu0 %v14659_v54 }
 0x44a   : > { %v14619_v2 = vpop.f32.mrb[182].mxu0 }
 0x44b   : > { %v3787_v24 = vpop.f32.mrb[183].mxu0 }
 0x44c   : > { %11179 = vmatmul.mubr.f32.gmra.mrb[158].mxu1 %v3682_v44 }
 0x44e   : > { %v14621_v0 = vpop.f32.mrb[184].mxu0 }
 0x44f   : > { %v3792_v34 = vpop.f32.mrb[185].mxu0 }
 0x452   : > { %v14623_v19 = vpop.f32.mrb[186].mxu0 }
 0x453   : > { %v3797_v58 = vpop.f32.mrb[187].mxu0 }
 0x456   : > { %v14625_v38 = vpop.f32.mrb[188].mxu0 }
 0x457   : > { %v3802_v40 = vpop.f32.mrb[189].mxu0 }
 0x45a   : > { %v14627_v57 = vpop.f32.mrb[190].mxu0 }
 0x45b   : > { %v3807_v59 = vpop.f32.mrb[191].mxu0 }
 0x45e   : > { %v14629_v63 = vpop.f32.mrb[192].mxu0 }
 0x45f   : > { %v3812_v7 = vpop.f32.mrb[193].mxu0 }
 0x462   : > { %v14633_v35 = vpop.f32.mrb[194].mxu0 }
 0x463   : > { %v3817_v37 = vpop.f32.mrb[195].mxu0 }
 0x466   : > { %v14635_v16 = vpop.f32.mrb[196].mxu0 }
 0x467   : > { %v3822_v3 = vpop.f32.mrb[197].mxu0 }
 0x46a   : > { %v14637_v32 = vpop.f32.mrb[198].mxu0 }
 0x46b   : > { %v3827_v52 = vpop.f32.mrb[199].mxu0 }
 0x46e   : > { %v14639_v33 = vpop.f32.mrb[200].mxu0 }
 0x46f   : > { %v3832_v25 = vpop.f32.mrb[201].mxu0 }
 0x472   : > { %v14641_v56 = vpop.f32.mrb[202].mxu0 }
 0x473   : > { %v3837_v8 = vpop.f32.mrb[203].mxu0 }
 0x476   : > { %v14643_v5 = vpop.f32.mrb[204].mxu0 }
 0x477   : > { %v3842_v12 = vpop.f32.mrb[205].mxu0 }
 0x47a   : > { %v14645_v14 = vpop.f32.mrb[206].mxu0 }
 0x47b   : > { %v3847_v10 = vpop.f32.mrb[207].mxu0 }
 0x47e   : > { %v14647_v28 = vpop.f32.mrb[208].mxu0 }
 0x47f   : > { %v3852_v27 = vpop.f32.mrb[209].mxu0 }
 0x482   : > { %v14649_v18 = vpop.f32.mrb[210].mxu0 }
 0x483   : > { %v3857_v60 = vpop.f32.mrb[211].mxu0 }
 0x486   : > { %v14651_v49 = vpop.f32.mrb[212].mxu0 }
 0x487   : > { %v3862_v20 = vpop.f32.mrb[213].mxu0 }
 0x48a   : > { %v14653_v36 = vpop.f32.mrb[214].mxu0 }
 0x48b   : > { %v3867_v46 = vpop.f32.mrb[215].mxu0 }
 0x48e   : > { %v14655_v15 = vpop.f32.mrb[216].mxu0 }
 0x48f   : > { %v3872_v55 = vpop.f32.mrb[217].mxu0 }
 0x4d3   : > { %v14670_v13 = vpop.f32.mrb[134].mxu1 }
 0x4d4   : > { %15950 = vst [vmem:[#allocation25_spill] sm:$0xff] %v14670_v13  ;;  %v3609_v43 = vpop.f32.mrb[135].mxu1 }
 0x4f3   : > { %v11147_v47 = vpop.f32.mrb[136].mxu1 }
 0x4f4   : > { %v3946_v30 = vadd.f32 %v11147_v47, %v14606_v62  ;;  %v3940_v42 = vpop.f32.mrb[137].mxu1 }
 0x4f5   : > { %v3941_v44 = vadd.f32 %v3940_v42, %v14602_v22 }
 0x4f7   : > { %v11150_v11 = vpop.f32.mrb[138].mxu1  ;;  %11193 = vmatprep.mubr.msk.f32.mxu1 %vm1138_vm0, %v3941_v44 }
 0x4f8   : > { %v3956_v4 = vadd.f32 %v11150_v11, %v14611_v23  ;;  %v3950_v41 = vpop.f32.mrb[139].mxu1  ;;  %11194 = vmatmul.mubr.msk.f32.vlgmr.msra.gmra.mrb[160].mxu1 %vm1138_vm0, %v3946_v30 }
 0x4f9   : > { %v3951_v21 = vadd.f32 %v3950_v41, %v14609_v29  ;;  %12272 = vmatpush3.bf16.msra.mxu1 %v14659_v54 }
 0x4fa   : > { %11233 = vmatprep.subr.mxu1 %v14665_v48 }
 0x4fb   : > { %v11153_v50 = vpop.f32.mrb[140].mxu1  ;;  %11196 = vmatprep.mubr.msk.f32.mxu1 %vm1138_vm0, %v3951_v21 }
 0x4fc   : > { %v3966_v62 = vadd.f32 %v11153_v50, %v14617_v31  ;;  %v3960_v22 = vpop.f32.mrb[141].mxu1  ;;  %11197 = vmatmul.mubr.msk.f32.gmra.mrb[162].mxu1 %vm1138_vm0, %v3956_v4 }
 0x4fd   : > { %v3961_v26 = vadd.f32 %v3960_v22, %v14613_v9  ;;  %11234 = vmatpush3.msra.mxu1 %v14665_v48 }
 0x4fe   : > { %12278 = vmatprep.subr.bf16.mxu1 %v14659_v54 }
 0x4ff   : > { %v11156_v23 = vpop.f32.mrb[142].mxu1  ;;  %11199 = vmatprep.mubr.msk.f32.mxu1 %vm1138_vm0, %v3961_v26 }
 0x500   : > { %v3976_v29 = vadd.f32 %v11156_v23, %v14621_v0  ;;  %v3970_v51 = vpop.f32.mrb[143].mxu1  ;;  %11200 = vmatmul.mubr.msk.f32.gmra.mrb[164].mxu1 %vm1138_vm0, %v3966_v62 }
 0x501   : > { %v3971_v24 = vadd.f32 %v3970_v51, %v14619_v2 }
 0x503   : > { %v11159_v31 = vpop.f32.mrb[144].mxu1  ;;  %11202 = vmatprep.mubr.msk.f32.mxu1 %vm1138_vm0, %v3971_v24 }
 0x504   : > { %v3986_v34 = vadd.f32 %v11159_v31, %v14625_v38  ;;  %v3980_v9 = vpop.f32.mrb[145].mxu1  ;;  %11203 = vmatmul.mubr.msk.f32.gmra.mrb[166].mxu1 %vm1138_vm0, %v3976_v29 }
 0x505   : > { %v3981_v58 = vadd.f32 %v3980_v9, %v14623_v19 }
 0x507   : > { %v11162_v40 = vpop.f32.mrb[146].mxu1  ;;  %11205 = vmatprep.mubr.msk.f32.mxu1 %vm1138_vm0, %v3981_v58 }
 0x508   : > { %v3996_v0 = vadd.f32 %v11162_v40, %v14629_v63  ;;  %v3990_v59 = vpop.f32.mrb[147].mxu1  ;;  %11206 = vmatmul.mubr.msk.f32.gmra.mrb[168].mxu1 %vm1138_vm0, %v3986_v34 }
 0x509   : > { %v3991_v2 = vadd.f32 %v3990_v59, %v14627_v57 }
 0x50b   : > { %v11165_v7 = vpop.f32.mrb[148].mxu1  ;;  %11208 = vmatprep.mubr.msk.f32.mxu1 %vm1138_vm0, %v3991_v2 }
 0x50c   : > { %v4006_v38 = vadd.f32 %v11165_v7, %v14635_v16  ;;  %v4000_v17 = vpop.f32.mrb[149].mxu1  ;;  %11209 = vmatmul.mubr.msk.f32.gmra.mrb[170].mxu1 %vm1138_vm0, %v3996_v0 }
 0x50d   : > { %v4001_v19 = vadd.f32 %v4000_v17, %v14633_v35 }
 0x50f   : > { %v11168_v1 = vpop.f32.mrb[150].mxu1  ;;  %11211 = vmatprep.mubr.msk.f32.mxu1 %vm1138_vm0, %v4001_v19 }
 0x510   : > { %v4016_v63 = vadd.f32 %v11168_v1, %v14639_v33  ;;  %v4010_v53 = vpop.f32.mrb[151].mxu1  ;;  %11212 = vmatmul.mubr.msk.f32.gmra.mrb[172].mxu1 %vm1138_vm0, %v4006_v38 }
 0x511   : > { %v4011_v57 = vadd.f32 %v4010_v53, %v14637_v32 }
 0x513   : > { %v11171_v37 = vpop.f32.mrb[152].mxu1  ;;  %11214 = vmatprep.mubr.msk.f32.mxu1 %vm1138_vm0, %v4011_v57 }
 0x514   : > { %v4026_v16 = vadd.f32 %v11171_v37, %v14643_v5  ;;  %v4020_v3 = vpop.f32.mrb[153].mxu1  ;;  %11215 = vmatmul.mubr.msk.f32.gmra.mrb[174].mxu1 %vm1138_vm0, %v4016_v63 }
 0x515   : > { %v4021_v35 = vadd.f32 %v4020_v3, %v14641_v56 }
 0x517   : > { %v11174_v52 = vpop.f32.mrb[154].mxu1  ;;  %11217 = vmatprep.mubr.msk.f32.mxu1 %vm1138_vm0, %v4021_v35 }
 0x518   : > { %v4036_v33 = vadd.f32 %v11174_v52, %v14647_v28  ;;  %v4030_v25 = vpop.f32.mrb[155].mxu1  ;;  %11218 = vmatmul.mubr.msk.f32.gmra.mrb[176].mxu1 %vm1138_vm0, %v4026_v16 }
 0x519   : > { %v4031_v32 = vadd.f32 %v4030_v25, %v14645_v14 }
 0x51b   : > { %v11177_v8 = vpop.f32.mrb[156].mxu1  ;;  %11220 = vmatprep.mubr.msk.f32.mxu1 %vm1138_vm0, %v4031_v32 }
 0x51c   : > { %v4046_v5 = vadd.f32 %v11177_v8, %v14651_v49  ;;  %v4040_v12 = vpop.f32.mrb[157].mxu1  ;;  %11221 = vmatmul.mubr.msk.f32.gmra.mrb[178].mxu1 %vm1138_vm0, %v4036_v33 }
 0x51d   : > { %v4041_v56 = vadd.f32 %v4040_v12, %v14649_v18 }
 0x51f   : > { %v11180_v10 = vpop.f32.mrb[158].mxu1  ;;  %11223 = vmatprep.mubr.msk.f32.mxu1 %vm1138_vm0, %v4041_v56 }
 0x520   : > { %v4050_v27 = vpop.f32.mrb[159].mxu1  ;;  %11224 = vmatmul.mubr.msk.f32.gmra.mrb[180].mxu1 %vm1138_vm0, %v4046_v5  ;;  %v4056_v28 = vadd.f32 %v11180_v10, %v14655_v15 }
 0x521   : > { %v4051_v14 = vadd.f32 %v4050_v27, %v14653_v36 }
 0x523   : > { %11226 = vmatprep.mubr.msk.f32.mxu1 %vm1138_vm0, %v4051_v14 }
 0x524   : > { %11227 = vmatmul.mubr.msk.f32.gmra.mrb[182].mxu1 %vm1138_vm0, %v4056_v28 }
 0x5cb   : > { %v14724_v60 = vpop.f32.mrb[160].mxu1 }
 0x5cc   : > { %v14726_v49 = vpop.f32.mrb[161].mxu1  ;;  %v4348_v62 = vmul.f32 %v14724_v60, %v14724_v60 }
 0x5cd   : > { %11235 = vmatprep.mubr.msk.f32.mxu1 %vm4383_vm4, %v14726_v49  ;;  %v4347_v41 = vmul.f32 %v14726_v49, %v14726_v49 }
 0x5ce   : > { %11236 = vmatmul.mubr.msk.f32.vlgmr.msra.gmra.mrb[184].mxu1 %vm4383_vm4, %v14724_v60 }
 0x5cf   : > { %v14734_v20 = vpop.f32.mrb[162].mxu1  ;;  %12280 = vmatpush3.bf16.msra.mxu1 %v14659_v54 }
 0x5d0   : > { %v14737_v36 = vpop.f32.mrb[163].mxu1  ;;  %11281 = vmatprep.subr.mxu1 %v14665_v48  ;;  %v4350_v31 = vmul.f32 %v14734_v20, %v14734_v20 }
 0x5d1   : > { %11238 = vmatprep.mubr.msk.f32.mxu1 %vm4383_vm4, %v14737_v36  ;;  %v4349_v23 = vmul.f32 %v14737_v36, %v14737_v36 }
 0x5d2   : > { %11239 = vmatmul.mubr.msk.f32.gmra.mrb[186].mxu1 %vm4383_vm4, %v14734_v20 }
 0x5d3   : > { %v14746_v15 = vpop.f32.mrb[164].mxu1  ;;  %11282 = vmatpush3.msra.mxu1 %v14665_v48 }
 0x5d4   : > { %v14749_v55 = vpop.f32.mrb[165].mxu1  ;;  %12286 = vmatprep.subr.bf16.mxu1 %v14659_v54  ;;  %v4352_v59 = vmul.f32 %v14746_v15, %v14746_v15 }
 0x5d5   : > { %11241 = vmatprep.mubr.msk.f32.mxu1 %vm4383_vm4, %v14749_v55  ;;  %v4351_v58 = vmul.f32 %v14749_v55, %v14749_v55 }
 0x5d6   : > { %11242 = vmatmul.mubr.msk.f32.gmra.mrb[188].mxu1 %vm4383_vm4, %v14746_v15 }
 0x5d7   : > { %v14758_v61 = vpop.f32.mrb[166].mxu1 }
 0x5d8   : > { %v14760_v43 = vpop.f32.mrb[167].mxu1 }
 0x5d9   : > { %11244 = vmatprep.mubr.msk.f32.mxu1 %vm4383_vm4, %v14760_v43  ;;  %v4353_v38 = vmul.f32 %v14760_v43, %v14760_v43 }
 0x5da   : > { %11245 = vmatmul.mubr.msk.f32.gmra.mrb[190].mxu1 %vm4383_vm4, %v14758_v61 }
 0x5db   : > { %v14768_v30 = vpop.f32.mrb[168].mxu1 }
 0x5dc   : > { %v14770_v42 = vpop.f32.mrb[169].mxu1  ;;  %v4356_v35 = vmul.f32 %v14768_v30, %v14768_v30 }
 0x5dd   : > { %11247 = vmatprep.mubr.msk.f32.mxu1 %vm4383_vm4, %v14770_v42  ;;  %v4355_v57 = vmul.f32 %v14770_v42, %v14770_v42 }
 0x5de   : > { %11248 = vmatmul.mubr.msk.f32.gmra.mrb[192].mxu1 %vm4383_vm4, %v14768_v30 }
 0x5df   : > { %v14778_v11 = vpop.f32.mrb[170].mxu1 }
 0x5e0   : > { %v14780_v4 = vpop.f32.mrb[171].mxu1  ;;  %v4358_v12 = vmul.f32 %v14778_v11, %v14778_v11 }
 0x5e1   : > { %11250 = vmatprep.mubr.msk.f32.mxu1 %vm4383_vm4, %v14780_v4  ;;  %v4357_v25 = vmul.f32 %v14780_v4, %v14780_v4 }
 0x5e2   : > { %11251 = vmatmul.mubr.msk.f32.gmra.mrb[194].mxu1 %vm4383_vm4, %v14778_v11 }
 0x5e3   : > { %v14790_v50 = vpop.f32.mrb[172].mxu1  ;;  %11283 = vmatprep.mubr.msk.f32.mxu1 %vm4383_vm4, %v4347_v41 }
 0x5e4   : > { %v14797_v22 = vmul.f32 %v14790_v50, %v14724_v60  ;;  %v14799_v26 = vpop.f32.mrb[173].mxu1  ;;  %v4360_v41 = vmul.f32 %v14790_v50, %v14790_v50 }
 0x5e5   : > { %v14805_v29 = vmul.f32 %v14799_v26, %v14726_v49  ;;  %11259 = vmatprep.mubr.msk.f32.mxu0 %vm4383_vm4, %v14799_v26  ;;  %v4359_v27 = vmul.f32 %v14799_v26, %v14799_v26 }
 0x5e6   : > { %11260 = vmatmul.mubr.msk.f32.vlgmr.msra.gmra.mrb[218].mxu0 %vm4383_vm4, %v14790_v50  ;;  %11284 = vmatmul.mubr.msk.f32.vlgmr.msra.gmra.mrb[196].mxu1 %vm4383_vm4, %v4348_v62 }
 0x5e7   : > { %v14814_v24 = vpop.f32.mrb[174].mxu1  ;;  %11286 = vmatprep.mubr.msk.f32.mxu1 %vm4383_vm4, %v4349_v23  ;;  %12284 = vmatpush3.bf16.msra.mxu0 %v14659_v54 }
 0x5e8   : > { %v14822_v34 = vmul.f32 %v14814_v24, %v14734_v20  ;;  %v14824_v9 = vpop.f32.mrb[175].mxu1  ;;  %12288 = vmatpush3.bf16.msra.mxu1 %v14659_v54  ;;  %11305 = vmatprep.subr.mxu0 %v14665_v48  ;;  %v4362_v23 = vmul.f32 %v14814_v24, %v14814_v24 }
 0x5e9   : > { %v4373_v40 = vmul.f32 %v14824_v9, %v14737_v36  ;;  %11262 = vmatprep.mubr.msk.f32.mxu0 %vm4383_vm4, %v14824_v9  ;;  %11329 = vmatprep.subr.mxu1 %v14665_v48  ;;  %v4361_v62 = vmul.f32 %v14824_v9, %v14824_v9 }
 0x5ea   : > { %11263 = vmatmul.mubr.msk.f32.gmra.mrb[220].mxu0 %vm4383_vm4, %v14814_v24  ;;  %11287 = vmatmul.mubr.msk.f32.gmra.mrb[198].mxu1 %vm4383_vm4, %v4350_v31 }
 0x5eb   : > { %v14840_v54 = vpop.f32.mrb[176].mxu1  ;;  %11289 = vmatprep.mubr.msk.f32.mxu1 %vm4383_vm4, %v4351_v58  ;;  %11306 = vmatpush3.msra.mxu0 %v14665_v48 }
 0x5ec   : > { %v4376_v2 = vmul.f32 %v14840_v54, %v14746_v15  ;;  %v14848_v7 = vpop.f32.mrb[177].mxu1  ;;  %11330 = vmatpush3.msra.mxu1 %v14665_v48  ;;  %v4354_v48 = vmul.f32 %v14758_v61, %v14758_v61 }
 0x5ed   : > { %15951 = vst [vmem:[#allocation26_spill] sm:$0xff] %v14848_v7  ;;  %v4375_v17 = vmul.f32 %v14848_v7, %v14749_v55  ;;  %11265 = vmatprep.mubr.msk.f32.mxu0 %vm4383_vm4, %v14848_v7 }
 0x5ee   : > { %11266 = vmatmul.mubr.msk.f32.gmra.mrb[222].mxu0 %vm4383_vm4, %v14840_v54  ;;  %11290 = vmatmul.mubr.msk.f32.gmra.mrb[200].mxu1 %vm4383_vm4, %v4352_v59 }
 0x5ef   : > { %v14862_v1 = vpop.f32.mrb[178].mxu1  ;;  %11292 = vmatprep.mubr.msk.f32.mxu1 %vm4383_vm4, %v4353_v38 }
 0x5f0   : > { %15952 = vst [vmem:[#allocation27_spill] sm:$0xff] %v14862_v1  ;;  %v4378_v63 = vmul.f32 %v14862_v1, %v14758_v61  ;;  %v14869_v53 = vpop.f32.mrb[179].mxu1 }
 0x5f1   : > { %15953 = vst [vmem:[#allocation28_spill] sm:$0xff] %v14869_v53  ;;  %v4377_v37 = vmul.f32 %v14869_v53, %v14760_v43  ;;  %11268 = vmatprep.mubr.msk.f32.mxu0 %vm4383_vm4, %v14869_v53  ;;  %v4365_v31 = vmul.f32 %v14869_v53, %v14869_v53 }
 0x5f2   : > { %11269 = vmatmul.mubr.msk.f32.gmra.mrb[224].mxu0 %vm4383_vm4, %v14862_v1  ;;  %11293 = vmatmul.mubr.msk.f32.gmra.mrb[202].mxu1 %vm4383_vm4, %v4354_v48 }
 0x5f3   : > { %v14882_v3 = vpop.f32.mrb[180].mxu1  ;;  %11295 = vmatprep.mubr.msk.f32.mxu1 %vm4383_vm4, %v4355_v57 }
 0x5f4   : > { %15954 = vst [vmem:[#allocation29_spill] sm:$0xff] %v14882_v3  ;;  %v4380_v52 = vmul.f32 %v14882_v3, %v14768_v30  ;;  %v14889_v33 = vpop.f32.mrb[181].mxu1 }
 0x5f5   : > { %15955 = vst [vmem:[#allocation30_spill] sm:$0xff] %v14889_v33  ;;  %v4379_v32 = vmul.f32 %v14889_v33, %v14770_v42  ;;  %11271 = vmatprep.mubr.msk.f32.mxu0 %vm4383_vm4, %v14889_v33  ;;  %v4367_v58 = vmul.f32 %v14889_v33, %v14889_v33 }
 0x5f6   : > { %11272 = vmatmul.mubr.msk.f32.gmra.mrb[226].mxu0 %vm4383_vm4, %v14882_v3  ;;  %11296 = vmatmul.mubr.msk.f32.gmra.mrb[204].mxu1 %vm4383_vm4, %v4356_v35 }
 0x5f7   : > { %v14902_v5 = vpop.f32.mrb[182].mxu1  ;;  %11298 = vmatprep.mubr.msk.f32.mxu1 %vm4383_vm4, %v4357_v25 }
 0x5f8   : > { %15956 = vst [vmem:[#allocation31_spill] sm:$0xff] %v14902_v5  ;;  %v4382_v56 = vmul.f32 %v14902_v5, %v14778_v11  ;;  %v14909_v10 = vpop.f32.mrb[183].mxu1 }
 0x5f9   : > { %15957 = vst [vmem:[#allocation32_spill] sm:$0xff] %v14909_v10  ;;  %v4381_v28 = vmul.f32 %v14909_v10, %v14780_v4  ;;  %11274 = vmatprep.mubr.msk.f32.mxu0 %vm4383_vm4, %v14909_v10  ;;  %v4369_v59 = vmul.f32 %v14909_v10, %v14909_v10 }
 0x5fa   : > { %11275 = vmatmul.mubr.msk.f32.gmra.mrb[228].mxu0 %vm4383_vm4, %v14902_v5  ;;  %11299 = vmatmul.mubr.msk.f32.gmra.mrb[206].mxu1 %vm4383_vm4, %v4358_v12 }
 0x5fb   : > { %11307 = vmatprep.mubr.msk.f32.mxu0 %vm4383_vm4, %v4359_v27  ;;  %11331 = vmatprep.mubr.msk.f32.mxu1 %vm4383_vm4, %v14805_v29  ;;  %v4363_v29 = vmul.f32 %v14848_v7, %v14848_v7 }
 0x5fe   : > { %11308 = vmatmul.mubr.msk.f32.vlgmr.msra.gmra.mrb[230].mxu0 %vm4383_vm4, %v4360_v41  ;;  %11332 = vmatmul.mubr.msk.f32.vlgmr.msra.gmra.mrb[208].mxu1 %vm4383_vm4, %v14797_v22  ;;  %v4364_v22 = vmul.f32 %v14840_v54, %v14840_v54 }
 0x5ff   : > { %11310 = vmatprep.mubr.msk.f32.mxu0 %vm4383_vm4, %v4361_v62  ;;  %11334 = vmatprep.mubr.msk.f32.mxu1 %vm4383_vm4, %v4373_v40  ;;  %v4368_v40 = vmul.f32 %v14882_v3, %v14882_v3 }
 0x602   : > { %11311 = vmatmul.mubr.msk.f32.gmra.mrb[232].mxu0 %vm4383_vm4, %v4362_v23  ;;  %11335 = vmatmul.mubr.msk.f32.gmra.mrb[210].mxu1 %vm4383_vm4, %v14822_v34  ;;  %v4366_v34 = vmul.f32 %v14862_v1, %v14862_v1 }
 0x603   : > { %11313 = vmatprep.mubr.msk.f32.mxu0 %vm4383_vm4, %v4363_v29  ;;  %11337 = vmatprep.mubr.msk.f32.mxu1 %vm4383_vm4, %v4375_v17 }
 0x606   : > { %11314 = vmatmul.mubr.msk.f32.gmra.mrb[234].mxu0 %vm4383_vm4, %v4364_v22  ;;  %11338 = vmatmul.mubr.msk.f32.gmra.mrb[212].mxu1 %vm4383_vm4, %v4376_v2  ;;  %v4370_v2 = vmul.f32 %v14902_v5, %v14902_v5 }
 0x607   : > { %11316 = vmatprep.mubr.msk.f32.mxu0 %vm4383_vm4, %v4365_v31  ;;  %11340 = vmatprep.mubr.msk.f32.mxu1 %vm4383_vm4, %v4377_v37 }
 0x60a   : > { %11317 = vmatmul.mubr.msk.f32.gmra.mrb[236].mxu0 %vm4383_vm4, %v4366_v34  ;;  %11341 = vmatmul.mubr.msk.f32.gmra.mrb[214].mxu1 %vm4383_vm4, %v4378_v63 }
 0x60b   : > { %11319 = vmatprep.mubr.msk.f32.mxu0 %vm4383_vm4, %v4367_v58  ;;  %11343 = vmatprep.mubr.msk.f32.mxu1 %vm4383_vm4, %v4379_v32 }
 0x60e   : > { %11320 = vmatmul.mubr.msk.f32.gmra.mrb[238].mxu0 %vm4383_vm4, %v4368_v40  ;;  %11344 = vmatmul.mubr.msk.f32.gmra.mrb[216].mxu1 %vm4383_vm4, %v4380_v52 }
 0x60f   : > { %11322 = vmatprep.mubr.msk.f32.mxu0 %vm4383_vm4, %v4369_v59  ;;  %11346 = vmatprep.mubr.msk.f32.mxu1 %vm4383_vm4, %v4381_v28 }
 0x612   : > { %11323 = vmatmul.mubr.msk.f32.gmra.mrb[240].mxu0 %vm4383_vm4, %v4370_v2  ;;  %11347 = vmatmul.mubr.msk.f32.gmra.mrb[218].mxu1 %vm4383_vm4, %v4382_v56 }
 0x613   : > { %5287 = vmatprep.mubr.f32.mxu0 %v15948_v6  ;;  %5418 = vmatprep.mubr.f32.mxu1 %v15948_v6 }
 0x6a1   : > { %v11237_v38 = vpop.f32.mrb[184].mxu1 }
 0x6a2   : > { %v4486_v17 = vpop.f32.mrb[185].mxu1 }
 0x6a3   : > { %v12291_v48 = vpack.c.bf16 %v11237_v38, %v4486_v17 }
 0x6a5   : > { %v11240_v63 = vpop.f32.mrb[186].mxu1 }
 0x6a6   : > { %v4496_v57 = vpop.f32.mrb[187].mxu1 }
 0x6a7   : > { %v12295_v37 = vpack.c.bf16 %v11240_v63, %v4496_v57 }
 0x6a9   : > { %v11243_v35 = vpop.f32.mrb[188].mxu1 }
 0x6aa   : > { %v4506_v52 = vpop.f32.mrb[189].mxu1 }
 0x6ab   : > { %v12299_v25 = vpack.c.bf16 %v11243_v35, %v4506_v52 }
 0x6ad   : > { %v11246_v32 = vpop.f32.mrb[190].mxu1 }
 0x6ae   : > { %v4516_v12 = vpop.f32.mrb[191].mxu1 }
 0x6af   : > { %v12303_v27 = vpack.c.bf16 %v11246_v32, %v4516_v12 }
 0x6b1   : > { %v11249_v28 = vpop.f32.mrb[192].mxu1 }
 0x6b2   : > { %v4526_v41 = vpop.f32.mrb[193].mxu1 }
 0x6b3   : > { %v12307_v62 = vpack.c.bf16 %v11249_v28, %v4526_v41 }
 0x6b5   : > { %v11252_v56 = vpop.f32.mrb[194].mxu1 }
 0x6b6   : > { %v4536_v23 = vpop.f32.mrb[195].mxu1 }
 0x6b7   : > { %v12311_v29 = vpack.c.bf16 %v11252_v56, %v4536_v23 }
 0x6b9   : > { %v11261_v22 = vpop.f32.mrb[218].mxu0  ;;  %v11285_v31 = vpop.f32.mrb[196].mxu1 }
 0x6ba   : > { %v4647_v34 = vpop.f32.mrb[219].mxu0  ;;  %v4808_v58 = vpop.f32.mrb[197].mxu1 }
 0x6bb   : > { %v12289_v40 = vpack.c.bf16 %v11261_v22, %v4647_v34  ;;  %v12315_v59 = vpack.c.bf16 %v11285_v31, %v4808_v58 }
 0x6bd   : > { %v11264_v2 = vpop.f32.mrb[220].mxu0  ;;  %v14973_v38 = vpop.f32.mrb[198].mxu1  ;;  %12290 = vmatprep.subr.bf16.mxu0 %v12289_v40 }
 0x6be   : > { %v4657_v17 = vpop.f32.mrb[221].mxu0  ;;  %v14975_v63 = vpop.f32.mrb[199].mxu1  ;;  %12292 = vmatpush1.bf16.msra.mxu0 %v12291_v48 }
 0x6bf   : > { %v12293_v57 = vpack.c.bf16 %v11264_v2, %v4657_v17  ;;  %v12319_v35 = vpack.c.bf16 %v14973_v38, %v14975_v63 }
 0x6c1   : > { %v11267_v52 = vpop.f32.mrb[222].mxu0  ;;  %v14979_v32 = vpop.f32.mrb[200].mxu1  ;;  %12294 = vmatprep.subr.bf16.mxu0 %v12293_v57 }
 0x6c2   : > { %v4667_v12 = vpop.f32.mrb[223].mxu0  ;;  %v14981_v28 = vpop.f32.mrb[201].mxu1  ;;  %12296 = vmatpush1.bf16.msra.mxu0 %v12295_v37 }
 0x6c3   : > { %v12297_v41 = vpack.c.bf16 %v11267_v52, %v4667_v12  ;;  %v12323_v56 = vpack.c.bf16 %v14979_v32, %v14981_v28  ;;  %v15037_v32 = vld [vmem:[%s13028_s14 + $0x20] sm:$0xff] }
 0x6c5   : > { %v11270_v23 = vpop.f32.mrb[224].mxu0  ;;  %v14985_v22 = vpop.f32.mrb[202].mxu1  ;;  %12298 = vmatprep.subr.bf16.mxu0 %v12297_v41 }
 0x6c6   : > { %v4677_v48 = vpop.f32.mrb[225].mxu0  ;;  %v14987_v31 = vpop.f32.mrb[203].mxu1  ;;  %12300 = vmatpush1.bf16.msra.mxu0 %v12299_v25 }
 0x6c7   : > { %v12301_v34 = vpack.c.bf16 %v11270_v23, %v4677_v48  ;;  %v12327_v58 = vpack.c.bf16 %v14985_v22, %v14987_v31  ;;  %v4324_v31 = vld [vmem:[%s13028_s14 + $0x28] sm:$0xff] }
 0x6c9   : > { %v11273_v40 = vpop.f32.mrb[226].mxu0  ;;  %v14991_v2 = vpop.f32.mrb[204].mxu1  ;;  %12302 = vmatprep.subr.bf16.mxu0 %v12301_v34 }
 0x6ca   : > { %v4687_v37 = vpop.f32.mrb[227].mxu0  ;;  %v14993_v38 = vpop.f32.mrb[205].mxu1  ;;  %12304 = vmatpush1.bf16.msra.mxu0 %v12303_v27 }
 0x6cb   : > { %v12305_v17 = vpack.c.bf16 %v11273_v40, %v4687_v37  ;;  %v12331_v63 = vpack.c.bf16 %v14991_v2, %v14993_v38  ;;  %v15004_v37 = vld [vmem:[%s13028_s14] sm:$0xff]  ;;  %v4325_v2 = vld [vmem:[%s13028_s14 + $0x30] sm:$0xff]  ;;  %v4326_v38 = vld [vmem:[%s13028_s14 + $0x38] sm:$0xff] }
 0x6cd   : > { %v11276_v57 = vpop.f32.mrb[228].mxu0  ;;  %v14997_v52 = vpop.f32.mrb[206].mxu1  ;;  %12306 = vmatprep.subr.bf16.mxu0 %v12305_v17 }
 0x6ce   : > { %v4697_v25 = vpop.f32.mrb[229].mxu0  ;;  %v14999_v12 = vpop.f32.mrb[207].mxu1  ;;  %12308 = vmatpush1.bf16.msra.mxu0 %v12307_v62 }
 0x6cf   : > { %v12309_v41 = vpack.c.bf16 %v11276_v57, %v4697_v25  ;;  %v12335_v23 = vpack.c.bf16 %v14997_v52, %v14999_v12  ;;  %v4328_v52 = vld [vmem:[%s13028_s14 + $0x48] sm:$0xff]  ;;  %v4329_v12 = vld [vmem:[%s13028_s14 + $0x50] sm:$0xff] }
 0x6d1   : > { %v11309_v48 = vpop.f32.mrb[230].mxu0  ;;  %v11333_v34 = vpop.f32.mrb[208].mxu1  ;;  %12310 = vmatprep.subr.bf16.mxu0 %v12309_v41  ;;  %v15010_v41 = vld [vmem:[%s13028_s14 + $0x8] sm:$0xff] }
 0x6d2   : > { %v4969_v27 = vpop.f32.mrb[231].mxu0  ;;  %v5130_v40 = vpop.f32.mrb[209].mxu1  ;;  %12312 = vmatpush1.bf16.msra.mxu0 %v12311_v29 }
 0x6d3   : > { %v12313_v14 = vpack.c.bf16 %v11309_v48, %v4969_v27  ;;  %v12338_v17 = vpack.c.bf16 %v11333_v34, %v5130_v40  ;;  %12337 = vmatprep.subr.bf16.mxu0 %v15949_v39 }
 0x6d5   : > { %v11312_v8 = vpop.f32.mrb[232].mxu0  ;;  %v11336_v62 = vpop.f32.mrb[210].mxu1  ;;  %9976 = vmatmul.mubr.msk.f32.vlgmr.msra.gmra.mrb[242].mxu0 %vm5189_vm5, %v15004_v37  ;;  %12314 = vmatprep.subr.bf16.mxu1 %v12313_v14 }
 0x6d6   : > { %v4979_v57 = vpop.f32.mrb[233].mxu0  ;;  %v5140_v25 = vpop.f32.mrb[211].mxu1  ;;  %12316 = vmatpush1.bf16.msra.mxu1 %v12315_v59  ;;  %12339 = vmatpush3.bf16.msra.mxu0 %v12338_v17  ;;  %v15017_v59 = vld [vmem:[%s13028_s14 + $0x10] sm:$0xff] }
 0x6d7   : > { %v12317_v29 = vpack.c.bf16 %v11312_v8, %v4979_v57  ;;  %v12341_v16 = vpack.c.bf16 %v11336_v62, %v5140_v25  ;;  %5293 = vmatprep.mubr.f32.mxu0 %v15948_v6  ;;  %12340 = vmatprep.subr.bf16.mxu0 %v15949_v39 }
 0x6d9   : > { %v11315_v48 = vpop.f32.mrb[234].mxu0  ;;  %v11339_v34 = vpop.f32.mrb[212].mxu1  ;;  %9977 = vmatmul.mubr.msk.f32.gmra.mrb[244].mxu0 %vm5189_vm5, %v15010_v41  ;;  %12318 = vmatprep.subr.bf16.mxu1 %v12317_v29 }
 0x6da   : > { %v4989_v14 = vpop.f32.mrb[235].mxu0  ;;  %v5150_v27 = vpop.f32.mrb[213].mxu1  ;;  %12320 = vmatpush1.bf16.msra.mxu1 %v12319_v35  ;;  %12342 = vmatpush3.bf16.msra.mxu0 %v12341_v16  ;;  %v15027_v16 = vld [vmem:[%s13028_s14 + $0x18] sm:$0xff] }
 0x6db   : > { %v12321_v40 = vpack.c.bf16 %v11315_v48, %v4989_v14  ;;  %v12344_v8 = vpack.c.bf16 %v11339_v34, %v5150_v27  ;;  %5299 = vmatprep.mubr.f32.mxu0 %v15948_v6  ;;  %12343 = vmatprep.subr.bf16.mxu0 %v15949_v39 }
 0x6dd   : > { %v11318_v17 = vpop.f32.mrb[236].mxu0  ;;  %v11342_v62 = vpop.f32.mrb[214].mxu1  ;;  %9978 = vmatmul.mubr.msk.f32.gmra.mrb[246].mxu0 %vm5189_vm5, %v15017_v59  ;;  %12322 = vmatprep.subr.bf16.mxu1 %v12321_v40 }
 0x6de   : > { %v4999_v57 = vpop.f32.mrb[237].mxu0  ;;  %v5160_v25 = vpop.f32.mrb[215].mxu1  ;;  %12324 = vmatpush1.bf16.msra.mxu1 %v12323_v56  ;;  %12345 = vmatpush3.bf16.msra.mxu0 %v12344_v8 }
 0x6df   : > { %v12325_v35 = vpack.c.bf16 %v11318_v17, %v4999_v57  ;;  %v12347_v29 = vpack.c.bf16 %v11342_v62, %v5160_v25  ;;  %5305 = vmatprep.mubr.f32.mxu0 %v15948_v6  ;;  %12346 = vmatprep.subr.bf16.mxu0 %v15949_v39  ;;  %v4333_v57 = vld [vmem:[%s13033_s19 + $0x18] sm:$0xff] }
 0x6e1   : > { %v11321_v48 = vpop.f32.mrb[238].mxu0  ;;  %v11345_v34 = vpop.f32.mrb[216].mxu1  ;;  %9979 = vmatmul.mubr.msk.f32.gmra.mrb[248].mxu0 %vm5189_vm5, %v15027_v16  ;;  %12326 = vmatprep.subr.bf16.mxu1 %v12325_v35  ;;  %v4335_v35 = vld [vmem:[%s13033_s19 + $0x28] sm:$0xff] }
 0x6e2   : > { %v5009_v14 = vpop.f32.mrb[239].mxu0  ;;  %v5170_v27 = vpop.f32.mrb[217].mxu1  ;;  %12328 = vmatpush1.bf16.msra.mxu1 %v12327_v58  ;;  %12348 = vmatpush3.bf16.msra.mxu0 %v12347_v29 }
 0x6e3   : > { %v12329_v28 = vpack.c.bf16 %v11321_v48, %v5009_v14  ;;  %v12350_v56 = vpack.c.bf16 %v11345_v34, %v5170_v27  ;;  %5311 = vmatprep.mubr.f32.mxu0 %v15948_v6  ;;  %12349 = vmatprep.subr.bf16.mxu0 %v15949_v39  ;;  %v4336_v48 = vld [vmem:[%s13033_s19 + $0x30] sm:$0xff]  ;;  %v4337_v34 = vld [vmem:[%s13033_s19 + $0x38] sm:$0xff]  ;;  %v4338_v27 = vld [vmem:[%s13033_s19 + $0x40] sm:$0xff] }
 0x6e4   : > { %v12365_v14 = vpack.c.bf16 %v4337_v34, %v4336_v48 }
 0x6e5   : > { %v11324_v40 = vpop.f32.mrb[240].mxu0  ;;  %v11348_v8 = vpop.f32.mrb[218].mxu1  ;;  %9980 = vmatmul.mubr.msk.f32.gmra.mrb[250].mxu0 %vm5189_vm5, %v15037_v32  ;;  %12330 = vmatprep.subr.bf16.mxu1 %v12329_v28 }
 0x6e6   : > { %v5019_v17 = vpop.f32.mrb[241].mxu0  ;;  %v5180_v22 = vpop.f32.mrb[219].mxu1  ;;  %12332 = vmatpush1.bf16.msra.mxu1 %v12331_v63  ;;  %12351 = vmatpush3.bf16.msra.mxu0 %v12350_v56  ;;  %v4327_v63 = vld [vmem:[%s13028_s14 + $0x40] sm:$0xff]  ;;  %v4340_v56 = vld [vmem:[%s13033_s19 + $0x50] sm:$0xff] }
 0x6e7   : > { %v12333_v58 = vpack.c.bf16 %v11324_v40, %v5019_v17  ;;  %v12353_v62 = vpack.c.bf16 %v11348_v8, %v5180_v22  ;;  %5317 = vmatprep.mubr.f32.mxu0 %v15948_v6  ;;  %12352 = vmatprep.subr.bf16.mxu0 %v15949_v39  ;;  %v4341_v40 = vld [vmem:[%s13033_s19 + $0x58] sm:$0xff]  ;;  %v4342_v17 = vld [vmem:[%s13033_s19 + $0x60] sm:$0xff]  ;;  %v4343_v22 = vld [vmem:[%s13033_s19 + $0x68] sm:$0xff] }
 0x6e8   : > { %v12371_v8 = vpack.c.bf16 %v4341_v40, %v4340_v56 }
 0x6e9   : > { %9981 = vmatmul.mubr.msk.f32.gmra.mrb[252].mxu0 %vm5189_vm5, %v4324_v31  ;;  %12334 = vmatprep.subr.bf16.mxu1 %v12333_v58  ;;  %v4344_v58 = vld [vmem:[%s13033_s19 + $0x70] sm:$0xff] }
 0x6ea   : > { %12336 = vmatpush1.bf16.msra.mxu1 %v12335_v23  ;;  %12354 = vmatpush3.bf16.msra.mxu0 %v12353_v62  ;;  %v4330_v23 = vld [vmem:[%s13033_s19] sm:$0xff]  ;;  %v4345_v62 = vld [vmem:[%s13033_s19 + $0x78] sm:$0xff] }
 0x6eb   : > { %5323 = vmatprep.mubr.f32.mxu0 %v15948_v6  ;;  %12355 = vmatprep.subr.bf16.mxu1 %v15949_v39 }
 0x6ec   : > { %12379 = vmatprep.subr.bf16.mxu0 %v15949_v39 }
 0x6ed   : > { %9982 = vmatmul.mubr.msk.f32.gmra.mrb[254].mxu0 %vm5189_vm5, %v4325_v2  ;;  %9987 = vmatmul.mubr.msk.f32.vlgmr.msra.gmra.mrb[220].mxu1 %vm5189_vm5, %v15004_v37 }
 0x6ee   : > { %5329 = vmatprep.mubr.f32.mxu0 %v15948_v6  ;;  %5424 = vmatprep.mubr.f32.mxu1 %v15948_v6 }
 0x6f1   : > { %9983 = vmatmul.mubr.msk.f32.gmra.mrb[0].mxu0 %vm5189_vm5, %v4326_v38  ;;  %9988 = vmatmul.mubr.msk.f32.gmra.mrb[222].mxu1 %vm5189_vm5, %v15010_v41 }
 0x6f2   : > { %5335 = vmatprep.mubr.f32.mxu0 %v15948_v6  ;;  %5430 = vmatprep.mubr.f32.mxu1 %v15948_v6 }
 0x6f5   : > { %9984 = vmatmul.mubr.msk.f32.gmra.mrb[2].mxu0 %vm5189_vm5, %v4327_v63  ;;  %9989 = vmatmul.mubr.msk.f32.gmra.mrb[224].mxu1 %vm5189_vm5, %v15017_v59 }
 0x6f6   : > { %5341 = vmatprep.mubr.f32.mxu0 %v15948_v6  ;;  %5436 = vmatprep.mubr.f32.mxu1 %v15948_v6 }
 0x6f9   : > { %9985 = vmatmul.mubr.msk.f32.gmra.mrb[4].mxu0 %vm5189_vm5, %v4328_v52  ;;  %9990 = vmatmul.mubr.msk.f32.gmra.mrb[226].mxu1 %vm5189_vm5, %v15027_v16 }
 0x6fa   : > { %5347 = vmatprep.mubr.f32.mxu0 %v15948_v6  ;;  %5442 = vmatprep.mubr.f32.mxu1 %v15948_v6 }
 0x6fd   : > { %9986 = vmatmul.mubr.msk.f32.gmra.mrb[6].mxu0 %vm5189_vm5, %v4329_v12  ;;  %9991 = vmatmul.mubr.msk.f32.gmra.mrb[228].mxu1 %vm5189_vm5, %v15037_v32 }
 0x6fe   : > { %5448 = vmatprep.mubr.f32.mxu1 %v15948_v6  ;;  %11373 = vmatprep.mubr.msk.f32.mxu0 %vm12967_vm2, %v15948_v6 }
 0x701   : > { %9992 = vmatmul.mubr.msk.f32.gmra.mrb[230].mxu1 %vm5189_vm5, %v4324_v31  ;;  %11374 = vmatmul.mubr.msk.f32.vlgmr.msra.gmra.mrb[8].mxu0 %vm5189_vm5, %v15004_v37  ;;  %v4331_v37 = vld [vmem:[%s13033_s19 + $0x8] sm:$0xff] }
 0x702   : > { %5454 = vmatprep.mubr.f32.mxu1 %v15948_v6  ;;  %11376 = vmatprep.mubr.msk.f32.mxu0 %vm12967_vm2, %v15948_v6 }
 0x705   : > { %9993 = vmatmul.mubr.msk.f32.gmra.mrb[232].mxu1 %vm5189_vm5, %v4325_v2  ;;  %11377 = vmatmul.mubr.msk.f32.gmra.mrb[10].mxu0 %vm5189_vm5, %v15010_v41  ;;  %v12356_v41 = vpack.c.bf16 %v4331_v37, %v4330_v23 }
 0x706   : > { %5460 = vmatprep.mubr.f32.mxu1 %v15948_v6  ;;  %11379 = vmatprep.mubr.msk.f32.mxu0 %vm12967_vm2, %v15948_v6 }
 0x707   : > { %12357 = vmatpush3.bf16.msra.mxu1 %v12356_v41 }
 0x708   : > { %12358 = vmatprep.subr.bf16.mxu1 %v15949_v39 }
 0x709   : > { %9994 = vmatmul.mubr.msk.f32.gmra.mrb[234].mxu1 %vm5189_vm5, %v4326_v38  ;;  %11380 = vmatmul.mubr.msk.f32.gmra.mrb[12].mxu0 %vm5189_vm5, %v15017_v59  ;;  %v4332_v59 = vld [vmem:[%s13033_s19 + $0x10] sm:$0xff] }
 0x70a   : > { %5466 = vmatprep.mubr.f32.mxu1 %v15948_v6  ;;  %11382 = vmatprep.mubr.msk.f32.mxu0 %vm12967_vm2, %v15948_v6  ;;  %v12359_v25 = vpack.c.bf16 %v4333_v57, %v4332_v59 }
 0x70c   : > { %12360 = vmatpush3.bf16.msra.mxu1 %v12359_v25 }
 0x70d   : > { %9995 = vmatmul.mubr.msk.f32.gmra.mrb[236].mxu1 %vm5189_vm5, %v4327_v63  ;;  %11383 = vmatmul.mubr.msk.f32.gmra.mrb[14].mxu0 %vm5189_vm5, %v15027_v16  ;;  %v4334_v16 = vld [vmem:[%s13033_s19 + $0x20] sm:$0xff] }
 0x70e   : > { %5472 = vmatprep.mubr.f32.mxu1 %v15948_v6  ;;  %11385 = vmatprep.mubr.msk.f32.mxu0 %vm12967_vm2, %v15948_v6  ;;  %v12362_v29 = vpack.c.bf16 %v4335_v35, %v4334_v16 }
 0x70f   : > { %12361 = vmatprep.subr.bf16.mxu1 %v15949_v39 }
 0x710   : > { %12363 = vmatpush3.bf16.msra.mxu1 %v12362_v29 }
 0x711   : > { %9996 = vmatmul.mubr.msk.f32.gmra.mrb[238].mxu1 %vm5189_vm5, %v4328_v52  ;;  %11386 = vmatmul.mubr.msk.f32.gmra.mrb[16].mxu0 %vm5189_vm5, %v15037_v32  ;;  %v4339_v32 = vld [vmem:[%s13033_s19 + $0x48] sm:$0xff] }
 0x712   : > { %5478 = vmatprep.mubr.f32.mxu1 %v15948_v6  ;;  %11388 = vmatprep.mubr.msk.f32.mxu0 %vm12967_vm2, %v15948_v6  ;;  %v12368_v28 = vpack.c.bf16 %v4339_v32, %v4338_v27 }
 0x713   : > { %12364 = vmatprep.subr.bf16.mxu1 %v15949_v39 }
 0x714   : > { %12366 = vmatpush3.bf16.msra.mxu1 %v12365_v14 }
 0x715   : > { %9997 = vmatmul.mubr.msk.f32.gmra.mrb[240].mxu1 %vm5189_vm5, %v4329_v12  ;;  %11389 = vmatmul.mubr.msk.f32.gmra.mrb[18].mxu0 %vm5189_vm5, %v4324_v31  ;;  %v12374_v31 = vpack.c.bf16 %v4343_v22, %v4342_v17 }
 0x716   : > { %11391 = vmatprep.mubr.msk.f32.mxu0 %vm12967_vm2, %v15948_v6  ;;  %11438 = vmatprep.mubr.msk.f32.mxu1 %vm12967_vm2, %v15948_v6 }
 0x717   : > { %12367 = vmatprep.subr.bf16.mxu1 %v15949_v39 }
 0x718   : > { %12369 = vmatpush3.bf16.msra.mxu1 %v12368_v28 }
 0x719   : > { %11392 = vmatmul.mubr.msk.f32.gmra.mrb[20].mxu0 %vm5189_vm5, %v4325_v2  ;;  %12370 = vmatprep.subr.bf16.mxu1 %v15949_v39  ;;  %v12377_v2 = vpack.c.bf16 %v4345_v62, %v4344_v58 }
 0x71a   : > { %11394 = vmatprep.mubr.msk.f32.mxu0 %vm12967_vm2, %v15948_v6 }
 0x71c   : > { %12372 = vmatpush3.bf16.msra.mxu1 %v12371_v8 }
 0x71d   : > { %11395 = vmatmul.mubr.msk.f32.gmra.mrb[22].mxu0 %vm5189_vm5, %v4326_v38  ;;  %12373 = vmatprep.subr.bf16.mxu1 %v15949_v39 }
 0x71e   : > { %11397 = vmatprep.mubr.msk.f32.mxu0 %vm12967_vm2, %v15948_v6 }
 0x720   : > { %12375 = vmatpush3.bf16.msra.mxu1 %v12374_v31 }
 0x721   : > { %11398 = vmatmul.mubr.msk.f32.gmra.mrb[24].mxu0 %vm5189_vm5, %v4327_v63  ;;  %12376 = vmatprep.subr.bf16.mxu1 %v15949_v39 }
 0x722   : > { %11400 = vmatprep.mubr.msk.f32.mxu0 %vm12967_vm2, %v15948_v6 }
 0x724   : > { %12378 = vmatpush3.bf16.msra.mxu1 %v12377_v2 }
 0x725   : > { %11401 = vmatmul.mubr.msk.f32.gmra.mrb[26].mxu0 %vm5189_vm5, %v4328_v52  ;;  %12394 = vmatprep.subr.bf16.mxu1 %v15949_v39 }
 0x726   : > { %11403 = vmatprep.mubr.msk.f32.mxu0 %vm12967_vm2, %v15948_v6 }
 0x729   : > { %11404 = vmatmul.mubr.msk.f32.gmra.mrb[28].mxu0 %vm5189_vm5, %v4329_v12 }
 0x72a   : > { %11493 = vmatprep.mubr.msk.f32.mxu0 %vm12967_vm2, %v15948_v6 }
 0x7a8   : > { %v5289_v38 = vpop.f32.mrb[242].mxu0 }
 0x7a9   : > { %v5291_v63 = vpop.f32.mrb[243].mxu0  ;;  %v5605_v28 = vmul.f32 %v5289_v38, %v5289_v38 }
 0x7aa   : > { %v15162_v52 = vmul.f32 %v5291_v63, %v5289_v38  ;;  %v5616_v56 = vmul.f32 %v5291_v63, %v5291_v63 }
 0x7ac   : > { %v5295_v12 = vpop.f32.mrb[244].mxu0 }
 0x7ad   : > { %v5297_v23 = vpop.f32.mrb[245].mxu0  ;;  %v5606_v2 = vmul.f32 %v5295_v12, %v5295_v12 }
 0x7ae   : > { %v15164_v37 = vmul.f32 %v5297_v23, %v5295_v12  ;;  %v5617_v19 = vmul.f32 %v5297_v23, %v5297_v23 }
 0x7b0   : > { %v5301_v41 = vpop.f32.mrb[246].mxu0 }
 0x7b1   : > { %v5303_v59 = vpop.f32.mrb[247].mxu0 }
 0x7b2   : > { %v15166_v57 = vmul.f32 %v5303_v59, %v5301_v41 }
 0x7b4   : > { %v5307_v25 = vpop.f32.mrb[248].mxu0 }
 0x7b5   : > { %v5309_v16 = vpop.f32.mrb[249].mxu0 }
 0x7b6   : > { %v15168_v35 = vmul.f32 %v5309_v16, %v5307_v25 }
 0x7b8   : > { %v5313_v29 = vpop.f32.mrb[250].mxu0 }
 0x7b9   : > { %v5315_v48 = vpop.f32.mrb[251].mxu0 }
 0x7ba   : > { %v15170_v34 = vmul.f32 %v5315_v48, %v5313_v29 }
 0x7bc   : > { %v5319_v14 = vpop.f32.mrb[252].mxu0 }
 0x7bd   : > { %v5321_v27 = vpop.f32.mrb[253].mxu0 }
 0x7be   : > { %v15172_v32 = vmul.f32 %v5321_v27, %v5319_v14 }
 0x7c0   : > { %v5420_v40 = vpop.f32.mrb[220].mxu1  ;;  %v5325_v8 = vpop.f32.mrb[254].mxu0 }
 0x7c1   : > { %v5671_v17 = vsub.f32 %v5420_v40, %v5605_v28  ;;  %v5422_v22 = vpop.f32.mrb[221].mxu1  ;;  %v5327_v31 = vpop.f32.mrb[255].mxu0  ;;  %v5607_v28 = vmul.f32 %v5301_v41, %v5301_v41  ;;  %v5618_v40 = vmul.f32 %v5303_v59, %v5303_v59  ;;  %v5611_v3 = vmul.f32 %v5325_v8, %v5325_v8 }
 0x7c2   : > { %v5682_v58 = vsub.f32 %v5422_v22, %v5616_v56  ;;  %v15174_v62 = vmul.f32 %v5327_v31, %v5325_v8 }
 0x7c4   : > { %v5693_v0 = vadd.f32 %v5682_v58, %v5671_v17  ;;  %v5426_v51 = vpop.f32.mrb[222].mxu1  ;;  %v15176_v21 = vpop.f32.mrb[0].mxu0 }
 0x7c5   : > { %v5672_v44 = vsub.f32 %v5426_v51, %v5606_v2  ;;  %v5428_v47 = vpop.f32.mrb[223].mxu1  ;;  %v15178_v45 = vpop.f32.mrb[1].mxu0 }
 0x7c6   : > { %v5683_v38 = vsub.f32 %v5428_v47, %v5617_v19  ;;  %v15182_v63 = vmul.f32 %v15178_v45, %v15176_v21  ;;  %v5608_v47 = vmul.f32 %v5307_v25, %v5307_v25  ;;  %v5619_v19 = vmul.f32 %v5309_v16, %v5309_v16 }
 0x7c7   : > { %v5704_v2 = vadd.f32 0.0009, %v5693_v0 }
 0x7c8   : > { %v5694_v56 = vadd.f32 %v5683_v38, %v5672_v44  ;;  %v5432_v22 = vpop.f32.mrb[224].mxu1  ;;  %v15184_v46 = vpop.f32.mrb[2].mxu0 }
 0x7c9   : > { %v5673_v12 = vsub.f32 %v5432_v22, %v5607_v28  ;;  %v5434_v23 = vpop.f32.mrb[225].mxu1  ;;  %v15186_v17 = vpop.f32.mrb[3].mxu0  ;;  %12784 = vrcp.f32 %v5704_v2 }
 0x7ca   : > { %v5684_v58 = vsub.f32 %v5434_v23, %v5618_v40  ;;  %v15190_v51 = vmul.f32 %v15186_v17, %v15184_v46  ;;  %v5609_v40 = vmul.f32 %v5313_v29, %v5313_v29  ;;  %v5620_v23 = vmul.f32 %v5315_v48, %v5315_v48 }
 0x7cb   : > { %v5705_v10 = vadd.f32 0.0009, %v5694_v56 }
 0x7cc   : > { %v5695_v18 = vadd.f32 %v5684_v58, %v5673_v12  ;;  %v5438_v13 = vpop.f32.mrb[226].mxu1  ;;  %v15192_v41 = vpop.f32.mrb[4].mxu0 }
 0x7cd   : > { %v5674_v44 = vsub.f32 %v5438_v13, %v5608_v47  ;;  %v5440_v59 = vpop.f32.mrb[227].mxu1  ;;  %v15194_v38 = vpop.f32.mrb[5].mxu0  ;;  %12786 = vrcp.f32 %v5705_v10 }
 0x7ce   : > { %v5685_v28 = vsub.f32 %v5440_v59, %v5619_v19  ;;  %v15198_v22 = vmul.f32 %v15194_v38, %v15192_v41  ;;  %v5610_v19 = vmul.f32 %v5319_v14, %v5319_v14  ;;  %v5621_v59 = vmul.f32 %v5321_v27, %v5321_v27 }
 0x7cf   : > { %v5706_v29 = vadd.f32 0.0009, %v5695_v18 }
 0x7d0   : > { %v5696_v25 = vadd.f32 %v5685_v28, %v5674_v44  ;;  %v5444_v16 = vpop.f32.mrb[228].mxu1  ;;  %v15200_v0 = vpop.f32.mrb[6].mxu0 }
 0x7d1   : > { %v5675_v12 = vsub.f32 %v5444_v16, %v5609_v40  ;;  %v5446_v58 = vpop.f32.mrb[229].mxu1  ;;  %v15202_v5 = vpop.f32.mrb[7].mxu0  ;;  %12788 = vrcp.f32 %v5706_v29 }
 0x7d2   : > { %v5686_v13 = vsub.f32 %v5446_v58, %v5620_v23  ;;  %v15206_v47 = vmul.f32 %v15202_v5, %v15200_v0  ;;  %v5622_v23 = vmul.f32 %v5327_v31, %v5327_v31  ;;  %v5707_v58 = vadd.f32 0.0009, %v5696_v25 }
 0x7d3   : > { %v5623_v31 = vmul.f32 %v15178_v45, %v15178_v45  ;;  %v5613_v45 = vmul.f32 %v15184_v46, %v15184_v46 }
 0x7d4   : > { %v5697_v48 = vadd.f32 %v5686_v13, %v5675_v12  ;;  %v5450_v2 = vpop.f32.mrb[230].mxu1  ;;  %v5551_v56 = vpop.f32.mrb[8].mxu0  ;;  %12790 = vrcp.f32 %v5707_v58 }
 0x7d5   : > { %v5676_v44 = vsub.f32 %v5450_v2, %v5610_v19  ;;  %v5638_v28 = vsub.f32 %v5551_v56, %v15162_v52  ;;  %v5452_v33 = vpop.f32.mrb[231].mxu1  ;;  %v11375_v40 = vpop.f32.mrb[9].mxu0  ;;  %v5612_v52 = vmul.f32 %v15176_v21, %v15176_v21  ;;  %v15958_v21 = vpack.c.bf16 %v14724_v60, %v14726_v49 }
 0x7d6   : > { %v5687_v16 = vsub.f32 %v5452_v33, %v5621_v59  ;;  %v12785_v19 = vpop.eup %12784  ;;  %v5708_v25 = vadd.f32 0.0009, %v5697_v48 }
 0x7d7   : > { %v5649_v53 = vmul.f32 2.0, %v5638_v28  ;;  %v12787_v28 = vpop.eup %12786 }
 0x7d8   : > { %v5698_v1 = vadd.f32 %v5687_v16, %v5676_v44  ;;  %v5456_v7 = vpop.f32.mrb[232].mxu1  ;;  %v5556_v14 = vpop.f32.mrb[10].mxu0  ;;  %12792 = vrcp.f32 %v5708_v25 }
 0x7d9   : > { %v5660_v27 = vadd.f32 0.0009, %v5649_v53  ;;  %v5677_v10 = vsub.f32 %v5456_v7, %v5611_v3  ;;  %v5639_v18 = vsub.f32 %v5556_v14, %v15164_v37  ;;  %v5458_v12 = vpop.f32.mrb[233].mxu1  ;;  %v11378_v13 = vpop.f32.mrb[11].mxu0 }
 0x7da   : > { %v5688_v2 = vsub.f32 %v5458_v12, %v5622_v23  ;;  %v5709_v23 = vadd.f32 0.0009, %v5698_v1  ;;  %v5614_v1 = vmul.f32 %v15192_v41, %v15192_v41 }
 0x7db   : > { %v5716_v33 = vmul.f32 %v12785_v19, %v5660_v27  ;;  %v5650_v8 = vmul.f32 2.0, %v5639_v18  ;;  %v12789_v46 = vpop.eup %12788  ;;  %v15959_v19 = vpack.c.bf16 %v14734_v20, %v14737_v36 }
 0x7dc   : > { %v5699_v59 = vadd.f32 %v5688_v2, %v5677_v10  ;;  %v5462_v29 = vpop.f32.mrb[234].mxu1  ;;  %v5561_v53 = vpop.f32.mrb[12].mxu0  ;;  %12794 = vrcp.f32 %v5709_v23 }
 0x7dd   : > { %v5661_v7 = vadd.f32 0.0009, %v5650_v8  ;;  %v5678_v3 = vsub.f32 %v5462_v29, %v5612_v52  ;;  %v5640_v37 = vsub.f32 %v5561_v53, %v15166_v57  ;;  %v5464_v56 = vpop.f32.mrb[235].mxu1  ;;  %11439 = vmatmul.mubr.f32.vlgmr.msra.gmra.mrb[242].mxu1 %v5716_v33  ;;  %v11381_v44 = vpop.f32.mrb[13].mxu0  ;;  %v5624_v57 = vmul.f32 %v15186_v17, %v15186_v17 }
 0x7de   : > { %v5689_v40 = vsub.f32 %v5464_v56, %v5623_v31  ;;  %12396 = vmatpush1.bf16.msra.mxu1 %v15958_v21  ;;  %11441 = vmatprep.mubr.msk.f32.mxu1 %vm12967_vm2, %v15948_v6  ;;  %v5710_v52 = vadd.f32 0.0009, %v5699_v59  ;;  %v12791_v41 = vpop.eup %12790 }
 0x7df   : > { %v5718_v48 = vmul.f32 %v12787_v28, %v5661_v7  ;;  %v5651_v16 = vmul.f32 2.0, %v5640_v37  ;;  %12397 = vmatprep.subr.bf16.mxu1 %v15949_v39 }
 0x7e0   : > { %v5700_v58 = vadd.f32 %v5689_v40, %v5678_v3  ;;  %v5468_v14 = vpop.f32.mrb[236].mxu1  ;;  %v5566_v27 = vpop.f32.mrb[14].mxu0  ;;  %v15960_v3 = vpack.c.bf16 %v14746_v15, %v14749_v55  ;;  %12796 = vrcp.f32 %v5710_v52 }
 0x7e1   : > { %v5662_v60 = vadd.f32 0.0009, %v5651_v16  ;;  %v5679_v49 = vsub.f32 %v5468_v14, %v5613_v45  ;;  %v5641_v10 = vsub.f32 %v5566_v27, %v15168_v35  ;;  %v5470_v18 = vpop.f32.mrb[237].mxu1  ;;  %11442 = vmatmul.mubr.f32.gmra.mrb[244].mxu1 %v5718_v48  ;;  %v11384_v12 = vpop.f32.mrb[15].mxu0  ;;  %v5625_v35 = vmul.f32 %v15194_v38, %v15194_v38 }
 0x7e2   : > { %v5690_v13 = vsub.f32 %v5470_v18, %v5624_v57  ;;  %12399 = vmatpush1.bf16.msra.mxu1 %v15959_v19  ;;  %11444 = vmatprep.mubr.msk.f32.mxu1 %vm12967_vm2, %v15948_v6  ;;  %v5615_v38 = vmul.f32 %v15200_v0, %v15200_v0  ;;  %v5711_v56 = vadd.f32 0.0009, %v5700_v58  ;;  %v12793_v0 = vpop.eup %12792  ;;  %v15961_v57 = vpack.c.bf16 %v14758_v61, %v14760_v43 }
 0x7e3   : > { %v5720_v17 = vmul.f32 %v12789_v46, %v5662_v60  ;;  %v5652_v2 = vmul.f32 2.0, %v5641_v10  ;;  %12400 = vmatprep.subr.bf16.mxu1 %v15949_v39  ;;  %v15962_v61 = vpack.c.bf16 %v14768_v30, %v14770_v42  ;;  %v15963_v30 = vpack.c.bf16 %v14778_v11, %v14780_v4 }
 0x7e4   : > { %v5701_v33 = vadd.f32 %v5690_v13, %v5679_v49  ;;  %v5474_v8 = vpop.f32.mrb[238].mxu1  ;;  %v5571_v31 = vpop.f32.mrb[16].mxu0  ;;  %12798 = vrcp.f32 %v5711_v56  ;;  %v15964_v11 = vpack.c.bf16 %v14790_v50, %v14799_v26  ;;  %v15968_v56 = vld [vmem:[#allocation27_spill] sm:$0xff] }
 0x7e5   : > { %v5663_v20 = vadd.f32 0.0009, %v5652_v2  ;;  %v5680_v36 = vsub.f32 %v5474_v8, %v5614_v1  ;;  %v5642_v25 = vsub.f32 %v5571_v31, %v15170_v34  ;;  %v5476_v29 = vpop.f32.mrb[239].mxu1  ;;  %11445 = vmatmul.mubr.f32.gmra.mrb[246].mxu1 %v5720_v17  ;;  %v11387_v53 = vpop.f32.mrb[17].mxu0  ;;  %v5626_v34 = vmul.f32 %v15202_v5, %v15202_v5 }
 0x7e6   : > { %v5691_v7 = vsub.f32 %v5476_v29, %v5625_v35  ;;  %12402 = vmatpush1.bf16.msra.mxu1 %v15960_v3  ;;  %11447 = vmatprep.mubr.msk.f32.mxu1 %vm12967_vm2, %v15948_v6  ;;  %v5712_v58 = vadd.f32 0.0009, %v5701_v33  ;;  %v12795_v10 = vpop.eup %12794  ;;  %v15965_v53 = vpack.c.bf16 %v14814_v24, %v14824_v9 }
 0x7e7   : > { %v5722_v59 = vmul.f32 %v12791_v41, %v5663_v20  ;;  %v5653_v37 = vmul.f32 2.0, %v5642_v25  ;;  %12403 = vmatprep.subr.bf16.mxu1 %v15949_v39 }
 0x7e8   : > { %v5702_v44 = vadd.f32 %v5691_v7, %v5680_v36  ;;  %v5480_v28 = vpop.f32.mrb[240].mxu1  ;;  %v5576_v40 = vpop.f32.mrb[18].mxu0  ;;  %12800 = vrcp.f32 %v5712_v58  ;;  %v5935_v58 = vld [vmem:[%s13043_s30 + $0x20] sm:$0xff] }
 0x7e9   : > { %v5664_v15 = vadd.f32 0.0009, %v5653_v37  ;;  %v5681_v55 = vsub.f32 %v5480_v28, %v5615_v38  ;;  %v5643_v21 = vsub.f32 %v5576_v40, %v15172_v32  ;;  %v5482_v45 = vpop.f32.mrb[241].mxu1  ;;  %11448 = vmatmul.mubr.f32.gmra.mrb[248].mxu1 %v5722_v59  ;;  %v11390_v48 = vpop.f32.mrb[19].mxu0  ;;  %v15966_v59 = vld [vmem:[#allocation26_spill] sm:$0xff]  ;;  %v5932_v40 = vld [vmem:[%s13043_s30 + $0x8] sm:$0xff] }
 0x7ea   : > { %v5692_v16 = vsub.f32 %v5482_v45, %v5626_v34  ;;  %12405 = vmatpush1.bf16.msra.mxu1 %v15961_v57  ;;  %11450 = vmatprep.mubr.msk.f32.mxu1 %vm12967_vm2, %v15948_v6  ;;  %v5713_v12 = vadd.f32 0.0009, %v5702_v44  ;;  %v12797_v1 = vpop.eup %12796  ;;  %v15967_v37 = vpack.c.bf16 %v14840_v54, %v15966_v59  ;;  %v15969_v44 = vld [vmem:[#allocation28_spill] sm:$0xff]  ;;  %v15974_v45 = vld [vmem:[#allocation31_spill] sm:$0xff] }
 0x7eb   : > { %v5724_v5 = vmul.f32 %v12793_v0, %v5664_v15  ;;  %v5654_v23 = vmul.f32 2.0, %v5643_v21  ;;  %12406 = vmatprep.subr.bf16.mxu1 %v15949_v39  ;;  %v15970_v28 = vpack.c.bf16 %v15968_v56, %v15969_v44  ;;  %v15971_v15 = vld [vmem:[#allocation29_spill] sm:$0xff]  ;;  %v15975_v48 = vld [vmem:[#allocation32_spill] sm:$0xff]  ;;  %v5934_v57 = vld [vmem:[%s13043_s30 + $0x18] sm:$0xff] }
 0x7ec   : > { %v5703_v14 = vadd.f32 %v5692_v16, %v5681_v55  ;;  %v5581_v32 = vpop.f32.mrb[20].mxu0  ;;  %12802 = vrcp.f32 %v5713_v12  ;;  %v15972_v55 = vld [vmem:[#allocation30_spill] sm:$0xff]  ;;  %v15976_v0 = vpack.c.bf16 %v15974_v45, %v15975_v48  ;;  %v5931_v16 = vld [vmem:[%s13043_s30] sm:$0xff] }
 0x7ed   : > { %v5665_v27 = vadd.f32 0.0009, %v5654_v23  ;;  %v5644_v60 = vsub.f32 %v5581_v32, %v15174_v62  ;;  %11451 = vmatmul.mubr.f32.gmra.mrb[250].mxu1 %v5724_v5  ;;  %v11393_v49 = vpop.f32.mrb[21].mxu0  ;;  %v15973_v21 = vpack.c.bf16 %v15971_v15, %v15972_v55  ;;  %v5933_v5 = vld [vmem:[%s13043_s30 + $0x10] sm:$0xff]  ;;  %v5936_v23 = vld [vmem:[%s13043_s30 + $0x28] sm:$0xff] }
 0x7ee   : > { %12408 = vmatpush1.bf16.msra.mxu1 %v15962_v61  ;;  %11453 = vmatprep.mubr.msk.f32.mxu1 %vm12967_vm2, %v15948_v6  ;;  %v5714_v2 = vadd.f32 0.0009, %v5703_v14  ;;  %v12799_v8 = vpop.eup %12798  ;;  %v5938_v14 = vld [vmem:[%s13043_s30 + $0x38] sm:$0xff]  ;;  %v5937_v32 = vld [vmem:[%s13043_s30 + $0x30] sm:$0xff]  ;;  %v5944_v61 = vld [vmem:[%s13043_s30 + $0x68] sm:$0xff] }
 0x7ef   : > { %v5726_v43 = vmul.f32 %v12795_v10, %v5665_v27  ;;  %v5655_v18 = vmul.f32 2.0, %v5644_v60  ;;  %12409 = vmatprep.subr.bf16.mxu1 %v15949_v39  ;;  %v5940_v27 = vld [vmem:[%s13043_s30 + $0x48] sm:$0xff]  ;;  %v5939_v60 = vld [vmem:[%s13043_s30 + $0x40] sm:$0xff]  ;;  %v5942_v49 = vld [vmem:[%s13043_s30 + $0x58] sm:$0xff] }
 0x7f0   : > { %v5586_v46 = vpop.f32.mrb[22].mxu0  ;;  %12804 = vrcp.f32 %v5714_v2  ;;  %v5941_v10 = vld [vmem:[%s13043_s30 + $0x50] sm:$0xff] }
 0x7f1   : > { %v5666_v13 = vadd.f32 0.0009, %v5655_v18  ;;  %v5645_v62 = vsub.f32 %v5586_v46, %v15182_v63  ;;  %11454 = vmatmul.mubr.f32.gmra.mrb[252].mxu1 %v5726_v43  ;;  %v11396_v19 = vpop.f32.mrb[23].mxu0  ;;  %v5943_v43 = vld [vmem:[%s13043_s30 + $0x60] sm:$0xff]  ;;  %v5946_v18 = vld [vmem:[%s13043_s30 + $0x78] sm:$0xff]  ;;  %v5945_v12 = vld [vmem:[%s13043_s30 + $0x70] sm:$0xff] }
 0x7f2   : > { %12411 = vmatpush1.bf16.msra.mxu1 %v15963_v30  ;;  %11456 = vmatprep.mubr.msk.f32.mxu1 %vm12967_vm2, %v15948_v6  ;;  %v12801_v29 = vpop.eup %12800  ;;  %v5948_v46 = vld [vmem:[%s13043_s30 + $0x88] sm:$0xff]  ;;  %v5949_v19 = vld [vmem:[%s13043_s30 + $0x90] sm:$0xff]  ;;  %v5951_v30 = vld [vmem:[%s13043_s30 + $0xa0] sm:$0xff] }
 0x7f3   : > { %v5728_v42 = vmul.f32 %v12797_v1, %v5666_v13  ;;  %v5656_v17 = vmul.f32 2.0, %v5645_v62  ;;  %12412 = vmatprep.subr.bf16.mxu1 %v15949_v39  ;;  %v5947_v13 = vld [vmem:[%s13043_s30 + $0x80] sm:$0xff]  ;;  %v5950_v62 = vld [vmem:[%s13043_s30 + $0x98] sm:$0xff]  ;;  %v5952_v1 = vld [vmem:[%s13043_s30 + $0xa8] sm:$0xff] }
 0x7f4   : > { %v5591_v35 = vpop.f32.mrb[24].mxu0 }
 0x7f5   : > { %v5667_v52 = vadd.f32 0.0009, %v5656_v17  ;;  %v5646_v63 = vsub.f32 %v5591_v35, %v15190_v51  ;;  %11457 = vmatmul.mubr.f32.gmra.mrb[254].mxu1 %v5728_v42  ;;  %v11399_v33 = vpop.f32.mrb[25].mxu0  ;;  %v5954_v42 = vld [vmem:[%s13043_s30 + $0xb8] sm:$0xff]  ;;  %v5953_v17 = vld [vmem:[%s13043_s30 + $0xb0] sm:$0xff] }
 0x7f6   : > { %12414 = vmatpush1.bf16.msra.mxu1 %v15964_v11  ;;  %11459 = vmatprep.mubr.msk.f32.mxu1 %vm12967_vm2, %v15948_v6  ;;  %v12803_v38 = vpop.eup %12802 }
 0x7f7   : > { %v5730_v4 = vmul.f32 %v12799_v8, %v5667_v52  ;;  %v5657_v31 = vmul.f32 2.0, %v5646_v63  ;;  %12415 = vmatprep.subr.bf16.mxu1 %v15949_v39 }
 0x7f8   : > { %v5596_v20 = vpop.f32.mrb[26].mxu0 }
 0x7f9   : > { %v5668_v36 = vadd.f32 0.0009, %v5657_v31  ;;  %v5647_v25 = vsub.f32 %v5596_v20, %v15198_v22  ;;  %11460 = vmatmul.mubr.f32.gmra.mrb[0].mxu1 %v5730_v4  ;;  %v11402_v51 = vpop.f32.mrb[27].mxu0 }
 0x7fa   : > { %12417 = vmatpush1.bf16.msra.mxu1 %v15965_v53  ;;  %11462 = vmatprep.mubr.msk.f32.mxu1 %vm12967_vm2, %v15948_v6 }
 0x7fb   : > { %v5732_v50 = vmul.f32 %v12801_v29, %v5668_v36  ;;  %v5658_v26 = vmul.f32 2.0, %v5647_v25  ;;  %12418 = vmatprep.subr.bf16.mxu1 %v15949_v39 }
 0x7fc   : > { %v5601_v41 = vpop.f32.mrb[28].mxu0 }
 0x7fd   : > { %v5669_v7 = vadd.f32 0.0009, %v5658_v26  ;;  %v5648_v3 = vsub.f32 %v5601_v41, %v15206_v47  ;;  %11463 = vmatmul.mubr.f32.gmra.mrb[2].mxu1 %v5732_v50  ;;  %v11405_v22 = vpop.f32.mrb[29].mxu0  ;;  %v12805_v47 = vpop.eup %12804 }
 0x7fe   : > { %12420 = vmatpush1.bf16.msra.mxu1 %v15967_v37  ;;  %11465 = vmatprep.mubr.msk.f32.mxu1 %vm12967_vm2, %v15948_v6 }
 0x7ff   : > { %v5734_v24 = vmul.f32 %v12803_v38, %v5669_v7  ;;  %v5659_v9 = vmul.f32 2.0, %v5648_v3  ;;  %12421 = vmatprep.subr.bf16.mxu1 %v15949_v39 }
 0x801   : > { %v5670_v34 = vadd.f32 0.0009, %v5659_v9  ;;  %11466 = vmatmul.mubr.f32.gmra.mrb[4].mxu1 %v5734_v24  ;;  %v5955_v9 = vld [vmem:[%s15924_s6] sm:$0xff] }
 0x802   : > { %12423 = vmatpush1.bf16.msra.mxu1 %v15970_v28  ;;  %11468 = vmatprep.mubr.msk.f32.mxu1 %vm12967_vm2, %v15948_v6  ;;  %v4346_v28 = vld [vmem:[%s13038_s24] sm:$0xf] }
 0x803   : > { %v5736_v54 = vmul.f32 %v12805_v47, %v5670_v34  ;;  %12424 = vmatprep.subr.bf16.mxu1 %v15949_v39  ;;  %v5956_v34 = vld [vmem:[%s15924_s6 + $0x8] sm:$0xff] }
 0x804   : > { %v12430_v56 = vpack.c.bf16 %v5956_v34, %v5955_v9 }
 0x805   : > { %11469 = vmatmul.mubr.f32.gmra.mrb[6].mxu1 %v5736_v54  ;;  %v5957_v54 = vld [vmem:[%s15924_s6 + $0x10] sm:$0xff]  ;;  %s12972_s6 = smov 3  }
 0x806   : > { %12426 = vmatpush1.bf16.msra.mxu1 %v15973_v21  ;;  %10010 = vmatprep.mubr.msk.f32.mxu1 %vm2424_vm1, %v5932_v40 }
 0x807   : > { %12427 = vmatprep.subr.bf16.mxu1 %v15949_v39 }
 0x80a   : > { %12429 = vmatpush1.bf16.msra.mxu1 %v15976_v0 }
 0x80d   : > { %6059 = vmatmul.mubr.f32.vlgmr.msra.gmra.mrb[8].mxu1 %v5931_v16 }
 0x80e   : > { %10011 = vmatprep.mubr.msk.f32.mxu1 %vm2424_vm1, %v5934_v57 }
 0x811   : > { %6064 = vmatmul.mubr.f32.gmra.mrb[10].mxu1 %v5933_v5 }
 0x812   : > { %10012 = vmatprep.mubr.msk.f32.mxu1 %vm2424_vm1, %v5936_v23 }
 0x815   : > { %6069 = vmatmul.mubr.f32.gmra.mrb[12].mxu1 %v5935_v58 }
 0x816   : > { %10013 = vmatprep.mubr.msk.f32.mxu1 %vm2424_vm1, %v5938_v14 }
 0x819   : > { %6074 = vmatmul.mubr.f32.gmra.mrb[14].mxu1 %v5937_v32 }
 0x81a   : > { %10014 = vmatprep.mubr.msk.f32.mxu1 %vm2424_vm1, %v5940_v27 }
 0x81d   : > { %6079 = vmatmul.mubr.f32.gmra.mrb[16].mxu1 %v5939_v60 }
 0x81e   : > { %10015 = vmatprep.mubr.msk.f32.mxu1 %vm2424_vm1, %v5942_v49 }
 0x821   : > { %6084 = vmatmul.mubr.f32.gmra.mrb[18].mxu1 %v5941_v10 }
 0x822   : > { %10016 = vmatprep.mubr.msk.f32.mxu1 %vm2424_vm1, %v5944_v61 }
 0x825   : > { %6089 = vmatmul.mubr.f32.gmra.mrb[20].mxu1 %v5943_v43 }
 0x826   : > { %10017 = vmatprep.mubr.msk.f32.mxu1 %vm2424_vm1, %v5946_v18 }
 0x829   : > { %6094 = vmatmul.mubr.f32.gmra.mrb[22].mxu1 %v5945_v12 }
 0x82a   : > { %10018 = vmatprep.mubr.msk.f32.mxu1 %vm2424_vm1, %v5948_v46 }
 0x82d   : > { %6099 = vmatmul.mubr.f32.gmra.mrb[24].mxu1 %v5947_v13 }
 0x82e   : > { %10019 = vmatprep.mubr.msk.f32.mxu1 %vm2424_vm1, %v5950_v62  ;;  %v6280_v62 = vld [vmem:[%s15977_s11] sm:$0xff] }
 0x831   : > { %6104 = vmatmul.mubr.f32.gmra.mrb[26].mxu1 %v5949_v19  ;;  %v6281_v19 = vld [vmem:[%s15977_s11 + $0x8] sm:$0xf]  ;;  %s12876_s11 = sshll.u32 %s12974_s9, 4  ;;  %s12877_s11 = int_to_ptr.vmem [resolvable:$false] %s12876_s11 }
 0x832   : > { %10020 = vmatprep.mubr.msk.f32.mxu1 %vm2424_vm1, %v5952_v1  ;;  %v15361_v1 = vpack.c.bf16 %v6281_v19, %v6280_v62  ;;  %s12878_s13 = scalar_lea.vmem %s12877_s11, 128 }
 0x834   : > { %12454 = vmatprep.subr.msk.bf16.mxu1 %vm15364_vm9, %v15361_v1 }
 0x835   : > { %6109 = vmatmul.mubr.f32.gmra.mrb[28].mxu1 %v5951_v30  ;;  %v8724_v30 = vld [vmem:[%s13123_s27 + $0x10] sm:$0xff] }
 0x836   : > { %10021 = vmatprep.mubr.msk.f32.mxu1 %vm2424_vm1, %v5954_v42  ;;  %12457 = vmatpush3.bf16.msk.msra.mxu1 %vm15364_vm9, %v15361_v1  ;;  %vm9479_vm1 = vcmask 31744  }
 0x839   : > { %6114 = vmatmul.mubr.f32.gmra.mrb[30].mxu1 %v5953_v17 }
 0x8b0   : > { %v5803_v2 = vpop.f32.mrb[242].mxu1 }
 0x8b1   : > { %v11440_v35 = vpop.f32.mrb[243].mxu1 }
 0x8b4   : > { %v5808_v52 = vpop.f32.mrb[244].mxu1 }
 0x8b5   : > { %v12380_v63 = vpack.c.bf16 %v5808_v52, %v5803_v2  ;;  %v11443_v33 = vpop.f32.mrb[245].mxu1 }
 0x8b7   : > { %12381 = vmatpush3.bf16.msra.mxu0 %v12380_v63 }
 0x8b8   : > { %v5813_v8 = vpop.f32.mrb[246].mxu1  ;;  %12382 = vmatprep.subr.bf16.mxu0 %v15949_v39 }
 0x8b9   : > { %v11446_v11 = vpop.f32.mrb[247].mxu1 }
 0x8bc   : > { %v5818_v4 = vpop.f32.mrb[248].mxu1 }
 0x8bd   : > { %v12383_v31 = vpack.c.bf16 %v5818_v4, %v5813_v8  ;;  %v11449_v20 = vpop.f32.mrb[249].mxu1 }
 0x8bf   : > { %12384 = vmatpush3.bf16.msra.mxu0 %v12383_v31 }
 0x8c0   : > { %v5823_v36 = vpop.f32.mrb[250].mxu1  ;;  %12385 = vmatprep.subr.bf16.mxu0 %v15949_v39 }
 0x8c1   : > { %v11452_v25 = vpop.f32.mrb[251].mxu1 }
 0x8c4   : > { %v5828_v51 = vpop.f32.mrb[252].mxu1 }
 0x8c5   : > { %v12386_v29 = vpack.c.bf16 %v5828_v51, %v5823_v36  ;;  %v11455_v53 = vpop.f32.mrb[253].mxu1 }
 0x8c7   : > { %12387 = vmatpush3.bf16.msra.mxu0 %v12386_v29 }
 0x8c8   : > { %v5833_v50 = vpop.f32.mrb[254].mxu1  ;;  %12388 = vmatprep.subr.bf16.mxu0 %v15949_v39 }
 0x8c9   : > { %v11458_v26 = vpop.f32.mrb[255].mxu1 }
 0x8cc   : > { %v5838_v41 = vpop.f32.mrb[0].mxu1 }
 0x8cd   : > { %v12389_v7 = vpack.c.bf16 %v5838_v41, %v5833_v50  ;;  %v11461_v3 = vpop.f32.mrb[1].mxu1 }
 0x8cf   : > { %12390 = vmatpush3.bf16.msra.mxu0 %v12389_v7 }
 0x8d0   : > { %v5843_v22 = vpop.f32.mrb[2].mxu1  ;;  %12391 = vmatprep.subr.bf16.mxu0 %v15949_v39 }
 0x8d1   : > { %v11464_v38 = vpop.f32.mrb[3].mxu1 }
 0x8d4   : > { %v5848_v59 = vpop.f32.mrb[4].mxu1 }
 0x8d5   : > { %v12392_v37 = vpack.c.bf16 %v5848_v59, %v5843_v22  ;;  %v11467_v24 = vpop.f32.mrb[5].mxu1 }
 0x8d7   : > { %12393 = vmatpush3.bf16.msra.mxu0 %v12392_v37 }
 0x8d8   : > { %v5853_v47 = vpop.f32.mrb[6].mxu1  ;;  %11491 = vmatprep.subr.mxu0 %v15948_v6 }
 0x8d9   : > { %v11470_v44 = vpop.f32.mrb[7].mxu1 }
 0x8db   : > { %11492 = vmatpush3.msra.mxu0 %v5853_v47 }
 0x8dc   : > { %11494 = vmatmul.mubr.msk.f32.vlgmr.msra.gmra.mrb[30].mxu0 %vm5857_vm6, %v4346_v28  ;;  %12431 = vmatprep.subr.bf16.mxu0 %v12430_v56 }
 0x8dd   : > { %12433 = vmatpush3.bf16.msra.mxu0 %v12430_v56 }
 0x8de   : > { %11500 = vmatprep.subr.mxu0 %v5957_v54 }
 0x8e0   : > { %v6060_v40 = vpop.f32.mrb[8].mxu1 }
 0x8e1   : > { %v6062_v15 = vpop.f32.mrb[9].mxu1  ;;  %11501 = vmatpush3.msra.mxu0 %v5957_v54  ;;  %11502 = vmatprep.mubr.msk.f32.mxu0 %vm4383_vm4, %v6060_v40 }
 0x8e2   : > { %12436 = vmatprep.subr.msk.bf16.mxu0 %vm15364_vm9, %v15361_v1 }
 0x8e4   : > { %v6065_v55 = vpop.f32.mrb[10].mxu1 }
 0x8e5   : > { %11503 = vmatmul.mubr.msk.f32.vlgmr.msra.gmra.mrb[32].mxu0 %vm4383_vm4, %v6065_v55  ;;  %v6067_v21 = vpop.f32.mrb[11].mxu1 }
 0x8e6   : > { %12439 = vmatpush3.bf16.msk.msra.mxu0 %vm15364_vm9, %v15361_v1 }
 0x8e7   : > { %12442 = vmatprep.subr.msk.bf16.mxu0 %vm15364_vm9, %v15361_v1 }
 0x8e8   : > { %v6070_v45 = vpop.f32.mrb[12].mxu1 }
 0x8e9   : > { %v6072_v48 = vpop.f32.mrb[13].mxu1  ;;  %11505 = vmatprep.mubr.msk.f32.mxu0 %vm4383_vm4, %v6070_v45 }
 0x8ec   : > { %v6075_v0 = vpop.f32.mrb[14].mxu1 }
 0x8ed   : > { %11506 = vmatmul.mubr.msk.f32.gmra.mrb[34].mxu0 %vm4383_vm4, %v6075_v0  ;;  %v6077_v16 = vpop.f32.mrb[15].mxu1 }
 0x8f0   : > { %v6080_v57 = vpop.f32.mrb[16].mxu1 }
 0x8f1   : > { %v6082_v5 = vpop.f32.mrb[17].mxu1  ;;  %11508 = vmatprep.mubr.msk.f32.mxu0 %vm4383_vm4, %v6080_v57 }
 0x8f4   : > { %v6085_v23 = vpop.f32.mrb[18].mxu1 }
 0x8f5   : > { %11509 = vmatmul.mubr.msk.f32.gmra.mrb[36].mxu0 %vm4383_vm4, %v6085_v23  ;;  %v6087_v58 = vpop.f32.mrb[19].mxu1 }
 0x8f8   : > { %v6090_v14 = vpop.f32.mrb[20].mxu1 }
 0x8f9   : > { %v6092_v32 = vpop.f32.mrb[21].mxu1  ;;  %11511 = vmatprep.mubr.msk.f32.mxu0 %vm4383_vm4, %v6090_v14 }
 0x8fc   : > { %v6095_v27 = vpop.f32.mrb[22].mxu1 }
 0x8fd   : > { %11512 = vmatmul.mubr.msk.f32.gmra.mrb[38].mxu0 %vm4383_vm4, %v6095_v27  ;;  %v6097_v60 = vpop.f32.mrb[23].mxu1 }
 0x900   : > { %v6100_v49 = vpop.f32.mrb[24].mxu1 }
 0x901   : > { %v6102_v10 = vpop.f32.mrb[25].mxu1  ;;  %11514 = vmatprep.mubr.msk.f32.mxu0 %vm4383_vm4, %v6100_v49 }
 0x904   : > { %v6105_v61 = vpop.f32.mrb[26].mxu1 }
 0x905   : > { %11515 = vmatmul.mubr.msk.f32.gmra.mrb[40].mxu0 %vm4383_vm4, %v6105_v61  ;;  %v6107_v43 = vpop.f32.mrb[27].mxu1 }
 0x908   : > { %v6110_v18 = vpop.f32.mrb[28].mxu1 }
 0x909   : > { %v6112_v12 = vpop.f32.mrb[29].mxu1  ;;  %11517 = vmatprep.mubr.msk.f32.mxu0 %vm4383_vm4, %v6110_v18 }
 0x90c   : > { %v6115_v46 = vpop.f32.mrb[30].mxu1 }
 0x90d   : > { %11518 = vmatmul.mubr.msk.f32.gmra.mrb[42].mxu0 %vm4383_vm4, %v6115_v46  ;;  %v6117_v13 = vpop.f32.mrb[31].mxu1 }
 0x9af   : > { %v5927_v42 = vpop.f32.mrb[30].mxu0 }
 0x9b0   : > { %9557 = vrot.lane.b32.xlu0 %v5927_v42, %s12970_s23  ;;  %v11495_v17 = vpop.f32.mrb[31].mxu0  ;;  %s15982_s23 = sld [smem:[#allocation15_spill]] }
 0x9b8   : > { %v11504_v2 = vpop.f32.mrb[32].mxu0 }
 0x9b9   : > { %v6221_v35 = vpop.f32.mrb[33].mxu0  ;;  %v6305_v54 = vmul.f32 %v11504_v2, %v11504_v2 }
 0x9ba   : > { %11524 = vmatprep.mubr.msk.f32.mxu0 %vm6322_vm10, %v6221_v35  ;;  %v15384_v52 = vpack.c.bf16 %v11504_v2, %v6221_v35  ;;  %v6304_v34 = vmul.f32 %v6221_v35, %v6221_v35 }
 0x9bb   : > { %11525 = vmatmul.mubr.msk.f32.vlgmr.msra.gmra.mrb[44].mxu0 %vm6322_vm10, %v11504_v2 }
 0x9bc   : > { %12445 = vmatpush3.bf16.msk.msra.mxu0 %vm15364_vm9, %v15361_v1 }
 0x9bd   : > { %12448 = vmatprep.subr.msk.bf16.mxu0 %vm15364_vm9, %v15361_v1 }
 0x9c0   : > { %v11507_v63 = vpop.f32.mrb[34].mxu0 }
 0x9c1   : > { %v6231_v33 = vpop.f32.mrb[35].mxu0  ;;  %v6307_v15 = vmul.f32 %v11507_v63, %v11507_v63 }
 0x9c2   : > { %11527 = vmatprep.mubr.msk.f32.mxu0 %vm6322_vm10, %v6231_v33  ;;  %v15394_v8 = vpack.c.bf16 %v11507_v63, %v6231_v33  ;;  %v6306_v40 = vmul.f32 %v6231_v33, %v6231_v33 }
 0x9c3   : > { %11528 = vmatmul.mubr.msk.f32.gmra.mrb[46].mxu0 %vm6322_vm10, %v11507_v63 }
 0x9c8   : > { %v11510_v11 = vpop.f32.mrb[36].mxu0 }
 0x9c9   : > { %v6241_v4 = vpop.f32.mrb[37].mxu0  ;;  %v6309_v21 = vmul.f32 %v11510_v11, %v11510_v11 }
 0x9ca   : > { %11530 = vmatprep.mubr.msk.f32.mxu0 %vm6322_vm10, %v6241_v4  ;;  %v15398_v31 = vpack.c.bf16 %v11510_v11, %v6241_v4  ;;  %v6308_v55 = vmul.f32 %v6241_v4, %v6241_v4 }
 0x9cb   : > { %11531 = vmatmul.mubr.msk.f32.gmra.mrb[48].mxu0 %vm6322_vm10, %v11510_v11 }
 0x9d0   : > { %v11513_v20 = vpop.f32.mrb[38].mxu0 }
 0x9d1   : > { %v6317_v36 = vmul.f32 %v11513_v20, %v11504_v2  ;;  %v6251_v25 = vpop.f32.mrb[39].mxu0  ;;  %v6311_v50 = vmul.f32 %v11513_v20, %v11513_v20 }
 0x9d2   : > { %v6310_v51 = vmul.f32 %v6251_v25, %v6251_v25  ;;  %v6316_v29 = vmul.f32 %v6251_v25, %v6221_v35  ;;  %11537 = vmatprep.mubr.msk.f32.mxu0 %vm6322_vm10, %v6251_v25  ;;  %v15402_v53 = vpack.c.bf16 %v11513_v20, %v6251_v25  ;;  %v15450_v25 = vld [vmem:[%s15980_s28 + $0x8] sm:$0xff] }
 0x9d3   : > { %11538 = vmatmul.mubr.msk.f32.vlgmr.msra.gmra.mrb[50].mxu0 %vm6322_vm10, %v11513_v20 }
 0x9d4   : > { %11563 = vmatprep.mubr.msk.f32.mxu1 %vm6322_vm10, %v6310_v51  ;;  %12451 = vmatpush3.bf16.msk.msra.mxu0 %vm15364_vm9, %v15361_v1 }
 0x9d5   : > { %11564 = vmatmul.mubr.msk.f32.vlgmr.msra.gmra.mrb[32].mxu1 %vm6322_vm10, %v6311_v50  ;;  %12460 = vmatprep.subr.msk.bf16.mxu0 %vm15364_vm9, %v15361_v1 }
 0x9d8   : > { %v11516_v26 = vpop.f32.mrb[40].mxu0 }
 0x9d9   : > { %v6319_v41 = vmul.f32 %v11516_v26, %v11507_v63  ;;  %v6261_v7 = vpop.f32.mrb[41].mxu0  ;;  %v6313_v59 = vmul.f32 %v11516_v26, %v11516_v26 }
 0x9da   : > { %v6312_v3 = vmul.f32 %v6261_v7, %v6261_v7  ;;  %v6318_v22 = vmul.f32 %v6261_v7, %v6231_v33  ;;  %11540 = vmatprep.mubr.msk.f32.mxu0 %vm6322_vm10, %v6261_v7  ;;  %v15414_v38 = vpack.c.bf16 %v11516_v26, %v6261_v7  ;;  %v6288_v7 = vld [vmem:[%s15981_s1 + $0x8] sm:$0xff] }
 0x9db   : > { %11541 = vmatmul.mubr.msk.f32.gmra.mrb[52].mxu0 %vm6322_vm10, %v11516_v26  ;;  %v15456_v26 = vld [vmem:[%s15980_s28 + $0x10] sm:$0xff] }
 0x9dc   : > { %11566 = vmatprep.mubr.msk.f32.mxu1 %vm6322_vm10, %v6312_v3 }
 0x9dd   : > { %11567 = vmatmul.mubr.msk.f32.gmra.mrb[34].mxu1 %vm6322_vm10, %v6313_v59 }
 0x9e0   : > { %v11519_v37 = vpop.f32.mrb[42].mxu0 }
 0x9e1   : > { %v6321_v24 = vmul.f32 %v11519_v37, %v11510_v11  ;;  %v6271_v9 = vpop.f32.mrb[43].mxu0  ;;  %v6315_v28 = vmul.f32 %v11519_v37, %v11519_v37  ;;  %v15443_v11 = vld [vmem:[%s15980_s28] sm:$0xff] }
 0x9e2   : > { %v6314_v47 = vmul.f32 %v6271_v9, %v6271_v9  ;;  %v6320_v56 = vmul.f32 %v6271_v9, %v6241_v4  ;;  %11543 = vmatprep.mubr.msk.f32.mxu0 %vm6322_vm10, %v6271_v9  ;;  %v15420_v44 = vpack.c.bf16 %v11519_v37, %v6271_v9  ;;  %v6290_v9 = vld [vmem:[%s15981_s1 + $0x18] sm:$0xff] }
 0x9e3   : > { %11544 = vmatmul.mubr.msk.f32.gmra.mrb[54].mxu0 %vm6322_vm10, %v11519_v37 }
 0x9e4   : > { %11550 = vmatprep.mubr.msk.f32.mxu0 %vm6322_vm10, %v6304_v34  ;;  %11569 = vmatprep.mubr.msk.f32.mxu1 %vm6322_vm10, %v6314_v47  ;;  %v15467_v47 = vld [vmem:[%s15980_s28 + $0x18] sm:$0xff] }
 0x9e5   : > { %11570 = vmatmul.mubr.msk.f32.gmra.mrb[36].mxu1 %vm6322_vm10, %v6315_v28 }
 0x9e6   : > { %6971 = vmatprep.mubr.f32.mxu1 %v15948_v6 }
 0x9e7   : > { %11551 = vmatmul.mubr.msk.f32.vlgmr.msra.gmra.mrb[56].mxu0 %vm6322_vm10, %v6305_v54 }
 0x9e8   : > { %11553 = vmatprep.mubr.msk.f32.mxu0 %vm6322_vm10, %v6306_v40  ;;  %12463 = vmatpush3.bf16.msk.msra.mxu0 %vm15364_vm9, %v15361_v1  ;;  %v6291_v40 = vld [vmem:[%s15981_s1 + $0x20] sm:$0xff] }
 0x9eb   : > { %11554 = vmatmul.mubr.msk.f32.gmra.mrb[58].mxu0 %vm6322_vm10, %v6307_v15  ;;  %v6292_v15 = vld [vmem:[%s15981_s1 + $0x28] sm:$0xff] }
 0x9ec   : > { %11556 = vmatprep.mubr.msk.f32.mxu0 %vm6322_vm10, %v6308_v55 }
 0x9ef   : > { %11557 = vmatmul.mubr.msk.f32.gmra.mrb[60].mxu0 %vm6322_vm10, %v6309_v21  ;;  %v6286_v21 = vld [vmem:[%s15980_s28 + $0x20] sm:$0xff] }
 0x9f0   : > { %11576 = vmatprep.mubr.msk.f32.mxu0 %vm6322_vm10, %v6316_v29 }
 0x9f3   : > { %11577 = vmatmul.mubr.msk.f32.vlgmr.msra.gmra.mrb[62].mxu0 %vm6322_vm10, %v6317_v36 }
 0x9f4   : > { %11579 = vmatprep.mubr.msk.f32.mxu0 %vm6322_vm10, %v6318_v22 }
 0x9f7   : > { %11580 = vmatmul.mubr.msk.f32.gmra.mrb[64].mxu0 %vm6322_vm10, %v6319_v41  ;;  %v6287_v41 = vld [vmem:[%s15981_s1] sm:$0xff] }
 0x9f8   : > { %11582 = vmatprep.mubr.msk.f32.mxu0 %vm6322_vm10, %v6320_v56  ;;  %v12498_v59 = vpack.c.bf16 %v6288_v7, %v6287_v41 }
 0x9fb   : > { %11583 = vmatmul.mubr.msk.f32.gmra.mrb[66].mxu0 %vm6322_vm10, %v6321_v24  ;;  %v6289_v24 = vld [vmem:[%s15981_s1 + $0x10] sm:$0xff] }
 0x9fc   : > { %7066 = vmatprep.mubr.f32.mxu0 %v15948_v6  ;;  %v12501_v28 = vpack.c.bf16 %v6290_v9, %v6289_v24 }
 0xa8e   : > { %v11526_v45 = vpop.f32.mrb[44].mxu0 }
 0xa8f   : > { %v6411_v48 = vpop.f32.mrb[45].mxu0 }
 0xa90   : > { %v12466_v0 = vpack.c.bf16 %v11526_v45, %v6411_v48  ;;  %v12504_v48 = vpack.c.bf16 %v6292_v15, %v6291_v40 }
 0xa96   : > { %v11529_v16 = vpop.f32.mrb[46].mxu0 }
 0xa97   : > { %v6421_v57 = vpop.f32.mrb[47].mxu0 }
 0xa98   : > { %v12470_v5 = vpack.c.bf16 %v11529_v16, %v6421_v57  ;;  %v6293_v16 = vld [vmem:[%s15981_s1 + $0x30] sm:$0xff]  ;;  %v6294_v57 = vld [vmem:[%s15981_s1 + $0x38] sm:$0xff] }
 0xa9e   : > { %v11532_v23 = vpop.f32.mrb[48].mxu0 }
 0xa9f   : > { %v6431_v58 = vpop.f32.mrb[49].mxu0 }
 0xaa0   : > { %v12474_v14 = vpack.c.bf16 %v11532_v23, %v6431_v58  ;;  %v12507_v23 = vpack.c.bf16 %v6294_v57, %v6293_v16  ;;  %v6295_v58 = vld [vmem:[%s15981_s1 + $0x40] sm:$0xff] }
 0xaa6   : > { %v11539_v32 = vpop.f32.mrb[50].mxu0 }
 0xaa7   : > { %v6524_v27 = vpop.f32.mrb[51].mxu0 }
 0xaa8   : > { %v12464_v60 = vpack.c.bf16 %v11539_v32, %v6524_v27  ;;  %v11565_v49 = vpop.f32.mrb[32].mxu1  ;;  %v6297_v27 = vld [vmem:[%s15981_s1 + $0x50] sm:$0xff] }
 0xaa9   : > { %v6750_v10 = vpop.f32.mrb[33].mxu1 }
 0xaaa   : > { %v12476_v61 = vpack.c.bf16 %v11565_v49, %v6750_v10  ;;  %12465 = vmatprep.subr.bf16.mxu1 %v12464_v60  ;;  %v6298_v60 = vld [vmem:[%s15981_s1 + $0x58] sm:$0xff]  ;;  %v6299_v10 = vld [vmem:[%s15981_s1 + $0x60] sm:$0xff] }
 0xaab   : > { %12467 = vmatpush1.bf16.msra.mxu1 %v12466_v0  ;;  %v12513_v49 = vpack.c.bf16 %v6298_v60, %v6297_v27 }
 0xaac   : > { %12477 = vmatprep.subr.bf16.mxu0 %v12476_v61  ;;  %v6300_v61 = vld [vmem:[%s15981_s1 + $0x68] sm:$0xff] }
 0xaae   : > { %v11542_v43 = vpop.f32.mrb[52].mxu0 }
 0xaaf   : > { %v6534_v18 = vpop.f32.mrb[53].mxu0 }
 0xab0   : > { %v12468_v12 = vpack.c.bf16 %v11542_v43, %v6534_v18  ;;  %v11568_v46 = vpop.f32.mrb[34].mxu1  ;;  %v12516_v43 = vpack.c.bf16 %v6300_v61, %v6299_v10  ;;  %v6301_v18 = vld [vmem:[%s15981_s1 + $0x70] sm:$0xff] }
 0xab1   : > { %v6760_v13 = vpop.f32.mrb[35].mxu1 }
 0xab2   : > { %v12480_v62 = vpack.c.bf16 %v11568_v46, %v6760_v13  ;;  %12469 = vmatprep.subr.bf16.mxu1 %v12468_v12  ;;  %v6302_v12 = vld [vmem:[%s15981_s1 + $0x78] sm:$0xff] }
 0xab3   : > { %12471 = vmatpush1.bf16.msra.mxu1 %v12470_v5  ;;  %v12519_v46 = vpack.c.bf16 %v6302_v12, %v6301_v18 }
 0xab6   : > { %v11545_v19 = vpop.f32.mrb[54].mxu0 }
 0xab7   : > { %v6544_v1 = vpop.f32.mrb[55].mxu0 }
 0xab8   : > { %v12472_v42 = vpack.c.bf16 %v11545_v19, %v6544_v1  ;;  %v11571_v17 = vpop.f32.mrb[36].mxu1 }
 0xab9   : > { %v6770_v2 = vpop.f32.mrb[37].mxu1 }
 0xaba   : > { %v12484_v35 = vpack.c.bf16 %v11571_v17, %v6770_v2  ;;  %v11552_v63 = vpop.f32.mrb[56].mxu0  ;;  %12473 = vmatprep.subr.bf16.mxu1 %v12472_v42 }
 0xabb   : > { %v6637_v33 = vpop.f32.mrb[57].mxu0  ;;  %12475 = vmatpush1.bf16.msra.mxu1 %v12474_v14  ;;  %v6296_v14 = vld [vmem:[%s15981_s1 + $0x48] sm:$0xff]  ;;  %s15983_s1 = sld [smem:[#allocation16_spill]] }
 0xabc   : > { %v12478_v4 = vpack.c.bf16 %v11552_v63, %v6637_v33  ;;  %12488 = vmatprep.subr.bf16.mxu1 %v15949_v39  ;;  %v12510_v32 = vpack.c.bf16 %v6296_v14, %v6295_v58 }
 0xabe   : > { %v11555_v20 = vpop.f32.mrb[58].mxu0  ;;  %12479 = vmatpush1.bf16.msra.mxu0 %v12478_v4  ;;  %10069 = vmatmul.mubr.msk.f32.vlgmr.msra.gmra.mrb[38].mxu1 %vm1138_vm0, %v15443_v11 }
 0xabf   : > { %v6647_v36 = vpop.f32.mrb[59].mxu0  ;;  %12481 = vmatprep.subr.bf16.mxu0 %v12480_v62  ;;  %6977 = vmatprep.mubr.f32.mxu1 %v15948_v6 }
 0xac0   : > { %v12482_v51 = vpack.c.bf16 %v11555_v20, %v6647_v36 }
 0xac2   : > { %v11558_v29 = vpop.f32.mrb[60].mxu0  ;;  %12483 = vmatpush1.bf16.msra.mxu0 %v12482_v51  ;;  %10070 = vmatmul.mubr.msk.f32.gmra.mrb[40].mxu1 %vm1138_vm0, %v15450_v25 }
 0xac3   : > { %v6657_v50 = vpop.f32.mrb[61].mxu0  ;;  %12485 = vmatprep.subr.bf16.mxu0 %v12484_v35  ;;  %6983 = vmatprep.mubr.f32.mxu1 %v15948_v6 }
 0xac4   : > { %v12486_v3 = vpack.c.bf16 %v11558_v29, %v6657_v50 }
 0xac6   : > { %v11578_v22 = vpop.f32.mrb[62].mxu0  ;;  %12487 = vmatpush1.bf16.msra.mxu0 %v12486_v3  ;;  %10071 = vmatmul.mubr.msk.f32.gmra.mrb[42].mxu1 %vm1138_vm0, %v15456_v26 }
 0xac7   : > { %v6863_v37 = vpop.f32.mrb[63].mxu0  ;;  %12497 = vmatprep.subr.bf16.mxu0 %v15949_v39  ;;  %6989 = vmatprep.mubr.f32.mxu1 %v15948_v6 }
 0xac8   : > { %v12489_v34 = vpack.c.bf16 %v11578_v22, %v6863_v37 }
 0xac9   : > { %10074 = vmatmul.mubr.msk.f32.vlgmr.msra.gmra.mrb[68].mxu0 %vm1138_vm0, %v15443_v11 }
 0xaca   : > { %v11581_v56 = vpop.f32.mrb[64].mxu0  ;;  %12490 = vmatpush3.bf16.msra.mxu1 %v12489_v34  ;;  %12499 = vmatpush3.bf16.msra.mxu0 %v12498_v59 }
 0xacb   : > { %v6873_v54 = vpop.f32.mrb[65].mxu0  ;;  %7072 = vmatprep.mubr.f32.mxu0 %v15948_v6  ;;  %10072 = vmatmul.mubr.msk.f32.gmra.mrb[44].mxu1 %vm1138_vm0, %v15467_v47 }
 0xacc   : > { %v12492_v55 = vpack.c.bf16 %v11581_v56, %v6873_v54  ;;  %12491 = vmatprep.subr.bf16.mxu1 %v15949_v39  ;;  %12500 = vmatprep.subr.bf16.mxu0 %v15949_v39 }
 0xacd   : > { %10075 = vmatmul.mubr.msk.f32.gmra.mrb[70].mxu0 %vm1138_vm0, %v15450_v25  ;;  %6995 = vmatprep.mubr.f32.mxu1 %v15948_v6 }
 0xace   : > { %v11584_v45 = vpop.f32.mrb[66].mxu0  ;;  %12493 = vmatpush3.bf16.msra.mxu1 %v12492_v55  ;;  %12502 = vmatpush3.bf16.msra.mxu0 %v12501_v28 }
 0xacf   : > { %v6883_v0 = vpop.f32.mrb[67].mxu0  ;;  %7078 = vmatprep.mubr.f32.mxu0 %v15948_v6  ;;  %10073 = vmatmul.mubr.msk.f32.gmra.mrb[46].mxu1 %vm1138_vm0, %v6286_v21 }
 0xad0   : > { %v12495_v5 = vpack.c.bf16 %v11584_v45, %v6883_v0  ;;  %12494 = vmatprep.subr.bf16.mxu1 %v15949_v39  ;;  %12503 = vmatprep.subr.bf16.mxu0 %v15949_v39 }
 0xad1   : > { %10076 = vmatmul.mubr.msk.f32.gmra.mrb[72].mxu0 %vm1138_vm0, %v15456_v26  ;;  %11597 = vmatprep.mubr.msk.f32.mxu1 %vm12967_vm2, %v15948_v6 }
 0xad2   : > { %12496 = vmatpush3.bf16.msra.mxu1 %v12495_v5  ;;  %12505 = vmatpush3.bf16.msra.mxu0 %v12504_v48 }
 0xad3   : > { %7084 = vmatprep.mubr.f32.mxu0 %v15948_v6  ;;  %12506 = vmatprep.subr.bf16.mxu0 %v15949_v39 }
 0xad4   : > { %12521 = vmatprep.subr.bf16.mxu1 %v15949_v39 }
 0xad5   : > { %10077 = vmatmul.mubr.msk.f32.gmra.mrb[74].mxu0 %vm1138_vm0, %v15467_v47  ;;  %11598 = vmatmul.mubr.msk.f32.vlgmr.msra.gmra.mrb[48].mxu1 %vm1138_vm0, %v15443_v11 }
 0xad6   : > { %12508 = vmatpush3.bf16.msra.mxu0 %v12507_v23  ;;  %7090 = vmatprep.mubr.f32.mxu0 %v15948_v6 }
 0xad7   : > { %11600 = vmatprep.mubr.msk.f32.mxu1 %vm12967_vm2, %v15948_v6  ;;  %12509 = vmatprep.subr.bf16.mxu0 %v15949_v39 }
 0xad9   : > { %10078 = vmatmul.mubr.msk.f32.gmra.mrb[76].mxu0 %vm1138_vm0, %v6286_v21  ;;  %11601 = vmatmul.mubr.msk.f32.gmra.mrb[50].mxu1 %vm1138_vm0, %v15450_v25 }
 0xada   : > { %12511 = vmatpush3.bf16.msra.mxu0 %v12510_v32  ;;  %11603 = vmatprep.mubr.msk.f32.mxu1 %vm12967_vm2, %v15948_v6 }
 0xadb   : > { %12512 = vmatprep.subr.bf16.mxu0 %v15949_v39  ;;  %11644 = vmatprep.mubr.msk.f32.mxu0 %vm12967_vm2, %v15948_v6 }
 0xadd   : > { %11604 = vmatmul.mubr.msk.f32.gmra.mrb[52].mxu1 %vm1138_vm0, %v15456_v26 }
 0xade   : > { %12514 = vmatpush3.bf16.msra.mxu0 %v12513_v49  ;;  %11606 = vmatprep.mubr.msk.f32.mxu1 %vm12967_vm2, %v15948_v6 }
 0xadf   : > { %12515 = vmatprep.subr.bf16.mxu0 %v15949_v39 }
 0xae1   : > { %11607 = vmatmul.mubr.msk.f32.gmra.mrb[54].mxu1 %vm1138_vm0, %v15467_v47 }
 0xae2   : > { %12517 = vmatpush3.bf16.msra.mxu0 %v12516_v43  ;;  %11609 = vmatprep.mubr.msk.f32.mxu1 %vm12967_vm2, %v15948_v6 }
 0xae3   : > { %12518 = vmatprep.subr.bf16.mxu0 %v15949_v39 }
 0xae5   : > { %11610 = vmatmul.mubr.msk.f32.gmra.mrb[56].mxu1 %vm1138_vm0, %v6286_v21 }
 0xae6   : > { %12520 = vmatpush3.bf16.msra.mxu0 %v12519_v46  ;;  %11669 = vmatprep.mubr.msk.f32.mxu1 %vm12967_vm2, %v15948_v6 }
 0xae7   : > { %12528 = vmatprep.subr.bf16.mxu0 %v15384_v52 }
 0xb91   : > { %v6973_v13 = vpop.f32.mrb[38].mxu1 }
 0xb92   : > { %v6975_v62 = vpop.f32.mrb[39].mxu1  ;;  %v7187_v63 = vmul.f32 %v6973_v13, %v6973_v13 }
 0xb93   : > { %v7197_v19 = vmul.f32 %v6975_v62, %v6973_v13  ;;  %v7192_v11 = vmul.f32 %v6975_v62, %v6975_v62 }
 0xb95   : > { %v6979_v1 = vpop.f32.mrb[40].mxu1 }
 0xb96   : > { %v6981_v42 = vpop.f32.mrb[41].mxu1  ;;  %v7188_v29 = vmul.f32 %v6979_v1, %v6979_v1 }
 0xb97   : > { %v7198_v17 = vmul.f32 %v6981_v42, %v6979_v1  ;;  %v7193_v26 = vmul.f32 %v6981_v42, %v6981_v42 }
 0xb99   : > { %v6985_v2 = vpop.f32.mrb[42].mxu1 }
 0xb9a   : > { %v6987_v35 = vpop.f32.mrb[43].mxu1  ;;  %v7189_v34 = vmul.f32 %v6985_v2, %v6985_v2 }
 0xb9b   : > { %v15533_v33 = vmul.f32 %v6987_v35, %v6985_v2  ;;  %v7194_v56 = vmul.f32 %v6987_v35, %v6987_v35 }
 0xb9c   : > { %v7068_v4 = vpop.f32.mrb[68].mxu0 }
 0xb9d   : > { %v7217_v20 = vsub.f32 %v7068_v4, %v7187_v63  ;;  %v7070_v36 = vpop.f32.mrb[69].mxu0 }
 0xb9e   : > { %v7222_v25 = vsub.f32 %v7070_v36, %v7192_v11  ;;  %v6991_v51 = vpop.f32.mrb[44].mxu1 }
 0xb9f   : > { %v6993_v50 = vpop.f32.mrb[45].mxu1  ;;  %v7190_v48 = vmul.f32 %v6991_v51, %v6991_v51 }
 0xba0   : > { %v7227_v41 = vadd.f32 %v7222_v25, %v7217_v20  ;;  %v7074_v7 = vpop.f32.mrb[70].mxu0  ;;  %v15535_v3 = vmul.f32 %v6993_v50, %v6991_v51  ;;  %v7195_v0 = vmul.f32 %v6993_v50, %v6993_v50 }
 0xba1   : > { %v7218_v22 = vsub.f32 %v7074_v7, %v7188_v29  ;;  %v7076_v59 = vpop.f32.mrb[71].mxu0 }
 0xba2   : > { %v7232_v37 = vadd.f32 0.0009, %v7227_v41  ;;  %v7223_v24 = vsub.f32 %v7076_v59, %v7193_v26  ;;  %v6997_v9 = vpop.f32.mrb[46].mxu1 }
 0xba3   : > { %v6999_v47 = vpop.f32.mrb[47].mxu1  ;;  %v7191_v49 = vmul.f32 %v6997_v9, %v6997_v9 }
 0xba4   : > { %12806 = vrcp.f32 %v7232_v37  ;;  %v7228_v28 = vadd.f32 %v7223_v24, %v7218_v22  ;;  %v7080_v54 = vpop.f32.mrb[72].mxu0  ;;  %v15537_v40 = vmul.f32 %v6999_v47, %v6997_v9  ;;  %v7196_v61 = vmul.f32 %v6999_v47, %v6999_v47 }
 0xba5   : > { %v7219_v15 = vsub.f32 %v7080_v54, %v7189_v34  ;;  %v7082_v55 = vpop.f32.mrb[73].mxu0 }
 0xba6   : > { %v7233_v21 = vadd.f32 0.0009, %v7228_v28  ;;  %v7224_v45 = vsub.f32 %v7082_v55, %v7194_v56  ;;  %v7414_v55 = vld [vmem:[%s15982_s23 + $0x18] sm:$0xff] }
 0xba8   : > { %12808 = vrcp.f32 %v7233_v21  ;;  %v7229_v16 = vadd.f32 %v7224_v45, %v7219_v15  ;;  %v7086_v57 = vpop.f32.mrb[74].mxu0  ;;  %v7163_v5 = vpop.f32.mrb[48].mxu1  ;;  %v7412_v15 = vld [vmem:[%s15982_s23 + $0x8] sm:$0xff]  ;;  %v7415_v21 = vld [vmem:[%s15982_s23 + $0x20] sm:$0xff] }
 0xba9   : > { %v7220_v23 = vsub.f32 %v7086_v57, %v7190_v48  ;;  %v7202_v58 = vsub.f32 %v7163_v5, %v7197_v19  ;;  %v7088_v14 = vpop.f32.mrb[75].mxu0  ;;  %v11599_v32 = vpop.f32.mrb[49].mxu1 }
 0xbaa   : > { %v7234_v27 = vadd.f32 0.0009, %v7229_v16  ;;  %v7225_v60 = vsub.f32 %v7088_v14, %v7195_v0  ;;  %v7417_v32 = vld [vmem:[%s15983_s1] sm:$0xff] }
 0xbab   : > { %v7207_v10 = vmul.f32 2.0, %v7202_v58 }
 0xbac   : > { %12810 = vrcp.f32 %v7234_v27  ;;  %v7230_v43 = vadd.f32 %v7225_v60, %v7220_v23  ;;  %v7092_v18 = vpop.f32.mrb[76].mxu0  ;;  %v7168_v12 = vpop.f32.mrb[50].mxu1  ;;  %v7418_v27 = vld [vmem:[%s15983_s1 + $0x8] sm:$0xf]  ;;  %s15988_s1 = sld [smem:[#allocation20_spill]] }
 0xbad   : > { %v7212_v46 = vadd.f32 0.0009, %v7207_v10  ;;  %v7221_v13 = vsub.f32 %v7092_v18, %v7191_v49  ;;  %v7203_v62 = vsub.f32 %v7168_v12, %v7198_v17  ;;  %v7094_v1 = vpop.f32.mrb[77].mxu0  ;;  %v11602_v42 = vpop.f32.mrb[51].mxu1  ;;  %v12551_v49 = vpack.c.bf16 %v7418_v27, %v7417_v32 }
 0xbae   : > { %v12807_v2 = vpop.eup %12806  ;;  %v7235_v35 = vadd.f32 0.0009, %v7230_v43  ;;  %v7226_v63 = vsub.f32 %v7094_v1, %v7196_v61  ;;  %v6303_v61 = vld [vmem:[%s15984_s3] sm:$0xf]  ;;  %s12971_s3 = smov 2  }
 0xbaf   : > { %v7238_v19 = vmul.f32 %v12807_v2, %v7212_v46  ;;  %v7208_v11 = vmul.f32 2.0, %v7203_v62  ;;  %v7648_v1 = vld [vmem:[%s15985_s5] sm:$0x3f]  ;;  %s15986_s5 = sld [smem:[#allocation18_spill]] }
 0xbb0   : > { %12812 = vrcp.f32 %v7235_v35  ;;  %v7231_v4 = vadd.f32 %v7226_v63, %v7221_v13  ;;  %v7173_v20 = vpop.f32.mrb[52].mxu1 }
 0xbb1   : > { %v7213_v36 = vadd.f32 0.0009, %v7208_v11  ;;  %v7204_v25 = vsub.f32 %v7173_v20, %v15533_v33  ;;  %11645 = vmatmul.mubr.f32.vlgmr.msra.gmra.mrb[78].mxu0 %v7238_v19  ;;  %v11605_v51 = vpop.f32.mrb[53].mxu1 }
 0xbb2   : > { %v12809_v29 = vpop.eup %12808  ;;  %v7236_v50 = vadd.f32 0.0009, %v7231_v4  ;;  %12530 = vmatpush3.bf16.msra.mxu0 %v15384_v52  ;;  %11647 = vmatprep.mubr.msk.f32.mxu0 %vm12967_vm2, %v15948_v6 }
 0xbb3   : > { %v7240_v17 = vmul.f32 %v12809_v29, %v7213_v36  ;;  %v7209_v26 = vmul.f32 2.0, %v7204_v25  ;;  %12532 = vmatprep.subr.bf16.mxu0 %v15394_v8 }
 0xbb4   : > { %12814 = vrcp.f32 %v7236_v50  ;;  %v7178_v41 = vpop.f32.mrb[54].mxu1 }
 0xbb5   : > { %v7214_v7 = vadd.f32 0.0009, %v7209_v26  ;;  %v7205_v22 = vsub.f32 %v7178_v41, %v15535_v3  ;;  %11648 = vmatmul.mubr.f32.gmra.mrb[80].mxu0 %v7240_v17  ;;  %v11608_v33 = vpop.f32.mrb[55].mxu1 }
 0xbb6   : > { %v12811_v59 = vpop.eup %12810  ;;  %12534 = vmatpush3.bf16.msra.mxu0 %v15394_v8  ;;  %11650 = vmatprep.mubr.msk.f32.mxu0 %vm12967_vm2, %v15948_v6 }
 0xbb7   : > { %v7242_v52 = vmul.f32 %v12811_v59, %v7214_v7  ;;  %v7210_v37 = vmul.f32 2.0, %v7205_v22  ;;  %12536 = vmatprep.subr.bf16.mxu0 %v15398_v31 }
 0xbb8   : > { %v7183_v24 = vpop.f32.mrb[56].mxu1 }
 0xbb9   : > { %v7215_v9 = vadd.f32 0.0009, %v7210_v37  ;;  %v7206_v34 = vsub.f32 %v7183_v24, %v15537_v40  ;;  %11651 = vmatmul.mubr.f32.gmra.mrb[82].mxu0 %v7242_v52  ;;  %v11611_v47 = vpop.f32.mrb[57].mxu1  ;;  %v7411_v40 = vld [vmem:[%s15982_s23] sm:$0xff] }
 0xbba   : > { %v12813_v3 = vpop.eup %12812  ;;  %12538 = vmatpush3.bf16.msra.mxu0 %v15398_v31  ;;  %11653 = vmatprep.mubr.msk.f32.mxu0 %vm12967_vm2, %v15948_v6 }
 0xbbb   : > { %v7244_v8 = vmul.f32 %v12813_v3, %v7215_v9  ;;  %v7211_v56 = vmul.f32 2.0, %v7206_v34  ;;  %12540 = vmatprep.subr.bf16.mxu0 %v15402_v53 }
 0xbbd   : > { %v7216_v28 = vadd.f32 0.0009, %v7211_v56  ;;  %11654 = vmatmul.mubr.f32.gmra.mrb[84].mxu0 %v7244_v8 }
 0xbbe   : > { %v12815_v54 = vpop.eup %12814  ;;  %12542 = vmatpush3.bf16.msra.mxu0 %v15402_v53  ;;  %11656 = vmatprep.mubr.msk.f32.mxu0 %vm12967_vm2, %v15948_v6  ;;  %v7413_v53 = vld [vmem:[%s15982_s23 + $0x10] sm:$0xff] }
 0xbbf   : > { %v7246_v31 = vmul.f32 %v12815_v54, %v7216_v28  ;;  %12544 = vmatprep.subr.bf16.mxu0 %v15414_v38 }
 0xbc1   : > { %11657 = vmatmul.mubr.f32.gmra.mrb[86].mxu0 %v7246_v31 }
 0xbc2   : > { %12546 = vmatpush3.bf16.msra.mxu0 %v15414_v38  ;;  %11696 = vmatprep.mubr.msk.f32.mxu0 %vm5189_vm5, %v7411_v40  ;;  %v7416_v38 = vld [vmem:[%s15982_s23 + $0x28] sm:$0xff] }
 0xbc3   : > { %12548 = vmatprep.subr.bf16.mxu0 %v15420_v44 }
 0xbc6   : > { %12550 = vmatpush3.bf16.msra.mxu0 %v15420_v44 }
 0xbc7   : > { %11740 = vmatprep.subr.mxu0 %v15948_v6 }
 0xbc9   : > { %11697 = vmatmul.mubr.msk.f32.vlgmr.msra.gmra.mrb[88].mxu0 %vm5189_vm5, %v7412_v15 }
 0xbca   : > { %11699 = vmatprep.mubr.msk.f32.mxu0 %vm5189_vm5, %v7413_v53  ;;  %11741 = vmatpush3.msk.msra.mxu0 %vm7687_vm12, %v7648_v1 }
 0xbcb   : > { %11762 = vmatprep.subr.mxu0 %v15948_v6 }
 0xbcd   : > { %11700 = vmatmul.mubr.msk.f32.gmra.mrb[90].mxu0 %vm5189_vm5, %v7414_v55 }
 0xbce   : > { %11702 = vmatprep.mubr.msk.f32.mxu0 %vm5189_vm5, %v7415_v21 }
 0xbd1   : > { %11703 = vmatmul.mubr.msk.f32.gmra.mrb[92].mxu0 %vm5189_vm5, %v7416_v38 }
 0xbd2   : > { %11742 = vmatprep.mubr.msk.f32.mxu0 %vm12967_vm2, %v15948_v6 }
 0xc84   : > { %v7313_v44 = vpop.f32.mrb[78].mxu0 }
 0xc85   : > { %v11646_v45 = vpop.f32.mrb[79].mxu0 }
 0xc88   : > { %v7318_v48 = vpop.f32.mrb[80].mxu0 }
 0xc89   : > { %v12522_v0 = vpack.c.bf16 %v7318_v48, %v7313_v44  ;;  %v11649_v16 = vpop.f32.mrb[81].mxu0 }
 0xc8b   : > { %12523 = vmatpush3.bf16.msra.mxu1 %v12522_v0 }
 0xc8c   : > { %v7323_v57 = vpop.f32.mrb[82].mxu0  ;;  %12524 = vmatprep.subr.bf16.mxu1 %v15949_v39 }
 0xc8d   : > { %v11652_v5 = vpop.f32.mrb[83].mxu0 }
 0xc90   : > { %v7328_v23 = vpop.f32.mrb[84].mxu0 }
 0xc91   : > { %v12525_v58 = vpack.c.bf16 %v7328_v23, %v7323_v57  ;;  %v11655_v14 = vpop.f32.mrb[85].mxu0 }
 0xc92   : > { %v7649_v14 = vld [vmem:[%s15986_s5] sm:$0xff] }
 0xc93   : > { %12526 = vmatpush3.bf16.msra.mxu1 %v12525_v58 }
 0xc94   : > { %v7333_v60 = vpop.f32.mrb[86].mxu0  ;;  %11667 = vmatprep.subr.mxu1 %v15948_v6 }
 0xc95   : > { %v11658_v10 = vpop.f32.mrb[87].mxu0 }
 0xc97   : > { %11668 = vmatpush3.msra.mxu1 %v7333_v60 }
 0xc98   : > { %11670 = vmatmul.mubr.msk.f32.vlgmr.msra.gmra.mrb[58].mxu1 %vm7337_vm11, %v6303_v61  ;;  %12553 = vmatprep.subr.msk.bf16.mxu1 %vm15364_vm9, %v12551_v49 }
 0xc99   : > { %12556 = vmatpush3.bf16.msk.msra.mxu1 %vm15364_vm9, %v12551_v49  ;;  %v7650_v49 = vld [vmem:[%s15986_s5 + $0x8] sm:$0xff]  ;;  %s15990_s5 = sld [smem:[#allocation22_spill]] }
 0xc9a   : > { %11718 = vmatprep.subr.mxu1 %v15948_v6 }
 0xc9c   : > { %v11698_v43 = vpop.f32.mrb[88].mxu0 }
 0xc9d   : > { %v7503_v18 = vpop.f32.mrb[89].mxu0 }
 0xc9e   : > { %11709 = vmatprep.mubr.msk.f32.mxu1 %vm6322_vm10, %v7503_v18 }
 0xc9f   : > { %11710 = vmatmul.mubr.msk.f32.vlgmr.msra.gmra.mrb[60].mxu1 %vm6322_vm10, %v11698_v43 }
 0xca0   : > { %v11701_v12 = vpop.f32.mrb[90].mxu0  ;;  %11719 = vmatpush3.msk.msra.mxu1 %vm7687_vm12, %v7648_v1 }
 0xca1   : > { %v7513_v46 = vpop.f32.mrb[91].mxu0  ;;  %11729 = vmatprep.subr.mxu1 %v15948_v6 }
 0xca2   : > { %11712 = vmatprep.mubr.msk.f32.mxu1 %vm6322_vm10, %v7513_v46 }
 0xca3   : > { %11713 = vmatmul.mubr.msk.f32.gmra.mrb[62].mxu1 %vm6322_vm10, %v11701_v12 }
 0xca4   : > { %v11704_v13 = vpop.f32.mrb[92].mxu0 }
 0xca5   : > { %v7523_v62 = vpop.f32.mrb[93].mxu0 }
 0xca6   : > { %11715 = vmatprep.mubr.msk.f32.mxu1 %vm6322_vm10, %v7523_v62 }
 0xca7   : > { %11716 = vmatmul.mubr.msk.f32.gmra.mrb[64].mxu1 %vm6322_vm10, %v11704_v13 }
 0xca8   : > { %11720 = vmatprep.mubr.msk.f32.mxu1 %vm12967_vm2, %v15948_v6 }
 0xd6b   : > { %v7407_v42 = vpop.f32.mrb[58].mxu1 }
 0xd6c   : > { %9561 = vrot.lane.b32.xlu0 %v7407_v42, %s12971_s3  ;;  %v11671_v2 = vpop.f32.mrb[59].mxu1  ;;  %s15987_s3 = sld [smem:[#allocation19_spill]] }
 0xd72   : > { %v15599_v35 = vpop.f32.mrb[60].mxu1  ;;  %v7651_v18 = vld [vmem:[%s15987_s3] sm:$0xff]  ;;  %v7652_v12 = vld [vmem:[%s15987_s3 + $0x8] sm:$0xff]  ;;  %v7653_v13 = vld [vmem:[%s15987_s3 + $0x10] sm:$0xff] }
 0xd73   : > { %v15601_v63 = vpop.f32.mrb[61].mxu1  ;;  %v7669_v25 = vmul.f32 %v15599_v35, %v15599_v35  ;;  %v7654_v62 = vld [vmem:[%s15987_s3 + $0x18] sm:$0xff]  ;;  %v12569_v42 = vpack.c.bf16 %v7652_v12, %v7651_v18 }
 0xd74   : > { %v7668_v19 = vmul.f32 %v15601_v63, %v15601_v63  ;;  %v12605_v11 = vpack.c.bf16 %v15599_v35, %v15601_v63  ;;  %11721 = vmatmul.mubr.msk.f32.vlgmr.msra.gmra.mrb[66].mxu1 %vm7677_vm13, %v15601_v63  ;;  %v12573_v2 = vpack.c.bf16 %v7654_v62, %v7653_v13 }
 0xd75   : > { %11723 = vmatprep.mubr.msk.f32.mxu1 %vm12967_vm2, %v15948_v6  ;;  %11730 = vmatpush3.msk.msra.mxu1 %vm7687_vm12, %v7648_v1 }
 0xd76   : > { %v15612_v4 = vpop.f32.mrb[62].mxu1  ;;  %11743 = vmatmul.mubr.msk.f32.vlgmr.msra.gmra.mrb[94].mxu0 %vm7677_vm13, %v7668_v19  ;;  %11751 = vmatprep.subr.mxu1 %v15948_v6  ;;  %v7655_v19 = vld [vmem:[%s15987_s3 + $0x20] sm:$0xff] }
 0xd77   : > { %v7674_v20 = vmul.f32 %v15612_v4, %v15601_v63  ;;  %v15618_v36 = vpop.f32.mrb[63].mxu1  ;;  %11745 = vmatprep.mubr.msk.f32.mxu0 %vm12967_vm2, %v15948_v6  ;;  %11763 = vmatpush3.msk.msra.mxu0 %vm7687_vm12, %v7648_v1  ;;  %v7671_v22 = vmul.f32 %v15612_v4, %v15612_v4 }
 0xd78   : > { %11724 = vmatmul.mubr.msk.f32.gmra.mrb[68].mxu1 %vm7677_vm13, %v15599_v35  ;;  %v12608_v51 = vpack.c.bf16 %v15612_v4, %v15618_v36  ;;  %v7670_v26 = vmul.f32 %v15618_v36, %v15618_v36 }
 0xd79   : > { %11726 = vmatprep.mubr.msk.f32.mxu1 %vm12967_vm2, %v15948_v6 }
 0xd7a   : > { %v15631_v29 = vpop.f32.mrb[64].mxu1  ;;  %11746 = vmatmul.mubr.msk.f32.gmra.mrb[96].mxu0 %vm7677_vm13, %v7669_v25 }
 0xd7b   : > { %v7676_v50 = vmul.f32 %v15631_v29, %v15618_v36  ;;  %v15636_v17 = vpop.f32.mrb[65].mxu1  ;;  %11748 = vmatprep.mubr.msk.f32.mxu0 %vm12967_vm2, %v15948_v6  ;;  %v7673_v59 = vmul.f32 %v15631_v29, %v15631_v29 }
 0xd7c   : > { %v7675_v41 = vmul.f32 %v15599_v35, %v15636_v17  ;;  %v12611_v7 = vpack.c.bf16 %v15631_v29, %v15636_v17  ;;  %11727 = vmatmul.mubr.msk.f32.gmra.mrb[70].mxu1 %vm7677_vm13, %v15618_v36  ;;  %v7672_v33 = vmul.f32 %v15636_v17, %v15636_v17 }
 0xd7d   : > { %11731 = vmatprep.mubr.msk.f32.mxu1 %vm12967_vm2, %v15948_v6 }
 0xd7e   : > { %11749 = vmatmul.mubr.msk.f32.gmra.mrb[98].mxu0 %vm7677_vm13, %v7670_v26  ;;  %v7658_v26 = vld [vmem:[%s15987_s3 + $0x38] sm:$0xff] }
 0xd7f   : > { %11764 = vmatprep.mubr.msk.f32.mxu0 %vm12967_vm2, %v15948_v6 }
 0xd80   : > { %11732 = vmatmul.mubr.msk.f32.vlgmr.msra.gmra.mrb[72].mxu1 %vm7677_vm13, %v15612_v4 }
 0xd81   : > { %11734 = vmatprep.mubr.msk.f32.mxu1 %vm12967_vm2, %v15948_v6  ;;  %11752 = vmatpush3.msk.msra.mxu1 %vm7687_vm12, %v7648_v1 }
 0xd82   : > { %11765 = vmatmul.mubr.msk.f32.vlgmr.msra.gmra.mrb[100].mxu0 %vm7677_vm13, %v7674_v20  ;;  %v7656_v20 = vld [vmem:[%s15987_s3 + $0x28] sm:$0xff] }
 0xd83   : > { %11767 = vmatprep.mubr.msk.f32.mxu0 %vm12967_vm2, %v15948_v6  ;;  %v12577_v25 = vpack.c.bf16 %v7656_v20, %v7655_v19 }
 0xd84   : > { %11735 = vmatmul.mubr.msk.f32.gmra.mrb[74].mxu1 %vm7677_vm13, %v15636_v17 }
 0xd85   : > { %11737 = vmatprep.mubr.msk.f32.mxu1 %vm12967_vm2, %v15948_v6 }
 0xd86   : > { %11768 = vmatmul.mubr.msk.f32.gmra.mrb[102].mxu0 %vm7677_vm13, %v7675_v41 }
 0xd87   : > { %11770 = vmatprep.mubr.msk.f32.mxu0 %vm12967_vm2, %v15948_v6 }
 0xd88   : > { %11738 = vmatmul.mubr.msk.f32.gmra.mrb[76].mxu1 %vm7677_vm13, %v15631_v29 }
 0xd89   : > { %11753 = vmatprep.mubr.msk.f32.mxu1 %vm12967_vm2, %v15948_v6 }
 0xd8a   : > { %11771 = vmatmul.mubr.msk.f32.gmra.mrb[104].mxu0 %vm7677_vm13, %v7676_v50  ;;  %v7657_v50 = vld [vmem:[%s15987_s3 + $0x30] sm:$0xff] }
 0xd8b   : > { %8274 = vmatprep.mubr.f32.mxu0 %v15948_v6  ;;  %v12581_v41 = vpack.c.bf16 %v7658_v26, %v7657_v50  ;;  %v7667_v50 = vld [vmem:[%s15988_s1] sm:$0xf]  ;;  %s15991_s1 = sld [smem:[#allocation23_spill]] }
 0xd8c   : > { %11754 = vmatmul.mubr.msk.f32.vlgmr.msra.gmra.mrb[78].mxu1 %vm7677_vm13, %v7671_v22  ;;  %v7659_v22 = vld [vmem:[%s15987_s3 + $0x40] sm:$0xff] }
 0xd8d   : > { %11756 = vmatprep.mubr.msk.f32.mxu1 %vm12967_vm2, %v15948_v6 }
 0xd90   : > { %11757 = vmatmul.mubr.msk.f32.gmra.mrb[80].mxu1 %vm7677_vm13, %v7672_v33  ;;  %v7660_v33 = vld [vmem:[%s15987_s3 + $0x48] sm:$0xff] }
 0xd91   : > { %11759 = vmatprep.mubr.msk.f32.mxu1 %vm12967_vm2, %v15948_v6 }
 0xd94   : > { %11760 = vmatmul.mubr.msk.f32.gmra.mrb[82].mxu1 %vm7677_vm13, %v7673_v59  ;;  %v12585_v59 = vpack.c.bf16 %v7660_v33, %v7659_v22  ;;  %v8720_v33 = vld [vmem:[%s15991_s1] sm:$0x7] }
 0xd95   : > { %8197 = vmatprep.mubr.f32.mxu1 %v15948_v6 }
 0xe47   : > { %v7757_v52 = vpop.f32.mrb[66].mxu1 }
 0xe48   : > { %v11722_v37 = vpop.f32.mrb[67].mxu1 }
 0xe49   : > { %v7935_v24 = vpop.f32.mrb[94].mxu0  ;;  %v7662_v37 = vld [vmem:[%s15987_s3 + $0x58] sm:$0xff] }
 0xe4a   : > { %v11744_v9 = vpop.f32.mrb[95].mxu0 }
 0xe4b   : > { %v7762_v34 = vpop.f32.mrb[68].mxu1  ;;  %v7663_v9 = vld [vmem:[%s15987_s3 + $0x60] sm:$0xff] }
 0xe4c   : > { %v12559_v47 = vpack.c.bf16 %v7762_v34, %v7757_v52  ;;  %v11725_v3 = vpop.f32.mrb[69].mxu1  ;;  %v7661_v52 = vld [vmem:[%s15987_s3 + $0x50] sm:$0xff]  ;;  %v7664_v34 = vld [vmem:[%s15987_s3 + $0x68] sm:$0xff] }
 0xe4d   : > { %v7940_v8 = vpop.f32.mrb[96].mxu0  ;;  %v7665_v3 = vld [vmem:[%s15987_s3 + $0x70] sm:$0xff] }
 0xe4e   : > { %v12563_v56 = vpack.c.bf16 %v7940_v8, %v7935_v24  ;;  %v11747_v28 = vpop.f32.mrb[97].mxu0  ;;  %v12589_v24 = vpack.c.bf16 %v7662_v37, %v7661_v52  ;;  %v7666_v8 = vld [vmem:[%s15987_s3 + $0x78] sm:$0xff]  ;;  %s15989_s3 = sld [smem:[#allocation21_spill]] }
 0xe4f   : > { %v7767_v54 = vpop.f32.mrb[70].mxu1 }
 0xe50   : > { %v11728_v31 = vpop.f32.mrb[71].mxu1 }
 0xe51   : > { %v7945_v40 = vpop.f32.mrb[98].mxu0 }
 0xe52   : > { %v11750_v15 = vpop.f32.mrb[99].mxu0 }
 0xe53   : > { %v7846_v53 = vpop.f32.mrb[72].mxu1 }
 0xe54   : > { %v11733_v55 = vpop.f32.mrb[73].mxu1  ;;  %v8535_v26 = vld [vmem:[%s15989_s3] sm:$0xff]  ;;  %v8536_v35 = vld [vmem:[%s15989_s3 + $0x8] sm:$0xff]  ;;  %v8537_v63 = vld [vmem:[%s15989_s3 + $0x10] sm:$0xff]  ;;  %s10158_s3 = sshll.u32 %s13156_s0, 6 }
 0xe55   : > { %v8113_v21 = vpop.f32.mrb[100].mxu0 }
 0xe56   : > { %v11766_v38 = vpop.f32.mrb[101].mxu0 }
 0xe57   : > { %v7851_v44 = vpop.f32.mrb[74].mxu1 }
 0xe58   : > { %v12557_v45 = vpack.c.bf16 %v7851_v44, %v7846_v53  ;;  %v11736_v48 = vpop.f32.mrb[75].mxu1 }
 0xe59   : > { %v8118_v0 = vpop.f32.mrb[102].mxu0 }
 0xe5a   : > { %v12565_v16 = vpack.c.bf16 %v8118_v0, %v8113_v21  ;;  %v11769_v57 = vpop.f32.mrb[103].mxu0  ;;  %12558 = vmatprep.subr.bf16.mxu1 %v12557_v45 }
 0xe5b   : > { %v7856_v5 = vpop.f32.mrb[76].mxu1  ;;  %12560 = vmatpush1.bf16.msra.mxu1 %v12559_v47  ;;  %v12593_v47 = vpack.c.bf16 %v7664_v34, %v7663_v9 }
 0xe5c   : > { %v11739_v23 = vpop.f32.mrb[77].mxu1  ;;  %8137 = vmatprep.subr.mxu1 %v7856_v5 }
 0xe5d   : > { %v8123_v58 = vpop.f32.mrb[104].mxu0 }
 0xe5e   : > { %v11772_v32 = vpop.f32.mrb[105].mxu0 }
 0xe5f   : > { %v8024_v27 = vpop.f32.mrb[78].mxu1  ;;  %8138 = vmatpush1.msra.mxu1 %v7767_v54 }
 0xe60   : > { %v11755_v60 = vpop.f32.mrb[79].mxu1  ;;  %12566 = vmatprep.subr.bf16.mxu1 %v12565_v16  ;;  %10118 = vmatmul.mubr.msk.f32.vlgmr.msra.gmra.mrb[84].mxu1 %vm4383_vm4, %v7649_v14 }
 0xe61   : > { %12568 = vmatpush3.bf16.msra.mxu1 %v12565_v16  ;;  %8203 = vmatprep.mubr.f32.mxu1 %v15948_v6 }
 0xe62   : > { %11777 = vmatprep.subr.mxu1 %v8123_v58 }
 0xe63   : > { %v8029_v10 = vpop.f32.mrb[80].mxu1 }
 0xe64   : > { %v12561_v61 = vpack.c.bf16 %v8029_v10, %v8024_v27  ;;  %v11758_v43 = vpop.f32.mrb[81].mxu1  ;;  %10119 = vmatmul.mubr.msk.f32.gmra.mrb[86].mxu1 %vm4383_vm4, %v7650_v49 }
 0xe65   : > { %11778 = vmatpush3.msra.mxu1 %v8123_v58  ;;  %11779 = vmatprep.mubr.msk.f32.mxu1 %vm4383_vm4, %v7649_v14 }
 0xe66   : > { %12562 = vmatprep.subr.bf16.mxu0 %v12561_v61  ;;  %12601 = vmatprep.subr.bf16.mxu1 %v15949_v39 }
 0xe67   : > { %v8034_v46 = vpop.f32.mrb[82].mxu1  ;;  %12564 = vmatpush1.bf16.msra.mxu0 %v12563_v56  ;;  %v12597_v56 = vpack.c.bf16 %v7666_v8, %v7665_v3 }
 0xe68   : > { %v11761_v1 = vpop.f32.mrb[83].mxu1  ;;  %8214 = vmatprep.subr.mxu0 %v8034_v46  ;;  %11780 = vmatmul.mubr.msk.f32.vlgmr.msra.gmra.mrb[88].mxu1 %vm4383_vm4, %v7650_v49 }
 0xe69   : > { %11821 = vmatprep.mubr.msk.f32.mxu1 %vm12967_vm2, %v15948_v6 }
 0xe6b   : > { %8215 = vmatpush1.msra.mxu0 %v7945_v40 }
 0xe6c   : > { %10120 = vmatmul.mubr.msk.f32.vlgmr.msra.gmra.mrb[106].mxu0 %vm4383_vm4, %v7649_v14  ;;  %12570 = vmatprep.subr.bf16.mxu0 %v12569_v42 }
 0xe6d   : > { %8280 = vmatprep.mubr.f32.mxu0 %v15948_v6  ;;  %12572 = vmatpush3.bf16.msra.mxu0 %v12569_v42 }
 0xe6e   : > { %12574 = vmatprep.subr.bf16.mxu0 %v12573_v2 }
 0xe70   : > { %10121 = vmatmul.mubr.msk.f32.gmra.mrb[108].mxu0 %vm4383_vm4, %v7650_v49  ;;  %vm9578_vm4 = vcmask 35840  }
 0xe71   : > { %12576 = vmatpush3.bf16.msra.mxu0 %v12573_v2 }
 0xe72   : > { %12578 = vmatprep.subr.bf16.mxu0 %v12577_v25 }
 0xe75   : > { %12580 = vmatpush3.bf16.msra.mxu0 %v12577_v25 }
 0xe76   : > { %12582 = vmatprep.subr.bf16.mxu0 %v12581_v41 }
 0xe79   : > { %12584 = vmatpush3.bf16.msra.mxu0 %v12581_v41 }
 0xe7a   : > { %12586 = vmatprep.subr.bf16.mxu0 %v12585_v59 }
 0xe7d   : > { %12588 = vmatpush3.bf16.msra.mxu0 %v12585_v59 }
 0xe7e   : > { %12590 = vmatprep.subr.bf16.mxu0 %v12589_v24 }
 0xe81   : > { %12592 = vmatpush3.bf16.msra.mxu0 %v12589_v24 }
 0xe82   : > { %12594 = vmatprep.subr.bf16.mxu0 %v12593_v47 }
 0xe85   : > { %12596 = vmatpush3.bf16.msra.mxu0 %v12593_v47 }
 0xe86   : > { %12598 = vmatprep.subr.bf16.mxu0 %v12597_v56 }
 0xe89   : > { %12600 = vmatpush3.bf16.msra.mxu0 %v12597_v56 }
 0xe8a   : > { %11856 = vmatprep.subr.msk.mxu0 %vm8757_vm15, %v8720_v33 }
 0xf33   : > { %v8199_v28 = vpop.f32.mrb[84].mxu1 }
 0xf34   : > { %v8201_v54 = vpop.f32.mrb[85].mxu1  ;;  %v8362_v21 = vmul.f32 %v8199_v28, %v8199_v28 }
 0xf35   : > { %v8366_v31 = vmul.f32 %v8201_v54, %v8199_v28  ;;  %v8364_v45 = vmul.f32 %v8201_v54, %v8201_v54 }
 0xf37   : > { %v8205_v40 = vpop.f32.mrb[86].mxu1 }
 0xf38   : > { %v8207_v15 = vpop.f32.mrb[87].mxu1  ;;  %v8363_v5 = vmul.f32 %v8205_v40, %v8205_v40 }
 0xf39   : > { %v8367_v53 = vmul.f32 %v8207_v15, %v8205_v40  ;;  %v8365_v58 = vmul.f32 %v8207_v15, %v8207_v15 }
 0xf3b   : > { %v11781_v55 = vpop.f32.mrb[88].mxu1 }
 0xf3c   : > { %v8369_v38 = vsub.f32 %v11781_v55, %v8367_v53  ;;  %v8353_v44 = vpop.f32.mrb[89].mxu1 }
 0xf3d   : > { %v8368_v48 = vsub.f32 %v8353_v44, %v8366_v31 }
 0xf3e   : > { %v8371_v12 = vmul.f32 2.0, %v8369_v38 }
 0xf3f   : > { %v8276_v0 = vpop.f32.mrb[106].mxu0  ;;  %v8370_v18 = vmul.f32 2.0, %v8368_v48 }
 0xf40   : > { %v8374_v16 = vsub.f32 %v8276_v0, %v8362_v21  ;;  %v8278_v57 = vpop.f32.mrb[107].mxu0  ;;  %v8373_v1 = vadd.f32 0.0009, %v8371_v12 }
 0xf41   : > { %v8376_v23 = vsub.f32 %v8278_v57, %v8364_v45  ;;  %v8372_v46 = vadd.f32 0.0009, %v8370_v18  ;;  %v8725_v18 = vld [vmem:[%s13123_s27 + $0x18] sm:$0xff] }
 0xf42   : > { %v12633_v12 = vpack.c.bf16 %v8725_v18, %v8724_v30 }
 0xf43   : > { %v8378_v14 = vadd.f32 %v8376_v23, %v8374_v16  ;;  %v8282_v32 = vpop.f32.mrb[108].mxu0 }
 0xf44   : > { %v8375_v27 = vsub.f32 %v8282_v32, %v8363_v5  ;;  %v8284_v60 = vpop.f32.mrb[109].mxu0 }
 0xf45   : > { %v8380_v49 = vadd.f32 0.0009, %v8378_v14  ;;  %v8377_v10 = vsub.f32 %v8284_v60, %v8365_v58  ;;  %v8721_v60 = vld [vmem:[%s13118_s20] sm:$0xf] }
 0xf47   : > { %12816 = vrcp.f32 %v8380_v49  ;;  %v8379_v61 = vadd.f32 %v8377_v10, %v8375_v27  ;;  %v8722_v10 = vld [vmem:[%s13123_s27] sm:$0xff] }
 0xf49   : > { %v8381_v43 = vadd.f32 0.0009, %v8379_v61  ;;  %v8723_v61 = vld [vmem:[%s13123_s27 + $0x8] sm:$0xff] }
 0xf4b   : > { %12818 = vrcp.f32 %v8381_v43  ;;  %v12630_v43 = vpack.c.bf16 %v8723_v61, %v8722_v10 }
 0xf51   : > { %v12817_v13 = vpop.eup %12816 }
 0xf52   : > { %v8383_v62 = vmul.f32 %v12817_v13, %v8372_v46  ;;  %v8726_v46 = vld [vmem:[%s13123_s27 + $0x20] sm:$0xff]  ;;  %v8727_v13 = vld [vmem:[%s13123_s27 + $0x28] sm:$0xff] }
 0xf54   : > { %11814 = vmatprep.mubr.f32.mxu0 %v8383_v62  ;;  %v12636_v62 = vpack.c.bf16 %v8727_v13, %v8726_v46 }
 0xf55   : > { %v12819_v42 = vpop.eup %12818 }
 0xf56   : > { %v8385_v2 = vmul.f32 %v12819_v42, %v8373_v1  ;;  %v8728_v1 = vld [vmem:[%s13123_s27 + $0x30] sm:$0xff] }
 0xf58   : > { %11815 = vmatmul.mubr.f32.vlgmr.msra.gmra.mrb[110].mxu0 %v8385_v2  ;;  %v8730_v2 = vld [vmem:[%s13123_s27 + $0x40] sm:$0xff] }
 0xf59   : > { %11857 = vmatpush3.msk.msra.mxu0 %vm8757_vm15, %v8720_v33 }
 0xf5a   : > { %11861 = vmatprep.subr.msk.mxu0 %vm8757_vm15, %v8720_v33 }
0x102b   : > { %v11816_v19 = vpop.f32.mrb[110].mxu0 }
0x102c   : > { %v8452_v20 = vpop.f32.mrb[111].mxu0 }
0x102d   : > { %v12602_v25 = vpack.c.bf16 %v11816_v19, %v8452_v20  ;;  %v8731_v19 = vld [vmem:[%s13123_s27 + $0x48] sm:$0xff] }
0x102e   : > { %v12642_v20 = vpack.c.bf16 %v8731_v19, %v8730_v2 }
0x102f   : > { %12603 = vmatpush3.bf16.msra.mxu1 %v12602_v25  ;;  %v8732_v25 = vld [vmem:[%s13123_s27 + $0x50] sm:$0xff] }
0x1030   : > { %12604 = vmatprep.subr.bf16.mxu1 %v15949_v39 }
0x1032   : > { %11822 = vmatmul.mubr.msk.f32.vlgmr.msra.gmra.mrb[90].mxu1 %vm8461_vm14, %v7667_v50  ;;  %v8733_v50 = vld [vmem:[%s13123_s27 + $0x58] sm:$0xff] }
0x1033   : > { %12606 = vmatpush3.bf16.msra.mxu1 %v12605_v11  ;;  %11836 = vmatprep.mubr.msk.f32.mxu1 %vm12967_vm2, %v15948_v6  ;;  %v8538_v11 = vld [vmem:[%s15990_s5] sm:$0x3f]  ;;  %s936_s5 = sand.u32 1, %s12926_s16  }
0x1034   : > { %12607 = vmatprep.subr.bf16.mxu1 %v15949_v39  ;;  %s9699_s1 = sshll.u32 %s936_s5, 2  ;;  %s9581_s0 = scalar_lea.sflag [#allocation3], %s936_s5 }
0x1037   : > { %12609 = vmatpush3.bf16.msra.mxu1 %v12608_v51 }
0x1038   : > { %12610 = vmatprep.subr.bf16.mxu1 %v15949_v39 }
0x103b   : > { %12612 = vmatpush3.bf16.msra.mxu1 %v12611_v7 }
0x103c   : > { %11845 = vmatprep.subr.mxu1 %v15948_v6 }
0x103e   : > { %11837 = vmatmul.mubr.msk.f32.vlgmr.msra.gmra.mrb[92].mxu1 %vm1138_vm0, %v8535_v26  ;;  %v12645_v26 = vpack.c.bf16 %v8733_v50, %v8732_v25 }
0x103f   : > { %11839 = vmatprep.mubr.msk.f32.mxu1 %vm12967_vm2, %v15948_v6  ;;  %11846 = vmatpush3.msk.msra.mxu1 %vm7687_vm12, %v8538_v11 }
0x1040   : > { %11866 = vmatprep.subr.msk.mxu1 %vm8757_vm15, %v8720_v33 }
0x1042   : > { %11840 = vmatmul.mubr.msk.f32.gmra.mrb[94].mxu1 %vm1138_vm0, %v8536_v35  ;;  %v8734_v35 = vld [vmem:[%s13123_s27 + $0x60] sm:$0xff] }
0x1043   : > { %11842 = vmatprep.mubr.msk.f32.mxu1 %vm12967_vm2, %v15948_v6 }
0x1046   : > { %11843 = vmatmul.mubr.msk.f32.gmra.mrb[96].mxu1 %vm1138_vm0, %v8537_v63  ;;  %vm8751_vm0 = vcmask 23552   ;;  %v8735_v63 = vld [vmem:[%s13123_s27 + $0x68] sm:$0xff] }
0x1047   : > { %11847 = vmatprep.mubr.msk.f32.mxu1 %vm12967_vm2, %v15948_v6  ;;  %v12648_v11 = vpack.c.bf16 %v8735_v63, %v8734_v35 }
0x1105   : > { %v8531_v4 = vpop.f32.mrb[90].mxu1 }
0x1106   : > { %9565 = vrot.lane.b32.xlu1 %v8531_v4, %s12972_s6  ;;  %v11823_v36 = vpop.f32.mrb[91].mxu1  ;;  %v8736_v4 = vld [vmem:[%s13123_s27 + $0x70] sm:$0xff]  ;;  %s12973_s6 = smov 4  }
0x1107   : > { %v8737_v36 = vld [vmem:[%s13123_s27 + $0x78] sm:$0xff] }
0x1111   : > { %v8614_v51 = vpop.f32.mrb[92].mxu1 }
0x1112   : > { %11848 = vmatmul.mubr.msk.f32.vlgmr.msra.gmra.mrb[98].mxu1 %vm7677_vm13, %v8614_v51  ;;  %v11838_v29 = vpop.f32.mrb[93].mxu1  ;;  %v12651_v51 = vpack.c.bf16 %v8737_v36, %v8736_v4 }
0x1113   : > { %11850 = vmatprep.mubr.msk.f32.mxu1 %vm12967_vm2, %v15948_v6  ;;  %11867 = vmatpush3.msk.msra.mxu1 %vm8757_vm15, %v8720_v33 }
0x1114   : > { %11876 = vmatprep.subr.msk.mxu1 %vm8757_vm15, %v8720_v33 }
0x1115   : > { %v8619_v17 = vpop.f32.mrb[94].mxu1 }
0x1116   : > { %11851 = vmatmul.mubr.msk.f32.gmra.mrb[100].mxu1 %vm7677_vm13, %v8619_v17  ;;  %v11841_v7 = vpop.f32.mrb[95].mxu1 }
0x1117   : > { %11853 = vmatprep.mubr.msk.f32.mxu1 %vm12967_vm2, %v15948_v6 }
0x1119   : > { %v8624_v41 = vpop.f32.mrb[96].mxu1 }
0x111a   : > { %11854 = vmatmul.mubr.msk.f32.gmra.mrb[102].mxu1 %vm7677_vm13, %v8624_v41  ;;  %v11844_v22 = vpop.f32.mrb[97].mxu1 }
0x11e5   : > { %v8706_v59 = vpop.f32.mrb[98].mxu1 }
0x11e6   : > { %v8739_v52 = vmul.f32 %v8706_v59, %v8706_v59  ;;  %v11849_v37 = vpop.f32.mrb[99].mxu1  ;;  %11858 = vmatprep.mubr.msk.f32.mxu0 %vm8751_vm0, %v8706_v59 }
0x11e8   : > { %11868 = vmatprep.mubr.msk.f32.mxu1 %vm8751_vm0, %v8739_v52 }
0x11e9   : > { %v8711_v24 = vpop.f32.mrb[100].mxu1 }
0x11ea   : > { %v8740_v9 = vmul.f32 %v8711_v24, %v8711_v24  ;;  %v11852_v34 = vpop.f32.mrb[101].mxu1  ;;  %11859 = vmatmul.mubr.msk.f32.vlgmr.msra.gmra.mrb[112].mxu0 %vm8751_vm0, %v8711_v24  ;;  %v8744_v3 = vrot.slane %v8711_v24, 4 }
0x11eb   : > { %11862 = vmatpush3.msk.msra.mxu0 %vm8757_vm15, %v8720_v33 }
0x11ec   : > { %11869 = vmatmul.mubr.msk.f32.vlgmr.msra.gmra.mrb[104].mxu1 %vm8751_vm0, %v8740_v9  ;;  %11871 = vmatprep.subr.msk.mxu0 %vm8757_vm15, %v8720_v33  ;;  %v8997_v54 = vrot.slane %v8740_v9, 4 }
0x11ed   : > { %v8716_v47 = vpop.f32.mrb[102].mxu1  ;;  %11877 = vmatpush3.msk.msra.mxu1 %vm8757_vm15, %v8720_v33 }
0x11ee   : > { %v8741_v8 = vmul.f32 %v8716_v47, %v8716_v47  ;;  %v8745_v56 = vrot.slane %v8716_v47, 4  ;;  %v11855_v28 = vpop.f32.mrb[103].mxu1 }
0x11f0   : > { %v8750_v31 = vmul.f32 %v8745_v56, %v8711_v24  ;;  %v8998_v40 = vrot.slane %v8741_v8, 4  ;;  %v8746_v15 = vsel %vm6341_vm7, %v8744_v3, %v8745_v56 }
0x11f1   : > { %v8749_v53 = vmul.f32 %v8746_v15, %v8706_v59  ;;  %11863 = vmatprep.mubr.msk.f32.mxu0 %vm8751_vm0, %v8746_v15 }
0x11f2   : > { %11864 = vmatmul.mubr.msk.f32.vlgmr.msra.gmra.mrb[114].mxu0 %vm8751_vm0, %v8745_v56  ;;  %v8999_v55 = vsel %vm6341_vm7, %v8997_v54, %v8998_v40 }
0x11f3   : > { %11878 = vmatprep.mubr.msk.f32.mxu1 %vm8751_vm0, %v8749_v53  ;;  %11872 = vmatpush3.msk.msra.mxu0 %vm8757_vm15, %v8720_v33 }
0x11f4   : > { %11879 = vmatmul.mubr.msk.f32.vlgmr.msra.gmra.mrb[106].mxu1 %vm8751_vm0, %v8750_v31  ;;  %11873 = vmatprep.mubr.msk.f32.mxu0 %vm8751_vm0, %v8999_v55 }
0x11f5   : > { %9313 = vmatprep.mubr.f32.mxu1 %v15948_v6 }
0x11f6   : > { %11874 = vmatmul.mubr.msk.f32.vlgmr.msra.gmra.mrb[116].mxu0 %vm8751_vm0, %v8998_v40 }
0x11f7   : > { %9242 = vmatprep.mubr.f32.mxu0 %v15948_v6 }
0x12bd   : > { %v11860_v21 = vpop.f32.mrb[112].mxu0 }
0x12be   : > { %v8827_v38 = vpop.f32.mrb[113].mxu0 }
0x12bf   : > { %v12616_v44 = vpack.c.bf16 %v11860_v21, %v8827_v38  ;;  %v11870_v45 = vpop.f32.mrb[104].mxu1  ;;  %v8738_v38 = vld [vmem:[%s15992_s4] sm:$0xf]  ;;  %s938_s4 = scalar_lea.vmem [#allocation2], %s9699_s1 }
0x12c0   : > { %v8987_v48 = vpop.f32.mrb[105].mxu1  ;;  %s9594_s8 = sshll.u32 %s938_s4, 4  ;;  %s15835_s8 = int_to_ptr.vmem [resolvable:$true] %s9594_s8 }
0x12c1   : > { %v12622_v0 = vpack.c.bf16 %v11870_v45, %v8987_v48  ;;  %s12872_s1 = scalar_lea.vmem %s15835_s8, 64  ;;  %p12879_p0 = scmp.lt.s32.totalorder %s15835_s8, %s12877_s11 }
0x12c2   : > { %p12873_p11 = scmp.ne.s32.totalorder %s15835_s8, %s12872_s1  ;;  %p12880_p1 = scmp.lt.s32.totalorder %s12878_s13, %s12872_s1 }
0x12c4   : > { %p12874_p12 = pnand %p12873_p11, %p13173_p5  ;;  %p12881_p2 = por %p12880_p1, %p12879_p0 }
0x12c5   : > { %v11865_v16 = vpop.f32.mrb[114].mxu0 }
0x12c6   : > { %v8906_v57 = vpop.f32.mrb[115].mxu0  ;;  %p12875_p13 = pneg %p12874_p12 }
0x12c7   : > { %v12613_v5 = vpack.c.bf16 %v11865_v16, %v8906_v57  ;;  %v11880_v23 = vpop.f32.mrb[106].mxu1  ;;  %v9558_v16 = vpop.permute.xlu0 %9557 }
0x12c8   : > { %v9151_v58 = vpop.f32.mrb[107].mxu1  ;;  %p12882_p3 = pnand %p12881_p2, %p12875_p13 }
0x12c9   : > { %v12626_v14 = vpack.c.bf16 %v11880_v23, %v9151_v58  ;;  %v11875_v32 = vpop.f32.mrb[116].mxu0  ;;  %12615 = vmatprep.subr.msk.bf16.mxu0 %vm15364_vm9, %v12613_v5  ;;  %v9566_v5 = vpop.permute.xlu1 %9565  ;;  %v15993_v23 = vld [vmem:[#allocation25_spill] sm:$0xff] }
0x12ca   : > { %v9070_v27 = vpop.f32.mrb[117].mxu0  ;;  %12618 = vmatpush1.bf16.msk.msra.mxu0 %vm15364_vm9, %v12616_v44 }
0x12cb   : > { %v12619_v49 = vpack.c.bf16 %v11875_v32, %v9070_v27  ;;  %12625 = vmatprep.subr.bf16.mxu0 %v15949_v39  ;;  %v9562_v57 = vpop.permute.xlu0 %9561 }
0x12cd   : > { %10149 = vmatmul.mubr.msk.f32.vlgmr.msra.gmra.mrb[118].mxu0 %vm6322_vm10, %v8721_v60  ;;  %12621 = vmatprep.subr.msk.bf16.mxu1 %vm15364_vm9, %v12619_v49 }
0x12ce   : > { %12624 = vmatpush1.bf16.msk.msra.mxu1 %vm15364_vm9, %v12622_v0  ;;  %12628 = vmatpush3.bf16.msk.msra.mxu0 %vm15364_vm9, %v12626_v14 }
0x12cf   : > { %11885 = vmatprep.mubr.msk.f32.mxu0 %vm12967_vm2, %v15948_v6  ;;  %12629 = vmatprep.subr.bf16.mxu1 %v15949_v39 }
0x12d0   : > { %11923 = vmatprep.subr.mxu0 %v15948_v6 }
0x12d1   : > { %10152 = vmatmul.mubr.msk.f32.vlgmr.msra.gmra.mrb[108].mxu1 %vm6322_vm10, %v8721_v60  ;;  %11886 = vmatmul.mubr.msk.f32.vlgmr.msra.gmra.mrb[120].mxu0 %vm6322_vm10, %v8721_v60 }
0x12d2   : > { %12631 = vmatpush3.bf16.msra.mxu1 %v12630_v43  ;;  %11920 = vmatprep.mubr.msk.f32.mxu1 %vm12967_vm2, %v15948_v6 }
0x12d3   : > { %12632 = vmatprep.subr.bf16.mxu1 %v15949_v39  ;;  %11925 = vmatprep.mubr.msk.f32.mxu0 %vm12967_vm2, %v15948_v6  ;;  %v8729_v6 = vld [vmem:[%s13123_s27 + $0x38] sm:$0xff]  ;;  %vm9572_vm2 = vcmask 7168  }
0x12d4   : > { %v12639_v42 = vpack.c.bf16 %v8729_v6, %v8728_v1  ;;  %v9573_v58 = vsel %vm9572_vm2, %v15993_v23, %v9558_v16 }
0x12d5   : > { %v9575_v14 = vsel %vm9574_vm3, %v9573_v58, %v9562_v57 }
0x12d6   : > { %12634 = vmatpush3.bf16.msra.mxu1 %v12633_v12  ;;  %v9576_v32 = vsel %vm8751_vm0, %v9575_v14, %v9566_v5 }
0x12d7   : > { %12635 = vmatprep.subr.bf16.mxu1 %v15949_v39 }
0x12da   : > { %12637 = vmatpush3.bf16.msra.mxu1 %v12636_v62 }
0x12db   : > { %12638 = vmatprep.subr.bf16.mxu1 %v15949_v39 }
0x12de   : > { %12640 = vmatpush3.bf16.msra.mxu1 %v12639_v42 }
0x12df   : > { %12641 = vmatprep.subr.bf16.mxu1 %v15949_v39 }
0x12e2   : > { %12643 = vmatpush3.bf16.msra.mxu1 %v12642_v20 }
0x12e3   : > { %12644 = vmatprep.subr.bf16.mxu1 %v15949_v39 }
0x12e6   : > { %12646 = vmatpush3.bf16.msra.mxu1 %v12645_v26 }
0x12e7   : > { %12647 = vmatprep.subr.bf16.mxu1 %v15949_v39 }
0x12ea   : > { %12649 = vmatpush3.bf16.msra.mxu1 %v12648_v11 }
0x12eb   : > { %12650 = vmatprep.subr.bf16.mxu1 %v15949_v39 }
0x12ee   : > { %12652 = vmatpush3.bf16.msra.mxu1 %v12651_v51 }
0x13a0   : > { %v9244_v29 = vpop.f32.mrb[118].mxu0 }
0x13a1   : > { %v9390_v17 = vmul.f32 %v9244_v29, %v9244_v29  ;;  %v9246_v7 = vpop.f32.mrb[119].mxu0 }
0x13a2   : > { %v9391_v41 = vmul.f32 %v9246_v7, %v9246_v7  ;;  %v9392_v22 = vmul.f32 %v9246_v7, %v9244_v29 }
0x13a4   : > { %v9404_v33 = vadd.f32 %v9391_v41, %v9390_v17  ;;  %v9315_v59 = vpop.f32.mrb[108].mxu1  ;;  %v9386_v52 = vpop.f32.mrb[120].mxu0  ;;  %v9402_v56 = vmul.f32 2.0, %v9392_v22 }
0x13a5   : > { %v9396_v37 = vsub.f32 %v9315_v59, %v9390_v17  ;;  %v9317_v24 = vpop.f32.mrb[109].mxu1  ;;  %v9393_v9 = vsub.f32 %v9386_v52, %v9392_v22  ;;  %v11887_v34 = vpop.f32.mrb[121].mxu0 }
0x13a6   : > { %v9405_v47 = vadd.f32 0.0001, %v9404_v33  ;;  %v9397_v3 = vsub.f32 %v9317_v24, %v9391_v41  ;;  %v9403_v28 = vadd.f32 0.0001, %v9402_v56 }
0x13a7   : > { %v9394_v54 = vmul.f32 2.0, %v9393_v9 }
0x13a8   : > { %12820 = vrcp.f32 %v9405_v47  ;;  %v9398_v39 = vadd.f32 %v9397_v3, %v9396_v37 }
0x13a9   : > { %v9395_v15 = vadd.f32 0.0009, %v9394_v54 }
0x13aa   : > { %v9399_v8 = vadd.f32 0.0009, %v9398_v39 }
0x13ac   : > { %12822 = vrcp.f32 %v9399_v8 }
0x13b2   : > { %v12821_v31 = vpop.eup %12820 }
0x13b3   : > { %v9407_v40 = vmul.f32 %v12821_v31, %v9403_v28 }
0x13b6   : > { %v12823_v53 = vpop.eup %12822 }
0x13b7   : > { %v9401_v55 = vmul.f32 %v12823_v53, %v9395_v15 }
0x13b9   : > { %v9408_v21 = vmul.f32 %v9407_v40, %v9401_v55 }
0x13bb   : > { %11921 = vmatmul.mubr.f32.vlgmr.msra.gmra.mrb[110].mxu1 %v9408_v21 }
0x148e   : > { %v9475_v44 = vpop.f32.mrb[110].mxu1 }
0x148f   : > { %v11922_v45 = vpop.f32.mrb[111].mxu1  ;;  %11924 = vmatpush3.msk.msra.mxu0 %vm6341_vm7, %v9475_v44 }
0x1490   : > { %11926 = vmatmul.mubr.msk.f32.vlgmr.msra.gmra.mrb[122].mxu0 %vm9479_vm1, %v8738_v38 }
0x1563   : > { %v9552_v48 = vpop.f32.mrb[122].mxu0 }
0x1564   : > { %9569 = vrot.lane.b32.xlu1 %v9552_v48, %s12973_s6  ;;  %v11927_v0 = vpop.f32.mrb[123].mxu0  ;;  %s15833_s6 = scalar_lea.hbm %s13133_s12, %s10158_s3 }
0x15d6   : > { %v9570_v27 = vpop.permute.xlu1 %9569 }
0x15d7   : > { %v9577_v60 = vsel %vm9479_vm1, %v9576_v32, %v9570_v27 }
0x15d8   : > { %9579 = vst.msk [vmem:[%s938_s4] sm:$0xf] %vm9578_vm4, %v9577_v60 }
0x15d9   : > { %12885 = shalt.err (!%p12882_p3)
}
0x15da   : > { %s12886_s4 = scalar_lea.hbm %s15833_s6, 64  ;;  %s12890_s9 = scalar_lea.hbm %s13133_s12, 128 }
0x15db   : > { %p12887_p4 = scmp.ne.s32.totalorder %s15833_s6, %s12886_s4  ;;  %p12891_p9 = scmp.lt.u32.totalorder %s15833_s6, %s13133_s12 }
0x15dc   : > { %p12892_p10 = scmp.lt.u32.totalorder %s12890_s9, %s12886_s4  ;;  %p12894_p12 = scmp.lt.u32.totalorder %s12886_s4, %s15833_s6 }
0x15dd   : > { %p12888_p7 = pnand %p12887_p4, %p13173_p5 }
0x15de   : > { %p12893_p11 = por %p12892_p10, %p12891_p9 }
0x15df   : > { %p12889_p8 = pneg %p12888_p7 }
0x15e0   : > { %p12895_p0 = por %p12894_p12, %p12893_p11 }
0x15e2   : > { %p12896_p13 = pnand %p12895_p0, %p12889_p8 }
0x15e4   : > { %12899 = shalt.err (!%p12896_p13)
}
0x15e5   : > { %12660 = dma.vmem_to_hbm [thread:$0]  (%p13173_p5), %s15835_s8, 64, %s15833_s6, %s9581_s0  }
0x15e6 PF: > { %p12666_p1 = scmp.ge.s32.totalorder %s12934_s22, 2  ;;  %s9606_s13 = sand.u32 1, %s12922_s15  }
0x15e7   : > { %s9607_s11 = scalar_lea.sflag [#allocation3], %s9606_s13 }
0x15e8   : > { %p12663_p2 = pnand %p12666_p1, %p13177_p6 }
0x15ea   : > { %12917 = dma.done.wait (!%p12663_p2), %s9607_s11, 64  }
0x15eb   : > { %12919 = vsyncadd (!%p12663_p2), %s9607_s11, 4294967232  ;;  %p71_p3 = scmp.ge.s32.totalorder %s13160_s26, 4   ;;  %s15994_s15 = smov %s12926_s16 }
0x15ec   : > { %s15995_s16 = smov %s12930_s18  ;;  %s15996_s18 = smov %s13171_s2 }
0x15ed   : > { %s15997_s22 = smov %s13160_s26  ;;  %73 = sbr.rel (!%p71_p3) target bundleno = 63 (0x3f), region = 208 }
0x15f4   :  { %9612 = vsyncpa [#allocation3], 1 }
0x15f5   :  { %9614 = vsyncpa [#allocation3 + $0x1], 1 }

</bundles_post_ra>
